<compile_context>
chip_gen: v7x
topology: tpu7x:2x2x1
jax: 0.10.0
libtpu: 0.0.40
codegen_flags: <defaults>
</compile_context>

<pallas_src>
import functools

import jax
import jax.numpy as jnp
from jax.experimental import pallas as pl
from jax.experimental.pallas import tpu as pltpu

LANE = 128  # pad every channel-like dim to a multiple of the TPU lane width


def _pad_to_lane(c):
    return max(LANE, ((c + LANE - 1) // LANE) * LANE)


# ---------------- Pallas kernels ----------------

def _conv_bn_relu_kernel(*refs, pool, fuse_input_bn):
    """Fused 3x3 'same' conv (stride 1, no conv bias) + folded BN + ReLU (+ optional
    non-overlapping maxpool).  Optionally fuses the network's input BatchNorm as an
    affine applied while filling the halo tile (padding stays exactly zero)."""
    if fuse_input_bn:
        (x_ref, w_ref, iscale_ref, ibias_ref, scale_ref, bias_ref, o_ref, *scratch) = refs
    else:
        (x_ref, w_ref, scale_ref, bias_ref, o_ref, *scratch) = refs
        iscale_ref = ibias_ref = None
    xpad_ref = scratch[0]
    pool_ref = scratch[1] if pool is not None else None

    _, H, W, Cin_p = x_ref.shape
    Cout_p = o_ref.shape[-1]

    # Build the zero-padded (H+2, W+2, Cin_p) halo tile in VMEM (no HBM im2col).
    xpad_ref[...] = jnp.zeros(xpad_ref.shape, xpad_ref.dtype)
    xi = x_ref[0]
    if fuse_input_bn:
        # Folded input BatchNorm (inference) applied only to the interior, in f32.
        xi = (xi.astype(jnp.float32) * iscale_ref[...] + ibias_ref[...]).astype(xpad_ref.dtype)
    xpad_ref[pl.ds(1, H), pl.ds(1, W), :] = xi

    # 3x3 conv as 9 accumulated MXU matmuls over shifted views: (H*W, Cin) @ (Cin, Cout).
    acc = jnp.zeros((H * W, Cout_p), jnp.float32)
    for kh in range(3):
        for kw in range(3):
            xs = xpad_ref[pl.ds(kh, H), pl.ds(kw, W), :].reshape(H * W, Cin_p)
            acc = acc + jnp.dot(xs, w_ref[kh * 3 + kw],
                                preferred_element_type=jnp.float32)

    # Folded BatchNorm (inference) + ReLU epilogue in f32.
    y = jnp.maximum(acc * scale_ref[...] + bias_ref[...], 0.0)  # (H*W, Cout_p)

    if pool is None:
        o_ref[0] = y.reshape(H, W, Cout_p).astype(o_ref.dtype)
    else:
        ph, pw = pool
        Ho, Wo = H // ph, W // pw
        # Pool over H on the value: contiguous row-group max (pure shape-cast, no relayout).
        y3 = y.reshape(Ho, ph * W, Cout_p)
        hmax = y3[:, 0:W, :]
        for i in range(1, ph):
            hmax = jnp.maximum(hmax, y3[:, i * W:(i + 1) * W, :])
        # Pool over W via sublane-strided reads from a small VMEM staging ref.
        pool_ref[...] = hmax                                   # (Ho, W, Cout_p) f32
        wmax = pool_ref[:, pl.ds(0, Wo, stride=pw), :]
        for j in range(1, pw):
            wmax = jnp.maximum(wmax, pool_ref[:, pl.ds(j, Wo, stride=pw), :])
        o_ref[0] = wmax.astype(o_ref.dtype)                    # (Ho, Wo, Cout_p)


def _head_kernel(x_ref, w_ref, b_ref, o_ref):
    # x_ref: (1, Hf, Wf, Cp)  w_ref: (Cp, NCp)  b_ref: (1, NCp) f32  o_ref: (1, 1, NCp) f32
    Hf = x_ref.shape[1]
    m = x_ref[0, 0]                                            # (Wf, Cp)
    for h in range(1, Hf):
        m = jnp.maximum(m, x_ref[0, h])
    feat = jnp.max(m, axis=0, keepdims=True)                   # amax over spatial -> (1, Cp)
    logits = jnp.dot(feat, w_ref[...], preferred_element_type=jnp.float32) + b_ref[...]
    o_ref[0] = logits


# ---------------- wrappers (pallas_call plumbing) ----------------

def conv3x3_bn_relu(x, w, scale, bias, *, pool=None, in_scale=None, in_bias=None):
    # x: (N, H, W, Cin_p) bf16;  w: (9, Cin_p, Cout_p) bf16;  scale/bias: (1, Cout_p) f32
    N, H, W, Cin_p = x.shape
    Cout_p = w.shape[-1]
    fuse_in = in_scale is not None
    if pool is not None:
        ph, pw = pool
        Ho, Wo = H // ph, W // pw
    else:
        Ho, Wo = H, W

    kernel = functools.partial(_conv_bn_relu_kernel, pool=pool, fuse_input_bn=fuse_in)

    in_specs = [pl.BlockSpec((1, H, W, Cin_p), lambda n: (n, 0, 0, 0)),
                pl.BlockSpec((9, Cin_p, Cout_p), lambda n: (0, 0, 0))]   # weights stay resident
    inputs = [x, w]
    if fuse_in:
        in_specs += [pl.BlockSpec((1, Cin_p), lambda n: (0, 0)),
                     pl.BlockSpec((1, Cin_p), lambda n: (0, 0))]
        inputs += [in_scale, in_bias]
    in_specs += [pl.BlockSpec((1, Cout_p), lambda n: (0, 0)),
                 pl.BlockSpec((1, Cout_p), lambda n: (0, 0))]
    inputs += [scale, bias]

    scratch = [pltpu.VMEM((H + 2, W + 2, Cin_p), x.dtype)]               # halo tile
    if pool is not None:
        scratch.append(pltpu.VMEM((Ho, W, Cout_p), jnp.float32))         # pool staging

    itemsize = jnp.dtype(x.dtype).itemsize
    flops = 2 * N * H * W * 9 * Cin_p * Cout_p
    bytes_accessed = (N * H * W * Cin_p + 9 * Cin_p * Cout_p
                      + N * Ho * Wo * Cout_p) * itemsize + 4 * Cout_p * 4

    return pl.pallas_call(
        kernel,
        out_shape=jax.ShapeDtypeStruct((N, Ho, Wo, Cout_p), x.dtype),
        grid=(N,),
        in_specs=in_specs,
        out_specs=pl.BlockSpec((1, Ho, Wo, Cout_p), lambda n: (n, 0, 0, 0)),
        scratch_shapes=scratch,
        compiler_params=pltpu.CompilerParams(
            dimension_semantics=("parallel",),
            vmem_limit_bytes=32 * 1024 * 1024),
        cost_estimate=pl.CostEstimate(flops=flops, transcendentals=0,
                                      bytes_accessed=bytes_accessed),
    )(*inputs)


def amax_linear(x, w, b):
    # x: (N, Hf, Wf, Cp) bf16;  w: (Cp, NCp) bf16;  b: (1, NCp) f32 -> (N, NCp) f32 logits
    N, Hf, Wf, Cp = x.shape
    NCp = w.shape[1]
    out = pl.pallas_call(
        _head_kernel,
        out_shape=jax.ShapeDtypeStruct((N, 1, NCp), jnp.float32),
        grid=(N,),
        in_specs=[pl.BlockSpec((1, Hf, Wf, Cp), lambda n: (n, 0, 0, 0)),
                  pl.BlockSpec((Cp, NCp), lambda n: (0, 0)),
                  pl.BlockSpec((1, NCp), lambda n: (0, 0))],
        out_specs=pl.BlockSpec((1, 1, NCp), lambda n: (n, 0, 0)),
        compiler_params=pltpu.CompilerParams(dimension_semantics=("parallel",)),
    )(x, w, b)
    return out.reshape(N, NCp)


# ---------------- parameter init (deterministic, synthetic, pre-padded) ----------------

def _bn_fold(gamma, beta, mean, var, eps=1e-5):
    scale = gamma / jnp.sqrt(var + eps)
    return scale, beta - mean * scale


def init_params(key, n_channels, n_classes, conv_params, act_dtype=jnp.bfloat16):
    keys = iter(jax.random.split(key, 512))

    def nrm(shape, s=0.1):
        return s * jax.random.normal(next(keys), shape, jnp.float32)

    def bn_params(c):
        gamma = 1.0 + 0.1 * jax.random.normal(next(keys), (c,), jnp.float32)
        beta = 0.1 * jax.random.normal(next(keys), (c,), jnp.float32)
        mean = 0.1 * jax.random.normal(next(keys), (c,), jnp.float32)
        var = jnp.abs(jax.random.normal(next(keys), (c,), jnp.float32)) + 0.5
        return _bn_fold(gamma, beta, mean, var)

    def pad_vec(v, cp, fill):
        return jnp.concatenate([v, jnp.full((cp - v.shape[0],), fill, v.dtype)]).reshape(1, cp)

    cin_p = _pad_to_lane(n_channels)
    s_in, b_in = bn_params(n_channels)
    params = {'in_scale': pad_vec(s_in, cin_p, 1.0),      # padded channels: identity BN
              'in_bias': pad_vec(b_in, cin_p, 0.0),
              'blocks': []}

    in_c = n_channels
    for (out_c, _pool_size, order) in conv_params:
        layers = []
        c_in = in_c
        for _ in range(order):
            cinp, coutp = _pad_to_lane(c_in), _pad_to_lane(out_c)
            w = nrm((3, 3, c_in, out_c)).reshape(9, c_in, out_c)   # row = kh*3 + kw
            w_p = jnp.zeros((9, cinp, coutp), jnp.float32).at[:, :c_in, :out_c].set(w)
            s, b = bn_params(out_c)
            layers.append({'w': w_p.astype(act_dtype),
                           'scale': pad_vec(s, coutp, 1.0),
                           'bias': pad_vec(b, coutp, 0.0)})        # bias=0 keeps padded C == 0
            c_in = out_c
        params['blocks'].append({'layers': layers})
        in_c = out_c

    coutp, ncp = _pad_to_lane(in_c), _pad_to_lane(n_classes)
    fw = nrm((in_c, n_classes))
    fb = nrm((n_classes,))
    params['fc_w'] = jnp.zeros((coutp, ncp), jnp.float32).at[:in_c, :n_classes].set(fw).astype(act_dtype)
    params['fc_b'] = pad_vec(fb, ncp, 0.0)
    return params


# ---------------- forward pass (matches VGGa.forward, inference-mode BN) ----------------

def vgga_forward(x_nchw, params, conv_params, n_classes, act_dtype=jnp.bfloat16):
    N, C, H, W = x_nchw.shape
    cin_p = params['in_scale'].shape[-1]
    # Boundary glue only: NCHW -> NHWC, cast to bf16, zero-pad channels to the lane width.
    x = jnp.transpose(x_nchw, (0, 2, 3, 1)).astype(act_dtype)
    x = jnp.pad(x, ((0, 0), (0, 0), (0, 0), (0, cin_p - C)))

    first = True
    for blk, (_out_c, pool_size, _order) in zip(params['blocks'], conv_params):
        layers = blk['layers']
        for li, layer in enumerate(layers):
            pool = tuple(pool_size) if li == len(layers) - 1 else None  # fuse maxpool in last conv
            if first:   # self.bn fused into the first conv kernel
                x = conv3x3_bn_relu(x, layer['w'], layer['scale'], layer['bias'], pool=pool,
                                    in_scale=params['in_scale'], in_bias=params['in_bias'])
                first = False
            else:
                x = conv3x3_bn_relu(x, layer['w'], layer['scale'], layer['bias'], pool=pool)

    logits = amax_linear(x, params['fc_w'], params['fc_b'])   # amax(2,3) + classifier
    return logits[:, :n_classes]                              # drop lane padding


if __name__ == "__main__":
    key = jax.random.PRNGKey(0)
    kx, kp = jax.random.split(key)

    n_channels, n_classes = 4, 10
    conv_params = [(8, (2, 2), 1), (16, (2, 2), 2)]           # (out_channels, pool, order)
    x = jax.random.normal(kx, (2, n_channels, 16, 16), jnp.float32)
    params = init_params(kp, n_channels, n_classes, conv_params)

    fwd = jax.jit(functools.partial(vgga_forward, params=params,
                                    conv_params=conv_params, n_classes=n_classes))
    out = jax.block_until_ready(fwd(x))
    assert out.shape == (2, n_classes), out.shape
    print("KERNEL_OK")
</pallas_src>

<mosaic_0001>
module attributes {stable_mosaic.version = 11 : i64} {
  func.func @_conv_bn_relu_kernel(%arg0: i32, %arg1: memref<1x16x16x128xbf16, #tpu.memory_space<vmem>>, %arg2: memref<9x128x128xbf16, #tpu.memory_space<vmem>>, %arg3: memref<1x128xf32, #tpu.memory_space<vmem>>, %arg4: memref<1x128xf32, #tpu.memory_space<vmem>>, %arg5: memref<1x128xf32, #tpu.memory_space<vmem>>, %arg6: memref<1x128xf32, #tpu.memory_space<vmem>>, %arg7: memref<1x8x8x128xbf16, #tpu.memory_space<vmem>>, %arg8: memref<18x18x128xbf16, #tpu.memory_space<vmem>>, %arg9: memref<8x16x128xf32, #tpu.memory_space<vmem>>) attributes {dimension_semantics = [#tpu.dimension_semantics<parallel>], iteration_bounds = array<i64: 2>, scalar_prefetch = 0 : i64, scratch_operands = 2 : i64, tpu.core_type = #tpu.core_type<tc>, window_params = [{transform_indices = @transform_0, window_bounds = array<i64: 1, 16, 16, 128>}, {pipeline_mode = #tpu.pipeline_mode<synchronous>, transform_indices = @transform_1, window_bounds = array<i64: 9, 128, 128>}, {pipeline_mode = #tpu.pipeline_mode<synchronous>, transform_indices = @transform_2, window_bounds = array<i64: 1, 128>}, {pipeline_mode = #tpu.pipeline_mode<synchronous>, transform_indices = @transform_3, window_bounds = array<i64: 1, 128>}, {pipeline_mode = #tpu.pipeline_mode<synchronous>, transform_indices = @transform_4, window_bounds = array<i64: 1, 128>}, {pipeline_mode = #tpu.pipeline_mode<synchronous>, transform_indices = @transform_5, window_bounds = array<i64: 1, 128>}, {transform_indices = @transform_6, window_bounds = array<i64: 1, 8, 8, 128>}]} {
    %cst = arith.constant 0.000000e+00 : bf16
    %0 = vector.broadcast %cst : bf16 to vector<18x18x128xbf16>
    %c0 = arith.constant 0 : index
    %c0_0 = arith.constant 0 : index
    %c0_1 = arith.constant 0 : index
    %1 = vector.load %arg8[%c0, %c0_0, %c0_1] : memref<18x18x128xbf16, #tpu.memory_space<vmem>>, vector<18x18x128xbf16>
    tpu.vector_store %arg8[%c0, %c0_0, %c0_1], %0 {strides = array<i32>} : memref<18x18x128xbf16, #tpu.memory_space<vmem>>, vector<18x18x128xbf16>,
    %c0_2 = arith.constant 0 : index
    %c0_3 = arith.constant 0 : index
    %c0_4 = arith.constant 0 : index
    %c0_5 = arith.constant 0 : index
    %2 = vector.load %arg1[%c0_2, %c0_3, %c0_4, %c0_5] : memref<1x16x16x128xbf16, #tpu.memory_space<vmem>>, vector<1x16x16x128xbf16>
    %3 = vector.shape_cast %2 : vector<1x16x16x128xbf16> to vector<16x16x128xbf16>
    %4 = arith.extf %3 : vector<16x16x128xbf16> to vector<16x16x128xf32>
    %c0_6 = arith.constant 0 : index
    %c0_7 = arith.constant 0 : index
    %5 = vector.load %arg3[%c0_6, %c0_7] : memref<1x128xf32, #tpu.memory_space<vmem>>, vector<1x128xf32>
    %6 = vector.shape_cast %5 : vector<1x128xf32> to vector<1x1x128xf32>
    %7 = vector.broadcast %6 : vector<1x1x128xf32> to vector<16x16x128xf32>
    %8 = arith.mulf %4, %7 : vector<16x16x128xf32>
    %c0_8 = arith.constant 0 : index
    %c0_9 = arith.constant 0 : index
    %9 = vector.load %arg4[%c0_8, %c0_9] : memref<1x128xf32, #tpu.memory_space<vmem>>, vector<1x128xf32>
    %10 = vector.shape_cast %9 : vector<1x128xf32> to vector<1x1x128xf32>
    %11 = vector.broadcast %10 : vector<1x1x128xf32> to vector<16x16x128xf32>
    %12 = arith.addf %8, %11 : vector<16x16x128xf32>
    %13 = arith.truncf %12 : vector<16x16x128xf32> to vector<16x16x128xbf16>
    %c1 = arith.constant 1 : index
    %c1_10 = arith.constant 1 : index
    %c0_11 = arith.constant 0 : index
    %14 = vector.load %arg8[%c1, %c1_10, %c0_11] : memref<18x18x128xbf16, #tpu.memory_space<vmem>>, vector<16x16x128xbf16>
    tpu.vector_store %arg8[%c1, %c1_10, %c0_11], %13 {strides = array<i32>} : memref<18x18x128xbf16, #tpu.memory_space<vmem>>, vector<16x16x128xbf16>,
    %cst_12 = arith.constant 0.000000e+00 : f32
    %15 = vector.broadcast %cst_12 : f32 to vector<256x128xf32>
    %c0_13 = arith.constant 0 : index
    %c0_14 = arith.constant 0 : index
    %c0_15 = arith.constant 0 : index
    %16 = vector.load %arg8[%c0_13, %c0_14, %c0_15] : memref<18x18x128xbf16, #tpu.memory_space<vmem>>, vector<16x16x128xbf16>
    %17 = vector.shape_cast %16 : vector<16x16x128xbf16> to vector<256x128xbf16>
    %c0_16 = arith.constant 0 : index
    %c0_17 = arith.constant 0 : index
    %c0_18 = arith.constant 0 : index
    %18 = vector.load %arg2[%c0_16, %c0_17, %c0_18] : memref<9x128x128xbf16, #tpu.memory_space<vmem>>, vector<1x128x128xbf16>
    %19 = vector.shape_cast %18 : vector<1x128x128xbf16> to vector<128x128xbf16>
    %cst_19 = arith.constant dense<0.000000e+00> : vector<256x128xf32>
    %20 = tpu.matmul %17, %19, %cst_19 {dimension_numbers = #tpu.dot_dimension_numbers<[1], [0], [0], [1], [0, 0, 1, 1], [], []>} : vector<256x128xbf16>, vector<128x128xbf16>, vector<256x128xf32> -> vector<256x128xf32>
    %21 = arith.addf %15, %20 : vector<256x128xf32>
    %c0_20 = arith.constant 0 : index
    %c1_21 = arith.constant 1 : index
    %c0_22 = arith.constant 0 : index
    %22 = vector.load %arg8[%c0_20, %c1_21, %c0_22] : memref<18x18x128xbf16, #tpu.memory_space<vmem>>, vector<16x16x128xbf16>
    %23 = vector.shape_cast %22 : vector<16x16x128xbf16> to vector<256x128xbf16>
    %c1_23 = arith.constant 1 : index
    %c0_24 = arith.constant 0 : index
    %c0_25 = arith.constant 0 : index
    %24 = vector.load %arg2[%c1_23, %c0_24, %c0_25] : memref<9x128x128xbf16, #tpu.memory_space<vmem>>, vector<1x128x128xbf16>
    %25 = vector.shape_cast %24 : vector<1x128x128xbf16> to vector<128x128xbf16>
    %cst_26 = arith.constant dense<0.000000e+00> : vector<256x128xf32>
    %26 = tpu.matmul %23, %25, %cst_26 {dimension_numbers = #tpu.dot_dimension_numbers<[1], [0], [0], [1], [0, 0, 1, 1], [], []>} : vector<256x128xbf16>, vector<128x128xbf16>, vector<256x128xf32> -> vector<256x128xf32>
    %27 = arith.addf %21, %26 : vector<256x128xf32>
    %c0_27 = arith.constant 0 : index
    %c2 = arith.constant 2 : index
    %c0_28 = arith.constant 0 : index
    %28 = vector.load %arg8[%c0_27, %c2, %c0_28] : memref<18x18x128xbf16, #tpu.memory_space<vmem>>, vector<16x16x128xbf16>
    %29 = vector.shape_cast %28 : vector<16x16x128xbf16> to vector<256x128xbf16>
    %c2_29 = arith.constant 2 : index
    %c0_30 = arith.constant 0 : index
    %c0_31 = arith.constant 0 : index
    %30 = vector.load %arg2[%c2_29, %c0_30, %c0_31] : memref<9x128x128xbf16, #tpu.memory_space<vmem>>, vector<1x128x128xbf16>
    %31 = vector.shape_cast %30 : vector<1x128x128xbf16> to vector<128x128xbf16>
    %cst_32 = arith.constant dense<0.000000e+00> : vector<256x128xf32>
    %32 = tpu.matmul %29, %31, %cst_32 {dimension_numbers = #tpu.dot_dimension_numbers<[1], [0], [0], [1], [0, 0, 1, 1], [], []>} : vector<256x128xbf16>, vector<128x128xbf16>, vector<256x128xf32> -> vector<256x128xf32>
    %33 = arith.addf %27, %32 : vector<256x128xf32>
    %c1_33 = arith.constant 1 : index
    %c0_34 = arith.constant 0 : index
    %c0_35 = arith.constant 0 : index
    %34 = vector.load %arg8[%c1_33, %c0_34, %c0_35] : memref<18x18x128xbf16, #tpu.memory_space<vmem>>, vector<16x16x128xbf16>
    %35 = vector.shape_cast %34 : vector<16x16x128xbf16> to vector<256x128xbf16>
    %c3 = arith.constant 3 : index
    %c0_36 = arith.constant 0 : index
    %c0_37 = arith.constant 0 : index
    %36 = vector.load %arg2[%c3, %c0_36, %c0_37] : memref<9x128x128xbf16, #tpu.memory_space<vmem>>, vector<1x128x128xbf16>
    %37 = vector.shape_cast %36 : vector<1x128x128xbf16> to vector<128x128xbf16>
    %cst_38 = arith.constant dense<0.000000e+00> : vector<256x128xf32>
    %38 = tpu.matmul %35, %37, %cst_38 {dimension_numbers = #tpu.dot_dimension_numbers<[1], [0], [0], [1], [0, 0, 1, 1], [], []>} : vector<256x128xbf16>, vector<128x128xbf16>, vector<256x128xf32> -> vector<256x128xf32>
    %39 = arith.addf %33, %38 : vector<256x128xf32>
    %c1_39 = arith.constant 1 : index
    %c1_40 = arith.constant 1 : index
    %c0_41 = arith.constant 0 : index
    %40 = vector.load %arg8[%c1_39, %c1_40, %c0_41] : memref<18x18x128xbf16, #tpu.memory_space<vmem>>, vector<16x16x128xbf16>
    %41 = vector.shape_cast %40 : vector<16x16x128xbf16> to vector<256x128xbf16>
    %c4 = arith.constant 4 : index
    %c0_42 = arith.constant 0 : index
    %c0_43 = arith.constant 0 : index
    %42 = vector.load %arg2[%c4, %c0_42, %c0_43] : memref<9x128x128xbf16, #tpu.memory_space<vmem>>, vector<1x128x128xbf16>
    %43 = vector.shape_cast %42 : vector<1x128x128xbf16> to vector<128x128xbf16>
    %cst_44 = arith.constant dense<0.000000e+00> : vector<256x128xf32>
    %44 = tpu.matmul %41, %43, %cst_44 {dimension_numbers = #tpu.dot_dimension_numbers<[1], [0], [0], [1], [0, 0, 1, 1], [], []>} : vector<256x128xbf16>, vector<128x128xbf16>, vector<256x128xf32> -> vector<256x128xf32>
    %45 = arith.addf %39, %44 : vector<256x128xf32>
    %c1_45 = arith.constant 1 : index
    %c2_46 = arith.constant 2 : index
    %c0_47 = arith.constant 0 : index
    %46 = vector.load %arg8[%c1_45, %c2_46, %c0_47] : memref<18x18x128xbf16, #tpu.memory_space<vmem>>, vector<16x16x128xbf16>
    %47 = vector.shape_cast %46 : vector<16x16x128xbf16> to vector<256x128xbf16>
    %c5 = arith.constant 5 : index
    %c0_48 = arith.constant 0 : index
    %c0_49 = arith.constant 0 : index
    %48 = vector.load %arg2[%c5, %c0_48, %c0_49] : memref<9x128x128xbf16, #tpu.memory_space<vmem>>, vector<1x128x128xbf16>
    %49 = vector.shape_cast %48 : vector<1x128x128xbf16> to vector<128x128xbf16>
    %cst_50 = arith.constant dense<0.000000e+00> : vector<256x128xf32>
    %50 = tpu.matmul %47, %49, %cst_50 {dimension_numbers = #tpu.dot_dimension_numbers<[1], [0], [0], [1], [0, 0, 1, 1], [], []>} : vector<256x128xbf16>, vector<128x128xbf16>, vector<256x128xf32> -> vector<256x128xf32>
    %51 = arith.addf %45, %50 : vector<256x128xf32>
    %c2_51 = arith.constant 2 : index
    %c0_52 = arith.constant 0 : index
    %c0_53 = arith.constant 0 : index
    %52 = vector.load %arg8[%c2_51, %c0_52, %c0_53] : memref<18x18x128xbf16, #tpu.memory_space<vmem>>, vector<16x16x128xbf16>
    %53 = vector.shape_cast %52 : vector<16x16x128xbf16> to vector<256x128xbf16>
    %c6 = arith.constant 6 : index
    %c0_54 = arith.constant 0 : index
    %c0_55 = arith.constant 0 : index
    %54 = vector.load %arg2[%c6, %c0_54, %c0_55] : memref<9x128x128xbf16, #tpu.memory_space<vmem>>, vector<1x128x128xbf16>
    %55 = vector.shape_cast %54 : vector<1x128x128xbf16> to vector<128x128xbf16>
    %cst_56 = arith.constant dense<0.000000e+00> : vector<256x128xf32>
    %56 = tpu.matmul %53, %55, %cst_56 {dimension_numbers = #tpu.dot_dimension_numbers<[1], [0], [0], [1], [0, 0, 1, 1], [], []>} : vector<256x128xbf16>, vector<128x128xbf16>, vector<256x128xf32> -> vector<256x128xf32>
    %57 = arith.addf %51, %56 : vector<256x128xf32>
    %c2_57 = arith.constant 2 : index
    %c1_58 = arith.constant 1 : index
    %c0_59 = arith.constant 0 : index
    %58 = vector.load %arg8[%c2_57, %c1_58, %c0_59] : memref<18x18x128xbf16, #tpu.memory_space<vmem>>, vector<16x16x128xbf16>
    %59 = vector.shape_cast %58 : vector<16x16x128xbf16> to vector<256x128xbf16>
    %c7 = arith.constant 7 : index
    %c0_60 = arith.constant 0 : index
    %c0_61 = arith.constant 0 : index
    %60 = vector.load %arg2[%c7, %c0_60, %c0_61] : memref<9x128x128xbf16, #tpu.memory_space<vmem>>, vector<1x128x128xbf16>
    %61 = vector.shape_cast %60 : vector<1x128x128xbf16> to vector<128x128xbf16>
    %cst_62 = arith.constant dense<0.000000e+00> : vector<256x128xf32>
    %62 = tpu.matmul %59, %61, %cst_62 {dimension_numbers = #tpu.dot_dimension_numbers<[1], [0], [0], [1], [0, 0, 1, 1], [], []>} : vector<256x128xbf16>, vector<128x128xbf16>, vector<256x128xf32> -> vector<256x128xf32>
    %63 = arith.addf %57, %62 : vector<256x128xf32>
    %c2_63 = arith.constant 2 : index
    %c2_64 = arith.constant 2 : index
    %c0_65 = arith.constant 0 : index
    %64 = vector.load %arg8[%c2_63, %c2_64, %c0_65] : memref<18x18x128xbf16, #tpu.memory_space<vmem>>, vector<16x16x128xbf16>
    %65 = vector.shape_cast %64 : vector<16x16x128xbf16> to vector<256x128xbf16>
    %c8 = arith.constant 8 : index
    %c0_66 = arith.constant 0 : index
    %c0_67 = arith.constant 0 : index
    %66 = vector.load %arg2[%c8, %c0_66, %c0_67] : memref<9x128x128xbf16, #tpu.memory_space<vmem>>, vector<1x128x128xbf16>
    %67 = vector.shape_cast %66 : vector<1x128x128xbf16> to vector<128x128xbf16>
    %cst_68 = arith.constant dense<0.000000e+00> : vector<256x128xf32>
    %68 = tpu.matmul %65, %67, %cst_68 {dimension_numbers = #tpu.dot_dimension_numbers<[1], [0], [0], [1], [0, 0, 1, 1], [], []>} : vector<256x128xbf16>, vector<128x128xbf16>, vector<256x128xf32> -> vector<256x128xf32>
    %69 = arith.addf %63, %68 : vector<256x128xf32>
    %c0_69 = arith.constant 0 : index
    %c0_70 = arith.constant 0 : index
    %70 = vector.load %arg5[%c0_69, %c0_70] : memref<1x128xf32, #tpu.memory_space<vmem>>, vector<1x128xf32>
    %71 = vector.broadcast %70 : vector<1x128xf32> to vector<256x128xf32>
    %72 = arith.mulf %69, %71 : vector<256x128xf32>
    %c0_71 = arith.constant 0 : index
    %c0_72 = arith.constant 0 : index
    %73 = vector.load %arg6[%c0_71, %c0_72] : memref<1x128xf32, #tpu.memory_space<vmem>>, vector<1x128xf32>
    %74 = vector.broadcast %73 : vector<1x128xf32> to vector<256x128xf32>
    %75 = arith.addf %72, %74 : vector<256x128xf32>
    %cst_73 = arith.constant 0.000000e+00 : f32
    %76 = vector.broadcast %cst_73 : f32 to vector<256x128xf32>
    %77 = arith.maximumf %75, %76 : vector<256x128xf32>
    %78 = vector.shape_cast %77 : vector<256x128xf32> to vector<8x32x128xf32>
    %79 = vector.extract_strided_slice %78 {offsets = [0, 0, 0], sizes = [8, 16, 128], strides = [1, 1, 1]} : vector<8x32x128xf32> to vector<8x16x128xf32>
    %80 = vector.extract_strided_slice %78 {offsets = [0, 16, 0], sizes = [8, 16, 128], strides = [1, 1, 1]} : vector<8x32x128xf32> to vector<8x16x128xf32>
    %81 = arith.maximumf %79, %80 : vector<8x16x128xf32>
    %c0_74 = arith.constant 0 : index
    %c0_75 = arith.constant 0 : index
    %c0_76 = arith.constant 0 : index
    %82 = vector.load %arg9[%c0_74, %c0_75, %c0_76] : memref<8x16x128xf32, #tpu.memory_space<vmem>>, vector<8x16x128xf32>
    tpu.vector_store %arg9[%c0_74, %c0_75, %c0_76], %81 {strides = array<i32>} : memref<8x16x128xf32, #tpu.memory_space<vmem>>, vector<8x16x128xf32>,
    %c0_77 = arith.constant 0 : index
    %c0_78 = arith.constant 0 : index
    %c0_79 = arith.constant 0 : index
    %83 = tpu.strided_load %arg9[%c0_77, %c0_78, %c0_79] {strides = array<i32: 1, 2, 1>} : memref<8x16x128xf32, #tpu.memory_space<vmem>>, vector<8x8x128xf32>
    %c0_80 = arith.constant 0 : index
    %c1_81 = arith.constant 1 : index
    %c0_82 = arith.constant 0 : index
    %84 = tpu.strided_load %arg9[%c0_80, %c1_81, %c0_82] {strides = array<i32: 1, 2, 1>} : memref<8x16x128xf32, #tpu.memory_space<vmem>>, vector<8x8x128xf32>
    %85 = arith.maximumf %83, %84 : vector<8x8x128xf32>
    %86 = arith.truncf %85 : vector<8x8x128xf32> to vector<8x8x128xbf16>
    %c0_83 = arith.constant 0 : index
    %c0_84 = arith.constant 0 : index
    %c0_85 = arith.constant 0 : index
    %c0_86 = arith.constant 0 : index
    %87 = vector.load %arg7[%c0_83, %c0_84, %c0_85, %c0_86] : memref<1x8x8x128xbf16, #tpu.memory_space<vmem>>, vector<1x8x8x128xbf16>
    %88 = vector.shape_cast %87 : vector<1x8x8x128xbf16> to vector<8x8x128xbf16>
    %89 = vector.shape_cast %86 : vector<8x8x128xbf16> to vector<1x8x8x128xbf16>
    tpu.vector_store %arg7[%c0_83, %c0_84, %c0_85, %c0_86], %89 {strides = array<i32>} : memref<1x8x8x128xbf16, #tpu.memory_space<vmem>>, vector<1x8x8x128xbf16>,
    return
  }
  func.func @transform_0(%arg0: i32) -> (i32, i32, i32, i32) {
    %c0_i32 = arith.constant 0 : i32
    %c0_i32_0 = arith.constant 0 : i32
    %c0_i32_1 = arith.constant 0 : i32
    %c0_i32_2 = arith.constant 0 : i32
    return %arg0, %c0_i32, %c0_i32_0, %c0_i32_1 : i32, i32, i32, i32
  }
  func.func @transform_1(%arg0: i32) -> (i32, i32, i32) {
    %c0_i32 = arith.constant 0 : i32
    %c0_i32_0 = arith.constant 0 : i32
    %c0_i32_1 = arith.constant 0 : i32
    %c0_i32_2 = arith.constant 0 : i32
    return %c0_i32, %c0_i32_0, %c0_i32_1 : i32, i32, i32
  }
  func.func @transform_2(%arg0: i32) -> (i32, i32) {
    %c0_i32 = arith.constant 0 : i32
    %c0_i32_0 = arith.constant 0 : i32
    %c0_i32_1 = arith.constant 0 : i32
    return %c0_i32, %c0_i32_0 : i32, i32
  }
  func.func @transform_3(%arg0: i32) -> (i32, i32) {
    %c0_i32 = arith.constant 0 : i32
    %c0_i32_0 = arith.constant 0 : i32
    %c0_i32_1 = arith.constant 0 : i32
    return %c0_i32, %c0_i32_0 : i32, i32
  }
  func.func @transform_4(%arg0: i32) -> (i32, i32) {
    %c0_i32 = arith.constant 0 : i32
    %c0_i32_0 = arith.constant 0 : i32
    %c0_i32_1 = arith.constant 0 : i32
    return %c0_i32, %c0_i32_0 : i32, i32
  }
  func.func @transform_5(%arg0: i32) -> (i32, i32) {
    %c0_i32 = arith.constant 0 : i32
    %c0_i32_0 = arith.constant 0 : i32
    %c0_i32_1 = arith.constant 0 : i32
    return %c0_i32, %c0_i32_0 : i32, i32
  }
  func.func @transform_6(%arg0: i32) -> (i32, i32, i32, i32) {
    %c0_i32 = arith.constant 0 : i32
    %c0_i32_0 = arith.constant 0 : i32
    %c0_i32_1 = arith.constant 0 : i32
    %c0_i32_2 = arith.constant 0 : i32
    return %arg0, %c0_i32, %c0_i32_0, %c0_i32_1 : i32, i32, i32, i32
  }
}

module attributes {stable_mosaic.version = 11 : i64} {
  func.func @_head_kernel(%arg0: i32, %arg1: memref<1x4x4x128xbf16, #tpu.memory_space<vmem>>, %arg2: memref<128x128xbf16, #tpu.memory_space<vmem>>, %arg3: memref<1x128xf32, #tpu.memory_space<vmem>>, %arg4: memref<1x1x128xf32, #tpu.memory_space<vmem>>) attributes {dimension_semantics = [#tpu.dimension_semantics<parallel>], iteration_bounds = array<i64: 2>, scalar_prefetch = 0 : i64, scratch_operands = 0 : i64, tpu.core_type = #tpu.core_type<tc>, window_params = [{transform_indices = @transform_0, window_bounds = array<i64: 1, 4, 4, 128>}, {pipeline_mode = #tpu.pipeline_mode<synchronous>, transform_indices = @transform_1, window_bounds = array<i64: 128, 128>}, {pipeline_mode = #tpu.pipeline_mode<synchronous>, transform_indices = @transform_2, window_bounds = array<i64: 1, 128>}, {transform_indices = @transform_3, window_bounds = array<i64: 1, 1, 128>}]} {
    %c0 = arith.constant 0 : index
    %c0_0 = arith.constant 0 : index
    %c0_1 = arith.constant 0 : index
    %c0_2 = arith.constant 0 : index
    %0 = vector.load %arg1[%c0, %c0_0, %c0_1, %c0_2] : memref<1x4x4x128xbf16, #tpu.memory_space<vmem>>, vector<1x1x4x128xbf16>
    %1 = vector.shape_cast %0 : vector<1x1x4x128xbf16> to vector<4x128xbf16>
    %c0_3 = arith.constant 0 : index
    %c1 = arith.constant 1 : index
    %c0_4 = arith.constant 0 : index
    %c0_5 = arith.constant 0 : index
    %2 = vector.load %arg1[%c0_3, %c1, %c0_4, %c0_5] : memref<1x4x4x128xbf16, #tpu.memory_space<vmem>>, vector<1x1x4x128xbf16>
    %3 = vector.shape_cast %2 : vector<1x1x4x128xbf16> to vector<4x128xbf16>
    %4 = arith.maximumf %1, %3 : vector<4x128xbf16>
    %c0_6 = arith.constant 0 : index
    %c2 = arith.constant 2 : index
    %c0_7 = arith.constant 0 : index
    %c0_8 = arith.constant 0 : index
    %5 = vector.load %arg1[%c0_6, %c2, %c0_7, %c0_8] : memref<1x4x4x128xbf16, #tpu.memory_space<vmem>>, vector<1x1x4x128xbf16>
    %6 = vector.shape_cast %5 : vector<1x1x4x128xbf16> to vector<4x128xbf16>
    %7 = arith.maximumf %4, %6 : vector<4x128xbf16>
    %c0_9 = arith.constant 0 : index
    %c3 = arith.constant 3 : index
    %c0_10 = arith.constant 0 : index
    %c0_11 = arith.constant 0 : index
    %8 = vector.load %arg1[%c0_9, %c3, %c0_10, %c0_11] : memref<1x4x4x128xbf16, #tpu.memory_space<vmem>>, vector<1x1x4x128xbf16>
    %9 = vector.shape_cast %8 : vector<1x1x4x128xbf16> to vector<4x128xbf16>
    %10 = arith.maximumf %7, %9 : vector<4x128xbf16>
    %cst = arith.constant dense<0xFF80> : vector<128xbf16>
    %11 = vector.multi_reduction <maximumf>, %10, %cst [0] : vector<4x128xbf16> to vector<128xbf16>
    %12 = vector.shape_cast %11 : vector<128xbf16> to vector<1x128xbf16>
    %c0_12 = arith.constant 0 : index
    %c0_13 = arith.constant 0 : index
    %13 = vector.load %arg2[%c0_12, %c0_13] : memref<128x128xbf16, #tpu.memory_space<vmem>>, vector<128x128xbf16>
    %cst_14 = arith.constant dense<0.000000e+00> : vector<1x128xf32>
    %14 = tpu.matmul %12, %13, %cst_14 {dimension_numbers = #tpu.dot_dimension_numbers<[1], [0], [0], [1], [0, 0, 1, 1], [], []>} : vector<1x128xbf16>, vector<128x128xbf16>, vector<1x128xf32> -> vector<1x128xf32>
    %c0_15 = arith.constant 0 : index
    %c0_16 = arith.constant 0 : index
    %15 = vector.load %arg3[%c0_15, %c0_16] : memref<1x128xf32, #tpu.memory_space<vmem>>, vector<1x128xf32>
    %16 = arith.addf %14, %15 : vector<1x128xf32>
    %c0_17 = arith.constant 0 : index
    %c0_18 = arith.constant 0 : index
    %c0_19 = arith.constant 0 : index
    %17 = vector.load %arg4[%c0_17, %c0_18, %c0_19] : memref<1x1x128xf32, #tpu.memory_space<vmem>>, vector<1x1x128xf32>
    %18 = vector.shape_cast %17 : vector<1x1x128xf32> to vector<1x128xf32>
    %19 = vector.shape_cast %16 : vector<1x128xf32> to vector<1x1x128xf32>
    tpu.vector_store %arg4[%c0_17, %c0_18, %c0_19], %19 {strides = array<i32>} : memref<1x1x128xf32, #tpu.memory_space<vmem>>, vector<1x1x128xf32>,
    return
  }
  func.func @transform_0(%arg0: i32) -> (i32, i32, i32, i32) {
    %c0_i32 = arith.constant 0 : i32
    %c0_i32_0 = arith.constant 0 : i32
    %c0_i32_1 = arith.constant 0 : i32
    %c0_i32_2 = arith.constant 0 : i32
    return %arg0, %c0_i32, %c0_i32_0, %c0_i32_1 : i32, i32, i32, i32
  }
  func.func @transform_1(%arg0: i32) -> (i32, i32) {
    %c0_i32 = arith.constant 0 : i32
    %c0_i32_0 = arith.constant 0 : i32
    %c0_i32_1 = arith.constant 0 : i32
    return %c0_i32, %c0_i32_0 : i32, i32
  }
  func.func @transform_2(%arg0: i32) -> (i32, i32) {
    %c0_i32 = arith.constant 0 : i32
    %c0_i32_0 = arith.constant 0 : i32
    %c0_i32_1 = arith.constant 0 : i32
    return %c0_i32, %c0_i32_0 : i32, i32
  }
  func.func @transform_3(%arg0: i32) -> (i32, i32, i32) {
    %c0_i32 = arith.constant 0 : i32
    %c0_i32_0 = arith.constant 0 : i32
    %c0_i32_1 = arith.constant 0 : i32
    return %arg0, %c0_i32, %c0_i32_0 : i32, i32, i32
  }
}

module attributes {stable_mosaic.version = 11 : i64} {
  func.func @_conv_bn_relu_kernel(%arg0: i32, %arg1: memref<1x8x8x128xbf16, #tpu.memory_space<vmem>>, %arg2: memref<9x128x128xbf16, #tpu.memory_space<vmem>>, %arg3: memref<1x128xf32, #tpu.memory_space<vmem>>, %arg4: memref<1x128xf32, #tpu.memory_space<vmem>>, %arg5: memref<1x4x4x128xbf16, #tpu.memory_space<vmem>>, %arg6: memref<10x10x128xbf16, #tpu.memory_space<vmem>>, %arg7: memref<4x8x128xf32, #tpu.memory_space<vmem>>) attributes {dimension_semantics = [#tpu.dimension_semantics<parallel>], iteration_bounds = array<i64: 2>, scalar_prefetch = 0 : i64, scratch_operands = 2 : i64, tpu.core_type = #tpu.core_type<tc>, window_params = [{transform_indices = @transform_0, window_bounds = array<i64: 1, 8, 8, 128>}, {pipeline_mode = #tpu.pipeline_mode<synchronous>, transform_indices = @transform_1, window_bounds = array<i64: 9, 128, 128>}, {pipeline_mode = #tpu.pipeline_mode<synchronous>, transform_indices = @transform_2, window_bounds = array<i64: 1, 128>}, {pipeline_mode = #tpu.pipeline_mode<synchronous>, transform_indices = @transform_3, window_bounds = array<i64: 1, 128>}, {transform_indices = @transform_4, window_bounds = array<i64: 1, 4, 4, 128>}]} {
    %cst = arith.constant 0.000000e+00 : bf16
    %0 = vector.broadcast %cst : bf16 to vector<10x10x128xbf16>
    %c0 = arith.constant 0 : index
    %c0_0 = arith.constant 0 : index
    %c0_1 = arith.constant 0 : index
    %1 = vector.load %arg6[%c0, %c0_0, %c0_1] : memref<10x10x128xbf16, #tpu.memory_space<vmem>>, vector<10x10x128xbf16>
    tpu.vector_store %arg6[%c0, %c0_0, %c0_1], %0 {strides = array<i32>} : memref<10x10x128xbf16, #tpu.memory_space<vmem>>, vector<10x10x128xbf16>,
    %c0_2 = arith.constant 0 : index
    %c0_3 = arith.constant 0 : index
    %c0_4 = arith.constant 0 : index
    %c0_5 = arith.constant 0 : index
    %2 = vector.load %arg1[%c0_2, %c0_3, %c0_4, %c0_5] : memref<1x8x8x128xbf16, #tpu.memory_space<vmem>>, vector<1x8x8x128xbf16>
    %3 = vector.shape_cast %2 : vector<1x8x8x128xbf16> to vector<8x8x128xbf16>
    %c1 = arith.constant 1 : index
    %c1_6 = arith.constant 1 : index
    %c0_7 = arith.constant 0 : index
    %4 = vector.load %arg6[%c1, %c1_6, %c0_7] : memref<10x10x128xbf16, #tpu.memory_space<vmem>>, vector<8x8x128xbf16>
    tpu.vector_store %arg6[%c1, %c1_6, %c0_7], %3 {strides = array<i32>} : memref<10x10x128xbf16, #tpu.memory_space<vmem>>, vector<8x8x128xbf16>,
    %cst_8 = arith.constant 0.000000e+00 : f32
    %5 = vector.broadcast %cst_8 : f32 to vector<64x128xf32>
    %c0_9 = arith.constant 0 : index
    %c0_10 = arith.constant 0 : index
    %c0_11 = arith.constant 0 : index
    %6 = vector.load %arg6[%c0_9, %c0_10, %c0_11] : memref<10x10x128xbf16, #tpu.memory_space<vmem>>, vector<8x8x128xbf16>
    %7 = vector.shape_cast %6 : vector<8x8x128xbf16> to vector<64x128xbf16>
    %c0_12 = arith.constant 0 : index
    %c0_13 = arith.constant 0 : index
    %c0_14 = arith.constant 0 : index
    %8 = vector.load %arg2[%c0_12, %c0_13, %c0_14] : memref<9x128x128xbf16, #tpu.memory_space<vmem>>, vector<1x128x128xbf16>
    %9 = vector.shape_cast %8 : vector<1x128x128xbf16> to vector<128x128xbf16>
    %cst_15 = arith.constant dense<0.000000e+00> : vector<64x128xf32>
    %10 = tpu.matmul %7, %9, %cst_15 {dimension_numbers = #tpu.dot_dimension_numbers<[1], [0], [0], [1], [0, 0, 1, 1], [], []>} : vector<64x128xbf16>, vector<128x128xbf16>, vector<64x128xf32> -> vector<64x128xf32>
    %11 = arith.addf %5, %10 : vector<64x128xf32>
    %c0_16 = arith.constant 0 : index
    %c1_17 = arith.constant 1 : index
    %c0_18 = arith.constant 0 : index
    %12 = vector.load %arg6[%c0_16, %c1_17, %c0_18] : memref<10x10x128xbf16, #tpu.memory_space<vmem>>, vector<8x8x128xbf16>
    %13 = vector.shape_cast %12 : vector<8x8x128xbf16> to vector<64x128xbf16>
    %c1_19 = arith.constant 1 : index
    %c0_20 = arith.constant 0 : index
    %c0_21 = arith.constant 0 : index
    %14 = vector.load %arg2[%c1_19, %c0_20, %c0_21] : memref<9x128x128xbf16, #tpu.memory_space<vmem>>, vector<1x128x128xbf16>
    %15 = vector.shape_cast %14 : vector<1x128x128xbf16> to vector<128x128xbf16>
    %cst_22 = arith.constant dense<0.000000e+00> : vector<64x128xf32>
    %16 = tpu.matmul %13, %15, %cst_22 {dimension_numbers = #tpu.dot_dimension_numbers<[1], [0], [0], [1], [0, 0, 1, 1], [], []>} : vector<64x128xbf16>, vector<128x128xbf16>, vector<64x128xf32> -> vector<64x128xf32>
    %17 = arith.addf %11, %16 : vector<64x128xf32>
    %c0_23 = arith.constant 0 : index
    %c2 = arith.constant 2 : index
    %c0_24 = arith.constant 0 : index
    %18 = vector.load %arg6[%c0_23, %c2, %c0_24] : memref<10x10x128xbf16, #tpu.memory_space<vmem>>, vector<8x8x128xbf16>
    %19 = vector.shape_cast %18 : vector<8x8x128xbf16> to vector<64x128xbf16>
    %c2_25 = arith.constant 2 : index
    %c0_26 = arith.constant 0 : index
    %c0_27 = arith.constant 0 : index
    %20 = vector.load %arg2[%c2_25, %c0_26, %c0_27] : memref<9x128x128xbf16, #tpu.memory_space<vmem>>, vector<1x128x128xbf16>
    %21 = vector.shape_cast %20 : vector<1x128x128xbf16> to vector<128x128xbf16>
    %cst_28 = arith.constant dense<0.000000e+00> : vector<64x128xf32>
    %22 = tpu.matmul %19, %21, %cst_28 {dimension_numbers = #tpu.dot_dimension_numbers<[1], [0], [0], [1], [0, 0, 1, 1], [], []>} : vector<64x128xbf16>, vector<128x128xbf16>, vector<64x128xf32> -> vector<64x128xf32>
    %23 = arith.addf %17, %22 : vector<64x128xf32>
    %c1_29 = arith.constant 1 : index
    %c0_30 = arith.constant 0 : index
    %c0_31 = arith.constant 0 : index
    %24 = vector.load %arg6[%c1_29, %c0_30, %c0_31] : memref<10x10x128xbf16, #tpu.memory_space<vmem>>, vector<8x8x128xbf16>
    %25 = vector.shape_cast %24 : vector<8x8x128xbf16> to vector<64x128xbf16>
    %c3 = arith.constant 3 : index
    %c0_32 = arith.constant 0 : index
    %c0_33 = arith.constant 0 : index
    %26 = vector.load %arg2[%c3, %c0_32, %c0_33] : memref<9x128x128xbf16, #tpu.memory_space<vmem>>, vector<1x128x128xbf16>
    %27 = vector.shape_cast %26 : vector<1x128x128xbf16> to vector<128x128xbf16>
    %cst_34 = arith.constant dense<0.000000e+00> : vector<64x128xf32>
    %28 = tpu.matmul %25, %27, %cst_34 {dimension_numbers = #tpu.dot_dimension_numbers<[1], [0], [0], [1], [0, 0, 1, 1], [], []>} : vector<64x128xbf16>, vector<128x128xbf16>, vector<64x128xf32> -> vector<64x128xf32>
    %29 = arith.addf %23, %28 : vector<64x128xf32>
    %c1_35 = arith.constant 1 : index
    %c1_36 = arith.constant 1 : index
    %c0_37 = arith.constant 0 : index
    %30 = vector.load %arg6[%c1_35, %c1_36, %c0_37] : memref<10x10x128xbf16, #tpu.memory_space<vmem>>, vector<8x8x128xbf16>
    %31 = vector.shape_cast %30 : vector<8x8x128xbf16> to vector<64x128xbf16>
    %c4 = arith.constant 4 : index
    %c0_38 = arith.constant 0 : index
    %c0_39 = arith.constant 0 : index
    %32 = vector.load %arg2[%c4, %c0_38, %c0_39] : memref<9x128x128xbf16, #tpu.memory_space<vmem>>, vector<1x128x128xbf16>
    %33 = vector.shape_cast %32 : vector<1x128x128xbf16> to vector<128x128xbf16>
    %cst_40 = arith.constant dense<0.000000e+00> : vector<64x128xf32>
    %34 = tpu.matmul %31, %33, %cst_40 {dimension_numbers = #tpu.dot_dimension_numbers<[1], [0], [0], [1], [0, 0, 1, 1], [], []>} : vector<64x128xbf16>, vector<128x128xbf16>, vector<64x128xf32> -> vector<64x128xf32>
    %35 = arith.addf %29, %34 : vector<64x128xf32>
    %c1_41 = arith.constant 1 : index
    %c2_42 = arith.constant 2 : index
    %c0_43 = arith.constant 0 : index
    %36 = vector.load %arg6[%c1_41, %c2_42, %c0_43] : memref<10x10x128xbf16, #tpu.memory_space<vmem>>, vector<8x8x128xbf16>
    %37 = vector.shape_cast %36 : vector<8x8x128xbf16> to vector<64x128xbf16>
    %c5 = arith.constant 5 : index
    %c0_44 = arith.constant 0 : index
    %c0_45 = arith.constant 0 : index
    %38 = vector.load %arg2[%c5, %c0_44, %c0_45] : memref<9x128x128xbf16, #tpu.memory_space<vmem>>, vector<1x128x128xbf16>
    %39 = vector.shape_cast %38 : vector<1x128x128xbf16> to vector<128x128xbf16>
    %cst_46 = arith.constant dense<0.000000e+00> : vector<64x128xf32>
    %40 = tpu.matmul %37, %39, %cst_46 {dimension_numbers = #tpu.dot_dimension_numbers<[1], [0], [0], [1], [0, 0, 1, 1], [], []>} : vector<64x128xbf16>, vector<128x128xbf16>, vector<64x128xf32> -> vector<64x128xf32>
    %41 = arith.addf %35, %40 : vector<64x128xf32>
    %c2_47 = arith.constant 2 : index
    %c0_48 = arith.constant 0 : index
    %c0_49 = arith.constant 0 : index
    %42 = vector.load %arg6[%c2_47, %c0_48, %c0_49] : memref<10x10x128xbf16, #tpu.memory_space<vmem>>, vector<8x8x128xbf16>
    %43 = vector.shape_cast %42 : vector<8x8x128xbf16> to vector<64x128xbf16>
    %c6 = arith.constant 6 : index
    %c0_50 = arith.constant 0 : index
    %c0_51 = arith.constant 0 : index
    %44 = vector.load %arg2[%c6, %c0_50, %c0_51] : memref<9x128x128xbf16, #tpu.memory_space<vmem>>, vector<1x128x128xbf16>
    %45 = vector.shape_cast %44 : vector<1x128x128xbf16> to vector<128x128xbf16>
    %cst_52 = arith.constant dense<0.000000e+00> : vector<64x128xf32>
    %46 = tpu.matmul %43, %45, %cst_52 {dimension_numbers = #tpu.dot_dimension_numbers<[1], [0], [0], [1], [0, 0, 1, 1], [], []>} : vector<64x128xbf16>, vector<128x128xbf16>, vector<64x128xf32> -> vector<64x128xf32>
    %47 = arith.addf %41, %46 : vector<64x128xf32>
    %c2_53 = arith.constant 2 : index
    %c1_54 = arith.constant 1 : index
    %c0_55 = arith.constant 0 : index
    %48 = vector.load %arg6[%c2_53, %c1_54, %c0_55] : memref<10x10x128xbf16, #tpu.memory_space<vmem>>, vector<8x8x128xbf16>
    %49 = vector.shape_cast %48 : vector<8x8x128xbf16> to vector<64x128xbf16>
    %c7 = arith.constant 7 : index
    %c0_56 = arith.constant 0 : index
    %c0_57 = arith.constant 0 : index
    %50 = vector.load %arg2[%c7, %c0_56, %c0_57] : memref<9x128x128xbf16, #tpu.memory_space<vmem>>, vector<1x128x128xbf16>
    %51 = vector.shape_cast %50 : vector<1x128x128xbf16> to vector<128x128xbf16>
    %cst_58 = arith.constant dense<0.000000e+00> : vector<64x128xf32>
    %52 = tpu.matmul %49, %51, %cst_58 {dimension_numbers = #tpu.dot_dimension_numbers<[1], [0], [0], [1], [0, 0, 1, 1], [], []>} : vector<64x128xbf16>, vector<128x128xbf16>, vector<64x128xf32> -> vector<64x128xf32>
    %53 = arith.addf %47, %52 : vector<64x128xf32>
    %c2_59 = arith.constant 2 : index
    %c2_60 = arith.constant 2 : index
    %c0_61 = arith.constant 0 : index
    %54 = vector.load %arg6[%c2_59, %c2_60, %c0_61] : memref<10x10x128xbf16, #tpu.memory_space<vmem>>, vector<8x8x128xbf16>
    %55 = vector.shape_cast %54 : vector<8x8x128xbf16> to vector<64x128xbf16>
    %c8 = arith.constant 8 : index
    %c0_62 = arith.constant 0 : index
    %c0_63 = arith.constant 0 : index
    %56 = vector.load %arg2[%c8, %c0_62, %c0_63] : memref<9x128x128xbf16, #tpu.memory_space<vmem>>, vector<1x128x128xbf16>
    %57 = vector.shape_cast %56 : vector<1x128x128xbf16> to vector<128x128xbf16>
    %cst_64 = arith.constant dense<0.000000e+00> : vector<64x128xf32>
    %58 = tpu.matmul %55, %57, %cst_64 {dimension_numbers = #tpu.dot_dimension_numbers<[1], [0], [0], [1], [0, 0, 1, 1], [], []>} : vector<64x128xbf16>, vector<128x128xbf16>, vector<64x128xf32> -> vector<64x128xf32>
    %59 = arith.addf %53, %58 : vector<64x128xf32>
    %c0_65 = arith.constant 0 : index
    %c0_66 = arith.constant 0 : index
    %60 = vector.load %arg3[%c0_65, %c0_66] : memref<1x128xf32, #tpu.memory_space<vmem>>, vector<1x128xf32>
    %61 = vector.broadcast %60 : vector<1x128xf32> to vector<64x128xf32>
    %62 = arith.mulf %59, %61 : vector<64x128xf32>
    %c0_67 = arith.constant 0 : index
    %c0_68 = arith.constant 0 : index
    %63 = vector.load %arg4[%c0_67, %c0_68] : memref<1x128xf32, #tpu.memory_space<vmem>>, vector<1x128xf32>
    %64 = vector.broadcast %63 : vector<1x128xf32> to vector<64x128xf32>
    %65 = arith.addf %62, %64 : vector<64x128xf32>
    %cst_69 = arith.constant 0.000000e+00 : f32
    %66 = vector.broadcast %cst_69 : f32 to vector<64x128xf32>
    %67 = arith.maximumf %65, %66 : vector<64x128xf32>
    %68 = vector.shape_cast %67 : vector<64x128xf32> to vector<4x16x128xf32>
    %69 = vector.extract_strided_slice %68 {offsets = [0, 0, 0], sizes = [4, 8, 128], strides = [1, 1, 1]} : vector<4x16x128xf32> to vector<4x8x128xf32>
    %70 = vector.extract_strided_slice %68 {offsets = [0, 8, 0], sizes = [4, 8, 128], strides = [1, 1, 1]} : vector<4x16x128xf32> to vector<4x8x128xf32>
    %71 = arith.maximumf %69, %70 : vector<4x8x128xf32>
    %c0_70 = arith.constant 0 : index
    %c0_71 = arith.constant 0 : index
    %c0_72 = arith.constant 0 : index
    %72 = vector.load %arg7[%c0_70, %c0_71, %c0_72] : memref<4x8x128xf32, #tpu.memory_space<vmem>>, vector<4x8x128xf32>
    tpu.vector_store %arg7[%c0_70, %c0_71, %c0_72], %71 {strides = array<i32>} : memref<4x8x128xf32, #tpu.memory_space<vmem>>, vector<4x8x128xf32>,
    %c0_73 = arith.constant 0 : index
    %c0_74 = arith.constant 0 : index
    %c0_75 = arith.constant 0 : index
    %73 = tpu.strided_load %arg7[%c0_73, %c0_74, %c0_75] {strides = array<i32: 1, 2, 1>} : memref<4x8x128xf32, #tpu.memory_space<vmem>>, vector<4x4x128xf32>
    %c0_76 = arith.constant 0 : index
    %c1_77 = arith.constant 1 : index
    %c0_78 = arith.constant 0 : index
    %74 = tpu.strided_load %arg7[%c0_76, %c1_77, %c0_78] {strides = array<i32: 1, 2, 1>} : memref<4x8x128xf32, #tpu.memory_space<vmem>>, vector<4x4x128xf32>
    %75 = arith.maximumf %73, %74 : vector<4x4x128xf32>
    %76 = arith.truncf %75 : vector<4x4x128xf32> to vector<4x4x128xbf16>
    %c0_79 = arith.constant 0 : index
    %c0_80 = arith.constant 0 : index
    %c0_81 = arith.constant 0 : index
    %c0_82 = arith.constant 0 : index
    %77 = vector.load %arg5[%c0_79, %c0_80, %c0_81, %c0_82] : memref<1x4x4x128xbf16, #tpu.memory_space<vmem>>, vector<1x4x4x128xbf16>
    %78 = vector.shape_cast %77 : vector<1x4x4x128xbf16> to vector<4x4x128xbf16>
    %79 = vector.shape_cast %76 : vector<4x4x128xbf16> to vector<1x4x4x128xbf16>
    tpu.vector_store %arg5[%c0_79, %c0_80, %c0_81, %c0_82], %79 {strides = array<i32>} : memref<1x4x4x128xbf16, #tpu.memory_space<vmem>>, vector<1x4x4x128xbf16>,
    return
  }
  func.func @transform_0(%arg0: i32) -> (i32, i32, i32, i32) {
    %c0_i32 = arith.constant 0 : i32
    %c0_i32_0 = arith.constant 0 : i32
    %c0_i32_1 = arith.constant 0 : i32
    %c0_i32_2 = arith.constant 0 : i32
    return %arg0, %c0_i32, %c0_i32_0, %c0_i32_1 : i32, i32, i32, i32
  }
  func.func @transform_1(%arg0: i32) -> (i32, i32, i32) {
    %c0_i32 = arith.constant 0 : i32
    %c0_i32_0 = arith.constant 0 : i32
    %c0_i32_1 = arith.constant 0 : i32
    %c0_i32_2 = arith.constant 0 : i32
    return %c0_i32, %c0_i32_0, %c0_i32_1 : i32, i32, i32
  }
  func.func @transform_2(%arg0: i32) -> (i32, i32) {
    %c0_i32 = arith.constant 0 : i32
    %c0_i32_0 = arith.constant 0 : i32
    %c0_i32_1 = arith.constant 0 : i32
    return %c0_i32, %c0_i32_0 : i32, i32
  }
  func.func @transform_3(%arg0: i32) -> (i32, i32) {
    %c0_i32 = arith.constant 0 : i32
    %c0_i32_0 = arith.constant 0 : i32
    %c0_i32_1 = arith.constant 0 : i32
    return %c0_i32, %c0_i32_0 : i32, i32
  }
  func.func @transform_4(%arg0: i32) -> (i32, i32, i32, i32) {
    %c0_i32 = arith.constant 0 : i32
    %c0_i32_0 = arith.constant 0 : i32
    %c0_i32_1 = arith.constant 0 : i32
    %c0_i32_2 = arith.constant 0 : i32
    return %arg0, %c0_i32, %c0_i32_0, %c0_i32_1 : i32, i32, i32, i32
  }
}

module attributes {stable_mosaic.version = 11 : i64} {
  func.func @_conv_bn_relu_kernel(%arg0: i32, %arg1: memref<1x8x8x128xbf16, #tpu.memory_space<vmem>>, %arg2: memref<9x128x128xbf16, #tpu.memory_space<vmem>>, %arg3: memref<1x128xf32, #tpu.memory_space<vmem>>, %arg4: memref<1x128xf32, #tpu.memory_space<vmem>>, %arg5: memref<1x8x8x128xbf16, #tpu.memory_space<vmem>>, %arg6: memref<10x10x128xbf16, #tpu.memory_space<vmem>>) attributes {dimension_semantics = [#tpu.dimension_semantics<parallel>], iteration_bounds = array<i64: 2>, scalar_prefetch = 0 : i64, scratch_operands = 1 : i64, tpu.core_type = #tpu.core_type<tc>, window_params = [{transform_indices = @transform_0, window_bounds = array<i64: 1, 8, 8, 128>}, {pipeline_mode = #tpu.pipeline_mode<synchronous>, transform_indices = @transform_1, window_bounds = array<i64: 9, 128, 128>}, {pipeline_mode = #tpu.pipeline_mode<synchronous>, transform_indices = @transform_2, window_bounds = array<i64: 1, 128>}, {pipeline_mode = #tpu.pipeline_mode<synchronous>, transform_indices = @transform_3, window_bounds = array<i64: 1, 128>}, {transform_indices = @transform_4, window_bounds = array<i64: 1, 8, 8, 128>}]} {
    %cst = arith.constant 0.000000e+00 : bf16
    %0 = vector.broadcast %cst : bf16 to vector<10x10x128xbf16>
    %c0 = arith.constant 0 : index
    %c0_0 = arith.constant 0 : index
    %c0_1 = arith.constant 0 : index
    %1 = vector.load %arg6[%c0, %c0_0, %c0_1] : memref<10x10x128xbf16, #tpu.memory_space<vmem>>, vector<10x10x128xbf16>
    tpu.vector_store %arg6[%c0, %c0_0, %c0_1], %0 {strides = array<i32>} : memref<10x10x128xbf16, #tpu.memory_space<vmem>>, vector<10x10x128xbf16>,
    %c0_2 = arith.constant 0 : index
    %c0_3 = arith.constant 0 : index
    %c0_4 = arith.constant 0 : index
    %c0_5 = arith.constant 0 : index
    %2 = vector.load %arg1[%c0_2, %c0_3, %c0_4, %c0_5] : memref<1x8x8x128xbf16, #tpu.memory_space<vmem>>, vector<1x8x8x128xbf16>
    %3 = vector.shape_cast %2 : vector<1x8x8x128xbf16> to vector<8x8x128xbf16>
    %c1 = arith.constant 1 : index
    %c1_6 = arith.constant 1 : index
    %c0_7 = arith.constant 0 : index
    %4 = vector.load %arg6[%c1, %c1_6, %c0_7] : memref<10x10x128xbf16, #tpu.memory_space<vmem>>, vector<8x8x128xbf16>
    tpu.vector_store %arg6[%c1, %c1_6, %c0_7], %3 {strides = array<i32>} : memref<10x10x128xbf16, #tpu.memory_space<vmem>>, vector<8x8x128xbf16>,
    %cst_8 = arith.constant 0.000000e+00 : f32
    %5 = vector.broadcast %cst_8 : f32 to vector<64x128xf32>
    %c0_9 = arith.constant 0 : index
    %c0_10 = arith.constant 0 : index
    %c0_11 = arith.constant 0 : index
    %6 = vector.load %arg6[%c0_9, %c0_10, %c0_11] : memref<10x10x128xbf16, #tpu.memory_space<vmem>>, vector<8x8x128xbf16>
    %7 = vector.shape_cast %6 : vector<8x8x128xbf16> to vector<64x128xbf16>
    %c0_12 = arith.constant 0 : index
    %c0_13 = arith.constant 0 : index
    %c0_14 = arith.constant 0 : index
    %8 = vector.load %arg2[%c0_12, %c0_13, %c0_14] : memref<9x128x128xbf16, #tpu.memory_space<vmem>>, vector<1x128x128xbf16>
    %9 = vector.shape_cast %8 : vector<1x128x128xbf16> to vector<128x128xbf16>
    %cst_15 = arith.constant dense<0.000000e+00> : vector<64x128xf32>
    %10 = tpu.matmul %7, %9, %cst_15 {dimension_numbers = #tpu.dot_dimension_numbers<[1], [0], [0], [1], [0, 0, 1, 1], [], []>} : vector<64x128xbf16>, vector<128x128xbf16>, vector<64x128xf32> -> vector<64x128xf32>
    %11 = arith.addf %5, %10 : vector<64x128xf32>
    %c0_16 = arith.constant 0 : index
    %c1_17 = arith.constant 1 : index
    %c0_18 = arith.constant 0 : index
    %12 = vector.load %arg6[%c0_16, %c1_17, %c0_18] : memref<10x10x128xbf16, #tpu.memory_space<vmem>>, vector<8x8x128xbf16>
    %13 = vector.shape_cast %12 : vector<8x8x128xbf16> to vector<64x128xbf16>
    %c1_19 = arith.constant 1 : index
    %c0_20 = arith.constant 0 : index
    %c0_21 = arith.constant 0 : index
    %14 = vector.load %arg2[%c1_19, %c0_20, %c0_21] : memref<9x128x128xbf16, #tpu.memory_space<vmem>>, vector<1x128x128xbf16>
    %15 = vector.shape_cast %14 : vector<1x128x128xbf16> to vector<128x128xbf16>
    %cst_22 = arith.constant dense<0.000000e+00> : vector<64x128xf32>
    %16 = tpu.matmul %13, %15, %cst_22 {dimension_numbers = #tpu.dot_dimension_numbers<[1], [0], [0], [1], [0, 0, 1, 1], [], []>} : vector<64x128xbf16>, vector<128x128xbf16>, vector<64x128xf32> -> vector<64x128xf32>
    %17 = arith.addf %11, %16 : vector<64x128xf32>
    %c0_23 = arith.constant 0 : index
    %c2 = arith.constant 2 : index
    %c0_24 = arith.constant 0 : index
    %18 = vector.load %arg6[%c0_23, %c2, %c0_24] : memref<10x10x128xbf16, #tpu.memory_space<vmem>>, vector<8x8x128xbf16>
    %19 = vector.shape_cast %18 : vector<8x8x128xbf16> to vector<64x128xbf16>
    %c2_25 = arith.constant 2 : index
    %c0_26 = arith.constant 0 : index
    %c0_27 = arith.constant 0 : index
    %20 = vector.load %arg2[%c2_25, %c0_26, %c0_27] : memref<9x128x128xbf16, #tpu.memory_space<vmem>>, vector<1x128x128xbf16>
    %21 = vector.shape_cast %20 : vector<1x128x128xbf16> to vector<128x128xbf16>
    %cst_28 = arith.constant dense<0.000000e+00> : vector<64x128xf32>
    %22 = tpu.matmul %19, %21, %cst_28 {dimension_numbers = #tpu.dot_dimension_numbers<[1], [0], [0], [1], [0, 0, 1, 1], [], []>} : vector<64x128xbf16>, vector<128x128xbf16>, vector<64x128xf32> -> vector<64x128xf32>
    %23 = arith.addf %17, %22 : vector<64x128xf32>
    %c1_29 = arith.constant 1 : index
    %c0_30 = arith.constant 0 : index
    %c0_31 = arith.constant 0 : index
    %24 = vector.load %arg6[%c1_29, %c0_30, %c0_31] : memref<10x10x128xbf16, #tpu.memory_space<vmem>>, vector<8x8x128xbf16>
    %25 = vector.shape_cast %24 : vector<8x8x128xbf16> to vector<64x128xbf16>
    %c3 = arith.constant 3 : index
    %c0_32 = arith.constant 0 : index
    %c0_33 = arith.constant 0 : index
    %26 = vector.load %arg2[%c3, %c0_32, %c0_33] : memref<9x128x128xbf16, #tpu.memory_space<vmem>>, vector<1x128x128xbf16>
    %27 = vector.shape_cast %26 : vector<1x128x128xbf16> to vector<128x128xbf16>
    %cst_34 = arith.constant dense<0.000000e+00> : vector<64x128xf32>
    %28 = tpu.matmul %25, %27, %cst_34 {dimension_numbers = #tpu.dot_dimension_numbers<[1], [0], [0], [1], [0, 0, 1, 1], [], []>} : vector<64x128xbf16>, vector<128x128xbf16>, vector<64x128xf32> -> vector<64x128xf32>
    %29 = arith.addf %23, %28 : vector<64x128xf32>
    %c1_35 = arith.constant 1 : index
    %c1_36 = arith.constant 1 : index
    %c0_37 = arith.constant 0 : index
    %30 = vector.load %arg6[%c1_35, %c1_36, %c0_37] : memref<10x10x128xbf16, #tpu.memory_space<vmem>>, vector<8x8x128xbf16>
    %31 = vector.shape_cast %30 : vector<8x8x128xbf16> to vector<64x128xbf16>
    %c4 = arith.constant 4 : index
    %c0_38 = arith.constant 0 : index
    %c0_39 = arith.constant 0 : index
    %32 = vector.load %arg2[%c4, %c0_38, %c0_39] : memref<9x128x128xbf16, #tpu.memory_space<vmem>>, vector<1x128x128xbf16>
    %33 = vector.shape_cast %32 : vector<1x128x128xbf16> to vector<128x128xbf16>
    %cst_40 = arith.constant dense<0.000000e+00> : vector<64x128xf32>
    %34 = tpu.matmul %31, %33, %cst_40 {dimension_numbers = #tpu.dot_dimension_numbers<[1], [0], [0], [1], [0, 0, 1, 1], [], []>} : vector<64x128xbf16>, vector<128x128xbf16>, vector<64x128xf32> -> vector<64x128xf32>
    %35 = arith.addf %29, %34 : vector<64x128xf32>
    %c1_41 = arith.constant 1 : index
    %c2_42 = arith.constant 2 : index
    %c0_43 = arith.constant 0 : index
    %36 = vector.load %arg6[%c1_41, %c2_42, %c0_43] : memref<10x10x128xbf16, #tpu.memory_space<vmem>>, vector<8x8x128xbf16>
    %37 = vector.shape_cast %36 : vector<8x8x128xbf16> to vector<64x128xbf16>
    %c5 = arith.constant 5 : index
    %c0_44 = arith.constant 0 : index
    %c0_45 = arith.constant 0 : index
    %38 = vector.load %arg2[%c5, %c0_44, %c0_45] : memref<9x128x128xbf16, #tpu.memory_space<vmem>>, vector<1x128x128xbf16>
    %39 = vector.shape_cast %38 : vector<1x128x128xbf16> to vector<128x128xbf16>
    %cst_46 = arith.constant dense<0.000000e+00> : vector<64x128xf32>
    %40 = tpu.matmul %37, %39, %cst_46 {dimension_numbers = #tpu.dot_dimension_numbers<[1], [0], [0], [1], [0, 0, 1, 1], [], []>} : vector<64x128xbf16>, vector<128x128xbf16>, vector<64x128xf32> -> vector<64x128xf32>
    %41 = arith.addf %35, %40 : vector<64x128xf32>
    %c2_47 = arith.constant 2 : index
    %c0_48 = arith.constant 0 : index
    %c0_49 = arith.constant 0 : index
    %42 = vector.load %arg6[%c2_47, %c0_48, %c0_49] : memref<10x10x128xbf16, #tpu.memory_space<vmem>>, vector<8x8x128xbf16>
    %43 = vector.shape_cast %42 : vector<8x8x128xbf16> to vector<64x128xbf16>
    %c6 = arith.constant 6 : index
    %c0_50 = arith.constant 0 : index
    %c0_51 = arith.constant 0 : index
    %44 = vector.load %arg2[%c6, %c0_50, %c0_51] : memref<9x128x128xbf16, #tpu.memory_space<vmem>>, vector<1x128x128xbf16>
    %45 = vector.shape_cast %44 : vector<1x128x128xbf16> to vector<128x128xbf16>
    %cst_52 = arith.constant dense<0.000000e+00> : vector<64x128xf32>
    %46 = tpu.matmul %43, %45, %cst_52 {dimension_numbers = #tpu.dot_dimension_numbers<[1], [0], [0], [1], [0, 0, 1, 1], [], []>} : vector<64x128xbf16>, vector<128x128xbf16>, vector<64x128xf32> -> vector<64x128xf32>
    %47 = arith.addf %41, %46 : vector<64x128xf32>
    %c2_53 = arith.constant 2 : index
    %c1_54 = arith.constant 1 : index
    %c0_55 = arith.constant 0 : index
    %48 = vector.load %arg6[%c2_53, %c1_54, %c0_55] : memref<10x10x128xbf16, #tpu.memory_space<vmem>>, vector<8x8x128xbf16>
    %49 = vector.shape_cast %48 : vector<8x8x128xbf16> to vector<64x128xbf16>
    %c7 = arith.constant 7 : index
    %c0_56 = arith.constant 0 : index
    %c0_57 = arith.constant 0 : index
    %50 = vector.load %arg2[%c7, %c0_56, %c0_57] : memref<9x128x128xbf16, #tpu.memory_space<vmem>>, vector<1x128x128xbf16>
    %51 = vector.shape_cast %50 : vector<1x128x128xbf16> to vector<128x128xbf16>
    %cst_58 = arith.constant dense<0.000000e+00> : vector<64x128xf32>
    %52 = tpu.matmul %49, %51, %cst_58 {dimension_numbers = #tpu.dot_dimension_numbers<[1], [0], [0], [1], [0, 0, 1, 1], [], []>} : vector<64x128xbf16>, vector<128x128xbf16>, vector<64x128xf32> -> vector<64x128xf32>
    %53 = arith.addf %47, %52 : vector<64x128xf32>
    %c2_59 = arith.constant 2 : index
    %c2_60 = arith.constant 2 : index
    %c0_61 = arith.constant 0 : index
    %54 = vector.load %arg6[%c2_59, %c2_60, %c0_61] : memref<10x10x128xbf16, #tpu.memory_space<vmem>>, vector<8x8x128xbf16>
    %55 = vector.shape_cast %54 : vector<8x8x128xbf16> to vector<64x128xbf16>
    %c8 = arith.constant 8 : index
    %c0_62 = arith.constant 0 : index
    %c0_63 = arith.constant 0 : index
    %56 = vector.load %arg2[%c8, %c0_62, %c0_63] : memref<9x128x128xbf16, #tpu.memory_space<vmem>>, vector<1x128x128xbf16>
    %57 = vector.shape_cast %56 : vector<1x128x128xbf16> to vector<128x128xbf16>
    %cst_64 = arith.constant dense<0.000000e+00> : vector<64x128xf32>
    %58 = tpu.matmul %55, %57, %cst_64 {dimension_numbers = #tpu.dot_dimension_numbers<[1], [0], [0], [1], [0, 0, 1, 1], [], []>} : vector<64x128xbf16>, vector<128x128xbf16>, vector<64x128xf32> -> vector<64x128xf32>
    %59 = arith.addf %53, %58 : vector<64x128xf32>
    %c0_65 = arith.constant 0 : index
    %c0_66 = arith.constant 0 : index
    %60 = vector.load %arg3[%c0_65, %c0_66] : memref<1x128xf32, #tpu.memory_space<vmem>>, vector<1x128xf32>
    %61 = vector.broadcast %60 : vector<1x128xf32> to vector<64x128xf32>
    %62 = arith.mulf %59, %61 : vector<64x128xf32>
    %c0_67 = arith.constant 0 : index
    %c0_68 = arith.constant 0 : index
    %63 = vector.load %arg4[%c0_67, %c0_68] : memref<1x128xf32, #tpu.memory_space<vmem>>, vector<1x128xf32>
    %64 = vector.broadcast %63 : vector<1x128xf32> to vector<64x128xf32>
    %65 = arith.addf %62, %64 : vector<64x128xf32>
    %cst_69 = arith.constant 0.000000e+00 : f32
    %66 = vector.broadcast %cst_69 : f32 to vector<64x128xf32>
    %67 = arith.maximumf %65, %66 : vector<64x128xf32>
    %68 = vector.shape_cast %67 : vector<64x128xf32> to vector<8x8x128xf32>
    %69 = arith.truncf %68 : vector<8x8x128xf32> to vector<8x8x128xbf16>
    %c0_70 = arith.constant 0 : index
    %c0_71 = arith.constant 0 : index
    %c0_72 = arith.constant 0 : index
    %c0_73 = arith.constant 0 : index
    %70 = vector.load %arg5[%c0_70, %c0_71, %c0_72, %c0_73] : memref<1x8x8x128xbf16, #tpu.memory_space<vmem>>, vector<1x8x8x128xbf16>
    %71 = vector.shape_cast %70 : vector<1x8x8x128xbf16> to vector<8x8x128xbf16>
    %72 = vector.shape_cast %69 : vector<8x8x128xbf16> to vector<1x8x8x128xbf16>
    tpu.vector_store %arg5[%c0_70, %c0_71, %c0_72, %c0_73], %72 {strides = array<i32>} : memref<1x8x8x128xbf16, #tpu.memory_space<vmem>>, vector<1x8x8x128xbf16>,
    return
  }
  func.func @transform_0(%arg0: i32) -> (i32, i32, i32, i32) {
    %c0_i32 = arith.constant 0 : i32
    %c0_i32_0 = arith.constant 0 : i32
    %c0_i32_1 = arith.constant 0 : i32
    %c0_i32_2 = arith.constant 0 : i32
    return %arg0, %c0_i32, %c0_i32_0, %c0_i32_1 : i32, i32, i32, i32
  }
  func.func @transform_1(%arg0: i32) -> (i32, i32, i32) {
    %c0_i32 = arith.constant 0 : i32
    %c0_i32_0 = arith.constant 0 : i32
    %c0_i32_1 = arith.constant 0 : i32
    %c0_i32_2 = arith.constant 0 : i32
    return %c0_i32, %c0_i32_0, %c0_i32_1 : i32, i32, i32
  }
  func.func @transform_2(%arg0: i32) -> (i32, i32) {
    %c0_i32 = arith.constant 0 : i32
    %c0_i32_0 = arith.constant 0 : i32
    %c0_i32_1 = arith.constant 0 : i32
    return %c0_i32, %c0_i32_0 : i32, i32
  }
  func.func @transform_3(%arg0: i32) -> (i32, i32) {
    %c0_i32 = arith.constant 0 : i32
    %c0_i32_0 = arith.constant 0 : i32
    %c0_i32_1 = arith.constant 0 : i32
    return %c0_i32, %c0_i32_0 : i32, i32
  }
  func.func @transform_4(%arg0: i32) -> (i32, i32, i32, i32) {
    %c0_i32 = arith.constant 0 : i32
    %c0_i32_0 = arith.constant 0 : i32
    %c0_i32_1 = arith.constant 0 : i32
    %c0_i32_2 = arith.constant 0 : i32
    return %arg0, %c0_i32, %c0_i32_0, %c0_i32_1 : i32, i32, i32, i32
  }
}

</mosaic_0001>

<bundles_post_ra>
// kernel: vgga_forward.7
= control target key start
LH: loop header
LB: loop body
LE: loop exit
PB: predicated region body
PF: predicated region fallthrough
CT: control target
= control target key end

     0   :  { %8 = vsyncpa [#allocation3], 0  ;;  %s682_s0 = inlined_call_operand.vmem [shape: bf16[2,4,4,128], index: 0, kind: input, shape index: {}]   ;;  %s683_s1 = inlined_call_operand.vmem [shape: bf16[128,128], index: 1, kind: input, shape index: {}]   ;;  %s684_s2 = inlined_call_operand.vmem [shape: f32[1,128], index: 2, kind: input, shape index: {}]   ;;  %s685_s3 = inlined_call_operand.hbm [shape: f32[2,1,128], index: 3, kind: output, shape index: {}]  }
   0x1   :  { %10 = vsyncpa [#allocation3 + $0x1], 0  ;;  %s555_s12 = smov 0   ;;  %s557_s13 = smov 0  }
   0x2   :  { %s559_s14 = smov 0   ;;  %s561_s15 = smov 0  }
   0x3 LB: > { %s576_s16 = sadd.s32 4294967295, %s530_s15   ;;  %s369_s17 = sadd.s32 4294967294, %s530_s15   ;;  %s530_s15 = sphi %s561_s15, %s691_s15   ;;  %s526_s14 = sphi %s559_s14, %s690_s14   ;;  %s522_s13 = sphi %s557_s13, %s689_s13   ;;  %s518_s12 = sphi %s555_s12, %s688_s12  }
   0x4   : > { %s580_s18 = sadd.s32 1, %s530_s15   ;;  %s91_s19 = sadd.s32 1, %s526_s14 }
   0x5   : > { %s88_s20 = ssub.s32 %s530_s15, %s580_s18  ;;  %p101_p0 = scmp.ne.s32.totalorder %s526_s14, %s522_s13 }
   0x6   : > { %p89_p1 = scmp.eq.s32.totalorder %s88_s20, 0  ;;  %p102_p2 = scmp.eq.s32.totalorder %s576_s16, 1 }
   0x7   : > { %p107_p3 = scmp.ne.s32.totalorder %s522_s13, %s518_s12  ;;  %p108_p4 = scmp.eq.s32.totalorder %s369_s17, 1 }
   0x8   : > { %s591_s21 = scalar_select %p89_p1, %s526_s14, %s91_s19  }
   0x9   : > { %p593_p5 = por %p102_p2, %p101_p0  ;;  %p597_p6 = por %p108_p4, %p107_p3 }
   0xa   : > { %p372_p7 = scmp.ge.s32.totalorder %s530_s15, 1  ;;  %p140_p8 = scmp.lt.s32.totalorder %s530_s15, 3 }
   0xc   : > { %p141_p9 = pnand %p372_p7, %p140_p8 }
   0xd   : > { %v460_v0 = vld [vmem:[%s683_s1] sm:$0xff] (!%p141_p9)   ;;  %v532_v1 = vmov (!%p141_p9), 0.0   ;;  %v461_v2 = vld [vmem:[%s683_s1 + $0x8] sm:$0xff] (!%p141_p9)   ;;  %vm533_vm0 = vmmov (!%p141_p9), 0   ;;  %p163_p10 = scmp.lt.s32.totalorder (!%p141_p9), %s576_s16, 1  ;;  %v462_v3 = vld [vmem:[%s683_s1 + $0x10] sm:$0xff] (!%p141_p9)  }
   0xe   : > { %144 = sbr.rel (%p141_p9) target bundleno = 279 (0x117), region = 32  ;;  %399 = vmatprep.subr.bf16.mxu0 (!%p141_p9), %v532_v1  ;;  %415 = vmatprep.mubr.msk.bf16.mxu0 (!%p141_p9), %vm533_vm0, %v532_v1  ;;  %v463_v8 = vld [vmem:[%s683_s1 + $0x18] sm:$0xff] (!%p141_p9)   ;;  %vm180_vm1 = vcmask (!%p141_p9), 1041408   ;;  %v464_v12 = vld [vmem:[%s683_s1 + $0x20] sm:$0xff] (!%p141_p9)   ;;  %v465_v16 = vld [vmem:[%s683_s1 + $0x28] sm:$0xff] (!%p141_p9)   ;;  %s161_s27 = sand.u32 (!%p141_p9), 1, %s522_s13  }
   0xf   : > { %400 = vmatpush3.bf16.msra.mxu0 (!%p141_p9), %v460_v0  ;;  %v466_v19 = vld [vmem:[%s683_s1 + $0x30] sm:$0xff] (!%p141_p9)   ;;  %v467_v22 = vld [vmem:[%s683_s1 + $0x38] sm:$0xff] (!%p141_p9)   ;;  %v211_v27 = vld [vmem:[%s684_s2] sm:$0x1] (!%p141_p9)  ;;  %s386_s30 = sshll.u32 (!%p141_p9), %s576_s16, 4  ;;  %s302_s9 = scalar_lea.sflag (!%p141_p9), [#allocation3], %s161_s27 }
  0x10   : > { %401 = vmatprep.subr.bf16.mxu0 (!%p141_p9), %v532_v1  ;;  %s640_s8 = scalar_lea.hbm (!%p141_p9), %s685_s3, %s386_s30  ;;  %s534_s10 = smov (!%p141_p9), [#allocation2]  }
  0x11   : > { %s472_s11 = sshll.u32 (!%p141_p9), %s534_s10, 4  ;;  %s473_s11 = int_to_ptr.vmem [resolvable:$false] %s472_s11 }
  0x12   : > { %s474_s17 = scalar_lea.vmem (!%p141_p9), %s473_s11, 32 }
  0x13   : > { %402 = vmatpush3.bf16.msra.mxu0 (!%p141_p9), %v461_v2 }
  0x14   : > { %403 = vmatprep.subr.bf16.mxu0 (!%p141_p9), %v532_v1 }
  0x15   : > { %s164_s28 = scalar_select %p163_p10, %s576_s16, 1 }
  0x17   : > { %s389_s4 = sshll.u32 %s164_s28, 3  ;;  %404 = vmatpush3.bf16.msra.mxu0 %v462_v3 }
  0x18   : > { %s167_s7 = scalar_lea.vmem %s682_s0, %s389_s4  ;;  %405 = vmatprep.subr.bf16.mxu0 %v532_v1  ;;  %s162_s4 = scalar_lea.vmem [#allocation2], %s161_s27 }
  0x19   : > { %v170_v4 = vld [vmem:[%s167_s7] sm:$0x3]  ;;  %v375_v5 = vld [vmem:[%s167_s7 + $0x2] sm:$0x3]  ;;  %v376_v6 = vld [vmem:[%s167_s7 + $0x4] sm:$0x3] }
  0x1a   : > { %v173_v7 = vmax.bf16 %v375_v5, %v170_v4  ;;  %v377_v9 = vld [vmem:[%s167_s7 + $0x6] sm:$0x3]  ;;  %s314_s5 = sshll.u32 %s162_s4, 4  ;;  %s642_s5 = int_to_ptr.vmem [resolvable:$true] %s314_s5 }
  0x1b   : > { %406 = vmatpush3.bf16.msra.mxu0 %v463_v8  ;;  %s468_s16 = scalar_lea.vmem %s642_s5, 16  ;;  %p475_p0 = scmp.lt.s32.totalorder %s642_s5, %s473_s11 }
  0x1c   : > { %v176_v10 = vmax.bf16 %v376_v6, %v173_v7  ;;  %407 = vmatprep.subr.bf16.mxu0 %v532_v1  ;;  %p469_p11 = scmp.ne.s32.totalorder %s642_s5, %s468_s16  ;;  %p476_p1 = scmp.lt.s32.totalorder %s474_s17, %s468_s16 }
  0x1e   : > { %v179_v11 = vmax.bf16 %v377_v9, %v176_v10  ;;  %p470_p12 = pnand %p469_p11, %p593_p5  ;;  %p477_p2 = por %p476_p1, %p475_p0 }
  0x1f   : > { %408 = vmatpush3.bf16.msra.mxu0 %v464_v12 }
  0x20   : > { %v183_v13 = vsel %vm180_vm1, %v179_v11, 4286644096  ;;  %409 = vmatprep.subr.bf16.mxu0 %v532_v1  ;;  %p471_p13 = pneg %p470_p12 }
  0x21   : > { %v185_v14 = vunpack.i.l.bf16 %v183_v13  ;;  %v186_v15 = vunpack.i.h.bf16 %v183_v13 }
  0x22   : > { %p478_p3 = pnand %p477_p2, %p471_p13 }
  0x23   : > { %v187_v17 = vmax.f32 %v185_v14, %v186_v15  ;;  %410 = vmatpush3.bf16.msra.mxu0 %v465_v16 }
  0x24   : > { %411 = vmatprep.subr.bf16.mxu0 %v532_v1 }
  0x25   : > { %v188_v18 = vrot.slane %v187_v17, 4 }
  0x27   : > { %v189_v20 = vmax.f32 %v187_v17, %v188_v18  ;;  %412 = vmatpush3.bf16.msra.mxu0 %v466_v19 }
  0x28   : > { %413 = vmatprep.subr.bf16.mxu0 %v532_v1 }
  0x29   : > { %v190_v21 = vrot.slane %v189_v20, 2 }
  0x2b   : > { %v191_v23 = vmax.f32 %v189_v20, %v190_v21  ;;  %414 = vmatpush3.bf16.msra.mxu0 %v467_v22 }
  0x2d   : > { %v192_v24 = vrot.slane %v191_v23, 1 }
  0x2f   : > { %v193_v25 = vmax.f32 %v191_v23, %v192_v24 }
  0x31   : > { %v194_v26 = vpack.i.bf16 %v193_v25, %v193_v25 }
  0x33   : > { %416 = vmatmul.mubr.bf16.vlgmr.msra.gmra.mrb[0].mxu0 %v194_v26 }
 0x106   : > { %v294_v28 = vpop.f32.mrb[0].mxu0 }
 0x107   : > { %v295_v29 = vadd.f32 %v294_v28, %v211_v27  ;;  %v417_v30 = vpop.f32.mrb[1].mxu0 }
 0x108   : > { %v297_v31 = vpop.f32.mrb[2].mxu0 }
 0x109   : > { %300 = vst [vmem:[%s162_s4] sm:$0x1] %v295_v29  ;;  %v418_v32 = vpop.f32.mrb[3].mxu0 }
 0x10a   : > { %481 = shalt.err (!%p478_p3)
}
 0x10b   : > { %s482_s19 = scalar_lea.hbm %s640_s8, 16  ;;  %s486_s25 = scalar_lea.hbm %s685_s3, 32 }
 0x10c   : > { %p483_p4 = scmp.ne.s32.totalorder %s640_s8, %s482_s19  ;;  %p487_p9 = scmp.lt.u32.totalorder %s640_s8, %s685_s3 }
 0x10d   : > { %p488_p10 = scmp.lt.u32.totalorder %s486_s25, %s482_s19  ;;  %p490_p12 = scmp.lt.u32.totalorder %s482_s19, %s640_s8 }
 0x10e   : > { %p484_p7 = pnand %p483_p4, %p593_p5 }
 0x10f   : > { %p489_p11 = por %p488_p10, %p487_p9 }
 0x110   : > { %p485_p8 = pneg %p484_p7 }
 0x111   : > { %p491_p13 = por %p490_p12, %p489_p11 }
 0x113   : > { %p492_p0 = pnand %p491_p13, %p485_p8 }
 0x115   : > { %495 = shalt.err (!%p492_p0)
}
 0x116   : > { %419 = dma.vmem_to_hbm [thread:$0]  (%p593_p5), %s642_s5, 16, %s640_s8, %s302_s9  }
 0x117 PF: > { %p425_p1 = scmp.ge.s32.totalorder %s530_s15, 2  ;;  %s326_s28 = sand.u32 1, %s518_s12  }
 0x118   : > { %s327_s29 = scalar_lea.sflag [#allocation3], %s326_s28 }
 0x119   : > { %p422_p2 = pnand %p425_p1, %p597_p6 }
 0x11b   : > { %513 = dma.done.wait (!%p422_p2), %s327_s29, 16  }
 0x11c   : > { %515 = vsyncadd (!%p422_p2), %s327_s29, 4294967280  ;;  %p13_p3 = scmp.ge.s32.totalorder %s580_s18, 4   ;;  %s688_s12 = smov %s522_s13 }
 0x11d   : > { %s689_s13 = smov %s526_s14  ;;  %s690_s14 = smov %s591_s21 }
 0x11e   : > { %s691_s15 = smov %s580_s18  ;;  %15 = sbr.rel (!%p13_p3) target bundleno = 3 (0x3), region = 70 }
 0x125   :  { %331 = vsyncpa [#allocation3], 1 }
 0x126   :  { %333 = vsyncpa [#allocation3 + $0x1], 1 }

// kernel: vgga_forward.6
= control target key start
LH: loop header
LB: loop body
LE: loop exit
PB: predicated region body
PF: predicated region fallthrough
CT: control target
= control target key end

     0   :  { %s3264_s15 = smov 0   ;;  %s3857_s0 = inlined_call_operand.vmem [shape: bf16[2,8,8,128], index: 0, kind: input, shape index: {}]   ;;  %s3858_s1 = inlined_call_operand.vmem [shape: bf16[9,128,128], index: 1, kind: input, shape index: {}]   ;;  %s3859_s2 = inlined_call_operand.vmem [shape: f32[1,128], index: 2, kind: input, shape index: {}]   ;;  %s3860_s3 = inlined_call_operand.vmem [shape: f32[1,128], index: 3, kind: input, shape index: {}]   ;;  %s3861_s4 = inlined_call_operand.vmem [shape: bf16[2,4,4,128], index: 4, kind: output, shape index: {}]  }
   0x1 LB: > { %s2458_s16 = sadd.s32 4294967295, %s3236_s15   ;;  %p2462_p0 = scmp.ge.s32.totalorder %s3236_s15, 1  ;;  %s3236_s15 = sphi %s3264_s15, %s14_s15  }
   0x2   : > { %p162_p1 = scmp.lt.s32.totalorder %s3236_s15, 3 }
   0x4   : > { %p163_p2 = pnand %p2462_p0, %p162_p1 }
   0x5   : > { %v3146_v0 = vld [vmem:[%s3858_s1 + $0x40] sm:$0xff] (!%p163_p2)   ;;  %v3148_v2 = vld [vmem:[%s3858_s1 + $0x48] sm:$0xff] (!%p163_p2)   ;;  %p3283_p3 = scmp.lt.s32.totalorder (!%p163_p2), %s2458_s16, 1  ;;  %v3238_v3 = vmov (!%p163_p2), 0   ;;  %v3150_v5 = vld [vmem:[%s3858_s1 + $0x50] sm:$0xff] (!%p163_p2)   ;;  %vm308_vm0 = vcmask (!%p163_p2), 1043456  }
   0x6   : > { %166 = sbr.rel (%p163_p2) target bundleno = 433 (0x1b1), region = 36  ;;  %v3147_v1 = vld [vmem:[%s3858_s1 + $0x100] sm:$0xff] (!%p163_p2)   ;;  %2841 = vmatprep.subr.bf16.mxu1 (!%p163_p2), %v3146_v0  ;;  %199 = vst [vmem:[#allocation2] sm:$0xf] (!%p163_p2), %v3238_v3  ;;  %200 = vst [vmem:[#allocation2 + $0x4] sm:$0x1] (!%p163_p2), %v3238_v3 }
   0x7   : > { %201 = vst [vmem:[#allocation2 + $0x8] sm:$0xf] (!%p163_p2), %v3238_v3  ;;  %202 = vst [vmem:[#allocation2 + $0xc] sm:$0x1] (!%p163_p2), %v3238_v3  ;;  %2937 = vmatprep.subr.bf16.mxu0 (!%p163_p2), %v3147_v1  ;;  %2842 = vmatpush3.bf16.msra.mxu1 (!%p163_p2), %v3146_v0  ;;  %v3149_v4 = vld [vmem:[%s3858_s1 + $0x108] sm:$0xff] (!%p163_p2)   ;;  %v3151_v6 = vld [vmem:[%s3858_s1 + $0x110] sm:$0xff] (!%p163_p2)  }
   0x8   : > { %203 = vst [vmem:[#allocation2 + $0x10] sm:$0xf] (!%p163_p2), %v3238_v3  ;;  %204 = vst [vmem:[#allocation2 + $0x14] sm:$0x1] (!%p163_p2), %v3238_v3  ;;  %2938 = vmatpush3.bf16.msra.mxu0 (!%p163_p2), %v3147_v1  ;;  %2843 = vmatprep.subr.bf16.mxu1 (!%p163_p2), %v3148_v2  ;;  %v3152_v7 = vld [vmem:[%s3858_s1 + $0x58] sm:$0xff] (!%p163_p2)   ;;  %v3154_v9 = vld [vmem:[%s3858_s1 + $0x60] sm:$0xff] (!%p163_p2)  }
   0x9   : > { %205 = vst [vmem:[#allocation2 + $0x18] sm:$0xf] (!%p163_p2), %v3238_v3  ;;  %206 = vst [vmem:[#allocation2 + $0x1c] sm:$0x1] (!%p163_p2), %v3238_v3  ;;  %2939 = vmatprep.subr.bf16.mxu0 (!%p163_p2), %v3149_v4  ;;  %v3153_v8 = vld [vmem:[%s3858_s1 + $0x118] sm:$0xff] (!%p163_p2)   ;;  %v3155_v10 = vld [vmem:[%s3858_s1 + $0x120] sm:$0xff] (!%p163_p2)  }
   0xa   : > { %207 = vst [vmem:[#allocation2 + $0x20] sm:$0xf] (!%p163_p2), %v3238_v3  ;;  %208 = vst [vmem:[#allocation2 + $0x24] sm:$0x1] (!%p163_p2), %v3238_v3  ;;  %v3156_v11 = vld [vmem:[%s3858_s1 + $0x68] sm:$0xff] (!%p163_p2)   ;;  %vm314_vm2 = vcmask (!%p163_p2), 1040384  }
   0xb   : > { %209 = vst [vmem:[#allocation2 + $0x28] sm:$0xf] (!%p163_p2), %v3238_v3  ;;  %210 = vst [vmem:[#allocation2 + $0x2c] sm:$0x1] (!%p163_p2), %v3238_v3  ;;  %2844 = vmatpush3.bf16.msra.mxu1 (!%p163_p2), %v3148_v2  ;;  %vm309_vm1 = vsmask.f32 (!%p163_p2), 7938 }
   0xc   : > { %211 = vst [vmem:[#allocation2 + $0x30] sm:$0xf] (!%p163_p2), %v3238_v3  ;;  %212 = vst [vmem:[#allocation2 + $0x34] sm:$0x1] (!%p163_p2), %v3238_v3  ;;  %2940 = vmatpush3.bf16.msra.mxu0 (!%p163_p2), %v3149_v4  ;;  %2845 = vmatprep.subr.bf16.mxu1 (!%p163_p2), %v3150_v5  ;;  %v3157_v13 = vld [vmem:[%s3858_s1 + $0x128] sm:$0xff] (!%p163_p2)   ;;  %v3158_v16 = vld [vmem:[%s3858_s1 + $0x70] sm:$0xff] (!%p163_p2)  }
   0xd   : > { %213 = vst [vmem:[#allocation2 + $0x38] sm:$0xf] %v3238_v3  ;;  %214 = vst [vmem:[#allocation2 + $0x3c] sm:$0x1] %v3238_v3  ;;  %s3872_s16 = smov (!%p3283_p3, %s2458_s16), 1  ;;  %2941 = vmatprep.subr.bf16.mxu0 %v3151_v6  ;;  %v3159_v26 = vld [vmem:[%s3858_s1 + $0x130] sm:$0xff]  }
   0xe   : > { %215 = vst [vmem:[#allocation2 + $0x40] sm:$0xf] %v3238_v3  ;;  %216 = vst [vmem:[#allocation2 + $0x44] sm:$0x1] %v3238_v3  ;;  %s2731_s8 = sshll.u32 %s3872_s16, 5  ;;  %v3160_v32 = vld [vmem:[%s3858_s1 + $0x78] sm:$0xff]  }
   0xf   : > { %217 = vst [vmem:[#allocation2 + $0x48] sm:$0xf] %v3238_v3  ;;  %218 = vst [vmem:[#allocation2 + $0x4c] sm:$0x1] %v3238_v3  ;;  %2846 = vmatpush3.bf16.msra.mxu1 %v3150_v5  ;;  %s3318_s17 = scalar_lea.vmem %s3857_s0, %s2731_s8  ;;  %vm315_vm3 = vsmask.f32 256 }
  0x10   : > { %2942 = vmatpush3.bf16.msra.mxu0 %v3151_v6  ;;  %2847 = vmatprep.subr.bf16.mxu1 %v3152_v7  ;;  %v219_v12 = vld [vmem:[%s3318_s17] sm:$0xf]  ;;  %v311_v17 = vld [vmem:[#allocation2 + $0x8] sm:$0xf]  ;;  %vm3332_vm4 = vmand %vm308_vm0, %vm309_vm1  ;;  %vm394_vm6 = vsmask.f32 3328 }
  0x11   : > { %2943 = vmatprep.subr.bf16.mxu0 %v3153_v8  ;;  %v228_v14 = vshrl.u32 %v219_v12, 16  ;;  %v231_v15 = vshll.u32 %v219_v12, 16  ;;  %v3330_v18 = vld [vmem:[#allocation2] sm:$0xf]  ;;  %v317_v21 = vld [vmem:[#allocation2 + $0xc] sm:$0x1]  ;;  %vm3338_vm5 = vmand %vm314_vm2, %vm315_vm3 }
  0x12   : > { %v3336_v22 = vld [vmem:[#allocation2 + $0x4] sm:$0x1]  ;;  %v398_v24 = vshrl.u32 %v3330_v18, 16  ;;  %v401_v25 = vshll.u32 %v3330_v18, 16  ;;  %v3161_v36 = vld [vmem:[%s3858_s1 + $0x138] sm:$0xff]   ;;  %v3172_v23 = vld [vmem:[%s3858_s1 + $0x28] sm:$0xff]  }
  0x13   : > { %2848 = vmatpush3.bf16.msra.mxu1 %v3152_v7  ;;  %v230_v19 = vrot.slane %v228_v14, 7  ;;  %v220_v29 = vld [vmem:[%s3318_s17 + $0x4] sm:$0xf]  ;;  %v407_v35 = vshll.u32 %v3336_v22, 16  ;;  %vm395_vm7 = vsmask.f32 7440 }
  0x14   : > { %2944 = vmatpush3.bf16.msra.mxu0 %v3153_v8  ;;  %2849 = vmatprep.subr.bf16.mxu1 %v3154_v9  ;;  %v236_v30 = vshrl.u32 %v220_v29, 16  ;;  %v239_v31 = vshll.u32 %v220_v29, 16  ;;  %v400_v37 = vrot.slane %v398_v24, 4  ;;  %v403_v38 = vrot.slane %v401_v25, 5  ;;  %v221_v40 = vld [vmem:[%s3318_s17 + $0x8] sm:$0xf]  ;;  %vm3395_vm8 = vmor %vm394_vm6, %vm395_vm7 }
  0x15   : > { %2945 = vmatprep.subr.bf16.mxu0 %v3155_v10  ;;  %v233_v27 = vor.u32 %v231_v15, %v230_v19  ;;  %v234_v28 = vrot.slane %v230_v19, 4  ;;  %v320_v41 = vld [vmem:[#allocation2 + $0x10] sm:$0xf]  ;;  %v323_v42 = vld [vmem:[#allocation2 + $0x14] sm:$0x1]  ;;  %v244_v43 = vshrl.u32 %v221_v40, 16 }
  0x16   : > { %v238_v39 = vrot.slane %v236_v30, 7  ;;  %v247_v44 = vshll.u32 %v221_v40, 16  ;;  %v3363_v45 = vld [vmem:[%s3858_s1] sm:$0xff]   ;;  %v326_v48 = vld [vmem:[#allocation2 + $0x18] sm:$0xf]  ;;  %v3366_v50 = vrot.slane %v407_v35, 5  ;;  %v404_v56 = vor.u32 %v403_v38, %v400_v37 }
  0x17   : > { %2850 = vmatpush3.bf16.msra.mxu1 %v3154_v9  ;;  %v312_v33 = vsel %vm3332_vm4, %v233_v27, %v311_v17  ;;  %v318_v34 = vsel %vm3338_vm5, %v234_v28, %v317_v21  ;;  %v222_v49 = vld [vmem:[%s3318_s17 + $0xc] sm:$0xf]  ;;  %v3371_v51 = vld [vmem:[%s3858_s1 + $0x140] sm:$0xff]   ;;  %v246_v52 = vrot.slane %v244_v43, 7  ;;  %v329_v53 = vld [vmem:[#allocation2 + $0x1c] sm:$0x1] }
  0x18   : > { %2946 = vmatpush3.bf16.msra.mxu0 %v3155_v10  ;;  %2851 = vmatprep.subr.bf16.mxu1 %v3156_v11  ;;  %313 = vst [vmem:[#allocation2 + $0x8] sm:$0xf] %v312_v33  ;;  %319 = vst [vmem:[#allocation2 + $0xc] sm:$0x1] %v318_v34  ;;  %v241_v46 = vor.u32 %v239_v31, %v238_v39  ;;  %v242_v47 = vrot.slane %v238_v39, 4  ;;  %v252_v54 = vshrl.u32 %v222_v49, 16 }
  0x19   : > { %2947 = vmatprep.subr.bf16.mxu0 %v3157_v13  ;;  %v255_v55 = vshll.u32 %v222_v49, 16  ;;  %v249_v59 = vor.u32 %v247_v44, %v246_v52  ;;  %v250_v60 = vrot.slane %v246_v52, 4  ;;  %v332_v62 = vld [vmem:[#allocation2 + $0x20] sm:$0xf]  ;;  %v405_v5 = vrot.slane %v404_v56, 4  ;;  %s2732_s26 = sshll.u32 %s3872_s16, 3 }
  0x1a   : > { %v321_v57 = vsel %vm3332_vm4, %v241_v46, %v320_v41  ;;  %v324_v58 = vsel %vm3338_vm5, %v242_v47, %v323_v42  ;;  %v254_v61 = vrot.slane %v252_v54, 7  ;;  %v335_v12 = vld [vmem:[#allocation2 + $0x24] sm:$0x1]  ;;  %vm816_vm9 = vcmask 1042432   ;;  %s197_s29 = scalar_lea.vmem %s3861_s4, %s2732_s26 }
  0x1b   : > { %2852 = vmatpush3.bf16.msra.mxu1 %v3156_v11  ;;  %322 = vst [vmem:[#allocation2 + $0x10] sm:$0xf] %v321_v57  ;;  %325 = vst [vmem:[#allocation2 + $0x14] sm:$0x1] %v324_v58  ;;  %v327_v2 = vsel %vm3332_vm4, %v249_v59, %v326_v48  ;;  %v330_v3 = vsel %vm3338_vm5, %v250_v60, %v329_v53  ;;  %v3171_v20 = vld [vmem:[%s3858_s1 + $0x160] sm:$0xff]   ;;  %vm817_vm10 = vcmask 1046532  }
  0x1c   : > { %2948 = vmatpush3.bf16.msra.mxu0 %v3157_v13  ;;  %2853 = vmatprep.subr.bf16.mxu1 %v3158_v16  ;;  %v257_v4 = vor.u32 %v255_v55, %v254_v61  ;;  %328 = vst [vmem:[#allocation2 + $0x18] sm:$0xf] %v327_v2  ;;  %331 = vst [vmem:[#allocation2 + $0x1c] sm:$0x1] %v330_v3  ;;  %v3226_v17 = vld [vmem:[%s3858_s1 + $0x220] sm:$0xff]  }
  0x1d   : > { %2949 = vmatprep.subr.bf16.mxu0 %v3159_v26  ;;  %vm3581_vm11 = vmor %vm816_vm9, %vm817_vm10 }
  0x1e   : > { %v333_v25 = vsel %vm3332_vm4, %v257_v4, %v332_v62 }
  0x1f   : > { %2854 = vmatpush3.bf16.msra.mxu1 %v3158_v16  ;;  %v3377_v63 = vld [vmem:[#allocation2 + $0x8] sm:$0xf]  ;;  %v3379_v0 = vld [vmem:[#allocation2 + $0xc] sm:$0x1]  ;;  %v258_v16 = vrot.slane %v254_v61, 4 }
  0x20   : > { %2950 = vmatpush3.bf16.msra.mxu0 %v3159_v26  ;;  %2855 = vmatprep.subr.bf16.mxu1 %v3160_v32  ;;  %v1175_v1 = vld [vmem:[#allocation2 + $0x8] sm:$0xf]  ;;  %v412_v6 = vshrl.u32 %v3377_v63, 16  ;;  %v415_v7 = vshll.u32 %v3377_v63, 16  ;;  %v421_v8 = vshll.u32 %v3379_v0, 16 }
  0x21   : > { %2951 = vmatprep.subr.bf16.mxu0 %v3161_v36  ;;  %v3389_v9 = vld [vmem:[#allocation2 + $0xc] sm:$0x1]  ;;  %v1192_v10 = vshrl.u32 %v1175_v1, 16  ;;  %v1195_v11 = vshll.u32 %v1175_v1, 16  ;;  %334 = vst [vmem:[#allocation2 + $0x20] sm:$0xf] %v333_v25  ;;  %v336_v30 = vsel %vm3338_vm5, %v258_v16, %v335_v12 }
  0x22   : > { %v414_v13 = vrot.slane %v412_v6, 4  ;;  %v417_v14 = vrot.slane %v415_v7, 5  ;;  %v1201_v15 = vshll.u32 %v3389_v9, 16  ;;  %v423_v19 = vrot.slane %v421_v8, 5  ;;  %v1177_v27 = vld [vmem:[#allocation2 + $0x10] sm:$0xf] }
  0x23   : > { %2856 = vmatpush3.bf16.msra.mxu1 %v3160_v32  ;;  %v1194_v21 = vrot.slane %v1192_v10, 4  ;;  %v1197_v24 = vrot.slane %v1195_v11, 5  ;;  %v3401_v28 = vld [vmem:[#allocation2 + $0x14] sm:$0x1]  ;;  %v3403_v29 = vld [vmem:[#allocation2 + $0x10] sm:$0xf] }
  0x24   : > { %2952 = vmatpush3.bf16.msra.mxu0 %v3161_v36  ;;  %2865 = vmatprep.subr.bf16.mxu1 %v3363_v45  ;;  %v418_v26 = vor.u32 %v417_v14, %v414_v13  ;;  %v1206_v32 = vshrl.u32 %v1177_v27, 16  ;;  %v1209_v33 = vshll.u32 %v1177_v27, 16  ;;  %v1215_v34 = vshll.u32 %v3401_v28, 16  ;;  %v3408_v35 = vld [vmem:[#allocation2 + $0x14] sm:$0x1] }
  0x25   : > { %2961 = vmatprep.subr.bf16.mxu0 %v3371_v51  ;;  %v1198_v31 = vor.u32 %v1197_v24, %v1194_v21  ;;  %337 = vst [vmem:[#allocation2 + $0x24] sm:$0x1] %v336_v30  ;;  %v410_v36 = vsel %vm3395_vm8, %v405_v5, %v3366_v50  ;;  %v426_v38 = vshrl.u32 %v3403_v29, 16  ;;  %v429_v39 = vshll.u32 %v3403_v29, 16  ;;  %v3415_v44 = vld [vmem:[#allocation2 + $0x18] sm:$0xf] }
  0x26   : > { %v419_v37 = vrot.slane %v418_v26, 4  ;;  %v1203_v41 = vrot.slane %v1201_v15, 5  ;;  %v1208_v42 = vrot.slane %v1206_v32, 4  ;;  %v1211_v43 = vrot.slane %v1209_v33, 5  ;;  %v3419_v47 = vld [vmem:[#allocation2 + $0x1c] sm:$0x1] }
  0x27   : > { %v1199_v40 = vrot.slane %v1198_v31, 4  ;;  %v428_v48 = vrot.slane %v426_v38, 4  ;;  %v431_v49 = vrot.slane %v429_v39, 5  ;;  %v435_v50 = vshll.u32 %v3408_v35, 16  ;;  %v1179_v56 = vld [vmem:[#allocation2 + $0x18] sm:$0xf] }
  0x28   : > { %v424_v46 = vsel %vm3395_vm8, %v419_v37, %v423_v19  ;;  %v1212_v53 = vor.u32 %v1211_v43, %v1208_v42  ;;  %v1217_v54 = vrot.slane %v1215_v34, 5  ;;  %v440_v55 = vshrl.u32 %v3415_v44, 16  ;;  %v3425_v60 = vld [vmem:[#allocation2 + $0x1c] sm:$0x1]  ;;  %v1181_v2 = vld [vmem:[#allocation2 + $0x20] sm:$0xf] }
  0x29   : > { %v2483_v52 = vcombine.low %v410_v36, %v424_v46  ;;  %v432_v57 = vor.u32 %v431_v49, %v428_v48  ;;  %v443_v58 = vshll.u32 %v3415_v44, 16  ;;  %v449_v59 = vshll.u32 %v3419_v47, 16  ;;  %v223_v36 = vld [vmem:[%s3318_s17 + $0x10] sm:$0xf]  ;;  %v3443_v42 = vld [vmem:[#allocation2 + $0x20] sm:$0xf] }
  0x2a   : > { %v1204_v61 = vsel %vm3395_vm8, %v1199_v40, %v1203_v41  ;;  %v1213_v62 = vrot.slane %v1212_v53, 4  ;;  %v442_v1 = vrot.slane %v440_v55, 4  ;;  %v437_v4 = vrot.slane %v435_v50, 5  ;;  %v3164_v40 = vld [vmem:[%s3858_s1 + $0x8] sm:$0xff]  }
  0x2b   : > { %2857 = vmatprep.mubr.bf16.mxu1 %v2483_v52  ;;  %v433_v3 = vrot.slane %v432_v57, 4  ;;  %v445_v5 = vrot.slane %v443_v58, 5  ;;  %v1220_v7 = vshrl.u32 %v1179_v56, 16  ;;  %v1223_v10 = vshll.u32 %v1179_v56, 16  ;;  %v338_v48 = vld [vmem:[#allocation2 + $0x28] sm:$0xf] }
  0x2c   : > { %v3429_v6 = vld [vmem:[#allocation2 + $0x24] sm:$0x1]  ;;  %v1218_v8 = vsel %vm3395_vm8, %v1213_v62, %v1217_v54  ;;  %v1229_v11 = vshll.u32 %v3425_v60, 16  ;;  %v1234_v12 = vshrl.u32 %v1181_v2, 16  ;;  %v451_v15 = vrot.slane %v449_v59, 5  ;;  %v3165_v59 = vld [vmem:[%s3858_s1 + $0x148] sm:$0xff]  }
  0x2d   : > { %v2587_v13 = vcombine.low %v1204_v61, %v1218_v8  ;;  %v446_v14 = vor.u32 %v445_v5, %v442_v1  ;;  %v1222_v16 = vrot.slane %v1220_v7, 4  ;;  %v1225_v19 = vrot.slane %v1223_v10, 5  ;;  %v341_v54 = vld [vmem:[#allocation2 + $0x2c] sm:$0x1]  ;;  %v224_v57 = vld [vmem:[%s3318_s17 + $0x14] sm:$0xf] }
  0x2e   : > { %v1236_v21 = vrot.slane %v1234_v12, 4  ;;  %v1237_v24 = vshll.u32 %v1181_v2, 16  ;;  %v438_v25 = vsel %vm3395_vm8, %v433_v3, %v437_v4  ;;  %v1243_v27 = vshll.u32 %v3429_v6, 16  ;;  %v3166_v61 = vld [vmem:[%s3858_s1 + $0x10] sm:$0xff]   ;;  %v3168_v5 = vld [vmem:[%s3858_s1 + $0x18] sm:$0xff]  }
  0x2f   : > { %2953 = vmatprep.mubr.bf16.mxu0 %v2587_v13  ;;  %v447_v26 = vrot.slane %v446_v14, 4  ;;  %v1226_v30 = vor.u32 %v1225_v19, %v1222_v16  ;;  %v1231_v31 = vrot.slane %v1229_v11, 5  ;;  %v260_v41 = vshrl.u32 %v223_v36, 16  ;;  %v344_v10 = vld [vmem:[#allocation2 + $0x30] sm:$0xf] }
  0x30   : > { %v1239_v32 = vrot.slane %v1237_v24, 5  ;;  %v1245_v34 = vrot.slane %v1243_v27, 5  ;;  %v821_v43 = vrot.slane %v3336_v22, 5  ;;  %v263_v46 = vshll.u32 %v223_v36, 16  ;;  %v347_v11 = vld [vmem:[#allocation2 + $0x34] sm:$0x1] }
  0x31   : > { %v452_v33 = vsel %vm3395_vm8, %v447_v26, %v451_v15  ;;  %v1227_v38 = vrot.slane %v1226_v30, 4  ;;  %v454_v49 = vshrl.u32 %v3443_v42, 16  ;;  %v262_v53 = vrot.slane %v260_v41, 7  ;;  %v225_v12 = vld [vmem:[%s3318_s17 + $0x18] sm:$0xf]  ;;  %v3167_v13 = vld [vmem:[%s3858_s1 + $0x150] sm:$0xff]  }
  0x32   : > { %v2484_v37 = vcombine.low %v438_v25, %v452_v33  ;;  %v1240_v39 = vor.u32 %v1239_v32, %v1236_v21  ;;  %v825_v55 = vrot.slane %v3379_v0, 5  ;;  %v457_v56 = vshll.u32 %v3443_v42, 16  ;;  %v3474_v14 = vld [vmem:[#allocation2 + $0x24] sm:$0x1]  ;;  %v226_v24 = vld [vmem:[%s3318_s17 + $0x1c] sm:$0xf] }
  0x33   : > { %v1232_v50 = vsel %vm3395_vm8, %v1227_v38, %v1231_v31  ;;  %v265_v62 = vor.u32 %v263_v46, %v262_v53  ;;  %v266_v1 = vrot.slane %v262_v53, 4  ;;  %v3461_v2 = vrot.slane %v454_v49, 4  ;;  %v350_v25 = vld [vmem:[#allocation2 + $0x38] sm:$0xf]  ;;  %v353_v26 = vld [vmem:[#allocation2 + $0x3c] sm:$0x1] }
  0x34   : > { %2858 = vmatmul.mubr.bf16.vlgmr.msra.gmra.mrb[0].mxu1 %v2484_v37  ;;  %v1241_v52 = vrot.slane %v1240_v39, 4  ;;  %v268_v3 = vshrl.u32 %v224_v57, 16  ;;  %v271_v4 = vshll.u32 %v224_v57, 16  ;;  %v459_v15 = vrot.slane %v457_v56, 5  ;;  %v359_v36 = vld [vmem:[#allocation2 + $0x44] sm:$0x1] }
  0x35   : > { %2866 = vmatpush3.bf16.msra.mxu1 %v3363_v45  ;;  %v339_v7 = vsel %vm3332_vm4, %v265_v62, %v338_v48  ;;  %v342_v8 = vsel %vm3338_vm5, %v266_v1, %v341_v54  ;;  %v276_v19 = vshrl.u32 %v225_v12, 16  ;;  %v279_v21 = vshll.u32 %v225_v12, 16  ;;  %v3170_v46 = vld [vmem:[%s3858_s1 + $0x20] sm:$0xff]   ;;  %v3169_v54 = vld [vmem:[%s3858_s1 + $0x158] sm:$0xff]  }
  0x36   : > { %v1246_v58 = vsel %vm3395_vm8, %v1241_v52, %v1245_v34  ;;  %2867 = vmatprep.subr.bf16.mxu1 %v3164_v40  ;;  %340 = vst [vmem:[#allocation2 + $0x28] sm:$0xf] %v339_v7  ;;  %343 = vst [vmem:[#allocation2 + $0x2c] sm:$0x1] %v342_v8  ;;  %v270_v16 = vrot.slane %v268_v3, 7  ;;  %v284_v27 = vshrl.u32 %v226_v24, 16  ;;  %v460_v48 = vor.u32 %v459_v15, %v3461_v2 }
  0x37   : > { %v2588_v45 = vcombine.low %v1232_v50, %v1246_v58  ;;  %v287_v30 = vshll.u32 %v226_v24, 16  ;;  %v278_v33 = vrot.slane %v276_v19, 7  ;;  %v356_v34 = vld [vmem:[#allocation2 + $0x40] sm:$0xf]  ;;  %v1483_v37 = vrot.slane %v3389_v9, 5 }
  0x38   : > { %v273_v31 = vor.u32 %v271_v4, %v270_v16  ;;  %v274_v32 = vrot.slane %v270_v16, 4  ;;  %v286_v38 = vrot.slane %v284_v27, 7  ;;  %v463_v49 = vshll.u32 %v3474_v14, 16  ;;  %v3517_v24 = vld [vmem:[#allocation2 + $0x8] sm:$0xe] }
  0x39   : > { %2954 = vmatmul.mubr.bf16.vlgmr.msra.gmra.mrb[0].mxu0 %v2588_v45  ;;  %2868 = vmatpush3.bf16.msra.mxu1 %v3164_v40  ;;  %v281_v40 = vor.u32 %v279_v21, %v278_v33  ;;  %v282_v41 = vrot.slane %v278_v33, 4  ;;  %v1487_v53 = vrot.slane %v3401_v28, 5  ;;  %v829_v8 = vrot.slane %v3408_v35, 5  ;;  %v3186_v35 = vld [vmem:[%s3858_s1 + $0x98] sm:$0xff]  }
  0x3a   : > { %2962 = vmatpush3.bf16.msra.mxu0 %v3371_v51  ;;  %2869 = vmatprep.subr.bf16.mxu1 %v3166_v61  ;;  %v345_v39 = vsel %vm3332_vm4, %v273_v31, %v344_v10  ;;  %v348_v51 = vsel %vm3338_vm5, %v274_v32, %v347_v11  ;;  %v289_v50 = vor.u32 %v287_v30, %v286_v38  ;;  %v290_v52 = vrot.slane %v286_v38, 4  ;;  %v3174_v31 = vld [vmem:[%s3858_s1 + $0x30] sm:$0xff]  }
  0x3b   : > { %2963 = vmatprep.subr.bf16.mxu0 %v3165_v59  ;;  %346 = vst [vmem:[#allocation2 + $0x30] sm:$0xf] %v345_v39  ;;  %349 = vst [vmem:[#allocation2 + $0x34] sm:$0x1] %v348_v51  ;;  %v351_v56 = vsel %vm3332_vm4, %v281_v40, %v350_v25  ;;  %v354_v57 = vsel %vm3338_vm5, %v282_v41, %v353_v26  ;;  %v465_v10 = vrot.slane %v463_v49, 5  ;;  %v3173_v39 = vld [vmem:[%s3858_s1 + $0x168] sm:$0xff]  }
  0x3c   : > { %352 = vst [vmem:[#allocation2 + $0x38] sm:$0xf] %v351_v56  ;;  %355 = vst [vmem:[#allocation2 + $0x3c] sm:$0x1] %v354_v57  ;;  %v357_v62 = vsel %vm3332_vm4, %v289_v50, %v356_v34  ;;  %v360_v1 = vsel %vm3338_vm5, %v290_v52, %v359_v36  ;;  %v2599_v56 = vrot.slane %v3517_v24, 9  ;;  %v1491_v9 = vrot.slane %v3425_v60, 5 }
  0x3d   : > { %2870 = vmatpush3.bf16.msra.mxu1 %v3166_v61  ;;  %v3496_v58 = vld [vmem:[#allocation2 + $0x28] sm:$0xf]  ;;  %v3507_v4 = vld [vmem:[#allocation2 + $0x2c] sm:$0x1]  ;;  %358 = vst [vmem:[#allocation2 + $0x40] sm:$0xf] %v357_v62  ;;  %v2496_v60 = vcombine.low %v3403_v29, %v3415_v44 }
  0x3e   : > { %2964 = vmatpush3.bf16.msra.mxu0 %v3165_v59  ;;  %2871 = vmatprep.subr.bf16.mxu1 %v3168_v5  ;;  %v3498_v59 = vld [vmem:[#allocation2 + $0x2c] sm:$0x1]  ;;  %v1183_v61 = vld [vmem:[#allocation2 + $0x28] sm:$0xf]  ;;  %v468_v2 = vshrl.u32 %v3496_v58, 16  ;;  %v471_v45 = vshll.u32 %v3496_v58, 16 }
  0x3f   : > { %2965 = vmatprep.subr.bf16.mxu0 %v3167_v13  ;;  %v477_v3 = vshll.u32 %v3498_v59, 16  ;;  %v1248_v7 = vshrl.u32 %v1183_v61, 16  ;;  %361 = vst [vmem:[#allocation2 + $0x44] sm:$0x1] %v360_v1  ;;  %v1251_v11 = vshll.u32 %v1183_v61, 16  ;;  %v1257_v19 = vshll.u32 %v3507_v4, 16 }
  0x40   : > { %v470_v12 = vrot.slane %v468_v2, 4  ;;  %v473_v15 = vrot.slane %v471_v45, 5  ;;  %v3176_v45 = vld [vmem:[%s3858_s1 + $0x38] sm:$0xff]   ;;  %v1495_v24 = vrot.slane %v3429_v6, 5  ;;  %v3182_v6 = vld [vmem:[%s3858_s1 + $0x88] sm:$0xff]  }
  0x41   : > { %2872 = vmatpush3.bf16.msra.mxu1 %v3168_v5  ;;  %v461_v5 = vrot.slane %v460_v48, 4  ;;  %v1250_v16 = vrot.slane %v1248_v7, 4  ;;  %v479_v21 = vrot.slane %v477_v3, 5  ;;  %v1259_v41 = vrot.slane %v1257_v19, 5 }
  0x42   : > { %2966 = vmatpush3.bf16.msra.mxu0 %v3167_v13  ;;  %2873 = vmatprep.subr.bf16.mxu1 %v3170_v46  ;;  %v1253_v13 = vrot.slane %v1251_v11, 5  ;;  %v474_v25 = vor.u32 %v473_v15, %v470_v12  ;;  %v1185_v26 = vld [vmem:[#allocation2 + $0x30] sm:$0xf]  ;;  %v3519_v27 = vld [vmem:[#allocation2 + $0x34] sm:$0x1] }
  0x43   : > { %2967 = vmatprep.subr.bf16.mxu0 %v3169_v54  ;;  %v3521_v30 = vld [vmem:[#allocation2 + $0x30] sm:$0xf]  ;;  %v1262_v33 = vshrl.u32 %v1185_v26, 16  ;;  %v1265_v34 = vshll.u32 %v1185_v26, 16  ;;  %v1271_v36 = vshll.u32 %v3519_v27, 16  ;;  %v466_v51 = vsel %vm3395_vm8, %v461_v5, %v465_v10 }
  0x44   : > { %v1254_v32 = vor.u32 %v1253_v13, %v1250_v16  ;;  %v3527_v38 = vld [vmem:[#allocation2 + $0x34] sm:$0x1]  ;;  %v475_v40 = vrot.slane %v474_v25, 4  ;;  %v482_v48 = vshrl.u32 %v3521_v30, 16  ;;  %v485_v62 = vshll.u32 %v3521_v30, 16 }
  0x45   : > { %2874 = vmatpush3.bf16.msra.mxu1 %v3170_v46  ;;  %v3534_v46 = vld [vmem:[#allocation2 + $0x38] sm:$0xf]  ;;  %v1264_v50 = vrot.slane %v1262_v33, 4  ;;  %v1267_v52 = vrot.slane %v1265_v34, 5  ;;  %v491_v1 = vshll.u32 %v3527_v38, 16  ;;  %v1273_v5 = vrot.slane %v1271_v36, 5 }
  0x46   : > { %2968 = vmatpush3.bf16.msra.mxu0 %v3169_v54  ;;  %2875 = vmatprep.subr.bf16.mxu1 %v3172_v23  ;;  %v1255_v49 = vrot.slane %v1254_v32, 4  ;;  %v3537_v54 = vld [vmem:[#allocation2 + $0x3c] sm:$0x1]  ;;  %v480_v57 = vsel %vm3395_vm8, %v475_v40, %v479_v21  ;;  %v484_v61 = vrot.slane %v482_v48, 4  ;;  %v1187_v2 = vld [vmem:[#allocation2 + $0x38] sm:$0xf] }
  0x47   : > { %2969 = vmatprep.subr.bf16.mxu0 %v3171_v20  ;;  %v2485_v3 = vcombine.low %v466_v51, %v480_v57  ;;  %v1268_v7 = vor.u32 %v1267_v52, %v1264_v50  ;;  %v3548_v10 = vld [vmem:[#allocation2 + $0x3c] sm:$0x1]  ;;  %v1189_v11 = vld [vmem:[#allocation2 + $0x40] sm:$0xf]  ;;  %v3175_v15 = vld [vmem:[%s3858_s1 + $0x170] sm:$0xff]   ;;  %v487_v16 = vrot.slane %v485_v62, 5 }
  0x48   : > { %v1260_v12 = vsel %vm3395_vm8, %v1255_v49, %v1259_v41  ;;  %v505_v19 = vshll.u32 %v3537_v54, 16  ;;  %v3557_v21 = vld [vmem:[#allocation2 + $0x44] sm:$0x1]  ;;  %v1276_v26 = vshrl.u32 %v1187_v2, 16  ;;  %v1279_v32 = vshll.u32 %v1187_v2, 16  ;;  %v3177_v41 = vld [vmem:[%s3858_s1 + $0x178] sm:$0xff]  }
  0x49   : > { %2876 = vmatpush3.bf16.msra.mxu1 %v3172_v23  ;;  %v496_v23 = vshrl.u32 %v3534_v46, 16  ;;  %2861 = vmatprep.mubr.bf16.mxu1 %v2485_v3  ;;  %v1269_v13 = vrot.slane %v1268_v7, 4  ;;  %v1458_v33 = vld [vmem:[#allocation2 + $0x10] sm:$0xe]  ;;  %v488_v34 = vor.u32 %v487_v16, %v484_v61  ;;  %v493_v36 = vrot.slane %v491_v1, 5  ;;  %v3568_v57 = vld [vmem:[%s3858_s1 + $0x80] sm:$0xff]  }
  0x4a   : > { %2970 = vmatpush3.bf16.msra.mxu0 %v3171_v20  ;;  %2877 = vmatprep.subr.bf16.mxu1 %v3174_v31  ;;  %v499_v20 = vshll.u32 %v3534_v46, 16  ;;  %v1285_v40 = vshll.u32 %v3548_v10, 16  ;;  %v1278_v49 = vrot.slane %v1276_v26, 4  ;;  %v1281_v50 = vrot.slane %v1279_v32, 5  ;;  %v1459_v32 = vld [vmem:[#allocation2 + $0x18] sm:$0xe] }
  0x4b   : > { %2971 = vmatprep.subr.bf16.mxu0 %v3173_v39  ;;  %v498_v25 = vrot.slane %v496_v23, 4  ;;  %v1274_v48 = vsel %vm3395_vm8, %v1269_v13, %v1273_v5  ;;  %v1290_v52 = vshrl.u32 %v1189_v11, 16  ;;  %v489_v61 = vrot.slane %v488_v34, 4  ;;  %v1462_v28 = vld [vmem:[#allocation2 + $0x30] sm:$0xe] }
  0x4c   : > { %v501_v51 = vrot.slane %v499_v20, 5  ;;  %v507_v1 = vrot.slane %v505_v19, 5  ;;  %v1282_v2 = vor.u32 %v1281_v50, %v1278_v49  ;;  %v1299_v7 = vshll.u32 %v3557_v21, 16 }
  0x4d   : > { %2878 = vmatpush3.bf16.msra.mxu1 %v3174_v31  ;;  %v2589_v31 = vcombine.low %v1260_v12, %v1274_v48  ;;  %v1292_v3 = vrot.slane %v1290_v52, 4  ;;  %v494_v5 = vsel %vm3395_vm8, %v489_v61, %v493_v36  ;;  %v2600_v16 = vrot.slane %v1458_v33, 9  ;;  %v3576_v12 = vld [vmem:[%s3858_s1 + $0x180] sm:$0xff]   ;;  %v1461_v48 = vld [vmem:[#allocation2 + $0x28] sm:$0xe] }
  0x4e   : > { %2972 = vmatpush3.bf16.msra.mxu0 %v3173_v39  ;;  %2879 = vmatprep.subr.bf16.mxu1 %v3176_v45  ;;  %v502_v62 = vor.u32 %v501_v51, %v498_v25  ;;  %v1293_v39 = vshll.u32 %v1189_v11, 16  ;;  %v1283_v20 = vrot.slane %v1282_v2, 4  ;;  %v1287_v13 = vrot.slane %v1285_v40, 5  ;;  %v1460_v33 = vld [vmem:[#allocation2 + $0x20] sm:$0xe] }
  0x4f   : > { %2973 = vmatprep.subr.bf16.mxu0 %v3175_v15  ;;  %2957 = vmatprep.mubr.bf16.mxu0 %v2589_v31  ;;  %v1301_v25 = vrot.slane %v1299_v7, 5  ;;  %v2495_v26 = vcombine.low %v3330_v18, %v3377_v63  ;;  %v1488_v51 = vsel %vm3581_vm11, %v2600_v16, %v1487_v53  ;;  %v833_v40 = vrot.slane %v3419_v47, 5  ;;  %v792_v2 = vld [vmem:[#allocation2] sm:$0xe] }
  0x50   : > { %v503_v23 = vrot.slane %v502_v62, 4  ;;  %v1295_v19 = vrot.slane %v1293_v39, 5  ;;  %v1288_v18 = vsel %vm3395_vm8, %v1283_v20, %v1287_v13  ;;  %v2601_v47 = vrot.slane %v1459_v32, 9  ;;  %v1464_v62 = vld [vmem:[#allocation2 + $0x40] sm:$0xe] }
  0x51   : > { %2880 = vmatpush3.bf16.msra.mxu1 %v3176_v45  ;;  %v2603_v50 = vrot.slane %v1461_v48, 9  ;;  %v1499_v52 = vrot.slane %v3507_v4, 5  ;;  %v2604_v31 = vrot.slane %v1462_v28, 9  ;;  %v1503_v61 = vrot.slane %v3519_v27, 5  ;;  %v3184_v27 = vld [vmem:[%s3858_s1 + $0x90] sm:$0xff]  }
  0x52   : > { %2974 = vmatpush3.bf16.msra.mxu0 %v3175_v15  ;;  %2889 = vmatprep.subr.bf16.mxu1 %v3568_v57  ;;  %v508_v45 = vsel %vm3395_vm8, %v503_v23, %v507_v1  ;;  %v1296_v36 = vor.u32 %v1295_v19, %v1292_v3  ;;  %v1484_v15 = vsel %vm3581_vm11, %v2599_v56, %v1483_v37  ;;  %v2602_v56 = vrot.slane %v1460_v33, 9  ;;  %v793_v3 = vld [vmem:[#allocation2 + $0x8] sm:$0xe]  ;;  %v795_v13 = vld [vmem:[#allocation2 + $0x18] sm:$0xe] }
  0x53   : > { %2975 = vmatprep.subr.bf16.mxu0 %v3177_v41  ;;  %v2486_v34 = vcombine.low %v494_v5, %v508_v45  ;;  %v2623_v53 = vcombine.low %v1484_v15, %v1488_v51  ;;  %v2497_v1 = vcombine.low %v3443_v42, %v3496_v58  ;;  %v1492_v4 = vsel %vm3581_vm11, %v2601_v47, %v1491_v9  ;;  %v3190_v15 = vld [vmem:[%s3858_s1 + $0xa8] sm:$0xff]   ;;  %v3189_v51 = vld [vmem:[%s3858_s1 + $0x1a0] sm:$0xff]   ;;  %v3194_v9 = vld [vmem:[%s3858_s1 + $0x1b0] sm:$0xff]  }
  0x54   : > { %v1297_v63 = vrot.slane %v1296_v36, 4  ;;  %v1496_v29 = vsel %vm3581_vm11, %v2602_v56, %v1495_v24  ;;  %v2507_v39 = vrot.slane %v792_v2, 9  ;;  %v1507_v7 = vrot.slane %v3548_v10, 5  ;;  %v794_v10 = vld [vmem:[#allocation2 + $0x10] sm:$0xe]  ;;  %v3196_v24 = vld [vmem:[%s3858_s1 + $0xb8] sm:$0xff]  }
  0x55   : > { %2862 = vmatmul.mubr.bf16.gmra.mrb[4].mxu1 %v2486_v34  ;;  %v2508_v5 = vrot.slane %v793_v3, 9  ;;  %v1500_v42 = vsel %vm3581_vm11, %v2603_v50, %v1499_v52  ;;  %v1504_v58 = vsel %vm3581_vm11, %v2604_v31, %v1503_v61  ;;  %v2606_v23 = vrot.slane %v1464_v62, 9  ;;  %v3188_v34 = vld [vmem:[%s3858_s1 + $0xa0] sm:$0xff]   ;;  %v3199_v36 = vld [vmem:[#allocation2 + $0x10] ss:$8 sps:$4 sm:$0xff]  }
  0x56   : > { %2976 = vmatpush3.bf16.msra.mxu0 %v3177_v41  ;;  %2881 = vmatprep.mubr.bf16.mxu1 %v2495_v26  ;;  %v1302_v37 = vsel %vm3395_vm8, %v1297_v63, %v1301_v25  ;;  %v1463_v41 = vld [vmem:[#allocation2 + $0x38] sm:$0xe]  ;;  %v1511_v16 = vrot.slane %v3557_v21, 5  ;;  %v2624_v20 = vcombine.low %v1492_v4, %v1496_v29  ;;  %v822_v19 = vsel %vm3581_vm11, %v2507_v39, %v821_v43  ;;  %v3183_v21 = vld [vmem:[%s3858_s1 + $0x188] sm:$0xff]   ;;  %v796_v63 = vld [vmem:[#allocation2 + $0x20] sm:$0xe] }
  0x57   : > { %2985 = vmatprep.subr.bf16.mxu0 %v3576_v12  ;;  %v2590_v49 = vcombine.low %v1288_v18, %v1302_v37  ;;  %v2605_v44 = vrot.slane %v1463_v41, 9  ;;  %v826_v25 = vsel %vm3581_vm11, %v2508_v5, %v825_v55  ;;  %v2509_v45 = vrot.slane %v794_v10, 9  ;;  %v3193_v18 = vld [vmem:[%s3858_s1 + $0xb0] sm:$0xff]   ;;  %v797_v48 = vld [vmem:[#allocation2 + $0x28] sm:$0xe]  ;;  %v3198_v61 = vld [vmem:[%s3858_s1 + $0xc0] sm:$0xff]  }
  0x58   : > { %v2510_v26 = vrot.slane %v795_v13, 9  ;;  %v2498_v32 = vcombine.low %v3521_v30, %v3534_v46  ;;  %v2531_v43 = vcombine.low %v822_v19, %v826_v25  ;;  %v1512_v30 = vsel %vm3581_vm11, %v2606_v23, %v1511_v16  ;;  %v3185_v46 = vld [vmem:[%s3858_s1 + $0x190] sm:$0xff]   ;;  %v799_v50 = vld [vmem:[#allocation2 + $0x38] sm:$0xe]  ;;  %v3201_v19 = vld [vmem:[#allocation2 + $0x20] ss:$8 sps:$4 sm:$0xff]  }
  0x59   : > { %2958 = vmatmul.mubr.bf16.gmra.mrb[4].mxu0 %v2590_v49  ;;  %v3647_v22 = vsel %vm3581_vm11, %v2509_v45, %v829_v8  ;;  %v1508_v8 = vsel %vm3581_vm11, %v2605_v44, %v1507_v7  ;;  %v2511_v28 = vrot.slane %v796_v63, 9  ;;  %v837_v37 = vrot.slane %v3474_v14, 5  ;;  %v1838_v56 = vld [vmem:[#allocation2 + $0x10] sm:$0xf]  ;;  %v1840_v52 = vld [vmem:[#allocation2 + $0x18] sm:$0xf] }
  0x5a   : > { %2977 = vmatprep.mubr.bf16.mxu0 %v2623_v53  ;;  %v3651_v0 = vsel %vm3581_vm11, %v2510_v26, %v833_v40  ;;  %v2626_v33 = vcombine.low %v1508_v8, %v1512_v30  ;;  %v3191_v40 = vld [vmem:[%s3858_s1 + $0x1a8] sm:$0xff]   ;;  %v2512_v53 = vrot.slane %v797_v48, 9  ;;  %v841_v47 = vrot.slane %v3498_v59, 5  ;;  %v798_v49 = vld [vmem:[#allocation2 + $0x30] sm:$0xe]  ;;  %v3197_v62 = vld [vmem:[%s3858_s1 + $0x1b8] sm:$0xff]  }
  0x5b   : > { %v2532_v55 = vcombine.low %v3647_v22, %v3651_v0  ;;  %v1855_v41 = vshrl.u32 %v1838_v56, 16  ;;  %v1872_v31 = vshll.u32 %v1840_v52, 16  ;;  %v838_v14 = vsel %vm3581_vm11, %v2511_v28, %v837_v37  ;;  %v3204_v25 = vld [vmem:[%s3858_s1 + $0xd0] sm:$0xff]   ;;  %v3203_v45 = vld [vmem:[%s3858_s1 + $0x1c8] sm:$0xff]  }
  0x5c   : > { %v842_v59 = vsel %vm3581_vm11, %v2512_v53, %v841_v47  ;;  %v845_v2 = vrot.slane %v3527_v38, 5  ;;  %v2514_v4 = vrot.slane %v799_v50, 9  ;;  %v849_v29 = vrot.slane %v3537_v54, 5  ;;  %v3200_v38 = vld [vmem:[%s3858_s1 + $0x1c0] sm:$0xff]   ;;  %v3212_v26 = vld [vmem:[#allocation2 + $0x30] ss:$8 sps:$4 sm:$0xff]  }
  0x5d   : > { %2882 = vmatmul.mubr.bf16.vlgmr.msra.gmra.mrb[0].mxu1 %v2496_v60  ;;  %v1858_v60 = vshll.u32 %v1838_v56, 16  ;;  %v1857_v44 = vrot.slane %v1855_v41, 4  ;;  %v1874_v7 = vrot.slane %v1872_v31, 5  ;;  %v2533_v5 = vcombine.low %v838_v14, %v842_v59  ;;  %v3205_v8 = vld [vmem:[%s3858_s1 + $0x1d0] sm:$0xff]   ;;  %v1844_v30 = vld [vmem:[#allocation2 + $0x28] sm:$0xf] }
  0x5e   : > { %2890 = vmatpush3.bf16.msra.mxu1 %v3568_v57  ;;  %2885 = vmatprep.mubr.bf16.mxu1 %v2497_v1  ;;  %v2625_v57 = vcombine.low %v1500_v42, %v1504_v58  ;;  %v2513_v1 = vrot.slane %v798_v49, 9  ;;  %v3706_v42 = vld [vmem:[#allocation2 + $0x1c] sm:$0x1]  ;;  %v3202_v58 = vld [vmem:[%s3858_s1 + $0xc8] sm:$0xff]   ;;  %v850_v23 = vsel %vm3581_vm11, %v2514_v4, %v849_v29  ;;  %v1897_v63 = vshrl.u32 %v1844_v30, 16  ;;  %v3209_v47 = vld [vmem:[%s3858_s1 + $0x1e0] sm:$0xff]  }
  0x5f   : > { %2891 = vmatprep.subr.bf16.mxu1 %v3182_v6  ;;  %v1860_v3 = vrot.slane %v1858_v60, 5  ;;  %v1878_v13 = vshll.u32 %v3706_v42, 16  ;;  %v1900_v48 = vshll.u32 %v1844_v30, 16  ;;  %v3210_v56 = vld [vmem:[%s3858_s1 + $0xe8] sm:$0xff]   ;;  %v3751_v49 = vld [vmem:[#allocation2 + $0x24] sm:$0x1] }
  0x60   : > { %v846_v54 = vsel %vm3581_vm11, %v2513_v1, %v845_v2  ;;  %v1899_v41 = vrot.slane %v1897_v63, 4  ;;  %v3757_v1 = vld [vmem:[#allocation2 + $0x3c] sm:$0x1]  ;;  %v3213_v2 = vld [vmem:[%s3858_s1 + $0xf0] sm:$0xff]   ;;  %v1850_v4 = vld [vmem:[#allocation2 + $0x40] sm:$0xf] }
  0x61   : > { %2978 = vmatmul.mubr.bf16.vlgmr.msra.gmra.mrb[0].mxu0 %v2624_v20  ;;  %v1861_v16 = vor.u32 %v1860_v3, %v1857_v44  ;;  %v1880_v0 = vrot.slane %v1878_v13, 5  ;;  %v1902_v60 = vrot.slane %v1900_v48, 5  ;;  %v1852_v29 = vld [vmem:[#allocation2 + $0x48] sm:$0xf] }
  0x62   : > { %2892 = vmatpush3.bf16.msra.mxu1 %v3182_v6  ;;  %2986 = vmatpush3.bf16.msra.mxu0 %v3576_v12  ;;  %v3187_v12 = vld [vmem:[%s3858_s1 + $0x198] sm:$0xff]   ;;  %v1869_v6 = vshrl.u32 %v1840_v52, 16  ;;  %v3211_v44 = vld [vmem:[%s3858_s1 + $0x1e8] sm:$0xff]   ;;  %v1956_v13 = vshll.u32 %v1852_v29, 16 }
  0x63   : > { %2893 = vmatprep.subr.bf16.mxu1 %v3184_v27  ;;  %2987 = vmatprep.subr.bf16.mxu0 %v3183_v21 }
  0x64   : > { %2981 = vmatprep.mubr.bf16.mxu0 %v2625_v57  ;;  %v1871_v39 = vrot.slane %v1869_v6, 4  ;;  %v1862_v57 = vrot.slane %v1861_v16, 4  ;;  %v3753_v6 = vld [vmem:[#allocation2 + $0x2c] sm:$0x1]  ;;  %v1939_v16 = vshrl.u32 %v1850_v4, 16 }
  0x65   : > { %2886 = vmatmul.mubr.bf16.gmra.mrb[4].mxu1 %v2498_v32 }
  0x66   : > { %2894 = vmatpush3.bf16.msra.mxu1 %v3184_v27  ;;  %2905 = vmatprep.mubr.bf16.mxu1 %v2531_v43  ;;  %v3704_v27 = vld [vmem:[#allocation2 + $0x14] sm:$0x1]  ;;  %v1875_v10 = vor.u32 %v1874_v7, %v1871_v39  ;;  %v3218_v43 = vld [vmem:[#allocation2 + $0x8] ss:$8 sps:$4 sm:$0xff]   ;;  %v1892_v39 = vshll.u32 %v3751_v49, 16  ;;  %v1903_v7 = vor.u32 %v1902_v60, %v1899_v41  ;;  %v2166_v41 = vrot.slane %v3757_v1, 5 }
  0x67   : > { %2988 = vmatpush3.bf16.msra.mxu0 %v3183_v21  ;;  %2895 = vmatprep.subr.bf16.mxu1 %v3186_v35  ;;  %v1864_v20 = vshll.u32 %v3704_v27, 16  ;;  %v2534_v21 = vcombine.low %v846_v54, %v850_v23  ;;  %v1934_v23 = vshll.u32 %v3757_v1, 16 }
  0x68   : > { %2989 = vmatprep.subr.bf16.mxu0 %v3185_v46  ;;  %v1876_v22 = vrot.slane %v1875_v10, 4  ;;  %v1953_v10 = vshrl.u32 %v1852_v29, 16 }
  0x69   : > { %2982 = vmatmul.mubr.bf16.gmra.mrb[4].mxu0 %v2626_v33  ;;  %v1866_v32 = vrot.slane %v1864_v20, 5  ;;  %v1942_v20 = vshll.u32 %v1850_v4, 16 }
  0x6a   : > { %2896 = vmatpush3.bf16.msra.mxu1 %v3186_v35  ;;  %3001 = vmatprep.mubr.bf16.mxu0 %v3199_v36  ;;  %v1842_v35 = vld [vmem:[#allocation2 + $0x20] sm:$0xf]  ;;  %v1848_v36 = vld [vmem:[#allocation2 + $0x38] sm:$0xf] }
  0x6b   : > { %2990 = vmatpush3.bf16.msra.mxu0 %v3185_v46  ;;  %2897 = vmatprep.subr.bf16.mxu1 %v3188_v34  ;;  %v1846_v46 = vld [vmem:[#allocation2 + $0x30] sm:$0xf]  ;;  %v1867_v33 = vsel %vm3395_vm8, %v1862_v57, %v1866_v32  ;;  %v1925_v37 = vshrl.u32 %v1848_v36, 16  ;;  %v1928_v53 = vshll.u32 %v1848_v36, 16  ;;  %v1944_v30 = vrot.slane %v1942_v20, 5 }
  0x6c   : > { %2991 = vmatprep.subr.bf16.mxu0 %v3187_v12  ;;  %v2124_v36 = vld [vmem:[#allocation2 + $0x30] sm:$0xe] }
  0x6d   : > { %v1927_v14 = vrot.slane %v1925_v37, 4  ;;  %v1930_v59 = vrot.slane %v1928_v53, 5 }
  0x6e   : > { %2898 = vmatpush3.bf16.msra.mxu1 %v3188_v34  ;;  %v1881_v34 = vsel %vm3395_vm8, %v1876_v22, %v1880_v0 }
  0x6f   : > { %2992 = vmatpush3.bf16.msra.mxu0 %v3187_v12  ;;  %2899 = vmatprep.subr.bf16.mxu1 %v3190_v15  ;;  %v3208_v12 = vld [vmem:[%s3858_s1 + $0xe0] sm:$0xff]   ;;  %v2679_v28 = vcombine.low %v1867_v33, %v1881_v34  ;;  %v1931_v54 = vor.u32 %v1930_v59, %v1927_v14  ;;  %v3217_v34 = vld [vmem:[%s3858_s1 + $0x1f8] sm:$0xff]   ;;  %v2120_v59 = vld [vmem:[#allocation2 + $0x10] sm:$0xe] }
  0x70   : > { %2993 = vmatprep.subr.bf16.mxu0 %v3189_v51  ;;  %v3220_v33 = vld [vmem:[%s3858_s1 + $0x200] sm:$0xff]  }
  0x71   : > { %v1932_v0 = vrot.slane %v1931_v54, 4 }
  0x72   : > { %2900 = vmatpush3.bf16.msra.mxu1 %v3190_v15  ;;  %v3207_v15 = vld [vmem:[%s3858_s1 + $0x1d8] sm:$0xff]  }
  0x73   : > { %2994 = vmatpush3.bf16.msra.mxu0 %v3189_v51  ;;  %2901 = vmatprep.subr.bf16.mxu1 %v3193_v18  ;;  %v3214_v51 = vld [vmem:[#allocation2 + $0x40] ss:$8 sps:$4 sm:$0xff]  }
  0x74   : > { %2995 = vmatprep.subr.bf16.mxu0 %v3191_v40 }
  0x76   : > { %2902 = vmatpush3.bf16.msra.mxu1 %v3193_v18  ;;  %v1886_v18 = vshll.u32 %v1842_v35, 16 }
  0x77   : > { %2996 = vmatpush3.bf16.msra.mxu0 %v3191_v40  ;;  %2903 = vmatprep.subr.bf16.mxu1 %v3196_v24  ;;  %v1883_v40 = vshrl.u32 %v1842_v35, 16  ;;  %v3777_v35 = vld [vmem:[#allocation2 + $0x4c] sm:$0x1] }
  0x78   : > { %2997 = vmatprep.subr.bf16.mxu0 %v3194_v9  ;;  %v1888_v52 = vrot.slane %v1886_v18, 5  ;;  %v1962_v48 = vshll.u32 %v3777_v35, 16 }
  0x79   : > { %v1885_v50 = vrot.slane %v1883_v40, 4 }
  0x7a   : > { %2904 = vmatpush3.bf16.msra.mxu1 %v3196_v24  ;;  %v1914_v24 = vshll.u32 %v1846_v46, 16  ;;  %v1964_v14 = vrot.slane %v1962_v48, 5 }
  0x7b   : > { %2998 = vmatpush3.bf16.msra.mxu0 %v3194_v9  ;;  %2913 = vmatprep.subr.bf16.mxu1 %v3198_v61  ;;  %v1911_v9 = vshrl.u32 %v1846_v46, 16  ;;  %v1889_v3 = vor.u32 %v1888_v52, %v1885_v50  ;;  %v1955_v46 = vrot.slane %v1953_v10, 4 }
  0x7c   : > { %2999 = vmatprep.subr.bf16.mxu0 %v3197_v62 }
  0x7d   : > { %2906 = vmatmul.mubr.bf16.vlgmr.msra.gmra.mrb[0].mxu1 %v2532_v55  ;;  %v3206_v55 = vld [vmem:[%s3858_s1 + $0xd8] sm:$0xff]   ;;  %v1913_v31 = vrot.slane %v1911_v9, 4  ;;  %v3222_v9 = vld [vmem:[#allocation2 + $0x28] ss:$8 sps:$4 sm:$0xff]  }
  0x7e   : > { %2914 = vmatpush3.bf16.msra.mxu1 %v3198_v61  ;;  %2909 = vmatprep.mubr.bf16.mxu1 %v2533_v5  ;;  %v1916_v61 = vrot.slane %v1914_v24, 5  ;;  %v1906_v5 = vshll.u32 %v3753_v6, 16 }
  0x7f   : > { %3000 = vmatpush3.bf16.msra.mxu0 %v3197_v62  ;;  %2915 = vmatprep.subr.bf16.mxu1 %v3202_v58  ;;  %v3755_v62 = vld [vmem:[#allocation2 + $0x34] sm:$0x1] }
  0x80   : > { %3009 = vmatprep.subr.bf16.mxu0 %v3200_v38  ;;  %v1908_v57 = vrot.slane %v1906_v5, 5  ;;  %v2162_v50 = vrot.slane %v3755_v62, 5 }
  0x82   : > { %3002 = vmatmul.mubr.bf16.vlgmr.msra.gmra.mrb[0].mxu0 %v3201_v19  ;;  %2916 = vmatpush3.bf16.msra.mxu1 %v3202_v58  ;;  %v1917_v58 = vor.u32 %v1916_v61, %v1913_v31  ;;  %v3216_v19 = vld [vmem:[%s3858_s1 + $0xf8] sm:$0xff]  }
  0x83   : > { %3010 = vmatpush3.bf16.msra.mxu0 %v3200_v38  ;;  %2917 = vmatprep.subr.bf16.mxu1 %v3204_v25  ;;  %v1920_v38 = vshll.u32 %v3755_v62, 16 }
  0x84   : > { %3011 = vmatprep.subr.bf16.mxu0 %v3203_v45  ;;  %3005 = vmatprep.mubr.bf16.mxu0 %v3212_v26  ;;  %v1894_v26 = vrot.slane %v1892_v39, 5  ;;  %v1918_v32 = vrot.slane %v1917_v58, 4  ;;  %v2691_v39 = vrot.slane %v2120_v59, 9  ;;  %v2150_v58 = vrot.slane %v3706_v42, 5 }
  0x85   : > { %2910 = vmatmul.mubr.bf16.gmra.mrb[4].mxu1 %v2534_v21  ;;  %v1904_v21 = vrot.slane %v1903_v7, 4  ;;  %v1922_v22 = vrot.slane %v1920_v38, 5  ;;  %v2146_v7 = vrot.slane %v3704_v27, 5 }
  0x86   : > { %2918 = vmatpush3.bf16.msra.mxu1 %v3204_v25  ;;  %2929 = vmatprep.mubr.bf16.mxu1 %v3218_v43  ;;  %v3215_v25 = vld [vmem:[%s3858_s1 + $0x1f0] sm:$0xff]   ;;  %v1936_v43 = vrot.slane %v1934_v23, 5 }
  0x87   : > { %3012 = vmatpush3.bf16.msra.mxu0 %v3203_v45  ;;  %2919 = vmatprep.subr.bf16.mxu1 %v3206_v55  ;;  %v1890_v45 = vrot.slane %v1889_v3, 4  ;;  %v1909_v18 = vsel %vm3395_vm8, %v1904_v21, %v1908_v57  ;;  %v1923_v24 = vsel %vm3395_vm8, %v1918_v32, %v1922_v22  ;;  %v3223_v3 = vld [vmem:[#allocation2 + $0x38] ss:$8 sps:$4 sm:$0xff]   ;;  %v2147_v27 = vsel %vm3581_vm11, %v2691_v39, %v2146_v7 }
  0x88   : > { %3013 = vmatprep.subr.bf16.mxu0 %v3205_v8  ;;  %v2174_v21 = vrot.slane %v3777_v35, 5  ;;  %v3229_v22 = vld [vmem:[%s3858_s1 + $0x238] sm:$0xff]  }
  0x89   : > { %v1895_v40 = vsel %vm3395_vm8, %v1890_v45, %v1894_v26  ;;  %v2127_v45 = vld [vmem:[#allocation2 + $0x48] sm:$0xe] }
  0x8a   : > { %2920 = vmatpush3.bf16.msra.mxu1 %v3206_v55  ;;  %3006 = vmatmul.mubr.bf16.gmra.mrb[4].mxu0 %v3214_v51  ;;  %v3775_v55 = vld [vmem:[#allocation2 + $0x44] sm:$0x1]  ;;  %v3219_v51 = vld [vmem:[#allocation2 + $0x18] ss:$8 sps:$4 sm:$0xff]   ;;  %v2680_v60 = vcombine.low %v1895_v40, %v1909_v18  ;;  %v2698_v32 = vrot.slane %v2127_v45, 9 }
  0x8b   : > { %3014 = vmatpush3.bf16.msra.mxu0 %v3205_v8  ;;  %2921 = vmatprep.subr.bf16.mxu1 %v3208_v12  ;;  %v1941_v8 = vrot.slane %v1939_v16, 4  ;;  %v1948_v63 = vshll.u32 %v3775_v55, 16  ;;  %v3225_v16 = vld [vmem:[%s3858_s1 + $0x218] sm:$0xff]   ;;  %v2170_v26 = vrot.slane %v3775_v55, 5 }
  0x8c   : > { %3015 = vmatprep.subr.bf16.mxu0 %v3207_v15  ;;  %3025 = vmatprep.mubr.bf16.mxu0 %v2679_v28  ;;  %v1937_v28 = vsel %vm3395_vm8, %v1932_v0, %v1936_v43  ;;  %v2122_v0 = vld [vmem:[#allocation2 + $0x20] sm:$0xe]  ;;  %v2123_v43 = vld [vmem:[#allocation2 + $0x28] sm:$0xe]  ;;  %v2175_v55 = vsel %vm3581_vm11, %v2698_v32, %v2174_v21 }
  0x8d   : > { %v1945_v37 = vor.u32 %v1944_v30, %v1941_v8  ;;  %v2681_v31 = vcombine.low %v1923_v24, %v1937_v28  ;;  %v1950_v61 = vrot.slane %v1948_v63, 5  ;;  %v2693_v35 = vrot.slane %v2122_v0, 9 }
  0x8e   : > { %2922 = vmatpush3.bf16.msra.mxu1 %v3208_v12  ;;  %v1958_v12 = vrot.slane %v1956_v13, 5  ;;  %v3227_v13 = vld [vmem:[%s3858_s1 + $0x228] sm:$0xff]   ;;  %v2154_v30 = vrot.slane %v3751_v49, 5 }
  0x8f   : > { %3016 = vmatpush3.bf16.msra.mxu0 %v3207_v15  ;;  %2923 = vmatprep.subr.bf16.mxu1 %v3210_v56  ;;  %v2125_v15 = vld [vmem:[#allocation2 + $0x38] sm:$0xe]  ;;  %v1946_v4 = vrot.slane %v1945_v37, 4 }
  0x90   : > { %3017 = vmatprep.subr.bf16.mxu0 %v3209_v47  ;;  %v1959_v53 = vor.u32 %v1958_v12, %v1955_v46  ;;  %v2696_v52 = vrot.slane %v2125_v15, 9  ;;  %v2694_v46 = vrot.slane %v2123_v43, 9  ;;  %v2158_v12 = vrot.slane %v3753_v6, 5 }
  0x91   : > { %v1951_v54 = vsel %vm3395_vm8, %v1946_v4, %v1950_v61  ;;  %v2728_v61 = vld [vmem:[%s3860_s3] ss:$0 sm:$0xff] }
  0x92   : > { %2924 = vmatpush3.bf16.msra.mxu1 %v3210_v56  ;;  %v2695_v56 = vrot.slane %v2124_v36, 9  ;;  %v1960_v29 = vrot.slane %v1959_v53, 4  ;;  %v2167_v1 = vsel %vm3581_vm11, %v2696_v52, %v2166_v41  ;;  %v2159_v36 = vsel %vm3581_vm11, %v2694_v46, %v2158_v12  ;;  %v2727_v52 = vld [vmem:[%s3859_s2] ss:$0 sm:$0xff] }
  0x93   : > { %3018 = vmatpush3.bf16.msra.mxu0 %v3209_v47  ;;  %2925 = vmatprep.subr.bf16.mxu1 %v3213_v2  ;;  %v3221_v47 = vld [vmem:[%s3858_s1 + $0x208] sm:$0xff]  }
  0x94   : > { %3019 = vmatprep.subr.bf16.mxu0 %v3211_v44  ;;  %v2163_v62 = vsel %vm3581_vm11, %v2695_v56, %v2162_v50  ;;  %v1965_v23 = vsel %vm3395_vm8, %v1960_v29, %v1964_v14 }
  0x95   : > { %v2717_v38 = vcombine.low %v2163_v62, %v2167_v1  ;;  %v2682_v20 = vcombine.low %v1951_v54, %v1965_v23 }
  0x96   : > { %2926 = vmatpush3.bf16.msra.mxu1 %v3213_v2  ;;  %v2121_v2 = vld [vmem:[#allocation2 + $0x18] sm:$0xe] }
  0x97   : > { %3020 = vmatpush3.bf16.msra.mxu0 %v3211_v44  ;;  %2927 = vmatprep.subr.bf16.mxu1 %v3216_v19  ;;  %v3224_v44 = vld [vmem:[%s3858_s1 + $0x210] sm:$0xff]   ;;  %v2692_v5 = vrot.slane %v2121_v2, 9 }
  0x98   : > { %3021 = vmatprep.subr.bf16.mxu0 %v3215_v25 }
  0x99   : > { %v2151_v42 = vsel %vm3581_vm11, %v2692_v5, %v2150_v58 }
  0x9a   : > { %2928 = vmatpush3.bf16.msra.mxu1 %v3216_v19  ;;  %v2715_v10 = vcombine.low %v2147_v27, %v2151_v42  ;;  %v3228_v19 = vld [vmem:[%s3858_s1 + $0x230] sm:$0xff]  }
  0x9b   : > { %3022 = vmatpush3.bf16.msra.mxu0 %v3215_v25  ;;  %3057 = vmatprep.subr.bf16.mxu1 %v3220_v33  ;;  %v2126_v25 = vld [vmem:[#allocation2 + $0x40] sm:$0xe] }
  0x9c   : > { %3023 = vmatprep.subr.bf16.mxu0 %v3217_v34  ;;  %v2697_v57 = vrot.slane %v2126_v25, 9 }
  0x9d   : > { %2930 = vmatmul.mubr.bf16.vlgmr.msra.gmra.mrb[0].mxu1 %v3219_v51 }
  0x9e   : > { %3065 = vmatpush3.bf16.msra.mxu1 %v3220_v33  ;;  %2933 = vmatprep.mubr.bf16.mxu1 %v3222_v9  ;;  %v2171_v8 = vsel %vm3581_vm11, %v2697_v57, %v2170_v26 }
  0x9f   : > { %3024 = vmatpush3.bf16.msra.mxu0 %v3217_v34  ;;  %3058 = vmatprep.subr.bf16.mxu1 %v3221_v47  ;;  %v2155_v34 = vsel %vm3581_vm11, %v2693_v35, %v2154_v30 }
  0xa0   : > { %3033 = vmatprep.subr.bf16.mxu0 %v3220_v33  ;;  %v2716_v15 = vcombine.low %v2155_v34, %v2159_v36 }
  0xa2   : > { %3026 = vmatmul.mubr.bf16.vlgmr.msra.gmra.mrb[0].mxu0 %v2680_v60  ;;  %3066 = vmatpush3.bf16.msra.mxu1 %v3221_v47 }
  0xa3   : > { %3034 = vmatpush3.bf16.msra.mxu0 %v3220_v33  ;;  %3029 = vmatprep.mubr.bf16.mxu0 %v2681_v31  ;;  %v2718_v33 = vcombine.low %v2171_v8, %v2175_v55 }
  0xa4   : > { %3035 = vmatprep.subr.bf16.mxu0 %v3221_v47  ;;  %3059 = vmatprep.subr.bf16.mxu1 %v3224_v44 }
  0xa5   : > { %2934 = vmatmul.mubr.bf16.gmra.mrb[4].mxu1 %v3223_v3 }
  0xa6   : > { %3067 = vmatpush3.bf16.msra.mxu1 %v3224_v44  ;;  %3053 = vmatprep.mubr.bf16.mxu1 %v2717_v38 }
  0xa7   : > { %3036 = vmatpush3.bf16.msra.mxu0 %v3221_v47  ;;  %3060 = vmatprep.subr.bf16.mxu1 %v3225_v16 }
  0xa8   : > { %3037 = vmatprep.subr.bf16.mxu0 %v3224_v44 }
  0xaa   : > { %3030 = vmatmul.mubr.bf16.gmra.mrb[4].mxu0 %v2682_v20  ;;  %3068 = vmatpush3.bf16.msra.mxu1 %v3225_v16 }
  0xab   : > { %3038 = vmatpush3.bf16.msra.mxu0 %v3224_v44  ;;  %3061 = vmatprep.subr.bf16.mxu1 %v3226_v17 }
  0xac   : > { %3039 = vmatprep.subr.bf16.mxu0 %v3225_v16  ;;  %3049 = vmatprep.mubr.bf16.mxu0 %v2715_v10 }
  0xae   : > { %3069 = vmatpush3.bf16.msra.mxu1 %v3226_v17 }
  0xaf   : > { %3040 = vmatpush3.bf16.msra.mxu0 %v3225_v16  ;;  %3062 = vmatprep.subr.bf16.mxu1 %v3227_v13 }
  0xb0   : > { %3041 = vmatprep.subr.bf16.mxu0 %v3226_v17 }
  0xb2   : > { %3070 = vmatpush3.bf16.msra.mxu1 %v3227_v13 }
  0xb3   : > { %3042 = vmatpush3.bf16.msra.mxu0 %v3226_v17  ;;  %3063 = vmatprep.subr.bf16.mxu1 %v3228_v19 }
  0xb4   : > { %3043 = vmatprep.subr.bf16.mxu0 %v3227_v13 }
  0xb6   : > { %3071 = vmatpush3.bf16.msra.mxu1 %v3228_v19 }
  0xb7   : > { %3044 = vmatpush3.bf16.msra.mxu0 %v3227_v13  ;;  %3064 = vmatprep.subr.bf16.mxu1 %v3229_v22 }
  0xb8   : > { %3045 = vmatprep.subr.bf16.mxu0 %v3228_v19 }
  0xba   : > { %3072 = vmatpush3.bf16.msra.mxu1 %v3229_v22 }
  0xbb   : > { %3046 = vmatpush3.bf16.msra.mxu0 %v3228_v19 }
  0xbc   : > { %3047 = vmatprep.subr.bf16.mxu0 %v3229_v22 }
  0xbd   : > { %3054 = vmatmul.mubr.bf16.vlgmr.msra.gmra.mrb[8].mxu1 %v2718_v33 }
  0xbf   : > { %3048 = vmatpush3.bf16.msra.mxu0 %v3229_v22 }
  0xc2   : > { %3050 = vmatmul.mubr.bf16.vlgmr.msra.gmra.mrb[0].mxu0 %v2716_v15 }
 0x170   : > { %v2931_v51 = vpop.f32.mrb[0].mxu1 }
 0x171   : > { %v1136_v49 = vpop.f32.mrb[1].mxu1 }
 0x172   : > { %v2932_v40 = vpop.f32.mrb[2].mxu1 }
 0x173   : > { %v1139_v18 = vpop.f32.mrb[3].mxu1 }
 0x178   : > { %v2935_v6 = vpop.f32.mrb[4].mxu1 }
 0x179   : > { %v1152_v63 = vpop.f32.mrb[5].mxu1 }
 0x17a   : > { %v2936_v48 = vpop.f32.mrb[6].mxu1 }
 0x17b   : > { %v1155_v9 = vpop.f32.mrb[7].mxu1 }
 0x17d   : > { %v3031_v24 = vpop.f32.mrb[4].mxu0 }
 0x17e   : > { %v3077_v28 = vadd.f32 %v3031_v24, %v2935_v6  ;;  %v2097_v37 = vpop.f32.mrb[5].mxu0 }
 0x17f   : > { %v3079_v53 = vadd.f32 %v2097_v37, %v1152_v63  ;;  %v3032_v47 = vpop.f32.mrb[6].mxu0 }
 0x180   : > { %v3081_v11 = vadd.f32 %v3032_v47, %v2936_v48  ;;  %v2100_v56 = vpop.f32.mrb[7].mxu0 }
 0x181   : > { %v3083_v50 = vadd.f32 %v2100_v56, %v1155_v9 }
 0x190   : > { %v3055_v41 = vpop.f32.mrb[8].mxu1 }
 0x191   : > { %v3078_v60 = vadd.f32 %v3077_v28, %v3055_v41  ;;  %v2307_v31 = vpop.f32.mrb[9].mxu1 }
 0x192   : > { %v3080_v14 = vadd.f32 %v3079_v53, %v2307_v31  ;;  %v3056_v59 = vpop.f32.mrb[10].mxu1 }
 0x193   : > { %v2343_v2 = vmul.f32 %v3078_v60, %v2727_v52  ;;  %v3082_v4 = vadd.f32 %v3081_v11, %v3056_v59  ;;  %v2310_v29 = vpop.f32.mrb[11].mxu1 }
 0x194   : > { %v2341_v62 = vmul.f32 %v3080_v14, %v2727_v52  ;;  %v3084_v1 = vadd.f32 %v3083_v50, %v2310_v29 }
 0x195   : > { %v3051_v44 = vpop.f32.mrb[0].mxu0  ;;  %v2358_v3 = vadd.f32 %v2728_v61, %v2343_v2  ;;  %v2344_v39 = vmul.f32 %v3082_v4, %v2727_v52 }
 0x196   : > { %v3073_v7 = vadd.f32 %v3051_v44, %v2931_v51  ;;  %v2291_v5 = vpop.f32.mrb[1].mxu0  ;;  %v2356_v58 = vadd.f32 %v2728_v61, %v2341_v62  ;;  %v2342_v38 = vmul.f32 %v3084_v1, %v2727_v52 }
 0x197   : > { %v3074_v54 = vadd.f32 %v2291_v5, %v1136_v49  ;;  %v3052_v23 = vpop.f32.mrb[2].mxu0  ;;  %v2359_v16 = vadd.f32 %v2728_v61, %v2344_v39  ;;  %v2366_v10 = vmax.f32 %v2358_v3, 0.0 }
 0x198   : > { %v2339_v27 = vmul.f32 %v3073_v7, %v2727_v52  ;;  %v3075_v42 = vadd.f32 %v3052_v23, %v2932_v40  ;;  %v2294_v20 = vpop.f32.mrb[3].mxu0  ;;  %v2357_v17 = vadd.f32 %v2728_v61, %v2342_v38  ;;  %v2364_v26 = vmax.f32 %v2356_v58, 0.0 }
 0x199   : > { %v2337_v13 = vmul.f32 %v3074_v54, %v2727_v52  ;;  %v2367_v19 = vmax.f32 %v2359_v16, 0.0  ;;  %v3076_v25 = vadd.f32 %v2294_v20, %v1139_v18 }
 0x19a   : > { %v2354_v45 = vadd.f32 %v2728_v61, %v2339_v27  ;;  %v2340_v21 = vmul.f32 %v3075_v42, %v2727_v52  ;;  %v2365_v57 = vmax.f32 %v2357_v17, 0.0 }
 0x19b   : > { %v2352_v32 = vadd.f32 %v2728_v61, %v2337_v13  ;;  %v2371_v22 = vmax.f32 %v2366_v10, %v2367_v19  ;;  %v2338_v0 = vmul.f32 %v3076_v25, %v2727_v52 }
 0x19c   : > { %v2355_v43 = vadd.f32 %v2728_v61, %v2340_v21  ;;  %v2370_v8 = vmax.f32 %v2364_v26, %v2365_v57  ;;  %v2362_v35 = vmax.f32 %v2354_v45, 0.0 }
 0x19d   : > { %2375 = vst [vmem:[#allocation3 + $0x18] sm:$0xff] %v2371_v22  ;;  %v2353_v55 = vadd.f32 %v2728_v61, %v2338_v0  ;;  %v2360_v46 = vmax.f32 %v2352_v32, 0.0 }
 0x19e   : > { %v2363_v30 = vmax.f32 %v2355_v43, 0.0  ;;  %2374 = vst [vmem:[#allocation3 + $0x10] sm:$0xff] %v2370_v8 }
 0x19f   : > { %v2361_v12 = vmax.f32 %v2353_v55, 0.0 }
 0x1a0   : > { %v2369_v33 = vmax.f32 %v2362_v35, %v2363_v30 }
 0x1a1   : > { %v2368_v34 = vmax.f32 %v2360_v46, %v2361_v12 }
 0x1a2   : > { %2373 = vst [vmem:[#allocation3 + $0x8] sm:$0xff] %v2369_v33 }
 0x1a3   : > { %2372 = vst [vmem:[#allocation3] sm:$0xff] %v2368_v34 }
 0x1a4   : > { %v2382_v36 = vld [vmem:[#allocation3 + $0x18] ss:$2 sm:$0xf]  ;;  %v2390_v15 = vld [vmem:[#allocation3 + $0x19] ss:$2 sm:$0xf] }
 0x1a5   : > { %v2394_v51 = vmax.f32 %v2382_v36, %v2390_v15  ;;  %v2380_v49 = vld [vmem:[#allocation3 + $0x10] ss:$2 sm:$0xf]  ;;  %v2388_v40 = vld [vmem:[#allocation3 + $0x11] ss:$2 sm:$0xf] }
 0x1a6   : > { %v2393_v18 = vmax.f32 %v2380_v49, %v2388_v40 }
 0x1a7   : > { %v2398_v6 = vpack.c.bf16 %v2394_v51, %v2394_v51 }
 0x1a8   : > { %v2397_v63 = vpack.c.bf16 %v2393_v18, %v2393_v18 }
 0x1a9   : > { %v2378_v48 = vld [vmem:[#allocation3 + $0x8] ss:$2 sm:$0xf]  ;;  %v2386_v9 = vld [vmem:[#allocation3 + $0x9] ss:$2 sm:$0xf] }
 0x1aa   : > { %2402 = vst [vmem:[%s197_s29 + $0x6] sm:$0x3] %v2398_v6  ;;  %v2392_v24 = vmax.f32 %v2378_v48, %v2386_v9  ;;  %v2376_v28 = vld [vmem:[#allocation3] ss:$2 sm:$0xf] }
 0x1ab   : > { %v2384_v37 = vld [vmem:[#allocation3 + $0x1] ss:$2 sm:$0xf]  ;;  %2401 = vst [vmem:[%s197_s29 + $0x4] sm:$0x3] %v2397_v63 }
 0x1ac   : > { %v2391_v53 = vmax.f32 %v2376_v28, %v2384_v37  ;;  %v2396_v47 = vpack.c.bf16 %v2392_v24, %v2392_v24 }
 0x1ae   : > { %v2395_v11 = vpack.c.bf16 %v2391_v53, %v2391_v53  ;;  %2400 = vst [vmem:[%s197_s29 + $0x2] sm:$0x3] %v2396_v47 }
 0x1b0   : > { %2399 = vst [vmem:[%s197_s29] sm:$0x3] %v2395_v11 }
 0x1b1 PF: > { %s14_s15 = sadd.s32 1, %s3236_s15  }
 0x1b2   : > { %p11_p4 = scmp.ge.s32.totalorder %s14_s15, 4  }
 0x1b4   :  { %13 = sbr.rel (!%p11_p4) target bundleno = 1 (0x1), region = 83 }

// kernel: vgga_forward.5
= control target key start
LH: loop header
LB: loop body
LE: loop exit
PB: predicated region body
PF: predicated region fallthrough
CT: control target
= control target key end

     0   :  { %s3268_s15 = smov 0   ;;  %s3864_s0 = inlined_call_operand.vmem [shape: bf16[2,8,8,128], index: 0, kind: input, shape index: {}]   ;;  %s3865_s1 = inlined_call_operand.vmem [shape: bf16[9,128,128], index: 1, kind: input, shape index: {}]   ;;  %s3866_s2 = inlined_call_operand.vmem [shape: f32[1,128], index: 2, kind: input, shape index: {}]   ;;  %s3867_s3 = inlined_call_operand.vmem [shape: f32[1,128], index: 3, kind: input, shape index: {}]   ;;  %s3868_s4 = inlined_call_operand.vmem [shape: bf16[2,8,8,128], index: 4, kind: output, shape index: {}]  }
   0x1 LB: > { %s2439_s16 = sadd.s32 4294967295, %s3240_s15   ;;  %p2443_p0 = scmp.ge.s32.totalorder %s3240_s15, 1  ;;  %s3240_s15 = sphi %s3268_s15, %s14_s15  }
   0x2   : > { %p162_p1 = scmp.lt.s32.totalorder %s3240_s15, 3 }
   0x4   : > { %p163_p2 = pnand %p2443_p0, %p162_p1 }
   0x5   : > { %v3150_v0 = vld [vmem:[%s3865_s1 + $0x40] sm:$0xff] (!%p163_p2)   ;;  %v3152_v2 = vld [vmem:[%s3865_s1 + $0x48] sm:$0xff] (!%p163_p2)   ;;  %p3287_p3 = scmp.lt.s32.totalorder (!%p163_p2), %s2439_s16, 1  ;;  %v3242_v3 = vmov (!%p163_p2), 0   ;;  %v3154_v5 = vld [vmem:[%s3865_s1 + $0x50] sm:$0xff] (!%p163_p2)   ;;  %vm308_vm0 = vcmask (!%p163_p2), 1043456  }
   0x6   : > { %166 = sbr.rel (%p163_p2) target bundleno = 420 (0x1a4), region = 36  ;;  %v3151_v1 = vld [vmem:[%s3865_s1 + $0x100] sm:$0xff] (!%p163_p2)   ;;  %2845 = vmatprep.subr.bf16.mxu1 (!%p163_p2), %v3150_v0  ;;  %199 = vst [vmem:[#allocation2] sm:$0xf] (!%p163_p2), %v3242_v3  ;;  %200 = vst [vmem:[#allocation2 + $0x4] sm:$0x1] (!%p163_p2), %v3242_v3 }
   0x7   : > { %201 = vst [vmem:[#allocation2 + $0x8] sm:$0xf] (!%p163_p2), %v3242_v3  ;;  %202 = vst [vmem:[#allocation2 + $0xc] sm:$0x1] (!%p163_p2), %v3242_v3  ;;  %2941 = vmatprep.subr.bf16.mxu0 (!%p163_p2), %v3151_v1  ;;  %2846 = vmatpush3.bf16.msra.mxu1 (!%p163_p2), %v3150_v0  ;;  %v3153_v4 = vld [vmem:[%s3865_s1 + $0x108] sm:$0xff] (!%p163_p2)   ;;  %v3155_v6 = vld [vmem:[%s3865_s1 + $0x110] sm:$0xff] (!%p163_p2)  }
   0x8   : > { %203 = vst [vmem:[#allocation2 + $0x10] sm:$0xf] (!%p163_p2), %v3242_v3  ;;  %204 = vst [vmem:[#allocation2 + $0x14] sm:$0x1] (!%p163_p2), %v3242_v3  ;;  %2942 = vmatpush3.bf16.msra.mxu0 (!%p163_p2), %v3151_v1  ;;  %2847 = vmatprep.subr.bf16.mxu1 (!%p163_p2), %v3152_v2  ;;  %v3156_v7 = vld [vmem:[%s3865_s1 + $0x58] sm:$0xff] (!%p163_p2)   ;;  %v3158_v9 = vld [vmem:[%s3865_s1 + $0x60] sm:$0xff] (!%p163_p2)  }
   0x9   : > { %205 = vst [vmem:[#allocation2 + $0x18] sm:$0xf] (!%p163_p2), %v3242_v3  ;;  %206 = vst [vmem:[#allocation2 + $0x1c] sm:$0x1] (!%p163_p2), %v3242_v3  ;;  %2943 = vmatprep.subr.bf16.mxu0 (!%p163_p2), %v3153_v4  ;;  %v3157_v8 = vld [vmem:[%s3865_s1 + $0x118] sm:$0xff] (!%p163_p2)   ;;  %v3159_v10 = vld [vmem:[%s3865_s1 + $0x120] sm:$0xff] (!%p163_p2)  }
   0xa   : > { %207 = vst [vmem:[#allocation2 + $0x20] sm:$0xf] (!%p163_p2), %v3242_v3  ;;  %208 = vst [vmem:[#allocation2 + $0x24] sm:$0x1] (!%p163_p2), %v3242_v3  ;;  %v3160_v11 = vld [vmem:[%s3865_s1 + $0x68] sm:$0xff] (!%p163_p2)   ;;  %vm314_vm2 = vcmask (!%p163_p2), 1040384  }
   0xb   : > { %209 = vst [vmem:[#allocation2 + $0x28] sm:$0xf] (!%p163_p2), %v3242_v3  ;;  %210 = vst [vmem:[#allocation2 + $0x2c] sm:$0x1] (!%p163_p2), %v3242_v3  ;;  %2848 = vmatpush3.bf16.msra.mxu1 (!%p163_p2), %v3152_v2  ;;  %vm309_vm1 = vsmask.f32 (!%p163_p2), 7938 }
   0xc   : > { %211 = vst [vmem:[#allocation2 + $0x30] sm:$0xf] (!%p163_p2), %v3242_v3  ;;  %212 = vst [vmem:[#allocation2 + $0x34] sm:$0x1] (!%p163_p2), %v3242_v3  ;;  %2944 = vmatpush3.bf16.msra.mxu0 (!%p163_p2), %v3153_v4  ;;  %2849 = vmatprep.subr.bf16.mxu1 (!%p163_p2), %v3154_v5  ;;  %v3161_v13 = vld [vmem:[%s3865_s1 + $0x128] sm:$0xff] (!%p163_p2)   ;;  %v3162_v16 = vld [vmem:[%s3865_s1 + $0x70] sm:$0xff] (!%p163_p2)  }
   0xd   : > { %213 = vst [vmem:[#allocation2 + $0x38] sm:$0xf] %v3242_v3  ;;  %214 = vst [vmem:[#allocation2 + $0x3c] sm:$0x1] %v3242_v3  ;;  %s3879_s16 = smov (!%p3287_p3, %s2439_s16), 1  ;;  %2945 = vmatprep.subr.bf16.mxu0 %v3155_v6  ;;  %v3163_v26 = vld [vmem:[%s3865_s1 + $0x130] sm:$0xff]  }
   0xe   : > { %215 = vst [vmem:[#allocation2 + $0x40] sm:$0xf] %v3242_v3  ;;  %216 = vst [vmem:[#allocation2 + $0x44] sm:$0x1] %v3242_v3  ;;  %s2712_s8 = sshll.u32 %s3879_s16, 5  ;;  %v3164_v32 = vld [vmem:[%s3865_s1 + $0x78] sm:$0xff]  }
   0xf   : > { %217 = vst [vmem:[#allocation2 + $0x48] sm:$0xf] %v3242_v3  ;;  %218 = vst [vmem:[#allocation2 + $0x4c] sm:$0x1] %v3242_v3  ;;  %2850 = vmatpush3.bf16.msra.mxu1 %v3154_v5  ;;  %s3324_s17 = scalar_lea.vmem %s3864_s0, %s2712_s8  ;;  %vm315_vm3 = vsmask.f32 256  ;;  %s197_s7 = scalar_lea.vmem %s3868_s4, %s2712_s8 }
  0x10   : > { %2946 = vmatpush3.bf16.msra.mxu0 %v3155_v6  ;;  %2851 = vmatprep.subr.bf16.mxu1 %v3156_v7  ;;  %v219_v12 = vld [vmem:[%s3324_s17] sm:$0xf]  ;;  %v311_v17 = vld [vmem:[#allocation2 + $0x8] sm:$0xf]  ;;  %vm3338_vm4 = vmand %vm308_vm0, %vm309_vm1  ;;  %vm394_vm6 = vsmask.f32 3328 }
  0x11   : > { %2947 = vmatprep.subr.bf16.mxu0 %v3157_v8  ;;  %v228_v14 = vshrl.u32 %v219_v12, 16  ;;  %v231_v15 = vshll.u32 %v219_v12, 16  ;;  %v3336_v18 = vld [vmem:[#allocation2] sm:$0xf]  ;;  %v317_v21 = vld [vmem:[#allocation2 + $0xc] sm:$0x1]  ;;  %vm3344_vm5 = vmand %vm314_vm2, %vm315_vm3 }
  0x12   : > { %v3342_v22 = vld [vmem:[#allocation2 + $0x4] sm:$0x1]  ;;  %v398_v24 = vshrl.u32 %v3336_v18, 16  ;;  %v401_v25 = vshll.u32 %v3336_v18, 16  ;;  %v3165_v36 = vld [vmem:[%s3865_s1 + $0x138] sm:$0xff]   ;;  %v3176_v23 = vld [vmem:[%s3865_s1 + $0x28] sm:$0xff]  }
  0x13   : > { %2852 = vmatpush3.bf16.msra.mxu1 %v3156_v7  ;;  %v230_v19 = vrot.slane %v228_v14, 7  ;;  %v220_v29 = vld [vmem:[%s3324_s17 + $0x4] sm:$0xf]  ;;  %v407_v35 = vshll.u32 %v3342_v22, 16  ;;  %vm395_vm7 = vsmask.f32 7440 }
  0x14   : > { %2948 = vmatpush3.bf16.msra.mxu0 %v3157_v8  ;;  %2853 = vmatprep.subr.bf16.mxu1 %v3158_v9  ;;  %v236_v30 = vshrl.u32 %v220_v29, 16  ;;  %v239_v31 = vshll.u32 %v220_v29, 16  ;;  %v400_v37 = vrot.slane %v398_v24, 4  ;;  %v403_v38 = vrot.slane %v401_v25, 5  ;;  %v221_v40 = vld [vmem:[%s3324_s17 + $0x8] sm:$0xf]  ;;  %vm3401_vm8 = vmor %vm394_vm6, %vm395_vm7 }
  0x15   : > { %2949 = vmatprep.subr.bf16.mxu0 %v3159_v10  ;;  %v233_v27 = vor.u32 %v231_v15, %v230_v19  ;;  %v234_v28 = vrot.slane %v230_v19, 4  ;;  %v320_v41 = vld [vmem:[#allocation2 + $0x10] sm:$0xf]  ;;  %v323_v42 = vld [vmem:[#allocation2 + $0x14] sm:$0x1]  ;;  %v244_v43 = vshrl.u32 %v221_v40, 16 }
  0x16   : > { %v238_v39 = vrot.slane %v236_v30, 7  ;;  %v247_v44 = vshll.u32 %v221_v40, 16  ;;  %v3369_v45 = vld [vmem:[%s3865_s1] sm:$0xff]   ;;  %v326_v48 = vld [vmem:[#allocation2 + $0x18] sm:$0xf]  ;;  %v3372_v50 = vrot.slane %v407_v35, 5  ;;  %v404_v56 = vor.u32 %v403_v38, %v400_v37 }
  0x17   : > { %2854 = vmatpush3.bf16.msra.mxu1 %v3158_v9  ;;  %v312_v33 = vsel %vm3338_vm4, %v233_v27, %v311_v17  ;;  %v318_v34 = vsel %vm3344_vm5, %v234_v28, %v317_v21  ;;  %v222_v49 = vld [vmem:[%s3324_s17 + $0xc] sm:$0xf]  ;;  %v3377_v51 = vld [vmem:[%s3865_s1 + $0x140] sm:$0xff]   ;;  %v246_v52 = vrot.slane %v244_v43, 7  ;;  %v329_v53 = vld [vmem:[#allocation2 + $0x1c] sm:$0x1] }
  0x18   : > { %2950 = vmatpush3.bf16.msra.mxu0 %v3159_v10  ;;  %2855 = vmatprep.subr.bf16.mxu1 %v3160_v11  ;;  %313 = vst [vmem:[#allocation2 + $0x8] sm:$0xf] %v312_v33  ;;  %319 = vst [vmem:[#allocation2 + $0xc] sm:$0x1] %v318_v34  ;;  %v241_v46 = vor.u32 %v239_v31, %v238_v39  ;;  %v242_v47 = vrot.slane %v238_v39, 4  ;;  %v252_v54 = vshrl.u32 %v222_v49, 16 }
  0x19   : > { %2951 = vmatprep.subr.bf16.mxu0 %v3161_v13  ;;  %v255_v55 = vshll.u32 %v222_v49, 16  ;;  %v249_v59 = vor.u32 %v247_v44, %v246_v52  ;;  %v250_v60 = vrot.slane %v246_v52, 4  ;;  %v332_v62 = vld [vmem:[#allocation2 + $0x20] sm:$0xf]  ;;  %v405_v5 = vrot.slane %v404_v56, 4 }
  0x1a   : > { %v321_v57 = vsel %vm3338_vm4, %v241_v46, %v320_v41  ;;  %v324_v58 = vsel %vm3344_vm5, %v242_v47, %v323_v42  ;;  %v254_v61 = vrot.slane %v252_v54, 7  ;;  %v335_v12 = vld [vmem:[#allocation2 + $0x24] sm:$0x1]  ;;  %vm816_vm9 = vcmask 1042432  }
  0x1b   : > { %2856 = vmatpush3.bf16.msra.mxu1 %v3160_v11  ;;  %322 = vst [vmem:[#allocation2 + $0x10] sm:$0xf] %v321_v57  ;;  %325 = vst [vmem:[#allocation2 + $0x14] sm:$0x1] %v324_v58  ;;  %v327_v2 = vsel %vm3338_vm4, %v249_v59, %v326_v48  ;;  %v330_v3 = vsel %vm3344_vm5, %v250_v60, %v329_v53  ;;  %v3175_v20 = vld [vmem:[%s3865_s1 + $0x160] sm:$0xff]   ;;  %vm817_vm10 = vcmask 1046532  }
  0x1c   : > { %2952 = vmatpush3.bf16.msra.mxu0 %v3161_v13  ;;  %2857 = vmatprep.subr.bf16.mxu1 %v3162_v16  ;;  %v257_v4 = vor.u32 %v255_v55, %v254_v61  ;;  %328 = vst [vmem:[#allocation2 + $0x18] sm:$0xf] %v327_v2  ;;  %331 = vst [vmem:[#allocation2 + $0x1c] sm:$0x1] %v330_v3  ;;  %v3230_v17 = vld [vmem:[%s3865_s1 + $0x220] sm:$0xff]  }
  0x1d   : > { %2953 = vmatprep.subr.bf16.mxu0 %v3163_v26  ;;  %vm3587_vm11 = vmor %vm816_vm9, %vm817_vm10 }
  0x1e   : > { %v333_v25 = vsel %vm3338_vm4, %v257_v4, %v332_v62 }
  0x1f   : > { %2858 = vmatpush3.bf16.msra.mxu1 %v3162_v16  ;;  %v3383_v63 = vld [vmem:[#allocation2 + $0x8] sm:$0xf]  ;;  %v3385_v0 = vld [vmem:[#allocation2 + $0xc] sm:$0x1]  ;;  %v258_v16 = vrot.slane %v254_v61, 4 }
  0x20   : > { %2954 = vmatpush3.bf16.msra.mxu0 %v3163_v26  ;;  %2859 = vmatprep.subr.bf16.mxu1 %v3164_v32  ;;  %v1175_v1 = vld [vmem:[#allocation2 + $0x8] sm:$0xf]  ;;  %v412_v6 = vshrl.u32 %v3383_v63, 16  ;;  %v415_v7 = vshll.u32 %v3383_v63, 16  ;;  %v421_v8 = vshll.u32 %v3385_v0, 16 }
  0x21   : > { %2955 = vmatprep.subr.bf16.mxu0 %v3165_v36  ;;  %v3395_v9 = vld [vmem:[#allocation2 + $0xc] sm:$0x1]  ;;  %v1192_v10 = vshrl.u32 %v1175_v1, 16  ;;  %v1195_v11 = vshll.u32 %v1175_v1, 16  ;;  %334 = vst [vmem:[#allocation2 + $0x20] sm:$0xf] %v333_v25  ;;  %v336_v30 = vsel %vm3344_vm5, %v258_v16, %v335_v12 }
  0x22   : > { %v414_v13 = vrot.slane %v412_v6, 4  ;;  %v417_v14 = vrot.slane %v415_v7, 5  ;;  %v1201_v15 = vshll.u32 %v3395_v9, 16  ;;  %v423_v19 = vrot.slane %v421_v8, 5  ;;  %v1177_v27 = vld [vmem:[#allocation2 + $0x10] sm:$0xf] }
  0x23   : > { %2860 = vmatpush3.bf16.msra.mxu1 %v3164_v32  ;;  %v1194_v21 = vrot.slane %v1192_v10, 4  ;;  %v1197_v24 = vrot.slane %v1195_v11, 5  ;;  %v3407_v28 = vld [vmem:[#allocation2 + $0x14] sm:$0x1]  ;;  %v3409_v29 = vld [vmem:[#allocation2 + $0x10] sm:$0xf] }
  0x24   : > { %2956 = vmatpush3.bf16.msra.mxu0 %v3165_v36  ;;  %2869 = vmatprep.subr.bf16.mxu1 %v3369_v45  ;;  %v418_v26 = vor.u32 %v417_v14, %v414_v13  ;;  %v1206_v32 = vshrl.u32 %v1177_v27, 16  ;;  %v1209_v33 = vshll.u32 %v1177_v27, 16  ;;  %v1215_v34 = vshll.u32 %v3407_v28, 16  ;;  %v3414_v35 = vld [vmem:[#allocation2 + $0x14] sm:$0x1] }
  0x25   : > { %2965 = vmatprep.subr.bf16.mxu0 %v3377_v51  ;;  %v1198_v31 = vor.u32 %v1197_v24, %v1194_v21  ;;  %337 = vst [vmem:[#allocation2 + $0x24] sm:$0x1] %v336_v30  ;;  %v410_v36 = vsel %vm3401_vm8, %v405_v5, %v3372_v50  ;;  %v426_v38 = vshrl.u32 %v3409_v29, 16  ;;  %v429_v39 = vshll.u32 %v3409_v29, 16  ;;  %v3421_v44 = vld [vmem:[#allocation2 + $0x18] sm:$0xf] }
  0x26   : > { %v419_v37 = vrot.slane %v418_v26, 4  ;;  %v1203_v41 = vrot.slane %v1201_v15, 5  ;;  %v1208_v42 = vrot.slane %v1206_v32, 4  ;;  %v1211_v43 = vrot.slane %v1209_v33, 5  ;;  %v3425_v47 = vld [vmem:[#allocation2 + $0x1c] sm:$0x1] }
  0x27   : > { %v1199_v40 = vrot.slane %v1198_v31, 4  ;;  %v428_v48 = vrot.slane %v426_v38, 4  ;;  %v431_v49 = vrot.slane %v429_v39, 5  ;;  %v435_v50 = vshll.u32 %v3414_v35, 16  ;;  %v1179_v56 = vld [vmem:[#allocation2 + $0x18] sm:$0xf] }
  0x28   : > { %v424_v46 = vsel %vm3401_vm8, %v419_v37, %v423_v19  ;;  %v1212_v53 = vor.u32 %v1211_v43, %v1208_v42  ;;  %v1217_v54 = vrot.slane %v1215_v34, 5  ;;  %v440_v55 = vshrl.u32 %v3421_v44, 16  ;;  %v3431_v60 = vld [vmem:[#allocation2 + $0x1c] sm:$0x1]  ;;  %v1181_v2 = vld [vmem:[#allocation2 + $0x20] sm:$0xf] }
  0x29   : > { %v2464_v52 = vcombine.low %v410_v36, %v424_v46  ;;  %v432_v57 = vor.u32 %v431_v49, %v428_v48  ;;  %v443_v58 = vshll.u32 %v3421_v44, 16  ;;  %v449_v59 = vshll.u32 %v3425_v47, 16  ;;  %v223_v36 = vld [vmem:[%s3324_s17 + $0x10] sm:$0xf]  ;;  %v3449_v42 = vld [vmem:[#allocation2 + $0x20] sm:$0xf] }
  0x2a   : > { %v1204_v61 = vsel %vm3401_vm8, %v1199_v40, %v1203_v41  ;;  %v1213_v62 = vrot.slane %v1212_v53, 4  ;;  %v442_v1 = vrot.slane %v440_v55, 4  ;;  %v437_v4 = vrot.slane %v435_v50, 5  ;;  %v3168_v40 = vld [vmem:[%s3865_s1 + $0x8] sm:$0xff]  }
  0x2b   : > { %2861 = vmatprep.mubr.bf16.mxu1 %v2464_v52  ;;  %v433_v3 = vrot.slane %v432_v57, 4  ;;  %v445_v5 = vrot.slane %v443_v58, 5  ;;  %v1220_v7 = vshrl.u32 %v1179_v56, 16  ;;  %v1223_v10 = vshll.u32 %v1179_v56, 16  ;;  %v338_v48 = vld [vmem:[#allocation2 + $0x28] sm:$0xf] }
  0x2c   : > { %v3435_v6 = vld [vmem:[#allocation2 + $0x24] sm:$0x1]  ;;  %v1218_v8 = vsel %vm3401_vm8, %v1213_v62, %v1217_v54  ;;  %v1229_v11 = vshll.u32 %v3431_v60, 16  ;;  %v1234_v12 = vshrl.u32 %v1181_v2, 16  ;;  %v451_v15 = vrot.slane %v449_v59, 5  ;;  %v3169_v59 = vld [vmem:[%s3865_s1 + $0x148] sm:$0xff]  }
  0x2d   : > { %v2568_v13 = vcombine.low %v1204_v61, %v1218_v8  ;;  %v446_v14 = vor.u32 %v445_v5, %v442_v1  ;;  %v1222_v16 = vrot.slane %v1220_v7, 4  ;;  %v1225_v19 = vrot.slane %v1223_v10, 5  ;;  %v341_v54 = vld [vmem:[#allocation2 + $0x2c] sm:$0x1]  ;;  %v224_v57 = vld [vmem:[%s3324_s17 + $0x14] sm:$0xf] }
  0x2e   : > { %v1236_v21 = vrot.slane %v1234_v12, 4  ;;  %v1237_v24 = vshll.u32 %v1181_v2, 16  ;;  %v438_v25 = vsel %vm3401_vm8, %v433_v3, %v437_v4  ;;  %v1243_v27 = vshll.u32 %v3435_v6, 16  ;;  %v3170_v61 = vld [vmem:[%s3865_s1 + $0x10] sm:$0xff]   ;;  %v3172_v5 = vld [vmem:[%s3865_s1 + $0x18] sm:$0xff]  }
  0x2f   : > { %2957 = vmatprep.mubr.bf16.mxu0 %v2568_v13  ;;  %v447_v26 = vrot.slane %v446_v14, 4  ;;  %v1226_v30 = vor.u32 %v1225_v19, %v1222_v16  ;;  %v1231_v31 = vrot.slane %v1229_v11, 5  ;;  %v260_v41 = vshrl.u32 %v223_v36, 16  ;;  %v344_v10 = vld [vmem:[#allocation2 + $0x30] sm:$0xf] }
  0x30   : > { %v1239_v32 = vrot.slane %v1237_v24, 5  ;;  %v1245_v34 = vrot.slane %v1243_v27, 5  ;;  %v821_v43 = vrot.slane %v3342_v22, 5  ;;  %v263_v46 = vshll.u32 %v223_v36, 16  ;;  %v347_v11 = vld [vmem:[#allocation2 + $0x34] sm:$0x1] }
  0x31   : > { %v452_v33 = vsel %vm3401_vm8, %v447_v26, %v451_v15  ;;  %v1227_v38 = vrot.slane %v1226_v30, 4  ;;  %v454_v49 = vshrl.u32 %v3449_v42, 16  ;;  %v262_v53 = vrot.slane %v260_v41, 7  ;;  %v225_v12 = vld [vmem:[%s3324_s17 + $0x18] sm:$0xf]  ;;  %v3171_v13 = vld [vmem:[%s3865_s1 + $0x150] sm:$0xff]  }
  0x32   : > { %v2465_v37 = vcombine.low %v438_v25, %v452_v33  ;;  %v1240_v39 = vor.u32 %v1239_v32, %v1236_v21  ;;  %v825_v55 = vrot.slane %v3385_v0, 5  ;;  %v457_v56 = vshll.u32 %v3449_v42, 16  ;;  %v3480_v14 = vld [vmem:[#allocation2 + $0x24] sm:$0x1]  ;;  %v226_v24 = vld [vmem:[%s3324_s17 + $0x1c] sm:$0xf] }
  0x33   : > { %v1232_v50 = vsel %vm3401_vm8, %v1227_v38, %v1231_v31  ;;  %v265_v62 = vor.u32 %v263_v46, %v262_v53  ;;  %v266_v1 = vrot.slane %v262_v53, 4  ;;  %v3467_v2 = vrot.slane %v454_v49, 4  ;;  %v350_v25 = vld [vmem:[#allocation2 + $0x38] sm:$0xf]  ;;  %v353_v26 = vld [vmem:[#allocation2 + $0x3c] sm:$0x1] }
  0x34   : > { %2862 = vmatmul.mubr.bf16.vlgmr.msra.gmra.mrb[0].mxu1 %v2465_v37  ;;  %v1241_v52 = vrot.slane %v1240_v39, 4  ;;  %v268_v3 = vshrl.u32 %v224_v57, 16  ;;  %v271_v4 = vshll.u32 %v224_v57, 16  ;;  %v459_v15 = vrot.slane %v457_v56, 5  ;;  %v359_v36 = vld [vmem:[#allocation2 + $0x44] sm:$0x1] }
  0x35   : > { %2870 = vmatpush3.bf16.msra.mxu1 %v3369_v45  ;;  %v339_v7 = vsel %vm3338_vm4, %v265_v62, %v338_v48  ;;  %v342_v8 = vsel %vm3344_vm5, %v266_v1, %v341_v54  ;;  %v276_v19 = vshrl.u32 %v225_v12, 16  ;;  %v279_v21 = vshll.u32 %v225_v12, 16  ;;  %v3174_v46 = vld [vmem:[%s3865_s1 + $0x20] sm:$0xff]   ;;  %v3173_v54 = vld [vmem:[%s3865_s1 + $0x158] sm:$0xff]  }
  0x36   : > { %v1246_v58 = vsel %vm3401_vm8, %v1241_v52, %v1245_v34  ;;  %2871 = vmatprep.subr.bf16.mxu1 %v3168_v40  ;;  %340 = vst [vmem:[#allocation2 + $0x28] sm:$0xf] %v339_v7  ;;  %343 = vst [vmem:[#allocation2 + $0x2c] sm:$0x1] %v342_v8  ;;  %v270_v16 = vrot.slane %v268_v3, 7  ;;  %v284_v27 = vshrl.u32 %v226_v24, 16  ;;  %v460_v48 = vor.u32 %v459_v15, %v3467_v2 }
  0x37   : > { %v2569_v45 = vcombine.low %v1232_v50, %v1246_v58  ;;  %v287_v30 = vshll.u32 %v226_v24, 16  ;;  %v278_v33 = vrot.slane %v276_v19, 7  ;;  %v356_v34 = vld [vmem:[#allocation2 + $0x40] sm:$0xf]  ;;  %v1483_v37 = vrot.slane %v3395_v9, 5 }
  0x38   : > { %v273_v31 = vor.u32 %v271_v4, %v270_v16  ;;  %v274_v32 = vrot.slane %v270_v16, 4  ;;  %v286_v38 = vrot.slane %v284_v27, 7  ;;  %v463_v49 = vshll.u32 %v3480_v14, 16  ;;  %v3523_v24 = vld [vmem:[#allocation2 + $0x8] sm:$0xe] }
  0x39   : > { %2958 = vmatmul.mubr.bf16.vlgmr.msra.gmra.mrb[0].mxu0 %v2569_v45  ;;  %2872 = vmatpush3.bf16.msra.mxu1 %v3168_v40  ;;  %v281_v40 = vor.u32 %v279_v21, %v278_v33  ;;  %v282_v41 = vrot.slane %v278_v33, 4  ;;  %v1487_v53 = vrot.slane %v3407_v28, 5  ;;  %v829_v8 = vrot.slane %v3414_v35, 5  ;;  %v3190_v35 = vld [vmem:[%s3865_s1 + $0x98] sm:$0xff]  }
  0x3a   : > { %2966 = vmatpush3.bf16.msra.mxu0 %v3377_v51  ;;  %2873 = vmatprep.subr.bf16.mxu1 %v3170_v61  ;;  %v345_v39 = vsel %vm3338_vm4, %v273_v31, %v344_v10  ;;  %v348_v51 = vsel %vm3344_vm5, %v274_v32, %v347_v11  ;;  %v289_v50 = vor.u32 %v287_v30, %v286_v38  ;;  %v290_v52 = vrot.slane %v286_v38, 4  ;;  %v3178_v31 = vld [vmem:[%s3865_s1 + $0x30] sm:$0xff]  }
  0x3b   : > { %2967 = vmatprep.subr.bf16.mxu0 %v3169_v59  ;;  %346 = vst [vmem:[#allocation2 + $0x30] sm:$0xf] %v345_v39  ;;  %349 = vst [vmem:[#allocation2 + $0x34] sm:$0x1] %v348_v51  ;;  %v351_v56 = vsel %vm3338_vm4, %v281_v40, %v350_v25  ;;  %v354_v57 = vsel %vm3344_vm5, %v282_v41, %v353_v26  ;;  %v465_v10 = vrot.slane %v463_v49, 5  ;;  %v3177_v39 = vld [vmem:[%s3865_s1 + $0x168] sm:$0xff]  }
  0x3c   : > { %352 = vst [vmem:[#allocation2 + $0x38] sm:$0xf] %v351_v56  ;;  %355 = vst [vmem:[#allocation2 + $0x3c] sm:$0x1] %v354_v57  ;;  %v357_v62 = vsel %vm3338_vm4, %v289_v50, %v356_v34  ;;  %v360_v1 = vsel %vm3344_vm5, %v290_v52, %v359_v36  ;;  %v2580_v56 = vrot.slane %v3523_v24, 9  ;;  %v1491_v9 = vrot.slane %v3431_v60, 5 }
  0x3d   : > { %2874 = vmatpush3.bf16.msra.mxu1 %v3170_v61  ;;  %v3502_v58 = vld [vmem:[#allocation2 + $0x28] sm:$0xf]  ;;  %v3513_v4 = vld [vmem:[#allocation2 + $0x2c] sm:$0x1]  ;;  %358 = vst [vmem:[#allocation2 + $0x40] sm:$0xf] %v357_v62  ;;  %v2477_v60 = vcombine.low %v3409_v29, %v3421_v44 }
  0x3e   : > { %2968 = vmatpush3.bf16.msra.mxu0 %v3169_v59  ;;  %2875 = vmatprep.subr.bf16.mxu1 %v3172_v5  ;;  %v3504_v59 = vld [vmem:[#allocation2 + $0x2c] sm:$0x1]  ;;  %v1183_v61 = vld [vmem:[#allocation2 + $0x28] sm:$0xf]  ;;  %v468_v2 = vshrl.u32 %v3502_v58, 16  ;;  %v471_v45 = vshll.u32 %v3502_v58, 16 }
  0x3f   : > { %2969 = vmatprep.subr.bf16.mxu0 %v3171_v13  ;;  %v477_v3 = vshll.u32 %v3504_v59, 16  ;;  %v1248_v7 = vshrl.u32 %v1183_v61, 16  ;;  %361 = vst [vmem:[#allocation2 + $0x44] sm:$0x1] %v360_v1  ;;  %v1251_v11 = vshll.u32 %v1183_v61, 16  ;;  %v1257_v19 = vshll.u32 %v3513_v4, 16 }
  0x40   : > { %v470_v12 = vrot.slane %v468_v2, 4  ;;  %v473_v15 = vrot.slane %v471_v45, 5  ;;  %v3180_v45 = vld [vmem:[%s3865_s1 + $0x38] sm:$0xff]   ;;  %v1495_v24 = vrot.slane %v3435_v6, 5  ;;  %v3186_v6 = vld [vmem:[%s3865_s1 + $0x88] sm:$0xff]  }
  0x41   : > { %2876 = vmatpush3.bf16.msra.mxu1 %v3172_v5  ;;  %v461_v5 = vrot.slane %v460_v48, 4  ;;  %v1250_v16 = vrot.slane %v1248_v7, 4  ;;  %v479_v21 = vrot.slane %v477_v3, 5  ;;  %v1259_v41 = vrot.slane %v1257_v19, 5 }
  0x42   : > { %2970 = vmatpush3.bf16.msra.mxu0 %v3171_v13  ;;  %2877 = vmatprep.subr.bf16.mxu1 %v3174_v46  ;;  %v1253_v13 = vrot.slane %v1251_v11, 5  ;;  %v474_v25 = vor.u32 %v473_v15, %v470_v12  ;;  %v1185_v26 = vld [vmem:[#allocation2 + $0x30] sm:$0xf]  ;;  %v3525_v27 = vld [vmem:[#allocation2 + $0x34] sm:$0x1] }
  0x43   : > { %2971 = vmatprep.subr.bf16.mxu0 %v3173_v54  ;;  %v3527_v30 = vld [vmem:[#allocation2 + $0x30] sm:$0xf]  ;;  %v1262_v33 = vshrl.u32 %v1185_v26, 16  ;;  %v1265_v34 = vshll.u32 %v1185_v26, 16  ;;  %v1271_v36 = vshll.u32 %v3525_v27, 16  ;;  %v466_v51 = vsel %vm3401_vm8, %v461_v5, %v465_v10 }
  0x44   : > { %v1254_v32 = vor.u32 %v1253_v13, %v1250_v16  ;;  %v3533_v38 = vld [vmem:[#allocation2 + $0x34] sm:$0x1]  ;;  %v475_v40 = vrot.slane %v474_v25, 4  ;;  %v482_v48 = vshrl.u32 %v3527_v30, 16  ;;  %v485_v62 = vshll.u32 %v3527_v30, 16 }
  0x45   : > { %2878 = vmatpush3.bf16.msra.mxu1 %v3174_v46  ;;  %v3540_v46 = vld [vmem:[#allocation2 + $0x38] sm:$0xf]  ;;  %v1264_v50 = vrot.slane %v1262_v33, 4  ;;  %v1267_v52 = vrot.slane %v1265_v34, 5  ;;  %v491_v1 = vshll.u32 %v3533_v38, 16  ;;  %v1273_v5 = vrot.slane %v1271_v36, 5 }
  0x46   : > { %2972 = vmatpush3.bf16.msra.mxu0 %v3173_v54  ;;  %2879 = vmatprep.subr.bf16.mxu1 %v3176_v23  ;;  %v1255_v49 = vrot.slane %v1254_v32, 4  ;;  %v3543_v54 = vld [vmem:[#allocation2 + $0x3c] sm:$0x1]  ;;  %v480_v57 = vsel %vm3401_vm8, %v475_v40, %v479_v21  ;;  %v484_v61 = vrot.slane %v482_v48, 4  ;;  %v1187_v2 = vld [vmem:[#allocation2 + $0x38] sm:$0xf] }
  0x47   : > { %2973 = vmatprep.subr.bf16.mxu0 %v3175_v20  ;;  %v2466_v3 = vcombine.low %v466_v51, %v480_v57  ;;  %v1268_v7 = vor.u32 %v1267_v52, %v1264_v50  ;;  %v3554_v10 = vld [vmem:[#allocation2 + $0x3c] sm:$0x1]  ;;  %v1189_v11 = vld [vmem:[#allocation2 + $0x40] sm:$0xf]  ;;  %v3179_v15 = vld [vmem:[%s3865_s1 + $0x170] sm:$0xff]   ;;  %v487_v16 = vrot.slane %v485_v62, 5 }
  0x48   : > { %v1260_v12 = vsel %vm3401_vm8, %v1255_v49, %v1259_v41  ;;  %v505_v19 = vshll.u32 %v3543_v54, 16  ;;  %v3563_v21 = vld [vmem:[#allocation2 + $0x44] sm:$0x1]  ;;  %v1276_v26 = vshrl.u32 %v1187_v2, 16  ;;  %v1279_v32 = vshll.u32 %v1187_v2, 16  ;;  %v3181_v41 = vld [vmem:[%s3865_s1 + $0x178] sm:$0xff]  }
  0x49   : > { %2880 = vmatpush3.bf16.msra.mxu1 %v3176_v23  ;;  %v496_v23 = vshrl.u32 %v3540_v46, 16  ;;  %2865 = vmatprep.mubr.bf16.mxu1 %v2466_v3  ;;  %v1269_v13 = vrot.slane %v1268_v7, 4  ;;  %v1458_v33 = vld [vmem:[#allocation2 + $0x10] sm:$0xe]  ;;  %v488_v34 = vor.u32 %v487_v16, %v484_v61  ;;  %v493_v36 = vrot.slane %v491_v1, 5  ;;  %v3574_v57 = vld [vmem:[%s3865_s1 + $0x80] sm:$0xff]  }
  0x4a   : > { %2974 = vmatpush3.bf16.msra.mxu0 %v3175_v20  ;;  %2881 = vmatprep.subr.bf16.mxu1 %v3178_v31  ;;  %v499_v20 = vshll.u32 %v3540_v46, 16  ;;  %v1285_v40 = vshll.u32 %v3554_v10, 16  ;;  %v1278_v49 = vrot.slane %v1276_v26, 4  ;;  %v1281_v50 = vrot.slane %v1279_v32, 5  ;;  %v1459_v32 = vld [vmem:[#allocation2 + $0x18] sm:$0xe] }
  0x4b   : > { %2975 = vmatprep.subr.bf16.mxu0 %v3177_v39  ;;  %v498_v25 = vrot.slane %v496_v23, 4  ;;  %v1274_v48 = vsel %vm3401_vm8, %v1269_v13, %v1273_v5  ;;  %v1290_v52 = vshrl.u32 %v1189_v11, 16  ;;  %v489_v61 = vrot.slane %v488_v34, 4  ;;  %v1462_v28 = vld [vmem:[#allocation2 + $0x30] sm:$0xe] }
  0x4c   : > { %v501_v51 = vrot.slane %v499_v20, 5  ;;  %v507_v1 = vrot.slane %v505_v19, 5  ;;  %v1282_v2 = vor.u32 %v1281_v50, %v1278_v49  ;;  %v1299_v7 = vshll.u32 %v3563_v21, 16 }
  0x4d   : > { %2882 = vmatpush3.bf16.msra.mxu1 %v3178_v31  ;;  %v2570_v31 = vcombine.low %v1260_v12, %v1274_v48  ;;  %v1292_v3 = vrot.slane %v1290_v52, 4  ;;  %v494_v5 = vsel %vm3401_vm8, %v489_v61, %v493_v36  ;;  %v2581_v16 = vrot.slane %v1458_v33, 9  ;;  %v3582_v12 = vld [vmem:[%s3865_s1 + $0x180] sm:$0xff]   ;;  %v1461_v48 = vld [vmem:[#allocation2 + $0x28] sm:$0xe] }
  0x4e   : > { %2976 = vmatpush3.bf16.msra.mxu0 %v3177_v39  ;;  %2883 = vmatprep.subr.bf16.mxu1 %v3180_v45  ;;  %v502_v62 = vor.u32 %v501_v51, %v498_v25  ;;  %v1293_v39 = vshll.u32 %v1189_v11, 16  ;;  %v1283_v20 = vrot.slane %v1282_v2, 4  ;;  %v1287_v13 = vrot.slane %v1285_v40, 5  ;;  %v1460_v33 = vld [vmem:[#allocation2 + $0x20] sm:$0xe] }
  0x4f   : > { %2977 = vmatprep.subr.bf16.mxu0 %v3179_v15  ;;  %2961 = vmatprep.mubr.bf16.mxu0 %v2570_v31  ;;  %v1301_v25 = vrot.slane %v1299_v7, 5  ;;  %v2476_v26 = vcombine.low %v3336_v18, %v3383_v63  ;;  %v1488_v51 = vsel %vm3587_vm11, %v2581_v16, %v1487_v53  ;;  %v833_v40 = vrot.slane %v3425_v47, 5  ;;  %v792_v2 = vld [vmem:[#allocation2] sm:$0xe] }
  0x50   : > { %v503_v23 = vrot.slane %v502_v62, 4  ;;  %v1295_v19 = vrot.slane %v1293_v39, 5  ;;  %v1288_v18 = vsel %vm3401_vm8, %v1283_v20, %v1287_v13  ;;  %v2582_v47 = vrot.slane %v1459_v32, 9  ;;  %v1464_v62 = vld [vmem:[#allocation2 + $0x40] sm:$0xe] }
  0x51   : > { %2884 = vmatpush3.bf16.msra.mxu1 %v3180_v45  ;;  %v2584_v50 = vrot.slane %v1461_v48, 9  ;;  %v1499_v52 = vrot.slane %v3513_v4, 5  ;;  %v2585_v31 = vrot.slane %v1462_v28, 9  ;;  %v1503_v61 = vrot.slane %v3525_v27, 5  ;;  %v3188_v27 = vld [vmem:[%s3865_s1 + $0x90] sm:$0xff]  }
  0x52   : > { %2978 = vmatpush3.bf16.msra.mxu0 %v3179_v15  ;;  %2893 = vmatprep.subr.bf16.mxu1 %v3574_v57  ;;  %v508_v45 = vsel %vm3401_vm8, %v503_v23, %v507_v1  ;;  %v1296_v36 = vor.u32 %v1295_v19, %v1292_v3  ;;  %v1484_v15 = vsel %vm3587_vm11, %v2580_v56, %v1483_v37  ;;  %v2583_v56 = vrot.slane %v1460_v33, 9  ;;  %v793_v3 = vld [vmem:[#allocation2 + $0x8] sm:$0xe]  ;;  %v795_v13 = vld [vmem:[#allocation2 + $0x18] sm:$0xe] }
  0x53   : > { %2979 = vmatprep.subr.bf16.mxu0 %v3181_v41  ;;  %v2467_v34 = vcombine.low %v494_v5, %v508_v45  ;;  %v2604_v53 = vcombine.low %v1484_v15, %v1488_v51  ;;  %v2478_v1 = vcombine.low %v3449_v42, %v3502_v58  ;;  %v1492_v4 = vsel %vm3587_vm11, %v2582_v47, %v1491_v9  ;;  %v3194_v15 = vld [vmem:[%s3865_s1 + $0xa8] sm:$0xff]   ;;  %v3193_v51 = vld [vmem:[%s3865_s1 + $0x1a0] sm:$0xff]   ;;  %v3198_v9 = vld [vmem:[%s3865_s1 + $0x1b0] sm:$0xff]  }
  0x54   : > { %v1297_v63 = vrot.slane %v1296_v36, 4  ;;  %v1496_v29 = vsel %vm3587_vm11, %v2583_v56, %v1495_v24  ;;  %v2488_v39 = vrot.slane %v792_v2, 9  ;;  %v1507_v7 = vrot.slane %v3554_v10, 5  ;;  %v794_v10 = vld [vmem:[#allocation2 + $0x10] sm:$0xe]  ;;  %v3200_v24 = vld [vmem:[%s3865_s1 + $0xb8] sm:$0xff]  }
  0x55   : > { %2866 = vmatmul.mubr.bf16.gmra.mrb[4].mxu1 %v2467_v34  ;;  %v2489_v5 = vrot.slane %v793_v3, 9  ;;  %v1500_v42 = vsel %vm3587_vm11, %v2584_v50, %v1499_v52  ;;  %v1504_v58 = vsel %vm3587_vm11, %v2585_v31, %v1503_v61  ;;  %v2587_v23 = vrot.slane %v1464_v62, 9  ;;  %v3192_v34 = vld [vmem:[%s3865_s1 + $0xa0] sm:$0xff]   ;;  %v3203_v36 = vld [vmem:[#allocation2 + $0x10] ss:$8 sps:$4 sm:$0xff]  }
  0x56   : > { %2980 = vmatpush3.bf16.msra.mxu0 %v3181_v41  ;;  %2885 = vmatprep.mubr.bf16.mxu1 %v2476_v26  ;;  %v1302_v37 = vsel %vm3401_vm8, %v1297_v63, %v1301_v25  ;;  %v1463_v41 = vld [vmem:[#allocation2 + $0x38] sm:$0xe]  ;;  %v1511_v16 = vrot.slane %v3563_v21, 5  ;;  %v2605_v20 = vcombine.low %v1492_v4, %v1496_v29  ;;  %v822_v19 = vsel %vm3587_vm11, %v2488_v39, %v821_v43  ;;  %v3187_v21 = vld [vmem:[%s3865_s1 + $0x188] sm:$0xff]   ;;  %v796_v63 = vld [vmem:[#allocation2 + $0x20] sm:$0xe] }
  0x57   : > { %2989 = vmatprep.subr.bf16.mxu0 %v3582_v12  ;;  %v2571_v49 = vcombine.low %v1288_v18, %v1302_v37  ;;  %v2586_v44 = vrot.slane %v1463_v41, 9  ;;  %v826_v25 = vsel %vm3587_vm11, %v2489_v5, %v825_v55  ;;  %v2490_v45 = vrot.slane %v794_v10, 9  ;;  %v3197_v18 = vld [vmem:[%s3865_s1 + $0xb0] sm:$0xff]   ;;  %v797_v48 = vld [vmem:[#allocation2 + $0x28] sm:$0xe]  ;;  %v3202_v61 = vld [vmem:[%s3865_s1 + $0xc0] sm:$0xff]  }
  0x58   : > { %v2491_v26 = vrot.slane %v795_v13, 9  ;;  %v2479_v32 = vcombine.low %v3527_v30, %v3540_v46  ;;  %v2512_v43 = vcombine.low %v822_v19, %v826_v25  ;;  %v1512_v30 = vsel %vm3587_vm11, %v2587_v23, %v1511_v16  ;;  %v3189_v46 = vld [vmem:[%s3865_s1 + $0x190] sm:$0xff]   ;;  %v799_v50 = vld [vmem:[#allocation2 + $0x38] sm:$0xe]  ;;  %v3205_v19 = vld [vmem:[#allocation2 + $0x20] ss:$8 sps:$4 sm:$0xff]  }
  0x59   : > { %2962 = vmatmul.mubr.bf16.gmra.mrb[4].mxu0 %v2571_v49  ;;  %v3653_v22 = vsel %vm3587_vm11, %v2490_v45, %v829_v8  ;;  %v1508_v8 = vsel %vm3587_vm11, %v2586_v44, %v1507_v7  ;;  %v2492_v28 = vrot.slane %v796_v63, 9  ;;  %v837_v37 = vrot.slane %v3480_v14, 5  ;;  %v1838_v56 = vld [vmem:[#allocation2 + $0x10] sm:$0xf]  ;;  %v1840_v52 = vld [vmem:[#allocation2 + $0x18] sm:$0xf] }
  0x5a   : > { %2981 = vmatprep.mubr.bf16.mxu0 %v2604_v53  ;;  %v3657_v0 = vsel %vm3587_vm11, %v2491_v26, %v833_v40  ;;  %v2607_v33 = vcombine.low %v1508_v8, %v1512_v30  ;;  %v3195_v40 = vld [vmem:[%s3865_s1 + $0x1a8] sm:$0xff]   ;;  %v2493_v53 = vrot.slane %v797_v48, 9  ;;  %v841_v47 = vrot.slane %v3504_v59, 5  ;;  %v798_v49 = vld [vmem:[#allocation2 + $0x30] sm:$0xe]  ;;  %v3201_v62 = vld [vmem:[%s3865_s1 + $0x1b8] sm:$0xff]  }
  0x5b   : > { %v2513_v55 = vcombine.low %v3653_v22, %v3657_v0  ;;  %v1855_v41 = vshrl.u32 %v1838_v56, 16  ;;  %v1872_v31 = vshll.u32 %v1840_v52, 16  ;;  %v838_v14 = vsel %vm3587_vm11, %v2492_v28, %v837_v37  ;;  %v3208_v25 = vld [vmem:[%s3865_s1 + $0xd0] sm:$0xff]   ;;  %v3207_v45 = vld [vmem:[%s3865_s1 + $0x1c8] sm:$0xff]  }
  0x5c   : > { %v842_v59 = vsel %vm3587_vm11, %v2493_v53, %v841_v47  ;;  %v845_v2 = vrot.slane %v3533_v38, 5  ;;  %v2495_v4 = vrot.slane %v799_v50, 9  ;;  %v849_v29 = vrot.slane %v3543_v54, 5  ;;  %v3204_v38 = vld [vmem:[%s3865_s1 + $0x1c0] sm:$0xff]   ;;  %v3216_v26 = vld [vmem:[#allocation2 + $0x30] ss:$8 sps:$4 sm:$0xff]  }
  0x5d   : > { %2886 = vmatmul.mubr.bf16.vlgmr.msra.gmra.mrb[0].mxu1 %v2477_v60  ;;  %v1858_v60 = vshll.u32 %v1838_v56, 16  ;;  %v1857_v44 = vrot.slane %v1855_v41, 4  ;;  %v1874_v7 = vrot.slane %v1872_v31, 5  ;;  %v2514_v5 = vcombine.low %v838_v14, %v842_v59  ;;  %v3209_v8 = vld [vmem:[%s3865_s1 + $0x1d0] sm:$0xff]   ;;  %v1844_v30 = vld [vmem:[#allocation2 + $0x28] sm:$0xf] }
  0x5e   : > { %2894 = vmatpush3.bf16.msra.mxu1 %v3574_v57  ;;  %2889 = vmatprep.mubr.bf16.mxu1 %v2478_v1  ;;  %v2606_v57 = vcombine.low %v1500_v42, %v1504_v58  ;;  %v2494_v1 = vrot.slane %v798_v49, 9  ;;  %v3712_v42 = vld [vmem:[#allocation2 + $0x1c] sm:$0x1]  ;;  %v3206_v58 = vld [vmem:[%s3865_s1 + $0xc8] sm:$0xff]   ;;  %v850_v23 = vsel %vm3587_vm11, %v2495_v4, %v849_v29  ;;  %v1897_v63 = vshrl.u32 %v1844_v30, 16  ;;  %v3213_v47 = vld [vmem:[%s3865_s1 + $0x1e0] sm:$0xff]  }
  0x5f   : > { %2895 = vmatprep.subr.bf16.mxu1 %v3186_v6  ;;  %v1860_v3 = vrot.slane %v1858_v60, 5  ;;  %v1878_v13 = vshll.u32 %v3712_v42, 16  ;;  %v1900_v48 = vshll.u32 %v1844_v30, 16  ;;  %v3214_v56 = vld [vmem:[%s3865_s1 + $0xe8] sm:$0xff]   ;;  %v3757_v49 = vld [vmem:[#allocation2 + $0x24] sm:$0x1] }
  0x60   : > { %v846_v54 = vsel %vm3587_vm11, %v2494_v1, %v845_v2  ;;  %v1899_v41 = vrot.slane %v1897_v63, 4  ;;  %v3763_v1 = vld [vmem:[#allocation2 + $0x3c] sm:$0x1]  ;;  %v3217_v2 = vld [vmem:[%s3865_s1 + $0xf0] sm:$0xff]   ;;  %v1850_v4 = vld [vmem:[#allocation2 + $0x40] sm:$0xf] }
  0x61   : > { %2982 = vmatmul.mubr.bf16.vlgmr.msra.gmra.mrb[0].mxu0 %v2605_v20  ;;  %v1861_v16 = vor.u32 %v1860_v3, %v1857_v44  ;;  %v1880_v0 = vrot.slane %v1878_v13, 5  ;;  %v1902_v60 = vrot.slane %v1900_v48, 5  ;;  %v1852_v29 = vld [vmem:[#allocation2 + $0x48] sm:$0xf] }
  0x62   : > { %2896 = vmatpush3.bf16.msra.mxu1 %v3186_v6  ;;  %2990 = vmatpush3.bf16.msra.mxu0 %v3582_v12  ;;  %v3191_v12 = vld [vmem:[%s3865_s1 + $0x198] sm:$0xff]   ;;  %v1869_v6 = vshrl.u32 %v1840_v52, 16  ;;  %v3215_v44 = vld [vmem:[%s3865_s1 + $0x1e8] sm:$0xff]   ;;  %v1956_v13 = vshll.u32 %v1852_v29, 16 }
  0x63   : > { %2897 = vmatprep.subr.bf16.mxu1 %v3188_v27  ;;  %2991 = vmatprep.subr.bf16.mxu0 %v3187_v21 }
  0x64   : > { %2985 = vmatprep.mubr.bf16.mxu0 %v2606_v57  ;;  %v1871_v39 = vrot.slane %v1869_v6, 4  ;;  %v1862_v57 = vrot.slane %v1861_v16, 4  ;;  %v3759_v6 = vld [vmem:[#allocation2 + $0x2c] sm:$0x1]  ;;  %v1939_v16 = vshrl.u32 %v1850_v4, 16 }
  0x65   : > { %2890 = vmatmul.mubr.bf16.gmra.mrb[4].mxu1 %v2479_v32 }
  0x66   : > { %2898 = vmatpush3.bf16.msra.mxu1 %v3188_v27  ;;  %2909 = vmatprep.mubr.bf16.mxu1 %v2512_v43  ;;  %v3710_v27 = vld [vmem:[#allocation2 + $0x14] sm:$0x1]  ;;  %v1875_v10 = vor.u32 %v1874_v7, %v1871_v39  ;;  %v3222_v43 = vld [vmem:[#allocation2 + $0x8] ss:$8 sps:$4 sm:$0xff]   ;;  %v1892_v39 = vshll.u32 %v3757_v49, 16  ;;  %v1903_v7 = vor.u32 %v1902_v60, %v1899_v41  ;;  %v2166_v41 = vrot.slane %v3763_v1, 5 }
  0x67   : > { %2992 = vmatpush3.bf16.msra.mxu0 %v3187_v21  ;;  %2899 = vmatprep.subr.bf16.mxu1 %v3190_v35  ;;  %v1864_v20 = vshll.u32 %v3710_v27, 16  ;;  %v2515_v21 = vcombine.low %v846_v54, %v850_v23  ;;  %v1934_v23 = vshll.u32 %v3763_v1, 16 }
  0x68   : > { %2993 = vmatprep.subr.bf16.mxu0 %v3189_v46  ;;  %v1876_v22 = vrot.slane %v1875_v10, 4  ;;  %v1953_v10 = vshrl.u32 %v1852_v29, 16 }
  0x69   : > { %2986 = vmatmul.mubr.bf16.gmra.mrb[4].mxu0 %v2607_v33  ;;  %v1866_v32 = vrot.slane %v1864_v20, 5  ;;  %v1942_v20 = vshll.u32 %v1850_v4, 16 }
  0x6a   : > { %2900 = vmatpush3.bf16.msra.mxu1 %v3190_v35  ;;  %3005 = vmatprep.mubr.bf16.mxu0 %v3203_v36  ;;  %v1842_v35 = vld [vmem:[#allocation2 + $0x20] sm:$0xf]  ;;  %v1848_v36 = vld [vmem:[#allocation2 + $0x38] sm:$0xf] }
  0x6b   : > { %2994 = vmatpush3.bf16.msra.mxu0 %v3189_v46  ;;  %2901 = vmatprep.subr.bf16.mxu1 %v3192_v34  ;;  %v1846_v46 = vld [vmem:[#allocation2 + $0x30] sm:$0xf]  ;;  %v1867_v33 = vsel %vm3401_vm8, %v1862_v57, %v1866_v32  ;;  %v1925_v37 = vshrl.u32 %v1848_v36, 16  ;;  %v1928_v53 = vshll.u32 %v1848_v36, 16  ;;  %v1944_v30 = vrot.slane %v1942_v20, 5 }
  0x6c   : > { %2995 = vmatprep.subr.bf16.mxu0 %v3191_v12  ;;  %v2124_v36 = vld [vmem:[#allocation2 + $0x30] sm:$0xe] }
  0x6d   : > { %v1927_v14 = vrot.slane %v1925_v37, 4  ;;  %v1930_v59 = vrot.slane %v1928_v53, 5 }
  0x6e   : > { %2902 = vmatpush3.bf16.msra.mxu1 %v3192_v34  ;;  %v1881_v34 = vsel %vm3401_vm8, %v1876_v22, %v1880_v0 }
  0x6f   : > { %2996 = vmatpush3.bf16.msra.mxu0 %v3191_v12  ;;  %2903 = vmatprep.subr.bf16.mxu1 %v3194_v15  ;;  %v3212_v12 = vld [vmem:[%s3865_s1 + $0xe0] sm:$0xff]   ;;  %v2660_v28 = vcombine.low %v1867_v33, %v1881_v34  ;;  %v1931_v54 = vor.u32 %v1930_v59, %v1927_v14  ;;  %v3221_v34 = vld [vmem:[%s3865_s1 + $0x1f8] sm:$0xff]   ;;  %v2120_v59 = vld [vmem:[#allocation2 + $0x10] sm:$0xe] }
  0x70   : > { %2997 = vmatprep.subr.bf16.mxu0 %v3193_v51  ;;  %v3224_v33 = vld [vmem:[%s3865_s1 + $0x200] sm:$0xff]  }
  0x71   : > { %v1932_v0 = vrot.slane %v1931_v54, 4 }
  0x72   : > { %2904 = vmatpush3.bf16.msra.mxu1 %v3194_v15  ;;  %v3211_v15 = vld [vmem:[%s3865_s1 + $0x1d8] sm:$0xff]  }
  0x73   : > { %2998 = vmatpush3.bf16.msra.mxu0 %v3193_v51  ;;  %2905 = vmatprep.subr.bf16.mxu1 %v3197_v18  ;;  %v3218_v51 = vld [vmem:[#allocation2 + $0x40] ss:$8 sps:$4 sm:$0xff]  }
  0x74   : > { %2999 = vmatprep.subr.bf16.mxu0 %v3195_v40 }
  0x76   : > { %2906 = vmatpush3.bf16.msra.mxu1 %v3197_v18  ;;  %v1886_v18 = vshll.u32 %v1842_v35, 16 }
  0x77   : > { %3000 = vmatpush3.bf16.msra.mxu0 %v3195_v40  ;;  %2907 = vmatprep.subr.bf16.mxu1 %v3200_v24  ;;  %v1883_v40 = vshrl.u32 %v1842_v35, 16  ;;  %v3783_v35 = vld [vmem:[#allocation2 + $0x4c] sm:$0x1] }
  0x78   : > { %3001 = vmatprep.subr.bf16.mxu0 %v3198_v9  ;;  %v1888_v52 = vrot.slane %v1886_v18, 5  ;;  %v1962_v48 = vshll.u32 %v3783_v35, 16 }
  0x79   : > { %v1885_v50 = vrot.slane %v1883_v40, 4 }
  0x7a   : > { %2908 = vmatpush3.bf16.msra.mxu1 %v3200_v24  ;;  %v1914_v24 = vshll.u32 %v1846_v46, 16  ;;  %v1964_v14 = vrot.slane %v1962_v48, 5 }
  0x7b   : > { %3002 = vmatpush3.bf16.msra.mxu0 %v3198_v9  ;;  %2917 = vmatprep.subr.bf16.mxu1 %v3202_v61  ;;  %v1911_v9 = vshrl.u32 %v1846_v46, 16  ;;  %v1889_v3 = vor.u32 %v1888_v52, %v1885_v50  ;;  %v1955_v46 = vrot.slane %v1953_v10, 4 }
  0x7c   : > { %3003 = vmatprep.subr.bf16.mxu0 %v3201_v62 }
  0x7d   : > { %2910 = vmatmul.mubr.bf16.vlgmr.msra.gmra.mrb[0].mxu1 %v2513_v55  ;;  %v3210_v55 = vld [vmem:[%s3865_s1 + $0xd8] sm:$0xff]   ;;  %v1913_v31 = vrot.slane %v1911_v9, 4  ;;  %v3226_v9 = vld [vmem:[#allocation2 + $0x28] ss:$8 sps:$4 sm:$0xff]  }
  0x7e   : > { %2918 = vmatpush3.bf16.msra.mxu1 %v3202_v61  ;;  %2913 = vmatprep.mubr.bf16.mxu1 %v2514_v5  ;;  %v1916_v61 = vrot.slane %v1914_v24, 5  ;;  %v1906_v5 = vshll.u32 %v3759_v6, 16 }
  0x7f   : > { %3004 = vmatpush3.bf16.msra.mxu0 %v3201_v62  ;;  %2919 = vmatprep.subr.bf16.mxu1 %v3206_v58  ;;  %v3761_v62 = vld [vmem:[#allocation2 + $0x34] sm:$0x1] }
  0x80   : > { %3013 = vmatprep.subr.bf16.mxu0 %v3204_v38  ;;  %v1908_v57 = vrot.slane %v1906_v5, 5  ;;  %v2162_v50 = vrot.slane %v3761_v62, 5 }
  0x82   : > { %3006 = vmatmul.mubr.bf16.vlgmr.msra.gmra.mrb[0].mxu0 %v3205_v19  ;;  %2920 = vmatpush3.bf16.msra.mxu1 %v3206_v58  ;;  %v1917_v58 = vor.u32 %v1916_v61, %v1913_v31  ;;  %v3220_v19 = vld [vmem:[%s3865_s1 + $0xf8] sm:$0xff]  }
  0x83   : > { %3014 = vmatpush3.bf16.msra.mxu0 %v3204_v38  ;;  %2921 = vmatprep.subr.bf16.mxu1 %v3208_v25  ;;  %v1920_v38 = vshll.u32 %v3761_v62, 16 }
  0x84   : > { %3015 = vmatprep.subr.bf16.mxu0 %v3207_v45  ;;  %3009 = vmatprep.mubr.bf16.mxu0 %v3216_v26  ;;  %v1894_v26 = vrot.slane %v1892_v39, 5  ;;  %v1918_v32 = vrot.slane %v1917_v58, 4  ;;  %v2672_v39 = vrot.slane %v2120_v59, 9  ;;  %v2150_v58 = vrot.slane %v3712_v42, 5 }
  0x85   : > { %2914 = vmatmul.mubr.bf16.gmra.mrb[4].mxu1 %v2515_v21  ;;  %v1904_v21 = vrot.slane %v1903_v7, 4  ;;  %v1922_v22 = vrot.slane %v1920_v38, 5  ;;  %v2146_v7 = vrot.slane %v3710_v27, 5 }
  0x86   : > { %2922 = vmatpush3.bf16.msra.mxu1 %v3208_v25  ;;  %2933 = vmatprep.mubr.bf16.mxu1 %v3222_v43  ;;  %v3219_v25 = vld [vmem:[%s3865_s1 + $0x1f0] sm:$0xff]   ;;  %v1936_v43 = vrot.slane %v1934_v23, 5 }
  0x87   : > { %3016 = vmatpush3.bf16.msra.mxu0 %v3207_v45  ;;  %2923 = vmatprep.subr.bf16.mxu1 %v3210_v55  ;;  %v1890_v45 = vrot.slane %v1889_v3, 4  ;;  %v1909_v18 = vsel %vm3401_vm8, %v1904_v21, %v1908_v57  ;;  %v1923_v24 = vsel %vm3401_vm8, %v1918_v32, %v1922_v22  ;;  %v3227_v3 = vld [vmem:[#allocation2 + $0x38] ss:$8 sps:$4 sm:$0xff]   ;;  %v2147_v27 = vsel %vm3587_vm11, %v2672_v39, %v2146_v7 }
  0x88   : > { %3017 = vmatprep.subr.bf16.mxu0 %v3209_v8  ;;  %v2174_v21 = vrot.slane %v3783_v35, 5  ;;  %v3233_v22 = vld [vmem:[%s3865_s1 + $0x238] sm:$0xff]  }
  0x89   : > { %v1895_v40 = vsel %vm3401_vm8, %v1890_v45, %v1894_v26  ;;  %v2127_v45 = vld [vmem:[#allocation2 + $0x48] sm:$0xe] }
  0x8a   : > { %2924 = vmatpush3.bf16.msra.mxu1 %v3210_v55  ;;  %3010 = vmatmul.mubr.bf16.gmra.mrb[4].mxu0 %v3218_v51  ;;  %v3781_v55 = vld [vmem:[#allocation2 + $0x44] sm:$0x1]  ;;  %v3223_v51 = vld [vmem:[#allocation2 + $0x18] ss:$8 sps:$4 sm:$0xff]   ;;  %v2661_v60 = vcombine.low %v1895_v40, %v1909_v18  ;;  %v2679_v32 = vrot.slane %v2127_v45, 9 }
  0x8b   : > { %3018 = vmatpush3.bf16.msra.mxu0 %v3209_v8  ;;  %2925 = vmatprep.subr.bf16.mxu1 %v3212_v12  ;;  %v1941_v8 = vrot.slane %v1939_v16, 4  ;;  %v1948_v63 = vshll.u32 %v3781_v55, 16  ;;  %v3229_v16 = vld [vmem:[%s3865_s1 + $0x218] sm:$0xff]   ;;  %v2170_v26 = vrot.slane %v3781_v55, 5 }
  0x8c   : > { %3019 = vmatprep.subr.bf16.mxu0 %v3211_v15  ;;  %3029 = vmatprep.mubr.bf16.mxu0 %v2660_v28  ;;  %v1937_v28 = vsel %vm3401_vm8, %v1932_v0, %v1936_v43  ;;  %v2122_v0 = vld [vmem:[#allocation2 + $0x20] sm:$0xe]  ;;  %v2123_v43 = vld [vmem:[#allocation2 + $0x28] sm:$0xe]  ;;  %v2175_v55 = vsel %vm3587_vm11, %v2679_v32, %v2174_v21 }
  0x8d   : > { %v1945_v37 = vor.u32 %v1944_v30, %v1941_v8  ;;  %v2662_v31 = vcombine.low %v1923_v24, %v1937_v28  ;;  %v1950_v61 = vrot.slane %v1948_v63, 5  ;;  %v2674_v35 = vrot.slane %v2122_v0, 9 }
  0x8e   : > { %2926 = vmatpush3.bf16.msra.mxu1 %v3212_v12  ;;  %v1958_v12 = vrot.slane %v1956_v13, 5  ;;  %v3231_v13 = vld [vmem:[%s3865_s1 + $0x228] sm:$0xff]   ;;  %v2154_v30 = vrot.slane %v3757_v49, 5 }
  0x8f   : > { %3020 = vmatpush3.bf16.msra.mxu0 %v3211_v15  ;;  %2927 = vmatprep.subr.bf16.mxu1 %v3214_v56  ;;  %v2125_v15 = vld [vmem:[#allocation2 + $0x38] sm:$0xe]  ;;  %v1946_v4 = vrot.slane %v1945_v37, 4 }
  0x90   : > { %3021 = vmatprep.subr.bf16.mxu0 %v3213_v47  ;;  %v1959_v53 = vor.u32 %v1958_v12, %v1955_v46  ;;  %v2677_v52 = vrot.slane %v2125_v15, 9  ;;  %v2675_v46 = vrot.slane %v2123_v43, 9  ;;  %v2158_v12 = vrot.slane %v3759_v6, 5 }
  0x91   : > { %v1951_v54 = vsel %vm3401_vm8, %v1946_v4, %v1950_v61  ;;  %v2709_v61 = vld [vmem:[%s3867_s3] ss:$0 sm:$0xff] }
  0x92   : > { %2928 = vmatpush3.bf16.msra.mxu1 %v3214_v56  ;;  %v2676_v56 = vrot.slane %v2124_v36, 9  ;;  %v1960_v29 = vrot.slane %v1959_v53, 4  ;;  %v2167_v1 = vsel %vm3587_vm11, %v2677_v52, %v2166_v41  ;;  %v2159_v36 = vsel %vm3587_vm11, %v2675_v46, %v2158_v12  ;;  %v2708_v52 = vld [vmem:[%s3866_s2] ss:$0 sm:$0xff] }
  0x93   : > { %3022 = vmatpush3.bf16.msra.mxu0 %v3213_v47  ;;  %2929 = vmatprep.subr.bf16.mxu1 %v3217_v2  ;;  %v3225_v47 = vld [vmem:[%s3865_s1 + $0x208] sm:$0xff]  }
  0x94   : > { %3023 = vmatprep.subr.bf16.mxu0 %v3215_v44  ;;  %v2163_v62 = vsel %vm3587_vm11, %v2676_v56, %v2162_v50  ;;  %v1965_v23 = vsel %vm3401_vm8, %v1960_v29, %v1964_v14 }
  0x95   : > { %v2698_v38 = vcombine.low %v2163_v62, %v2167_v1  ;;  %v2663_v20 = vcombine.low %v1951_v54, %v1965_v23 }
  0x96   : > { %2930 = vmatpush3.bf16.msra.mxu1 %v3217_v2  ;;  %v2121_v2 = vld [vmem:[#allocation2 + $0x18] sm:$0xe] }
  0x97   : > { %3024 = vmatpush3.bf16.msra.mxu0 %v3215_v44  ;;  %2931 = vmatprep.subr.bf16.mxu1 %v3220_v19  ;;  %v3228_v44 = vld [vmem:[%s3865_s1 + $0x210] sm:$0xff]   ;;  %v2673_v5 = vrot.slane %v2121_v2, 9 }
  0x98   : > { %3025 = vmatprep.subr.bf16.mxu0 %v3219_v25 }
  0x99   : > { %v2151_v42 = vsel %vm3587_vm11, %v2673_v5, %v2150_v58 }
  0x9a   : > { %2932 = vmatpush3.bf16.msra.mxu1 %v3220_v19  ;;  %v2696_v10 = vcombine.low %v2147_v27, %v2151_v42  ;;  %v3232_v19 = vld [vmem:[%s3865_s1 + $0x230] sm:$0xff]  }
  0x9b   : > { %3026 = vmatpush3.bf16.msra.mxu0 %v3219_v25  ;;  %3061 = vmatprep.subr.bf16.mxu1 %v3224_v33  ;;  %v2126_v25 = vld [vmem:[#allocation2 + $0x40] sm:$0xe] }
  0x9c   : > { %3027 = vmatprep.subr.bf16.mxu0 %v3221_v34  ;;  %v2678_v57 = vrot.slane %v2126_v25, 9 }
  0x9d   : > { %2934 = vmatmul.mubr.bf16.vlgmr.msra.gmra.mrb[0].mxu1 %v3223_v51 }
  0x9e   : > { %3069 = vmatpush3.bf16.msra.mxu1 %v3224_v33  ;;  %2937 = vmatprep.mubr.bf16.mxu1 %v3226_v9  ;;  %v2171_v8 = vsel %vm3587_vm11, %v2678_v57, %v2170_v26 }
  0x9f   : > { %3028 = vmatpush3.bf16.msra.mxu0 %v3221_v34  ;;  %3062 = vmatprep.subr.bf16.mxu1 %v3225_v47  ;;  %v2155_v34 = vsel %vm3587_vm11, %v2674_v35, %v2154_v30 }
  0xa0   : > { %3037 = vmatprep.subr.bf16.mxu0 %v3224_v33  ;;  %v2697_v15 = vcombine.low %v2155_v34, %v2159_v36 }
  0xa2   : > { %3030 = vmatmul.mubr.bf16.vlgmr.msra.gmra.mrb[0].mxu0 %v2661_v60  ;;  %3070 = vmatpush3.bf16.msra.mxu1 %v3225_v47 }
  0xa3   : > { %3038 = vmatpush3.bf16.msra.mxu0 %v3224_v33  ;;  %3033 = vmatprep.mubr.bf16.mxu0 %v2662_v31  ;;  %v2699_v33 = vcombine.low %v2171_v8, %v2175_v55 }
  0xa4   : > { %3039 = vmatprep.subr.bf16.mxu0 %v3225_v47  ;;  %3063 = vmatprep.subr.bf16.mxu1 %v3228_v44 }
  0xa5   : > { %2938 = vmatmul.mubr.bf16.gmra.mrb[4].mxu1 %v3227_v3 }
  0xa6   : > { %3071 = vmatpush3.bf16.msra.mxu1 %v3228_v44  ;;  %3057 = vmatprep.mubr.bf16.mxu1 %v2698_v38 }
  0xa7   : > { %3040 = vmatpush3.bf16.msra.mxu0 %v3225_v47  ;;  %3064 = vmatprep.subr.bf16.mxu1 %v3229_v16 }
  0xa8   : > { %3041 = vmatprep.subr.bf16.mxu0 %v3228_v44 }
  0xaa   : > { %3034 = vmatmul.mubr.bf16.gmra.mrb[4].mxu0 %v2663_v20  ;;  %3072 = vmatpush3.bf16.msra.mxu1 %v3229_v16 }
  0xab   : > { %3042 = vmatpush3.bf16.msra.mxu0 %v3228_v44  ;;  %3065 = vmatprep.subr.bf16.mxu1 %v3230_v17 }
  0xac   : > { %3043 = vmatprep.subr.bf16.mxu0 %v3229_v16  ;;  %3053 = vmatprep.mubr.bf16.mxu0 %v2696_v10 }
  0xae   : > { %3073 = vmatpush3.bf16.msra.mxu1 %v3230_v17 }
  0xaf   : > { %3044 = vmatpush3.bf16.msra.mxu0 %v3229_v16  ;;  %3066 = vmatprep.subr.bf16.mxu1 %v3231_v13 }
  0xb0   : > { %3045 = vmatprep.subr.bf16.mxu0 %v3230_v17 }
  0xb2   : > { %3074 = vmatpush3.bf16.msra.mxu1 %v3231_v13 }
  0xb3   : > { %3046 = vmatpush3.bf16.msra.mxu0 %v3230_v17  ;;  %3067 = vmatprep.subr.bf16.mxu1 %v3232_v19 }
  0xb4   : > { %3047 = vmatprep.subr.bf16.mxu0 %v3231_v13 }
  0xb6   : > { %3075 = vmatpush3.bf16.msra.mxu1 %v3232_v19 }
  0xb7   : > { %3048 = vmatpush3.bf16.msra.mxu0 %v3231_v13  ;;  %3068 = vmatprep.subr.bf16.mxu1 %v3233_v22 }
  0xb8   : > { %3049 = vmatprep.subr.bf16.mxu0 %v3232_v19 }
  0xba   : > { %3076 = vmatpush3.bf16.msra.mxu1 %v3233_v22 }
  0xbb   : > { %3050 = vmatpush3.bf16.msra.mxu0 %v3232_v19 }
  0xbc   : > { %3051 = vmatprep.subr.bf16.mxu0 %v3233_v22 }
  0xbd   : > { %3058 = vmatmul.mubr.bf16.vlgmr.msra.gmra.mrb[8].mxu1 %v2699_v33 }
  0xbf   : > { %3052 = vmatpush3.bf16.msra.mxu0 %v3233_v22 }
  0xc2   : > { %3054 = vmatmul.mubr.bf16.vlgmr.msra.gmra.mrb[0].mxu0 %v2697_v15 }
 0x170   : > { %v2935_v51 = vpop.f32.mrb[0].mxu1 }
 0x171   : > { %v1136_v49 = vpop.f32.mrb[1].mxu1 }
 0x172   : > { %v2936_v40 = vpop.f32.mrb[2].mxu1 }
 0x173   : > { %v1139_v18 = vpop.f32.mrb[3].mxu1 }
 0x178   : > { %v2939_v6 = vpop.f32.mrb[4].mxu1 }
 0x179   : > { %v1152_v63 = vpop.f32.mrb[5].mxu1 }
 0x17a   : > { %v2940_v48 = vpop.f32.mrb[6].mxu1 }
 0x17b   : > { %v1155_v9 = vpop.f32.mrb[7].mxu1 }
 0x17d   : > { %v3035_v24 = vpop.f32.mrb[4].mxu0 }
 0x17e   : > { %v3081_v28 = vadd.f32 %v3035_v24, %v2939_v6  ;;  %v2097_v37 = vpop.f32.mrb[5].mxu0 }
 0x17f   : > { %v3083_v53 = vadd.f32 %v2097_v37, %v1152_v63  ;;  %v3036_v47 = vpop.f32.mrb[6].mxu0 }
 0x180   : > { %v3085_v11 = vadd.f32 %v3036_v47, %v2940_v48  ;;  %v2100_v56 = vpop.f32.mrb[7].mxu0 }
 0x181   : > { %v3087_v50 = vadd.f32 %v2100_v56, %v1155_v9 }
 0x190   : > { %v3059_v41 = vpop.f32.mrb[8].mxu1 }
 0x191   : > { %v3082_v60 = vadd.f32 %v3081_v28, %v3059_v41  ;;  %v2307_v31 = vpop.f32.mrb[9].mxu1 }
 0x192   : > { %v3084_v14 = vadd.f32 %v3083_v53, %v2307_v31  ;;  %v3060_v59 = vpop.f32.mrb[10].mxu1 }
 0x193   : > { %v2343_v2 = vmul.f32 %v3082_v60, %v2708_v52  ;;  %v3086_v4 = vadd.f32 %v3085_v11, %v3060_v59  ;;  %v2310_v29 = vpop.f32.mrb[11].mxu1 }
 0x194   : > { %v2341_v62 = vmul.f32 %v3084_v14, %v2708_v52  ;;  %v3088_v1 = vadd.f32 %v3087_v50, %v2310_v29 }
 0x195   : > { %v3055_v44 = vpop.f32.mrb[0].mxu0  ;;  %v2358_v3 = vadd.f32 %v2709_v61, %v2343_v2  ;;  %v2344_v39 = vmul.f32 %v3086_v4, %v2708_v52 }
 0x196   : > { %v3077_v7 = vadd.f32 %v3055_v44, %v2935_v51  ;;  %v2291_v5 = vpop.f32.mrb[1].mxu0  ;;  %v2356_v58 = vadd.f32 %v2709_v61, %v2341_v62  ;;  %v2342_v38 = vmul.f32 %v3088_v1, %v2708_v52 }
 0x197   : > { %v3078_v54 = vadd.f32 %v2291_v5, %v1136_v49  ;;  %v3056_v23 = vpop.f32.mrb[2].mxu0  ;;  %v2359_v16 = vadd.f32 %v2709_v61, %v2344_v39  ;;  %v2366_v10 = vmax.f32 %v2358_v3, 0.0 }
 0x198   : > { %v2339_v27 = vmul.f32 %v3077_v7, %v2708_v52  ;;  %v3079_v42 = vadd.f32 %v3056_v23, %v2936_v40  ;;  %v2294_v20 = vpop.f32.mrb[3].mxu0  ;;  %v2357_v17 = vadd.f32 %v2709_v61, %v2342_v38  ;;  %v2364_v26 = vmax.f32 %v2356_v58, 0.0 }
 0x199   : > { %v2337_v13 = vmul.f32 %v3078_v54, %v2708_v52  ;;  %v2367_v19 = vmax.f32 %v2359_v16, 0.0  ;;  %v3080_v25 = vadd.f32 %v2294_v20, %v1139_v18 }
 0x19a   : > { %v2354_v45 = vadd.f32 %v2709_v61, %v2339_v27  ;;  %v2340_v21 = vmul.f32 %v3079_v42, %v2708_v52  ;;  %v2365_v57 = vmax.f32 %v2357_v17, 0.0 }
 0x19b   : > { %v2352_v32 = vadd.f32 %v2709_v61, %v2337_v13  ;;  %v2732_v22 = vpack.c.bf16 %v2367_v19, %v2366_v10  ;;  %v2338_v0 = vmul.f32 %v3080_v25, %v2708_v52 }
 0x19c   : > { %v2355_v43 = vadd.f32 %v2709_v61, %v2340_v21  ;;  %v2727_v8 = vpack.c.bf16 %v2365_v57, %v2364_v26  ;;  %v2362_v35 = vmax.f32 %v2354_v45, 0.0 }
 0x19d   : > { %2736 = vst [vmem:[%s197_s7 + $0x18] sm:$0xff] %v2732_v22   ;;  %v2353_v55 = vadd.f32 %v2709_v61, %v2338_v0  ;;  %v2360_v46 = vmax.f32 %v2352_v32, 0.0 }
 0x19e   : > { %v2363_v30 = vmax.f32 %v2355_v43, 0.0  ;;  %2735 = vst [vmem:[%s197_s7 + $0x10] sm:$0xff] %v2727_v8  }
 0x19f   : > { %v2361_v12 = vmax.f32 %v2353_v55, 0.0 }
 0x1a0   : > { %v2722_v33 = vpack.c.bf16 %v2363_v30, %v2362_v35 }
 0x1a1   : > { %v2717_v34 = vpack.c.bf16 %v2361_v12, %v2360_v46 }
 0x1a2   : > { %2734 = vst [vmem:[%s197_s7 + $0x8] sm:$0xff] %v2722_v33  }
 0x1a3   : > { %2718 = vst [vmem:[%s197_s7] sm:$0xff] %v2717_v34  }
 0x1a4 PF: > { %s14_s15 = sadd.s32 1, %s3240_s15  }
 0x1a5   : > { %p11_p4 = scmp.ge.s32.totalorder %s14_s15, 4  }
 0x1a7   :  { %13 = sbr.rel (!%p11_p4) target bundleno = 1 (0x1), region = 76 }

// kernel: vgga_forward.4
= control target key start
LH: loop header
LB: loop body
LE: loop exit
PB: predicated region body
PF: predicated region fallthrough
CT: control target
= control target key end

     0   :  { %s7794_s21 = smov 0   ;;  %s9679_s0 = inlined_call_operand.vmem [shape: bf16[2,16,16,128], index: 0, kind: input, shape index: {}]   ;;  %s9680_s1 = inlined_call_operand.vmem [shape: bf16[9,128,128], index: 1, kind: input, shape index: {}]   ;;  %s9681_s2 = inlined_call_operand.vmem [shape: f32[1,128], index: 2, kind: input, shape index: {}]   ;;  %s9682_s3 = inlined_call_operand.vmem [shape: f32[1,128], index: 3, kind: input, shape index: {}]   ;;  %s9683_s4 = inlined_call_operand.vmem [shape: f32[1,128], index: 4, kind: input, shape index: {}]   ;;  %s9684_s5 = inlined_call_operand.vmem [shape: f32[1,128], index: 5, kind: input, shape index: {}]   ;;  %s9685_s6 = inlined_call_operand.vmem [shape: bf16[2,8,8,128], index: 6, kind: output, shape index: {}]  }
   0x1 LB: > { %s6046_s22 = sadd.s32 4294967295, %s7756_s21   ;;  %p6050_p0 = scmp.ge.s32.totalorder %s7756_s21, 1  ;;  %s7756_s21 = sphi %s7794_s21, %s16_s21  }
   0x2   : > { %p212_p1 = scmp.lt.s32.totalorder %s7756_s21, 3 }
   0x4   : > { %p213_p2 = pnand %p6050_p0, %p212_p1 }
   0x6   : > { %216 = sbr.rel (%p213_p2) target bundleno = 706 (0x2c2), region = 44 }
   0xd   : > { %v7550_v0 = vld [vmem:[%s9680_s1 + $0x40] sm:$0xff]   ;;  %v7758_v2 = vmov 0   ;;  %v7552_v3 = vld [vmem:[%s9680_s1 + $0x48] sm:$0xff]   ;;  %v7554_v5 = vld [vmem:[%s9680_s1 + $0x50] sm:$0xff]   ;;  %p242_p3 = scmp.lt.s32.totalorder %s6046_s22, 1  ;;  %vm869_vm3 = vcmask 1043456  }
   0xe   : > { %v7551_v1 = vld [vmem:[%s9680_s1 + $0x100] sm:$0xff]   ;;  %253 = vst [vmem:[#allocation2] sm:$0xf] %v7758_v2  ;;  %254 = vst [vmem:[#allocation2 + $0x4] sm:$0xf] %v7758_v2  ;;  %6837 = vmatprep.subr.bf16.mxu1 %v7550_v0  ;;  %v7553_v4 = vld [vmem:[%s9680_s1 + $0x108] sm:$0xff]  }
   0xf   : > { %255 = vst [vmem:[#allocation2 + $0x8] sm:$0x1] %v7758_v2  ;;  %256 = vst [vmem:[#allocation2 + $0xc] sm:$0xf] %v7758_v2  ;;  %7029 = vmatprep.subr.bf16.mxu0 %v7551_v1  ;;  %6838 = vmatpush3.bf16.msra.mxu1 %v7550_v0  ;;  %v7555_v6 = vld [vmem:[%s9680_s1 + $0x110] sm:$0xff]   ;;  %v7556_v7 = vld [vmem:[%s9680_s1 + $0x58] sm:$0xff]  }
  0x10   : > { %257 = vst [vmem:[#allocation2 + $0x10] sm:$0xf] %v7758_v2  ;;  %258 = vst [vmem:[#allocation2 + $0x14] sm:$0x1] %v7758_v2  ;;  %7030 = vmatpush3.bf16.msra.mxu0 %v7551_v1  ;;  %6839 = vmatprep.subr.bf16.mxu1 %v7552_v3  ;;  %s9761_s22 = smov (!%p242_p3, %s6046_s22), 1  ;;  %v7557_v8 = vld [vmem:[%s9680_s1 + $0x118] sm:$0xff]  }
  0x11   : > { %259 = vst [vmem:[#allocation2 + $0x18] sm:$0xf] %v7758_v2  ;;  %260 = vst [vmem:[#allocation2 + $0x1c] sm:$0xf] %v7758_v2  ;;  %7031 = vmatprep.subr.bf16.mxu0 %v7553_v4  ;;  %v7558_v9 = vld [vmem:[%s9680_s1 + $0x60] sm:$0xff]   ;;  %s6485_s17 = sshll.u32 %s9761_s22, 7 }
  0x12   : > { %261 = vst [vmem:[#allocation2 + $0x20] sm:$0x1] %v7758_v2  ;;  %262 = vst [vmem:[#allocation2 + $0x24] sm:$0xf] %v7758_v2  ;;  %v7559_v10 = vld [vmem:[%s9680_s1 + $0x120] sm:$0xff]   ;;  %v7560_v11 = vld [vmem:[%s9680_s1 + $0x68] sm:$0xff]   ;;  %s7845_s26 = scalar_lea.vmem %s9679_s0, %s6485_s17 }
  0x13   : > { %263 = vst [vmem:[#allocation2 + $0x28] sm:$0xf] %v7758_v2  ;;  %264 = vst [vmem:[#allocation2 + $0x2c] sm:$0x1] %v7758_v2  ;;  %6840 = vmatpush3.bf16.msra.mxu1 %v7552_v3  ;;  %v7561_v15 = vld [vmem:[%s9680_s1 + $0x128] sm:$0xff]   ;;  %v6520_v21 = vld [vmem:[%s7845_s26] sm:$0xff]  }
  0x14   : > { %265 = vst [vmem:[#allocation2 + $0x30] sm:$0xf] %v7758_v2  ;;  %266 = vst [vmem:[#allocation2 + $0x34] sm:$0xf] %v7758_v2  ;;  %7032 = vmatpush3.bf16.msra.mxu0 %v7553_v4  ;;  %6841 = vmatprep.subr.bf16.mxu1 %v7554_v5  ;;  %vm1050_vm0 = vsmask.f32 3328  ;;  %v6521_v24 = vunpack.c.l.bf16 %v6520_v21  ;;  %v6522_v25 = vunpack.c.h.bf16 %v6520_v21 }
  0x15   : > { %267 = vst [vmem:[#allocation2 + $0x38] sm:$0x1] %v7758_v2  ;;  %268 = vst [vmem:[#allocation2 + $0x3c] sm:$0xf] %v7758_v2  ;;  %7033 = vmatprep.subr.bf16.mxu0 %v7555_v6  ;;  %v986_v12 = vld [vmem:[#allocation2] sm:$0xf] }
  0x16   : > { %269 = vst [vmem:[#allocation2 + $0x40] sm:$0xf] %v7758_v2  ;;  %270 = vst [vmem:[#allocation2 + $0x44] sm:$0x1] %v7758_v2  ;;  %v987_v13 = vld [vmem:[#allocation2 + $0x4] sm:$0xf] }
  0x17   : > { %271 = vst [vmem:[#allocation2 + $0x48] sm:$0xf] %v7758_v2  ;;  %272 = vst [vmem:[#allocation2 + $0x4c] sm:$0xf] %v7758_v2  ;;  %6842 = vmatpush3.bf16.msra.mxu1 %v7554_v5  ;;  %v1034_v14 = vld [vmem:[#allocation2 + $0x8] sm:$0x1] }
  0x18   : > { %273 = vst [vmem:[#allocation2 + $0x50] sm:$0x1] %v7758_v2  ;;  %274 = vst [vmem:[#allocation2 + $0x54] sm:$0xf] %v7758_v2  ;;  %7034 = vmatpush3.bf16.msra.mxu0 %v7555_v6  ;;  %6843 = vmatprep.subr.bf16.mxu1 %v7556_v7  ;;  %v1054_v16 = vshrl.u32 %v986_v12, 16  ;;  %v1057_v17 = vshll.u32 %v986_v12, 16 }
  0x19   : > { %275 = vst [vmem:[#allocation2 + $0x58] sm:$0xf] %v7758_v2  ;;  %276 = vst [vmem:[#allocation2 + $0x5c] sm:$0x1] %v7758_v2  ;;  %7035 = vmatprep.subr.bf16.mxu0 %v7557_v8  ;;  %vm1051_vm1 = vsmask.f32 7440 }
  0x1a   : > { %277 = vst [vmem:[#allocation2 + $0x60] sm:$0xf] %v7758_v2  ;;  %278 = vst [vmem:[#allocation2 + $0x64] sm:$0xf] %v7758_v2  ;;  %v1063_v18 = vshll.u32 %v987_v13, 16  ;;  %v1067_v19 = vshrl.u32 %v987_v13, 16 }
  0x1b   : > { %279 = vst [vmem:[#allocation2 + $0x68] sm:$0x1] %v7758_v2  ;;  %280 = vst [vmem:[#allocation2 + $0x6c] sm:$0xf] %v7758_v2  ;;  %6844 = vmatpush3.bf16.msra.mxu1 %v7556_v7  ;;  %v1073_v20 = vshll.u32 %v1034_v14, 16  ;;  %v1056_v22 = vrot.slane %v1054_v16, 4 }
  0x1c   : > { %281 = vst [vmem:[#allocation2 + $0x70] sm:$0xf] %v7758_v2  ;;  %282 = vst [vmem:[#allocation2 + $0x74] sm:$0x1] %v7758_v2  ;;  %7036 = vmatpush3.bf16.msra.mxu0 %v7557_v8  ;;  %6845 = vmatprep.subr.bf16.mxu1 %v7558_v9  ;;  %v1059_v23 = vrot.slane %v1057_v17, 5  ;;  %v7562_v27 = vld [vmem:[%s9680_s1 + $0x70] sm:$0xff]  }
  0x1d   : > { %283 = vst [vmem:[#allocation2 + $0x78] sm:$0xf] %v7758_v2  ;;  %284 = vst [vmem:[#allocation2 + $0x7c] sm:$0xf] %v7758_v2  ;;  %7037 = vmatprep.subr.bf16.mxu0 %v7559_v10  ;;  %v7854_v26 = vld [vmem:[%s9681_s2] ss:$0 sm:$0xff] }
  0x1e   : > { %285 = vst [vmem:[#allocation2 + $0x80] sm:$0x1] %v7758_v2  ;;  %286 = vst [vmem:[#allocation2 + $0x84] sm:$0xf] %v7758_v2  ;;  %v1065_v28 = vrot.slane %v1063_v18, 5  ;;  %v1069_v29 = vrot.slane %v1067_v19, 4  ;;  %v1060_v32 = vor.u32 %v1059_v23, %v1056_v22  ;;  %v378_v33 = vmul.f32 %v6521_v24, %v7854_v26 }
  0x1f   : > { %287 = vst [vmem:[#allocation2 + $0x88] sm:$0xf] %v7758_v2  ;;  %288 = vst [vmem:[#allocation2 + $0x8c] sm:$0x1] %v7758_v2  ;;  %6846 = vmatpush3.bf16.msra.mxu1 %v7558_v9  ;;  %v7862_v30 = vld [vmem:[%s9682_s3] ss:$0 sm:$0xff]  ;;  %v379_v34 = vmul.f32 %v6522_v25, %v7854_v26 }
  0x20   : > { %289 = vst [vmem:[#allocation2 + $0x90] sm:$0xf] %v7758_v2  ;;  %290 = vst [vmem:[#allocation2 + $0x94] sm:$0xf] %v7758_v2  ;;  %7038 = vmatpush3.bf16.msra.mxu0 %v7559_v10  ;;  %6847 = vmatprep.subr.bf16.mxu1 %v7560_v11  ;;  %v7563_v31 = vld [vmem:[%s9680_s1 + $0x130] sm:$0xff]   ;;  %v1070_v36 = vor.u32 %v1069_v29, %v1065_v28  ;;  %v1075_v37 = vrot.slane %v1073_v20, 5  ;;  %v417_v39 = vadd.f32 %v7862_v30, %v378_v33 }
  0x21   : > { %291 = vst [vmem:[#allocation2 + $0x98] sm:$0x1] %v7758_v2  ;;  %292 = vst [vmem:[#allocation2 + $0x9c] sm:$0xf] %v7758_v2  ;;  %7039 = vmatprep.subr.bf16.mxu0 %v7561_v15  ;;  %v1061_v38 = vrot.slane %v1060_v32, 4  ;;  %v418_v40 = vadd.f32 %v7862_v30, %v379_v34  ;;  %v7564_v41 = vld [vmem:[%s9680_s1 + $0x78] sm:$0xff]  }
  0x22   : > { %293 = vst [vmem:[#allocation2 + $0xa0] sm:$0xf] %v7758_v2  ;;  %294 = vst [vmem:[#allocation2 + $0xa4] sm:$0x1] %v7758_v2  ;;  %v1071_v42 = vrot.slane %v1070_v36, 4  ;;  %vm876_vm5 = vcmask 1040384   ;;  %v6487_v46 = vpack.c.bf16 %v417_v39, %v417_v39 }
  0x23   : > { %295 = vst [vmem:[#allocation2 + $0xa8] sm:$0xf] %v7758_v2  ;;  %296 = vst [vmem:[#allocation2 + $0xac] sm:$0xf] %v7758_v2  ;;  %6848 = vmatpush3.bf16.msra.mxu1 %v7560_v11  ;;  %vm545_vm4 = vsmask.f32 256  ;;  %v6488_v47 = vpack.c.bf16 %v418_v40, %v418_v40 }
  0x24   : > { %297 = vst [vmem:[#allocation2 + $0xb0] sm:$0x1] %v7758_v2  ;;  %298 = vst [vmem:[#allocation2 + $0xb4] sm:$0xf] %v7758_v2  ;;  %7040 = vmatpush3.bf16.msra.mxu0 %v7561_v15  ;;  %6849 = vmatprep.subr.bf16.mxu1 %v7562_v27  ;;  %v6603_v43 = vld [vmem:[%s7845_s26 + $0x8] sm:$0xff]   ;;  %v7565_v44 = vld [vmem:[%s9680_s1 + $0x138] sm:$0xff]  }
  0x25   : > { %299 = vst [vmem:[#allocation2 + $0xb8] sm:$0xf] %v7758_v2  ;;  %300 = vst [vmem:[#allocation2 + $0xbc] sm:$0x1] %v7758_v2  ;;  %7041 = vmatprep.subr.bf16.mxu0 %v7563_v31  ;;  %v6525_v48 = vunpack.c.l.bf16 %v6603_v43  ;;  %vm546_vm6 = vsmask.f32 4368  ;;  %v6526_v51 = vunpack.c.h.bf16 %v6603_v43 }
  0x26   : > { %301 = vst [vmem:[#allocation2 + $0xc0] sm:$0xf] %v7758_v2  ;;  %302 = vst [vmem:[#allocation2 + $0xc4] sm:$0xf] %v7758_v2  ;;  %vm870_vm7 = vsmask.f32 7938 }
  0x27   : > { %303 = vst [vmem:[#allocation2 + $0xc8] sm:$0x1] %v7758_v2  ;;  %304 = vst [vmem:[#allocation2 + $0xcc] sm:$0xf] %v7758_v2  ;;  %v7891_v50 = vld [vmem:[%s9680_s1] sm:$0xff]   ;;  %v6604_v52 = vld [vmem:[%s7845_s26 + $0x10] sm:$0xff]   ;;  %6850 = vmatpush3.bf16.msra.mxu1 %v7562_v27  ;;  %v380_v61 = vmul.f32 %v6525_v48, %v7854_v26  ;;  %v381_v62 = vmul.f32 %v6526_v51, %v7854_v26 }
  0x28   : > { %305 = vst [vmem:[#allocation2 + $0xd0] sm:$0xf] %v7758_v2  ;;  %306 = vst [vmem:[#allocation2 + $0xd4] sm:$0x1] %v7758_v2  ;;  %v549_v54 = vshrl.u32 %v6487_v46, 16  ;;  %v552_v55 = vshll.u32 %v6487_v46, 16  ;;  %7042 = vmatpush3.bf16.msra.mxu0 %v7563_v31  ;;  %6851 = vmatprep.subr.bf16.mxu1 %v7564_v41  ;;  %v6529_v63 = vunpack.c.l.bf16 %v6604_v52  ;;  %v6530_v3 = vunpack.c.h.bf16 %v6604_v52 }
  0x29   : > { %vm7871_vm2 = vmor %vm1050_vm0, %vm1051_vm1  ;;  %v557_v56 = vshrl.u32 %v6488_v47, 16  ;;  %v7897_v57 = vld [vmem:[%s9680_s1 + $0x140] sm:$0xff]   ;;  %v560_v58 = vshll.u32 %v6488_v47, 16  ;;  %v872_v59 = vld [vmem:[#allocation2 + $0xc] sm:$0xf]  ;;  %7043 = vmatprep.subr.bf16.mxu0 %v7565_v44  ;;  %v419_v7 = vadd.f32 %v7862_v30, %v380_v61  ;;  %v420_v8 = vadd.f32 %v7862_v30, %v381_v62  ;;  %s6486_s8 = sshll.u32 %s9761_s22, 5 }
  0x2a   : > { %v1066_v45 = vsel %vm7871_vm2, %v1061_v38, %v1065_v28  ;;  %v1076_v49 = vsel %vm7871_vm2, %v1071_v42, %v1075_v37  ;;  %vm7901_vm8 = vmand %vm876_vm5, %vm545_vm4  ;;  %v551_v1 = vrot.slane %v549_v54, 7  ;;  %v6605_v4 = vld [vmem:[%s7845_s26 + $0x18] sm:$0xff]   ;;  %v878_v6 = vld [vmem:[#allocation2 + $0x14] sm:$0x1]  ;;  %v382_v9 = vmul.f32 %v6529_v63, %v7854_v26  ;;  %s9636_s10 = scalar_lea.vmem %s9685_s6, %s6486_s8 }
  0x2b   : > { %v6105_v53 = vcombine.low %v1066_v45, %v1076_v49  ;;  %vm7909_vm9 = vmor %vm545_vm4, %vm546_vm6  ;;  %v559_v2 = vrot.slane %v557_v56, 7  ;;  %v6533_v10 = vunpack.c.l.bf16 %v6605_v4  ;;  %6852 = vmatpush3.bf16.msra.mxu1 %v7564_v41  ;;  %v6489_v15 = vpack.c.bf16 %v419_v7, %v419_v7  ;;  %v6606_v36 = vld [vmem:[%s7845_s26 + $0x20] sm:$0xff]   ;;  %v881_v37 = vld [vmem:[#allocation2 + $0x18] sm:$0xf] }
  0x2c   : > { %vm7916_vm10 = vmand %vm869_vm3, %vm870_vm7  ;;  %v554_v11 = vor.u32 %v552_v55, %v551_v1  ;;  %v555_v12 = vrot.slane %v551_v1, 4  ;;  %7044 = vmatpush3.bf16.msra.mxu0 %v7565_v44  ;;  %6885 = vmatprep.subr.bf16.mxu1 %v7891_v50  ;;  %v6490_v16 = vpack.c.bf16 %v420_v8, %v420_v8  ;;  %v383_v17 = vmul.f32 %v6530_v3, %v7854_v26  ;;  %v885_v38 = vld [vmem:[#allocation2 + $0x20] sm:$0x1]  ;;  %v888_v56 = vld [vmem:[#allocation2 + $0x24] sm:$0xf] }
  0x2d   : > { %6853 = vmatprep.mubr.bf16.mxu1 %v6105_v53  ;;  %v562_v13 = vor.u32 %v560_v58, %v559_v2  ;;  %v564_v14 = vrot.slane %v559_v2, 4  ;;  %v6534_v18 = vunpack.c.h.bf16 %v6605_v4  ;;  %7077 = vmatprep.subr.bf16.mxu0 %v7897_v57  ;;  %v421_v22 = vadd.f32 %v7862_v30, %v382_v9 }
  0x2e   : > { %v873_v20 = vsel %vm7916_vm10, %v554_v11, %v872_v59  ;;  %v566_v23 = vshrl.u32 %v6489_v15, 16  ;;  %v569_v24 = vshll.u32 %v6489_v15, 16  ;;  %v574_v25 = vshrl.u32 %v6490_v16, 16 }
  0x2f   : > { %v563_v19 = vsel %vm7909_vm9, %v555_v12, %v562_v13  ;;  %v879_v21 = vsel %vm7901_vm8, %v564_v14, %v878_v6  ;;  %874 = vst [vmem:[#allocation2 + $0xc] sm:$0xf] %v873_v20  ;;  %v577_v27 = vshll.u32 %v6490_v16, 16  ;;  %v422_v28 = vadd.f32 %v7862_v30, %v383_v17 }
  0x30   : > { %875 = vst [vmem:[#allocation2 + $0x10] sm:$0xf] %v563_v19  ;;  %880 = vst [vmem:[#allocation2 + $0x14] sm:$0x1] %v879_v21  ;;  %v6491_v29 = vpack.c.bf16 %v421_v22, %v421_v22  ;;  %v384_v31 = vmul.f32 %v6533_v10, %v7854_v26  ;;  %v385_v32 = vmul.f32 %v6534_v18, %v7854_v26  ;;  %v568_v33 = vrot.slane %v566_v23, 7 }
  0x31   : > { %v576_v34 = vrot.slane %v574_v25, 7  ;;  %v7937_v39 = vpack.c.bf16 %v422_v28, %v422_v28  ;;  %v6537_v51 = vunpack.c.l.bf16 %v6606_v36  ;;  %v6538_v1 = vunpack.c.h.bf16 %v6606_v36 }
  0x32   : > { %v583_v40 = vshrl.u32 %v6491_v29, 16  ;;  %v586_v41 = vshll.u32 %v6491_v29, 16  ;;  %v423_v42 = vadd.f32 %v7862_v30, %v384_v31  ;;  %v571_v43 = vor.u32 %v569_v24, %v568_v33 }
  0x33   : > { %v572_v44 = vrot.slane %v568_v33, 4  ;;  %v579_v45 = vor.u32 %v577_v27, %v576_v34  ;;  %v581_v46 = vrot.slane %v576_v34, 4  ;;  %v591_v48 = vshrl.u32 %v7937_v39, 16 }
  0x34   : > { %v7940_v47 = vrot.slane %v583_v40, 7  ;;  %v424_v49 = vadd.f32 %v7862_v30, %v385_v32  ;;  %v882_v53 = vsel %vm7916_vm10, %v571_v43, %v881_v37  ;;  %v594_v55 = vshll.u32 %v7937_v39, 16  ;;  %v7578_v39 = vld [vmem:[%s9680_s1 + $0x20] sm:$0xff]  }
  0x35   : > { %v580_v52 = vsel %vm7909_vm9, %v572_v44, %v579_v45  ;;  %v886_v54 = vsel %vm7901_vm8, %v581_v46, %v885_v38  ;;  %883 = vst [vmem:[#allocation2 + $0x18] sm:$0xf] %v882_v53  ;;  %v7952_v63 = vpack.c.bf16 %v423_v42, %v423_v42  ;;  %v386_v13 = vmul.f32 %v6537_v51, %v7854_v26 }
  0x36   : > { %v988_v58 = vld [vmem:[#allocation2 + $0xc] sm:$0xf]  ;;  %884 = vst [vmem:[#allocation2 + $0x1c] sm:$0xf] %v580_v52  ;;  %887 = vst [vmem:[#allocation2 + $0x20] sm:$0x1] %v886_v54  ;;  %v588_v62 = vor.u32 %v586_v41, %v7940_v47  ;;  %v7958_v12 = vpack.c.bf16 %v424_v49, %v424_v49  ;;  %v387_v31 = vmul.f32 %v6538_v1, %v7854_v26 }
  0x37   : > { %v989_v59 = vld [vmem:[#allocation2 + $0x10] sm:$0xf]  ;;  %v1035_v61 = vld [vmem:[#allocation2 + $0x14] sm:$0x1]  ;;  %v1078_v2 = vshrl.u32 %v988_v58, 16  ;;  %v1081_v3 = vshll.u32 %v988_v58, 16  ;;  %v7968_v44 = vadd.f32 %v7862_v30, %v386_v13 }
  0x38   : > { %v1087_v4 = vshll.u32 %v989_v59, 16  ;;  %v1091_v6 = vshrl.u32 %v989_v59, 16  ;;  %v2903_v7 = vld [vmem:[#allocation2 + $0xc] sm:$0xf]  ;;  %v1097_v8 = vshll.u32 %v1035_v61, 16  ;;  %v889_v11 = vsel %vm7916_vm10, %v588_v62, %v888_v56 }
  0x39   : > { %v2904_v9 = vld [vmem:[#allocation2 + $0x10] sm:$0xf]  ;;  %v7954_v10 = vld [vmem:[#allocation2 + $0x14] sm:$0x1]  ;;  %v1080_v14 = vrot.slane %v1078_v2, 4  ;;  %v1083_v15 = vrot.slane %v1081_v3, 5 }
  0x3a   : > { %v1089_v16 = vrot.slane %v1087_v4, 5  ;;  %v1093_v17 = vrot.slane %v1091_v6, 4  ;;  %890 = vst [vmem:[#allocation2 + $0x24] sm:$0xf] %v889_v11  ;;  %v1099_v18 = vrot.slane %v1097_v8, 5  ;;  %v2952_v19 = vshrl.u32 %v2903_v7, 16 }
  0x3b   : > { %v2955_v20 = vshll.u32 %v2903_v7, 16  ;;  %v2961_v21 = vshll.u32 %v2904_v9, 16  ;;  %v1084_v22 = vor.u32 %v1083_v15, %v1080_v14  ;;  %v2965_v24 = vshrl.u32 %v2904_v9, 16  ;;  %v7569_v59 = vld [vmem:[%s9680_s1 + $0x8] sm:$0xff]  }
  0x3c   : > { %v1094_v23 = vor.u32 %v1093_v17, %v1089_v16  ;;  %v2971_v25 = vshll.u32 %v7954_v10, 16  ;;  %v2954_v27 = vrot.slane %v2952_v19, 4  ;;  %v2906_v37 = vld [vmem:[#allocation2 + $0x18] sm:$0xf]  ;;  %v3726_v4 = vrot.slane %v7954_v10, 5 }
  0x3d   : > { %v2957_v28 = vrot.slane %v2955_v20, 5  ;;  %v2963_v29 = vrot.slane %v2961_v21, 5  ;;  %v1085_v32 = vrot.slane %v1084_v22, 4  ;;  %v2967_v34 = vrot.slane %v2965_v24, 4  ;;  %v7963_v40 = vld [vmem:[#allocation2 + $0x1c] sm:$0xf] }
  0x3e   : > { %v1095_v33 = vrot.slane %v1094_v23, 4  ;;  %v2973_v36 = vrot.slane %v2971_v25, 5  ;;  %v7965_v41 = vld [vmem:[#allocation2 + $0x20] sm:$0x1]  ;;  %v2976_v42 = vshrl.u32 %v2906_v37, 16  ;;  %v2979_v43 = vshll.u32 %v2906_v37, 16 }
  0x3f   : > { %v2958_v38 = vor.u32 %v2957_v28, %v2954_v27  ;;  %v1090_v45 = vsel %vm7871_vm2, %v1085_v32, %v1089_v16  ;;  %v2968_v49 = vor.u32 %v2967_v34, %v2963_v29  ;;  %v2985_v51 = vshll.u32 %v7963_v40, 16  ;;  %v990_v58 = vld [vmem:[#allocation2 + $0x18] sm:$0xf]  ;;  %v991_v7 = vld [vmem:[#allocation2 + $0x1c] sm:$0xf]  ;;  %v7572_v21 = vld [vmem:[%s9680_s1 + $0x10] sm:$0xff]  }
  0x40   : > { %v1100_v46 = vsel %vm7871_vm2, %v1095_v33, %v1099_v18  ;;  %v2978_v54 = vrot.slane %v2976_v42, 4  ;;  %v2981_v56 = vrot.slane %v2979_v43, 5  ;;  %v2989_v1 = vshrl.u32 %v7963_v40, 16  ;;  %v1036_v8 = vld [vmem:[#allocation2 + $0x20] sm:$0x1] }
  0x41   : > { %v6106_v52 = vcombine.low %v1090_v45, %v1100_v46  ;;  %v2959_v53 = vrot.slane %v2958_v38, 4  ;;  %v2969_v61 = vrot.slane %v2968_v49, 4  ;;  %v2987_v62 = vrot.slane %v2985_v51, 5  ;;  %v992_v16 = vld [vmem:[#allocation2 + $0x24] sm:$0xf]  ;;  %v7575_v46 = vld [vmem:[%s9680_s1 + $0x18] sm:$0xff]  }
  0x42   : > { %v2995_v2 = vshll.u32 %v7965_v41, 16  ;;  %v2982_v6 = vor.u32 %v2981_v56, %v2978_v54  ;;  %v7984_v9 = vadd.f32 %v7862_v30, %v387_v31  ;;  %v2991_v13 = vrot.slane %v2989_v1, 4  ;;  %v892_v31 = vld [vmem:[#allocation2 + $0x2c] sm:$0x1]  ;;  %v2909_v32 = vld [vmem:[#allocation2 + $0x24] sm:$0xf] }
  0x43   : > { %6854 = vmatmul.mubr.bf16.vlgmr.msra.gmra.mrb[0].mxu1 %v6106_v52  ;;  %v2964_v3 = vsel %vm7871_vm2, %v2959_v53, %v2963_v29  ;;  %v2974_v11 = vsel %vm7871_vm2, %v2969_v61, %v2973_v36  ;;  %v3730_v14 = vrot.slane %v7963_v40, 5  ;;  %v1102_v15 = vshrl.u32 %v990_v58, 16 }
  0x44   : > { %6886 = vmatpush3.bf16.msra.mxu1 %v7891_v50  ;;  %v6265_v17 = vcombine.low %v2964_v3, %v2974_v11  ;;  %v2983_v18 = vrot.slane %v2982_v6, 4  ;;  %v2997_v19 = vrot.slane %v2995_v2, 5  ;;  %v1105_v20 = vshll.u32 %v990_v58, 16 }
  0x45   : > { %6887 = vmatprep.subr.bf16.mxu1 %v7569_v59  ;;  %v2992_v22 = vor.u32 %v2991_v13, %v2987_v62  ;;  %v1104_v23 = vrot.slane %v1102_v15, 4  ;;  %v1111_v24 = vshll.u32 %v991_v7, 16  ;;  %v1115_v25 = vshrl.u32 %v991_v7, 16  ;;  %v8024_v15 = vld [vmem:[%s7845_s26 + $0x28] sm:$0xff]  }
  0x46   : > { %7045 = vmatprep.mubr.bf16.mxu0 %v6265_v17  ;;  %v2988_v50 = vsel %vm7871_vm2, %v2983_v18, %v2987_v62  ;;  %v1107_v27 = vrot.slane %v1105_v20, 5  ;;  %v1121_v28 = vshll.u32 %v1036_v8, 16  ;;  %v589_v29 = vrot.slane %v7940_v47, 4 }
  0x47   : > { %v2993_v33 = vrot.slane %v2992_v22, 4  ;;  %v1113_v34 = vrot.slane %v1111_v24, 5  ;;  %v1117_v36 = vrot.slane %v1115_v25, 4  ;;  %v593_v37 = vrot.slane %v591_v48, 7  ;;  %v7568_v48 = vld [vmem:[%s9680_s1 + $0x148] sm:$0xff]  }
  0x48   : > { %6888 = vmatpush3.bf16.msra.mxu1 %v7569_v59  ;;  %v1108_v38 = vor.u32 %v1107_v27, %v1104_v23  ;;  %v1123_v42 = vrot.slane %v1121_v28, 5  ;;  %v1126_v43 = vshrl.u32 %v992_v16, 16  ;;  %v1129_v45 = vshll.u32 %v992_v16, 16  ;;  %v895_v22 = vld [vmem:[#allocation2 + $0x30] sm:$0xf] }
  0x49   : > { %6889 = vmatprep.subr.bf16.mxu1 %v7572_v21  ;;  %v2998_v47 = vsel %vm7871_vm2, %v2993_v33, %v2997_v19  ;;  %v1118_v49 = vor.u32 %v1117_v36, %v1113_v34  ;;  %v596_v51 = vor.u32 %v594_v55, %v593_v37  ;;  %v598_v52 = vrot.slane %v593_v37, 4  ;;  %v7570_v19 = vld [vmem:[%s9680_s1 + $0x150] sm:$0xff]   ;;  %v899_v27 = vld [vmem:[#allocation2 + $0x38] sm:$0x1] }
  0x4a   : > { %v6266_v53 = vcombine.low %v2988_v50, %v2998_v47  ;;  %v1109_v54 = vrot.slane %v1108_v38, 4  ;;  %v1128_v56 = vrot.slane %v1126_v43, 4  ;;  %v1131_v58 = vrot.slane %v1129_v45, 5 }
  0x4b   : > { %v1119_v59 = vrot.slane %v1118_v49, 4  ;;  %v597_v61 = vsel %vm7909_vm9, %v589_v29, %v596_v51  ;;  %v893_v62 = vsel %vm7901_vm8, %v598_v52, %v892_v31  ;;  %v3000_v1 = vshrl.u32 %v2909_v32, 16 }
  0x4c   : > { %6890 = vmatpush3.bf16.msra.mxu1 %v7572_v21  ;;  %7046 = vmatmul.mubr.bf16.vlgmr.msra.gmra.mrb[0].mxu0 %v6266_v53  ;;  %v1114_v55 = vsel %vm7871_vm2, %v1109_v54, %v1113_v34  ;;  %891 = vst [vmem:[#allocation2 + $0x28] sm:$0xf] %v597_v61  ;;  %894 = vst [vmem:[#allocation2 + $0x2c] sm:$0x1] %v893_v62  ;;  %v1132_v2 = vor.u32 %v1131_v58, %v1128_v56  ;;  %v3003_v3 = vshll.u32 %v2909_v32, 16  ;;  %v7571_v34 = vld [vmem:[%s9680_s1 + $0x158] sm:$0xff]  }
  0x4d   : > { %v600_v6 = vshrl.u32 %v7952_v63, 16  ;;  %6891 = vmatprep.subr.bf16.mxu1 %v7575_v46  ;;  %7078 = vmatpush3.bf16.msra.mxu0 %v7897_v57  ;;  %v1124_v7 = vsel %vm7871_vm2, %v1119_v59, %v1123_v42  ;;  %v3002_v8 = vrot.slane %v3000_v1, 4  ;;  %v603_v11 = vshll.u32 %v7952_v63, 16  ;;  %v902_v56 = vld [vmem:[#allocation2 + $0x3c] sm:$0xf]  ;;  %v7573_v58 = vld [vmem:[%s9680_s1 + $0x160] sm:$0xff]  }
  0x4e   : > { %v608_v13 = vshrl.u32 %v7958_v12, 16  ;;  %7079 = vmatprep.subr.bf16.mxu0 %v7568_v48  ;;  %v6107_v16 = vcombine.low %v1114_v55, %v1124_v7  ;;  %v8026_v17 = vrot.slane %v1132_v2, 4  ;;  %v3005_v18 = vrot.slane %v3003_v3, 5 }
  0x4f   : > { %v602_v57 = vrot.slane %v600_v6, 7  ;;  %v611_v21 = vshll.u32 %v7958_v12, 16  ;;  %v6495_v63 = vpack.c.bf16 %v7968_v44, %v7968_v44  ;;  %v6496_v23 = vpack.c.bf16 %v7984_v9, %v7984_v9  ;;  %v7580_v12 = vld [vmem:[%s9680_s1 + $0x28] sm:$0xff]  }
  0x50   : > { %v610_v20 = vrot.slane %v608_v13, 7  ;;  %6892 = vmatpush3.bf16.msra.mxu1 %v7575_v46  ;;  %6857 = vmatprep.mubr.bf16.mxu1 %v6107_v16  ;;  %v3006_v24 = vor.u32 %v3005_v18, %v3002_v8  ;;  %v6541_v28 = vunpack.c.l.bf16 %v8024_v15  ;;  %v6542_v47 = vunpack.c.h.bf16 %v8024_v15  ;;  %v8061_v13 = vld [vmem:[%s7845_s26 + $0x30] sm:$0xff]  }
  0x51   : > { %v605_v25 = vor.u32 %v603_v11, %v602_v57  ;;  %v606_v50 = vrot.slane %v602_v57, 4  ;;  %6893 = vmatprep.subr.bf16.mxu1 %v7578_v39  ;;  %7080 = vmatpush3.bf16.msra.mxu0 %v7568_v48  ;;  %v617_v44 = vshrl.u32 %v6495_v63, 16  ;;  %v620_v32 = vshll.u32 %v6495_v63, 16  ;;  %v906_v57 = vld [vmem:[#allocation2 + $0x44] sm:$0x1] }
  0x52   : > { %v613_v29 = vor.u32 %v611_v21, %v610_v20  ;;  %v615_v31 = vrot.slane %v610_v20, 4  ;;  %v8040_v33 = vrot.slane %v3006_v24, 4  ;;  %7081 = vmatprep.subr.bf16.mxu0 %v7570_v19  ;;  %v625_v36 = vshrl.u32 %v6496_v23, 16 }
  0x53   : > { %v896_v9 = vsel %vm7916_vm10, %v605_v25, %v895_v22  ;;  %v628_v37 = vshll.u32 %v6496_v23, 16  ;;  %v993_v38 = vld [vmem:[#allocation2 + $0x28] sm:$0xf]  ;;  %v1037_v42 = vld [vmem:[#allocation2 + $0x2c] sm:$0x1]  ;;  %v388_v49 = vmul.f32 %v6541_v28, %v7854_v26  ;;  %v619_v62 = vrot.slane %v617_v44, 7 }
  0x54   : > { %v8047_v43 = vld [vmem:[#allocation2 + $0x28] sm:$0xf]  ;;  %v614_v45 = vsel %vm7909_vm9, %v606_v50, %v613_v29  ;;  %897 = vst [vmem:[#allocation2 + $0x30] sm:$0xf] %v896_v9  ;;  %v900_v46 = vsel %vm7901_vm8, %v615_v31, %v899_v27  ;;  %6894 = vmatpush3.bf16.msra.mxu1 %v7578_v39  ;;  %v1135_v51 = vshll.u32 %v993_v38, 16  ;;  %v1139_v52 = vshrl.u32 %v993_v38, 16 }
  0x55   : > { %v1145_v53 = vshll.u32 %v1037_v42, 16  ;;  %v2911_v48 = vld [vmem:[#allocation2 + $0x2c] sm:$0x1]  ;;  %v3009_v54 = vshll.u32 %v8047_v43, 16  ;;  %898 = vst [vmem:[#allocation2 + $0x34] sm:$0xf] %v614_v45  ;;  %6895 = vmatprep.subr.bf16.mxu1 %v7580_v12  ;;  %7082 = vmatpush3.bf16.msra.mxu0 %v7570_v19  ;;  %v622_v8 = vor.u32 %v620_v32, %v619_v62  ;;  %v389_v63 = vmul.f32 %v6542_v47, %v7854_v26 }
  0x56   : > { %901 = vst [vmem:[#allocation2 + $0x38] sm:$0x1] %v900_v46  ;;  %v3013_v59 = vshrl.u32 %v8047_v43, 16  ;;  %v3019_v61 = vshll.u32 %v2911_v48, 16  ;;  %v627_v1 = vrot.slane %v625_v36, 7  ;;  %v1137_v39 = vrot.slane %v1135_v51, 5  ;;  %7083 = vmatprep.subr.bf16.mxu0 %v7571_v34 }
  0x57   : > { %v1141_v55 = vrot.slane %v1139_v52, 4  ;;  %v1147_v2 = vrot.slane %v1145_v53, 5  ;;  %v3011_v3 = vrot.slane %v3009_v54, 5  ;;  %v623_v11 = vrot.slane %v619_v62, 4  ;;  %v7582_v23 = vld [vmem:[%s9680_s1 + $0x30] sm:$0xff]   ;;  %v7574_v28 = vld [vmem:[%s9680_s1 + $0x168] sm:$0xff]  }
  0x58   : > { %v3015_v6 = vrot.slane %v3013_v59, 4  ;;  %v3021_v7 = vrot.slane %v3019_v61, 5  ;;  %6896 = vmatpush3.bf16.msra.mxu1 %v7580_v12  ;;  %v1138_v15 = vsel %vm7871_vm2, %v8026_v17, %v1137_v39  ;;  %v630_v19 = vor.u32 %v628_v37, %v627_v1 }
  0x59   : > { %v1142_v16 = vor.u32 %v1141_v55, %v1137_v39  ;;  %v3012_v18 = vsel %vm7871_vm2, %v8040_v33, %v3011_v3  ;;  %7084 = vmatpush3.bf16.msra.mxu0 %v7571_v34  ;;  %v632_v21 = vrot.slane %v627_v1, 4  ;;  %v903_v22 = vsel %vm7916_vm10, %v622_v8, %v902_v56  ;;  %6897 = vmatprep.subr.bf16.mxu1 %v7582_v23  ;;  %v7576_v56 = vld [vmem:[%s9680_s1 + $0x170] sm:$0xff]  }
  0x5a   : > { %v3016_v20 = vor.u32 %v3015_v6, %v3011_v3  ;;  %v631_v50 = vsel %vm7909_vm9, %v623_v11, %v630_v19  ;;  %904 = vst [vmem:[#allocation2 + $0x3c] sm:$0xf] %v903_v22  ;;  %7085 = vmatprep.subr.bf16.mxu0 %v7573_v58  ;;  %v427_v27 = vadd.f32 %v7862_v30, %v388_v49  ;;  %v6545_v12 = vunpack.c.l.bf16 %v8061_v13 }
  0x5b   : > { %v1143_v17 = vrot.slane %v1142_v16, 4  ;;  %v2912_v24 = vld [vmem:[#allocation2 + $0x30] sm:$0xf]  ;;  %905 = vst [vmem:[#allocation2 + $0x40] sm:$0xf] %v631_v50  ;;  %v907_v33 = vsel %vm7901_vm8, %v632_v21, %v906_v57  ;;  %v8089_v9 = vadd.f32 %v7862_v30, %v389_v63  ;;  %vm2080_vm11 = vcmask 1042432  }
  0x5c   : > { %v994_v25 = vld [vmem:[#allocation2 + $0x30] sm:$0xf]  ;;  %v3017_v29 = vrot.slane %v3016_v20, 4  ;;  %v8082_v31 = vld [vmem:[#allocation2 + $0x34] sm:$0xf]  ;;  %v3024_v32 = vshrl.u32 %v2912_v24, 16  ;;  %6898 = vmatpush3.bf16.msra.mxu1 %v7582_v23  ;;  %v8101_v11 = vpack.c.bf16 %v427_v27, %v427_v27 }
  0x5d   : > { %v8084_v44 = vld [vmem:[#allocation2 + $0x38] sm:$0x1]  ;;  %v1148_v34 = vsel %vm7871_vm2, %v1143_v17, %v1147_v2  ;;  %v3027_v36 = vshll.u32 %v2912_v24, 16  ;;  %v3033_v37 = vshll.u32 %v8082_v31, 16  ;;  %v3037_v38 = vshrl.u32 %v8082_v31, 16  ;;  %7086 = vmatpush3.bf16.msra.mxu0 %v7573_v58 }
  0x5e   : > { %v995_v42 = vld [vmem:[#allocation2 + $0x34] sm:$0xf]  ;;  %908 = vst [vmem:[#allocation2 + $0x44] sm:$0x1] %v907_v33  ;;  %v6108_v45 = vcombine.low %v1138_v15, %v1148_v34  ;;  %v3022_v46 = vsel %vm7871_vm2, %v3017_v29, %v3021_v7  ;;  %v3026_v47 = vrot.slane %v3024_v32, 4  ;;  %v3043_v49 = vshll.u32 %v8084_v44, 16  ;;  %7087 = vmatprep.subr.bf16.mxu0 %v7574_v28 }
  0x5f   : > { %v1038_v51 = vld [vmem:[#allocation2 + $0x38] sm:$0x1]  ;;  %v6267_v52 = vcombine.low %v3012_v18, %v3022_v46  ;;  %v3029_v53 = vrot.slane %v3027_v36, 5  ;;  %v3035_v48 = vrot.slane %v3033_v37, 5  ;;  %v3039_v54 = vrot.slane %v3037_v38, 4  ;;  %v8113_v46 = vld [vmem:[%s9680_s1 + $0x180] sm:$0xff]  }
  0x60   : > { %6858 = vmatmul.mubr.bf16.gmra.mrb[4].mxu1 %v6108_v45  ;;  %v3045_v59 = vrot.slane %v3043_v49, 5  ;;  %v1150_v61 = vshrl.u32 %v994_v25, 16  ;;  %v1153_v62 = vshll.u32 %v994_v25, 16  ;;  %v1159_v1 = vshll.u32 %v995_v42, 16  ;;  %v7577_v15 = vld [vmem:[%s9680_s1 + $0x178] sm:$0xff]  }
  0x61   : > { %7049 = vmatprep.mubr.bf16.mxu0 %v6267_v52  ;;  %v3030_v39 = vor.u32 %v3029_v53, %v3026_v47  ;;  %v3040_v55 = vor.u32 %v3039_v54, %v3035_v48  ;;  %v1163_v2 = vshrl.u32 %v995_v42, 16  ;;  %v1169_v3 = vshll.u32 %v1038_v51, 16  ;;  %v996_v8 = vld [vmem:[#allocation2 + $0x3c] sm:$0xf]  ;;  %7088 = vmatpush3.bf16.msra.mxu0 %v7574_v28 }
  0x62   : > { %v1152_v58 = vrot.slane %v1150_v61, 4  ;;  %v1155_v6 = vrot.slane %v1153_v62, 5  ;;  %v1161_v7 = vrot.slane %v1159_v1, 5  ;;  %v997_v20 = vld [vmem:[#allocation2 + $0x40] sm:$0xf]  ;;  %7089 = vmatprep.subr.bf16.mxu0 %v7576_v56  ;;  %v1174_v63 = vshrl.u32 %v996_v8, 16 }
  0x63   : > { %v3031_v16 = vrot.slane %v3030_v39, 4  ;;  %v3041_v18 = vrot.slane %v3040_v55, 4  ;;  %v1165_v19 = vrot.slane %v1163_v2, 4  ;;  %v1171_v57 = vrot.slane %v1169_v3, 5  ;;  %v2915_v28 = vld [vmem:[#allocation2 + $0x3c] sm:$0xf] }
  0x64   : > { %v1156_v21 = vor.u32 %v1155_v6, %v1152_v58  ;;  %v1177_v23 = vshll.u32 %v996_v8, 16  ;;  %v1183_v17 = vshll.u32 %v997_v20, 16  ;;  %v1187_v27 = vshrl.u32 %v997_v20, 16  ;;  %v2916_v36 = vld [vmem:[#allocation2 + $0x40] sm:$0xf] }
  0x65   : > { %v1039_v22 = vld [vmem:[#allocation2 + $0x44] sm:$0x1]  ;;  %v3036_v24 = vsel %vm7871_vm2, %v3031_v16, %v3035_v48  ;;  %v3046_v25 = vsel %vm7871_vm2, %v3041_v18, %v3045_v59  ;;  %v1166_v50 = vor.u32 %v1165_v19, %v1161_v7  ;;  %v1176_v33 = vrot.slane %v1174_v63, 4  ;;  %7090 = vmatpush3.bf16.msra.mxu0 %v7576_v56  ;;  %v909_v20 = vld [vmem:[#allocation2 + $0x48] sm:$0xf] }
  0x66   : > { %v6268_v29 = vcombine.low %v3036_v24, %v3046_v25  ;;  %v1157_v32 = vrot.slane %v1156_v21, 4  ;;  %v1179_v34 = vrot.slane %v1177_v23, 5  ;;  %v1185_v38 = vrot.slane %v1183_v17, 5  ;;  %7091 = vmatprep.subr.bf16.mxu0 %v7577_v15  ;;  %v2917_v51 = vld [vmem:[#allocation2 + $0x44] sm:$0x1]  ;;  %v6609_v17 = vld [vmem:[%s7845_s26 + $0x38] sm:$0xff]  }
  0x67   : > { %v1167_v37 = vrot.slane %v1166_v50, 4  ;;  %v1189_v42 = vrot.slane %v1187_v27, 4  ;;  %v1193_v45 = vshll.u32 %v1039_v22, 16  ;;  %v3048_v52 = vshrl.u32 %v2915_v28, 16  ;;  %v913_v50 = vld [vmem:[#allocation2 + $0x50] sm:$0x1] }
  0x68   : > { %7050 = vmatmul.mubr.bf16.gmra.mrb[4].mxu0 %v6268_v29  ;;  %v1162_v47 = vsel %vm7871_vm2, %v1157_v32, %v1161_v7  ;;  %v1180_v49 = vor.u32 %v1179_v34, %v1176_v33  ;;  %v3051_v53 = vshll.u32 %v2915_v28, 16  ;;  %v3057_v59 = vshll.u32 %v2916_v36, 16 }
  0x69   : > { %v1172_v48 = vsel %vm7871_vm2, %v1167_v37, %v1171_v57  ;;  %v1190_v54 = vor.u32 %v1189_v42, %v1185_v38  ;;  %v1195_v56 = vrot.slane %v1193_v45, 5  ;;  %v3050_v1 = vrot.slane %v3048_v52, 4  ;;  %7092 = vmatpush3.bf16.msra.mxu0 %v7577_v15  ;;  %v6610_v52 = vld [vmem:[%s7845_s26 + $0x40] sm:$0xff]  }
  0x6a   : > { %v6109_v61 = vcombine.low %v1162_v47, %v1172_v48  ;;  %v1181_v62 = vrot.slane %v1180_v49, 4  ;;  %v3053_v39 = vrot.slane %v3051_v53, 5  ;;  %v3059_v2 = vrot.slane %v3057_v59, 5  ;;  %7125 = vmatprep.subr.bf16.mxu0 %v8113_v46  ;;  %v8144_v47 = vld [vmem:[%s9682_s3] ss:$0 sm:$0xff]  ;;  %v7584_v53 = vld [vmem:[%s9680_s1 + $0x38] sm:$0xff]  }
  0x6b   : > { %v1191_v55 = vrot.slane %v1190_v54, 4  ;;  %v3061_v3 = vshrl.u32 %v2916_v36, 16  ;;  %v3067_v58 = vshll.u32 %v2917_v51, 16  ;;  %v6498_v8 = vpack.c.bf16 %v8089_v9, %v8089_v9  ;;  %6899 = vmatprep.subr.bf16.mxu1 %v7584_v53 }
  0x6c   : > { %6861 = vmatprep.mubr.bf16.mxu1 %v6109_v61  ;;  %v1186_v6 = vsel %vm7871_vm2, %v1181_v62, %v1185_v38  ;;  %v3054_v7 = vor.u32 %v3053_v39, %v3050_v1  ;;  %v634_v16 = vshrl.u32 %v8101_v11, 16  ;;  %v637_v57 = vshll.u32 %v8101_v11, 16  ;;  %6900 = vmatpush3.bf16.msra.mxu1 %v7584_v53 }
  0x6d   : > { %v1196_v15 = vsel %vm7871_vm2, %v1191_v55, %v1195_v56  ;;  %v3063_v18 = vrot.slane %v3061_v3, 4  ;;  %v3069_v19 = vrot.slane %v3067_v58, 5  ;;  %v642_v23 = vshrl.u32 %v6498_v8, 16 }
  0x6e   : > { %v6110_v21 = vcombine.low %v1186_v6, %v1196_v15  ;;  %v3055_v22 = vrot.slane %v3054_v7, 4  ;;  %v636_v63 = vrot.slane %v634_v16, 7  ;;  %v645_v25 = vshll.u32 %v6498_v8, 16  ;;  %v916_v16 = vld [vmem:[#allocation2 + $0x54] sm:$0xf] }
  0x6f   : > { %v3064_v24 = vor.u32 %v3063_v18, %v3059_v2  ;;  %v6546_v9 = vunpack.c.h.bf16 %v8061_v13  ;;  %v390_v27 = vmul.f32 %v6545_v12, %v7854_v26  ;;  %v644_v32 = vrot.slane %v642_v23, 7 }
  0x70   : > { %6862 = vmatmul.mubr.bf16.gmra.mrb[8].mxu1 %v6110_v21  ;;  %v3060_v28 = vsel %vm7871_vm2, %v3055_v22, %v3059_v2  ;;  %v639_v11 = vor.u32 %v637_v57, %v636_v63  ;;  %v640_v29 = vrot.slane %v636_v63, 4  ;;  %v6549_v37 = vunpack.c.l.bf16 %v6609_v17 }
  0x71   : > { %v3065_v33 = vrot.slane %v3064_v24, 4  ;;  %v391_v34 = vmul.f32 %v6546_v9, %v7854_v26  ;;  %v429_v36 = vadd.f32 %v7862_v30, %v390_v27  ;;  %v647_v38 = vor.u32 %v645_v25, %v644_v32  ;;  %v8150_v30 = vld [vmem:[%s9681_s2] ss:$0 sm:$0xff] }
  0x72   : > { %v649_v42 = vrot.slane %v644_v32, 4  ;;  %v910_v13 = vsel %vm7916_vm10, %v639_v11, %v909_v20  ;;  %v6550_v12 = vunpack.c.h.bf16 %v6609_v17  ;;  %v392_v51 = vmul.f32 %v8150_v30, %v6549_v37 }
  0x73   : > { %v3070_v45 = vsel %vm7871_vm2, %v3065_v33, %v3069_v19  ;;  %911 = vst [vmem:[#allocation2 + $0x48] sm:$0xf] %v910_v13  ;;  %v430_v26 = vadd.f32 %v8144_v47, %v391_v34  ;;  %v6499_v49 = vpack.c.bf16 %v429_v36, %v429_v36  ;;  %v648_v54 = vsel %vm7909_vm9, %v640_v29, %v647_v38 }
  0x74   : > { %v6269_v48 = vcombine.low %v3060_v28, %v3070_v45  ;;  %v914_v56 = vsel %vm7901_vm8, %v649_v42, %v913_v50  ;;  %v393_v59 = vmul.f32 %v8150_v30, %v6550_v12  ;;  %912 = vst [vmem:[#allocation2 + $0x4c] sm:$0xf] %v648_v54  ;;  %v431_v39 = vadd.f32 %v8144_v47, %v392_v51 }
  0x75   : > { %915 = vst [vmem:[#allocation2 + $0x50] sm:$0x1] %v914_v56  ;;  %v6500_v61 = vpack.c.bf16 %v430_v26, %v430_v26  ;;  %v651_v62 = vshrl.u32 %v6499_v49, 16  ;;  %v654_v1 = vshll.u32 %v6499_v49, 16  ;;  %v3733_v55 = vrot.slane %v7965_v41, 5  ;;  %v7588_v56 = vld [vmem:[%s9680_s1 + $0x80] sm:$0xff]  }
  0x76   : > { %7053 = vmatprep.mubr.bf16.mxu0 %v6269_v48  ;;  %v432_v2 = vadd.f32 %v8144_v47, %v393_v59  ;;  %v6553_v3 = vunpack.c.l.bf16 %v6610_v52  ;;  %v6554_v58 = vunpack.c.h.bf16 %v6610_v52  ;;  %v8167_v6 = vrot.slane %v3730_v14, 4  ;;  %6933 = vmatprep.subr.bf16.mxu1 %v7588_v56  ;;  %v8210_v56 = vld [vmem:[%s7845_s26 + $0x48] sm:$0xff]  }
  0x77   : > { %v653_v7 = vrot.slane %v651_v62, 7  ;;  %v659_v8 = vshrl.u32 %v6500_v61, 16  ;;  %v8169_v15 = vpack.c.bf16 %v431_v39, %v431_v39  ;;  %v662_v18 = vshll.u32 %v6500_v61, 16  ;;  %v920_v39 = vld [vmem:[#allocation2 + $0x5c] sm:$0x1] }
  0x78   : > { %v8171_v19 = vpack.c.bf16 %v432_v2, %v432_v2  ;;  %v394_v57 = vmul.f32 %v8150_v30, %v6553_v3  ;;  %v395_v20 = vmul.f32 %v8150_v30, %v6554_v58  ;;  %vm2081_vm12 = vcmask 1046532   ;;  %v930_v41 = vld [vmem:[#allocation2 + $0x6c] sm:$0xf] }
  0x79   : > { %v656_v21 = vor.u32 %v654_v1, %v653_v7  ;;  %v657_v22 = vrot.slane %v653_v7, 4  ;;  %v661_v63 = vrot.slane %v659_v8, 7  ;;  %v668_v23 = vshrl.u32 %v8169_v15, 16  ;;  %vm8221_vm13 = vmor %vm2080_vm11, %vm2081_vm12 }
  0x7a   : > { %v2918_v17 = vld [vmem:[#allocation2 + $0x48] sm:$0xf]  ;;  %v671_v25 = vshll.u32 %v8169_v15, 16  ;;  %v676_v50 = vshrl.u32 %v8171_v19, 16  ;;  %v433_v9 = vadd.f32 %v8144_v47, %v394_v57  ;;  %v434_v27 = vadd.f32 %v8144_v47, %v395_v20 }
  0x7b   : > { %v998_v24 = vld [vmem:[#allocation2 + $0x48] sm:$0xf]  ;;  %v3072_v28 = vshrl.u32 %v2918_v17, 16  ;;  %v3075_v11 = vshll.u32 %v2918_v17, 16  ;;  %v8180_v33 = vld [vmem:[#allocation2 + $0x4c] sm:$0xf]  ;;  %v664_v37 = vor.u32 %v662_v18, %v661_v63  ;;  %v917_v38 = vsel %vm7916_vm10, %v656_v21, %v916_v16 }
  0x7c   : > { %v1198_v29 = vshrl.u32 %v998_v24, 16  ;;  %v1201_v32 = vshll.u32 %v998_v24, 16  ;;  %v8182_v34 = vld [vmem:[#allocation2 + $0x50] sm:$0x1]  ;;  %v999_v36 = vld [vmem:[#allocation2 + $0x4c] sm:$0xf]  ;;  %v8186_v42 = vpack.c.bf16 %v433_v9, %v433_v9  ;;  %v8188_v13 = vpack.c.bf16 %v434_v27, %v434_v27 }
  0x7d   : > { %v3074_v12 = vrot.slane %v3072_v28, 4  ;;  %v3077_v45 = vrot.slane %v3075_v11, 5  ;;  %v3081_v26 = vshll.u32 %v8180_v33, 16  ;;  %v3085_v49 = vshrl.u32 %v8180_v33, 16  ;;  %v1040_v51 = vld [vmem:[#allocation2 + $0x50] sm:$0x1] }
  0x7e   : > { %918 = vst [vmem:[#allocation2 + $0x54] sm:$0xf] %v917_v38  ;;  %v3091_v52 = vshll.u32 %v8182_v34, 16  ;;  %v1200_v53 = vrot.slane %v1198_v29, 4  ;;  %v1203_v48 = vrot.slane %v1201_v32, 5  ;;  %v1207_v54 = vshll.u32 %v999_v36, 16 }
  0x7f   : > { %v3078_v59 = vor.u32 %v3077_v45, %v3074_v12  ;;  %v3083_v61 = vrot.slane %v3081_v26, 5  ;;  %v3087_v62 = vrot.slane %v3085_v49, 4  ;;  %v1211_v1 = vshrl.u32 %v999_v36, 16  ;;  %v923_v45 = vld [vmem:[#allocation2 + $0x60] sm:$0xf] }
  0x80   : > { %v3093_v2 = vrot.slane %v3091_v52, 5  ;;  %v1204_v3 = vor.u32 %v1203_v48, %v1200_v53  ;;  %v1209_v58 = vrot.slane %v1207_v54, 5  ;;  %v1217_v7 = vshll.u32 %v1040_v51, 16  ;;  %v927_v52 = vld [vmem:[#allocation2 + $0x68] sm:$0x1] }
  0x81   : > { %v3079_v8 = vrot.slane %v3078_v59, 4  ;;  %v3088_v16 = vor.u32 %v3087_v62, %v3083_v61  ;;  %v1213_v15 = vrot.slane %v1211_v1, 4  ;;  %v665_v18 = vsel %vm7909_vm9, %v657_v22, %v664_v37  ;;  %v7691_v5 = vld [vmem:[#allocation2 + $0x48] sm:$0xf] }
  0x82   : > { %v1205_v57 = vrot.slane %v1204_v3, 4  ;;  %v1219_v20 = vrot.slane %v1217_v7, 5  ;;  %v666_v21 = vrot.slane %v661_v63, 4  ;;  %919 = vst [vmem:[#allocation2 + $0x58] sm:$0xf] %v665_v18  ;;  %v670_v17 = vrot.slane %v668_v23, 7 }
  0x83   : > { %v3084_v24 = vsel %vm7871_vm2, %v3079_v8, %v3083_v61  ;;  %v3089_v9 = vrot.slane %v3088_v16, 4  ;;  %v1214_v27 = vor.u32 %v1213_v15, %v1209_v58  ;;  %v678_v28 = vrot.slane %v676_v50, 7 }
  0x84   : > { %v1210_v11 = vsel %vm7871_vm2, %v1205_v57, %v1209_v58  ;;  %v921_v29 = vsel %vm7901_vm8, %v666_v21, %v920_v39  ;;  %v673_v22 = vor.u32 %v671_v25, %v670_v17  ;;  %v674_v37 = vrot.slane %v670_v17, 4 }
  0x85   : > { %v1000_v32 = vld [vmem:[#allocation2 + $0x54] sm:$0xf]  ;;  %v3094_v63 = vsel %vm7871_vm2, %v3089_v9, %v3093_v2  ;;  %v1215_v23 = vrot.slane %v1214_v27, 4  ;;  %922 = vst [vmem:[#allocation2 + $0x5c] sm:$0x1] %v921_v29  ;;  %v679_v51 = vshll.u32 %v8171_v19, 16  ;;  %v8238_v29 = vsel %vm8221_vm13, %v8167_v6, %v3733_v55 }
  0x86   : > { %v2921_v36 = vld [vmem:[#allocation2 + $0x54] sm:$0xf]  ;;  %v1222_v38 = vshrl.u32 %v1000_v32, 16  ;;  %v1225_v12 = vshll.u32 %v1000_v32, 16  ;;  %v6270_v50 = vcombine.low %v3084_v24, %v3094_v63  ;;  %v683_v54 = vrot.slane %v678_v28, 4 }
  0x87   : > { %v3096_v26 = vshrl.u32 %v2921_v36, 16  ;;  %v3099_v49 = vshll.u32 %v2921_v36, 16  ;;  %v1220_v53 = vsel %vm7871_vm2, %v1215_v23, %v1219_v20  ;;  %v681_v1 = vor.u32 %v679_v51, %v678_v28 }
  0x88   : > { %v1224_v25 = vrot.slane %v1222_v38, 4  ;;  %v1227_v48 = vrot.slane %v1225_v12, 5  ;;  %7054 = vmatmul.mubr.bf16.gmra.mrb[8].mxu0 %v6270_v50  ;;  %v6111_v59 = vcombine.low %v1210_v11, %v1220_v53  ;;  %v924_v19 = vsel %vm7916_vm10, %v673_v22, %v923_v45 }
  0x89   : > { %v3098_v61 = vrot.slane %v3096_v26, 4  ;;  %v3101_v62 = vrot.slane %v3099_v49, 5  ;;  %v1001_v39 = vld [vmem:[#allocation2 + $0x58] sm:$0xf]  ;;  %v928_v58 = vsel %vm7901_vm8, %v683_v54, %v927_v52  ;;  %v685_v7 = vshrl.u32 %v8186_v42, 16 }
  0x8a   : > { %v1228_v2 = vor.u32 %v1227_v48, %v1224_v25  ;;  %v8212_v3 = vld [vmem:[#allocation2 + $0x58] sm:$0xf]  ;;  %6865 = vmatprep.mubr.bf16.mxu1 %v6111_v59  ;;  %v1231_v16 = vshll.u32 %v1001_v39, 16  ;;  %v1235_v15 = vshrl.u32 %v1001_v39, 16  ;;  %925 = vst [vmem:[#allocation2 + $0x60] sm:$0xf] %v924_v19  ;;  %v682_v17 = vsel %vm7909_vm9, %v674_v37, %v681_v1 }
  0x8b   : > { %v3102_v18 = vor.u32 %v3101_v62, %v3098_v61  ;;  %v3105_v57 = vshll.u32 %v8212_v3, 16  ;;  %929 = vst [vmem:[#allocation2 + $0x68] sm:$0x1] %v928_v58  ;;  %v3109_v21 = vshrl.u32 %v8212_v3, 16  ;;  %v8229_v24 = vrot.slane %v685_v7, 7 }
  0x8c   : > { %v1229_v20 = vrot.slane %v1228_v2, 4  ;;  %v1041_v9 = vld [vmem:[#allocation2 + $0x5c] sm:$0x1]  ;;  %v1233_v27 = vrot.slane %v1231_v16, 5  ;;  %v1237_v28 = vrot.slane %v1235_v15, 4  ;;  %v6557_v32 = vunpack.c.l.bf16 %v8210_v56 }
  0x8d   : > { %v8231_v11 = vld [vmem:[#allocation2 + $0x5c] sm:$0x1]  ;;  %926 = vst [vmem:[#allocation2 + $0x64] sm:$0xf] %v682_v17  ;;  %v1241_v36 = vshll.u32 %v1041_v9, 16  ;;  %v3103_v22 = vrot.slane %v3102_v18, 4  ;;  %v6558_v59 = vunpack.c.h.bf16 %v8210_v56 }
  0x8e   : > { %v3107_v37 = vrot.slane %v3105_v57, 5  ;;  %v3111_v63 = vrot.slane %v3109_v21, 4  ;;  %v1234_v23 = vsel %vm7871_vm2, %v1229_v20, %v1233_v27  ;;  %v1238_v38 = vor.u32 %v1237_v28, %v1233_v27 }
  0x8f   : > { %v3115_v12 = vshll.u32 %v8231_v11, 16  ;;  %v688_v45 = vshll.u32 %v8186_v42, 16  ;;  %v1243_v50 = vrot.slane %v1241_v36, 5  ;;  %v691_v26 = vrot.slane %v8229_v24, 4  ;;  %v3657_v36 = vld [vmem:[#allocation2 + $0xc] sm:$0xe] }
  0x90   : > { %v3108_v55 = vsel %vm7871_vm2, %v3103_v22, %v3107_v37  ;;  %v3112_v6 = vor.u32 %v3111_v63, %v3107_v37  ;;  %v1239_v49 = vrot.slane %v1238_v38, 4  ;;  %v693_v53 = vshrl.u32 %v8188_v13, 16  ;;  %v3658_v38 = vld [vmem:[#allocation2 + $0x18] sm:$0xe] }
  0x91   : > { %v3117_v51 = vrot.slane %v3115_v12, 5  ;;  %v690_v52 = vor.u32 %v688_v45, %v8229_v24  ;;  %v2924_v48 = vld [vmem:[#allocation2 + $0x60] sm:$0xf]  ;;  %v696_v42 = vshll.u32 %v8188_v13, 16  ;;  %v8255_v61 = vmul.f32 %v8150_v30, %v6557_v32  ;;  %v6612_v24 = vld [vmem:[%s7845_s26 + $0x50] sm:$0xff]  }
  0x92   : > { %v3113_v25 = vrot.slane %v3112_v6, 4  ;;  %v8250_v54 = vld [vmem:[#allocation2 + $0x68] sm:$0x1]  ;;  %v1244_v62 = vsel %vm7871_vm2, %v1239_v49, %v1243_v50  ;;  %v3120_v1 = vshrl.u32 %v2924_v48, 16  ;;  %v3123_v39 = vshll.u32 %v2924_v48, 16 }
  0x93   : > { %v3139_v2 = vshll.u32 %v8250_v54, 16  ;;  %v1002_v19 = vld [vmem:[#allocation2 + $0x60] sm:$0xf]  ;;  %v6112_v58 = vcombine.low %v1234_v23, %v1244_v62  ;;  %v931_v56 = vsel %vm7916_vm10, %v690_v52, %v930_v41  ;;  %v8267_v15 = vmul.f32 %v8150_v30, %v6558_v59  ;;  %v1042_v17 = vld [vmem:[#allocation2 + $0x68] sm:$0x1] }
  0x94   : > { %v3118_v7 = vsel %vm7871_vm2, %v3113_v25, %v3117_v51  ;;  %v8262_v16 = vld [vmem:[#allocation2 + $0x64] sm:$0xf]  ;;  %v3122_v57 = vrot.slane %v3120_v1, 4  ;;  %v3125_v20 = vrot.slane %v3123_v39, 5  ;;  %932 = vst [vmem:[#allocation2 + $0x6c] sm:$0xf] %v931_v56 }
  0x95   : > { %v1003_v13 = vld [vmem:[#allocation2 + $0x64] sm:$0xf]  ;;  %v6271_v18 = vcombine.low %v3108_v55, %v3118_v7  ;;  %v3129_v21 = vshll.u32 %v8262_v16, 16  ;;  %6866 = vmatmul.mubr.bf16.gmra.mrb[12].mxu1 %v6112_v58  ;;  %v3133_v9 = vshrl.u32 %v8262_v16, 16  ;;  %v3141_v27 = vrot.slane %v3139_v2, 5 }
  0x96   : > { %v1246_v28 = vshrl.u32 %v1002_v19, 16  ;;  %v1249_v32 = vshll.u32 %v1002_v19, 16  ;;  %v3126_v22 = vor.u32 %v3125_v20, %v3122_v57  ;;  %v1255_v63 = vshll.u32 %v1003_v13, 16  ;;  %v934_v59 = vld [vmem:[#allocation2 + $0x74] sm:$0x1] }
  0x97   : > { %7057 = vmatprep.mubr.bf16.mxu0 %v6271_v18  ;;  %v3131_v37 = vrot.slane %v3129_v21, 5  ;;  %v1259_v23 = vshrl.u32 %v1003_v13, 16  ;;  %v3135_v12 = vrot.slane %v3133_v9, 4  ;;  %v1265_v50 = vshll.u32 %v1042_v17, 16  ;;  %v7672_v56 = vld [vmem:[#allocation2 + $0x10] sm:$0xf] }
  0x98   : > { %v1248_v45 = vrot.slane %v1246_v28, 4  ;;  %v1251_v41 = vrot.slane %v1249_v32, 5  ;;  %v3127_v55 = vrot.slane %v3126_v22, 4  ;;  %v1257_v6 = vrot.slane %v1255_v63, 5 }
  0x99   : > { %v1261_v49 = vrot.slane %v1259_v23, 4  ;;  %v695_v51 = vrot.slane %v693_v53, 7  ;;  %v3136_v52 = vor.u32 %v3135_v12, %v3131_v37  ;;  %v1267_v48 = vrot.slane %v1265_v50, 5 }
  0x9a   : > { %v1252_v25 = vor.u32 %v1251_v41, %v1248_v45  ;;  %v6289_v62 = vrot.slane %v3657_v36, 9  ;;  %v3132_v1 = vsel %vm7871_vm2, %v3127_v55, %v3131_v37  ;;  %v3723_v18 = vrot.slane %v7672_v56, 5  ;;  %v3659_v36 = vld [vmem:[#allocation2 + $0x24] sm:$0xe]  ;;  %v937_v56 = vld [vmem:[#allocation2 + $0x78] sm:$0xf] }
  0x9b   : > { %v1262_v39 = vor.u32 %v1261_v49, %v1257_v6  ;;  %v698_v2 = vor.u32 %v696_v42, %v695_v51  ;;  %v700_v19 = vrot.slane %v695_v51, 4  ;;  %v3137_v58 = vrot.slane %v3136_v52, 4  ;;  %v1004_v13 = vld [vmem:[#allocation2 + $0x6c] sm:$0xf] }
  0x9c   : > { %v1253_v7 = vrot.slane %v1252_v25, 4  ;;  %v6290_v57 = vrot.slane %v3658_v38, 9  ;;  %v1270_v17 = vshrl.u32 %v1004_v13, 16  ;;  %v1273_v28 = vshll.u32 %v1004_v13, 16 }
  0x9d   : > { %v1263_v20 = vrot.slane %v1262_v39, 4  ;;  %v699_v53 = vsel %vm7909_vm9, %v691_v26, %v698_v2  ;;  %v935_v21 = vsel %vm7901_vm8, %v700_v19, %v934_v59  ;;  %v3142_v42 = vsel %vm7871_vm2, %v3137_v58, %v3141_v27 }
  0x9e   : > { %v1258_v9 = vsel %vm7871_vm2, %v1253_v7, %v1257_v6  ;;  %933 = vst [vmem:[#allocation2 + $0x70] sm:$0xf] %v699_v53  ;;  %936 = vst [vmem:[#allocation2 + $0x74] sm:$0x1] %v935_v21  ;;  %v3724_v32 = vsel %vm8221_vm13, %v6289_v62, %v3723_v18  ;;  %v6272_v22 = vcombine.low %v3132_v1, %v3142_v42  ;;  %v1272_v37 = vrot.slane %v1270_v17, 4 }
  0x9f   : > { %v1268_v26 = vsel %vm7871_vm2, %v1263_v20, %v1267_v48  ;;  %v3725_v63 = vrot.slane %v3723_v18, 4  ;;  %v1275_v38 = vrot.slane %v1273_v28, 5  ;;  %v3731_v27 = vsel %vm8221_vm13, %v6290_v57, %v3730_v14  ;;  %v941_v57 = vld [vmem:[#allocation2 + $0x80] sm:$0x1] }
  0xa0   : > { %v6113_v23 = vcombine.low %v1258_v9, %v1268_v26  ;;  %v435_v12 = vadd.f32 %v8144_v47, %v8255_v61  ;;  %7058 = vmatmul.mubr.bf16.gmra.mrb[12].mxu0 %v6272_v22  ;;  %v6322_v41 = vcombine.low %v3731_v27, %v8238_v29  ;;  %v436_v50 = vadd.f32 %v8144_v47, %v8267_v15 }
  0xa1   : > { %v3727_v45 = vsel %vm8221_vm13, %v3725_v63, %v3726_v4  ;;  %v6561_v55 = vunpack.c.l.bf16 %v6612_v24  ;;  %v1276_v40 = vor.u32 %v1275_v38, %v1272_v37  ;;  %v6562_v14 = vunpack.c.h.bf16 %v6612_v24 }
  0xa2   : > { %6869 = vmatprep.mubr.bf16.mxu1 %v6113_v23  ;;  %v6321_v6 = vcombine.low %v3724_v32, %v3727_v45  ;;  %v6505_v49 = vpack.c.bf16 %v435_v12, %v435_v12  ;;  %v6506_v51 = vpack.c.bf16 %v436_v50, %v436_v50  ;;  %v6291_v52 = vrot.slane %v3659_v36, 9  ;;  %v3660_v32 = vld [vmem:[#allocation2 + $0x30] sm:$0xe]  ;;  %v944_v50 = vld [vmem:[#allocation2 + $0x84] sm:$0xf] }
  0xa3   : > { %v398_v61 = vmul.f32 %v8150_v30, %v6561_v55  ;;  %v3737_v10 = vrot.slane %v8047_v43, 5  ;;  %v8303_v25 = vrot.slane %v1276_v40, 4  ;;  %v399_v48 = vmul.f32 %v8150_v30, %v6562_v14  ;;  %v7581_v43 = vld [vmem:[%s9680_s1 + $0x188] sm:$0xff]   ;;  %v6613_v55 = vld [vmem:[%s7845_s26 + $0x58] sm:$0xff]  }
  0xa4   : > { %7093 = vmatprep.mubr.bf16.mxu0 %v6321_v6  ;;  %v702_v4 = vshrl.u32 %v6505_v49, 16  ;;  %v705_v29 = vshll.u32 %v6505_v49, 16  ;;  %v710_v62 = vshrl.u32 %v6506_v51, 16  ;;  %v713_v1 = vshll.u32 %v6506_v51, 16  ;;  %v948_v14 = vld [vmem:[#allocation2 + $0x8c] sm:$0x1] }
  0xa5   : > { %v1005_v15 = vld [vmem:[#allocation2 + $0x70] sm:$0xf]  ;;  %v1043_v59 = vld [vmem:[#allocation2 + $0x74] sm:$0x1]  ;;  %v437_v39 = vadd.f32 %v8144_v47, %v398_v61  ;;  %v8309_v2 = vsel %vm8221_vm13, %v6291_v52, %v3737_v10  ;;  %v438_v20 = vadd.f32 %v8144_v47, %v399_v48  ;;  %v3739_v21 = vrot.slane %v3737_v10, 4 }
  0xa6   : > { %v1279_v19 = vshll.u32 %v1005_v15, 16  ;;  %v1283_v58 = vshrl.u32 %v1005_v15, 16  ;;  %v1289_v7 = vshll.u32 %v1043_v59, 16  ;;  %v704_v13 = vrot.slane %v702_v4, 7  ;;  %v7673_v51 = vld [vmem:[#allocation2 + $0x2c] sm:$0x1] }
  0xa7   : > { %v712_v18 = vrot.slane %v710_v62, 7  ;;  %v6507_v53 = vpack.c.bf16 %v437_v39, %v437_v39  ;;  %v6508_v26 = vpack.c.bf16 %v438_v20, %v438_v20  ;;  %v3740_v61 = vrot.slane %v7673_v51, 5 }
  0xa8   : > { %v1281_v17 = vrot.slane %v1279_v19, 5  ;;  %v1285_v42 = vrot.slane %v1283_v58, 4  ;;  %v1291_v9 = vrot.slane %v1289_v7, 5  ;;  %v707_v28 = vor.u32 %v705_v29, %v704_v13  ;;  %7094 = vmatmul.mubr.bf16.vlgmr.msra.gmra.mrb[0].mxu0 %v6322_v41  ;;  %v8331_v29 = vld [vmem:[#allocation2 + $0x3c] sm:$0xe] }
  0xa9   : > { %v708_v24 = vrot.slane %v704_v13, 4  ;;  %v715_v36 = vor.u32 %v713_v1, %v712_v18  ;;  %v717_v22 = vrot.slane %v712_v18, 4  ;;  %7126 = vmatpush3.bf16.msra.mxu0 %v8113_v46  ;;  %v719_v38 = vshrl.u32 %v6507_v53, 16  ;;  %v7583_v46 = vld [vmem:[%s9680_s1 + $0x190] sm:$0xff]   ;;  %v6614_v1 = vld [vmem:[%s7845_s26 + $0x60] sm:$0xff]  }
  0xaa   : > { %v1282_v37 = vsel %vm7871_vm2, %v8303_v25, %v1281_v17  ;;  %v1286_v63 = vor.u32 %v1285_v42, %v1281_v17  ;;  %v938_v23 = vsel %vm7916_vm10, %v707_v28, %v937_v56  ;;  %v722_v45 = vshll.u32 %v6507_v53, 16  ;;  %7127 = vmatprep.subr.bf16.mxu0 %v7581_v43  ;;  %v7589_v28 = vld [vmem:[%s9680_s1 + $0x1a0] sm:$0xff]  }
  0xab   : > { %v716_v27 = vsel %vm7909_vm9, %v708_v24, %v715_v36  ;;  %939 = vst [vmem:[#allocation2 + $0x78] sm:$0xf] %v938_v23  ;;  %v942_v12 = vsel %vm7901_vm8, %v717_v22, %v941_v57  ;;  %v727_v41 = vshrl.u32 %v6508_v26, 16  ;;  %v721_v6 = vrot.slane %v719_v38, 7 }
  0xac   : > { %v1287_v40 = vrot.slane %v1286_v63, 4  ;;  %940 = vst [vmem:[#allocation2 + $0x7c] sm:$0xf] %v716_v27  ;;  %943 = vst [vmem:[#allocation2 + $0x80] sm:$0x1] %v942_v12  ;;  %v730_v49 = vshll.u32 %v6508_v26, 16  ;;  %v3741_v62 = vsel %vm8221_vm13, %v3739_v21, %v3740_v61  ;;  %v6565_v18 = vunpack.c.l.bf16 %v6613_v55 }
  0xad   : > { %v729_v52 = vrot.slane %v727_v41, 7  ;;  %v6292_v10 = vrot.slane %v3660_v32, 9  ;;  %v3744_v25 = vrot.slane %v8082_v31, 5  ;;  %v3747_v4 = vrot.slane %v8084_v44, 5  ;;  %7128 = vmatpush3.bf16.msra.mxu0 %v7581_v43  ;;  %v7585_v31 = vld [vmem:[%s9680_s1 + $0x198] sm:$0xff]  }
  0xae   : > { %v1292_v48 = vsel %vm7871_vm2, %v1287_v40, %v1291_v9  ;;  %v724_v15 = vor.u32 %v722_v45, %v721_v6  ;;  %v725_v59 = vrot.slane %v721_v6, 4  ;;  %v6323_v7 = vcombine.low %v8309_v2, %v3741_v62  ;;  %7129 = vmatprep.subr.bf16.mxu0 %v7583_v46 }
  0xaf   : > { %v6114_v39 = vcombine.low %v1282_v37, %v1292_v48  ;;  %v732_v19 = vor.u32 %v730_v49, %v729_v52  ;;  %v734_v58 = vrot.slane %v729_v52, 4  ;;  %v3745_v13 = vsel %vm8221_vm13, %v6292_v10, %v3744_v25  ;;  %v7593_v52 = vld [vmem:[%s9680_s1 + $0x1a8] sm:$0xff]  }
  0xb0   : > { %v945_v44 = vsel %vm7916_vm10, %v724_v15, %v944_v50  ;;  %v3746_v56 = vrot.slane %v3744_v25, 4  ;;  %7097 = vmatprep.mubr.bf16.mxu0 %v6323_v7  ;;  %v6566_v57 = vunpack.c.h.bf16 %v6613_v55  ;;  %v6569_v20 = vunpack.c.l.bf16 %v6614_v1  ;;  %v7674_v15 = vld [vmem:[#allocation2 + $0x40] sm:$0xf] }
  0xb1   : > { %6870 = vmatmul.mubr.bf16.gmra.mrb[16].mxu1 %v6114_v39  ;;  %v733_v43 = vsel %vm7909_vm9, %v725_v59, %v732_v19  ;;  %946 = vst [vmem:[#allocation2 + $0x84] sm:$0xf] %v945_v44  ;;  %v949_v2 = vsel %vm7901_vm8, %v734_v58, %v948_v14  ;;  %v400_v17 = vmul.f32 %v8150_v30, %v6565_v18  ;;  %v6570_v42 = vunpack.c.h.bf16 %v6614_v1 }
  0xb2   : > { %v1006_v53 = vld [vmem:[#allocation2 + $0x78] sm:$0xf]  ;;  %947 = vst [vmem:[#allocation2 + $0x88] sm:$0xf] %v733_v43  ;;  %950 = vst [vmem:[#allocation2 + $0x8c] sm:$0x1] %v949_v2  ;;  %v3748_v21 = vsel %vm8221_vm13, %v3746_v56, %v3747_v4  ;;  %7130 = vmatpush3.bf16.msra.mxu0 %v7583_v46  ;;  %v401_v37 = vmul.f32 %v8150_v30, %v6566_v57  ;;  %v402_v50 = vmul.f32 %v8150_v30, %v6569_v20 }
  0xb3   : > { %v6293_v9 = vrot.slane %v8331_v29, 9  ;;  %v8357_v32 = vld [vmem:[#allocation2 + $0x7c] sm:$0xf]  ;;  %v1044_v24 = vld [vmem:[#allocation2 + $0x80] sm:$0x1]  ;;  %v1294_v36 = vshrl.u32 %v1006_v53, 16  ;;  %v6324_v26 = vcombine.low %v3745_v13, %v3748_v21  ;;  %7131 = vmatprep.subr.bf16.mxu0 %v7585_v31  ;;  %v439_v27 = vadd.f32 %v8144_v47, %v400_v17 }
  0xb4   : > { %v1297_v22 = vshll.u32 %v1006_v53, 16  ;;  %v1303_v63 = vshll.u32 %v8357_v32, 16  ;;  %v1307_v23 = vshrl.u32 %v8357_v32, 16  ;;  %v1313_v38 = vshll.u32 %v1044_v24, 16  ;;  %v951_v17 = vld [vmem:[#allocation2 + $0x90] sm:$0xf] }
  0xb5   : > { %v1296_v12 = vrot.slane %v1294_v36, 4  ;;  %7098 = vmatmul.mubr.bf16.gmra.mrb[4].mxu0 %v6324_v26  ;;  %v440_v41 = vadd.f32 %v8144_v47, %v401_v37  ;;  %v6509_v6 = vpack.c.bf16 %v439_v27, %v439_v27  ;;  %v403_v51 = vmul.f32 %v8150_v30, %v6570_v42  ;;  %v8407_v29 = vld [vmem:[%s9680_s1 + $0x1c0] sm:$0xff]  }
  0xb6   : > { %v1299_v45 = vrot.slane %v1297_v22, 5  ;;  %v1305_v55 = vrot.slane %v1303_v63, 5  ;;  %v1309_v46 = vrot.slane %v1307_v23, 4  ;;  %v1315_v40 = vrot.slane %v1313_v38, 5  ;;  %7132 = vmatpush3.bf16.msra.mxu0 %v7585_v31  ;;  %v955_v38 = vld [vmem:[#allocation2 + $0x98] sm:$0x1] }
  0xb7   : > { %v8365_v14 = vpack.c.bf16 %v440_v41, %v440_v41  ;;  %v441_v61 = vadd.f32 %v8144_v47, %v402_v50  ;;  %7133 = vmatprep.subr.bf16.mxu0 %v7589_v28  ;;  %v736_v4 = vshrl.u32 %v6509_v6, 16  ;;  %v739_v48 = vshll.u32 %v6509_v6, 16  ;;  %v3662_v41 = vld [vmem:[#allocation2 + $0x48] sm:$0xe]  ;;  %v7601_v50 = vld [vmem:[%s9680_s1 + $0x1b8] sm:$0xff]  }
  0xb8   : > { %v1300_v49 = vor.u32 %v1299_v45, %v1296_v12  ;;  %v1310_v10 = vor.u32 %v1309_v46, %v1305_v55  ;;  %v8372_v25 = vld [vmem:[#allocation2 + $0x84] sm:$0xf]  ;;  %v3751_v59 = vrot.slane %v7674_v15, 5  ;;  %v442_v19 = vadd.f32 %v8144_v47, %v403_v51  ;;  %v7597_v47 = vld [vmem:[%s9680_s1 + $0x1b0] sm:$0xff]   ;;  %v958_v6 = vld [vmem:[#allocation2 + $0x9c] sm:$0xf] }
  0xb9   : > { %v8374_v1 = vld [vmem:[#allocation2 + $0x88] sm:$0xf]  ;;  %v1045_v39 = vld [vmem:[#allocation2 + $0x8c] sm:$0x1]  ;;  %v1318_v30 = vshrl.u32 %v8372_v25, 16  ;;  %v6511_v58 = vpack.c.bf16 %v441_v61, %v441_v61  ;;  %v1321_v31 = vshll.u32 %v8372_v25, 16 }
  0xba   : > { %v1301_v62 = vrot.slane %v1300_v49, 4  ;;  %v1311_v7 = vrot.slane %v1310_v10, 4  ;;  %v1327_v44 = vshll.u32 %v8374_v1, 16  ;;  %v1331_v13 = vshrl.u32 %v8374_v1, 16  ;;  %7134 = vmatpush3.bf16.msra.mxu0 %v7589_v28  ;;  %v6615_v10 = vld [vmem:[%s7845_s26 + $0x68] sm:$0xff]  }
  0xbb   : > { %v1320_v18 = vrot.slane %v1318_v30, 4  ;;  %v1337_v43 = vshll.u32 %v1045_v39, 16  ;;  %v738_v2 = vrot.slane %v736_v4, 7  ;;  %7135 = vmatprep.subr.bf16.mxu0 %v7593_v52  ;;  %v1323_v20 = vrot.slane %v1321_v31, 5  ;;  %v7675_v31 = vld [vmem:[#allocation2 + $0x44] sm:$0x1] }
  0xbc   : > { %v1306_v56 = vsel %vm7871_vm2, %v1301_v62, %v1305_v55  ;;  %v1316_v57 = vsel %vm7871_vm2, %v1311_v7, %v1315_v40  ;;  %v1329_v53 = vrot.slane %v1327_v44, 5  ;;  %v1333_v21 = vrot.slane %v1331_v13, 4  ;;  %v962_v7 = vld [vmem:[#allocation2 + $0xa4] sm:$0x1] }
  0xbd   : > { %v6115_v42 = vcombine.low %v1306_v56, %v1316_v57  ;;  %v1339_v28 = vrot.slane %v1337_v43, 5  ;;  %v741_v24 = vor.u32 %v739_v48, %v738_v2  ;;  %v742_v36 = vrot.slane %v738_v2, 4 }
  0xbe   : > { %v1324_v22 = vor.u32 %v1323_v20, %v1320_v18  ;;  %v1334_v26 = vor.u32 %v1333_v21, %v1329_v53  ;;  %v744_v37 = vshrl.u32 %v8365_v14, 16  ;;  %v747_v63 = vshll.u32 %v8365_v14, 16  ;;  %7136 = vmatpush3.bf16.msra.mxu0 %v7593_v52 }
  0xbf   : > { %6873 = vmatprep.mubr.bf16.mxu1 %v6115_v42  ;;  %v952_v23 = vsel %vm7916_vm10, %v741_v24, %v951_v17  ;;  %v6512_v27 = vpack.c.bf16 %v442_v19, %v442_v19  ;;  %v753_v12 = vshrl.u32 %v6511_v58, 16  ;;  %v756_v45 = vshll.u32 %v6511_v58, 16  ;;  %7137 = vmatprep.subr.bf16.mxu0 %v7597_v47  ;;  %v6616_v17 = vld [vmem:[%s7845_s26 + $0x70] sm:$0xff]  }
  0xc0   : > { %v1325_v55 = vrot.slane %v1324_v22, 4  ;;  %v1335_v46 = vrot.slane %v1334_v26, 4  ;;  %v746_v40 = vrot.slane %v744_v37, 7  ;;  %953 = vst [vmem:[#allocation2 + $0x90] sm:$0xf] %v952_v23  ;;  %v3752_v49 = vsel %vm8221_vm13, %v6293_v9, %v3751_v59 }
  0xc1   : > { %v755_v14 = vrot.slane %v753_v12, 7  ;;  %v761_v51 = vshrl.u32 %v6512_v27, 16  ;;  %v764_v61 = vshll.u32 %v6512_v27, 16  ;;  %v3753_v52 = vrot.slane %v3751_v59, 4  ;;  %v8436_v37 = vld [vmem:[%s9681_s2] ss:$0 sm:$0xff] }
  0xc2   : > { %v1330_v4 = vsel %vm7871_vm2, %v1325_v55, %v1329_v53  ;;  %v1340_v48 = vsel %vm7871_vm2, %v1335_v46, %v1339_v28  ;;  %v749_v15 = vor.u32 %v747_v63, %v746_v40  ;;  %v751_v62 = vrot.slane %v746_v40, 4  ;;  %7138 = vmatpush3.bf16.msra.mxu0 %v7597_v47  ;;  %v8416_v47 = vld [vmem:[#allocation2 + $0x54] sm:$0xe]  ;;  %v8446_v55 = vld [vmem:[%s9682_s3] ss:$0 sm:$0xff] }
  0xc3   : > { %v6116_v9 = vcombine.low %v1330_v4, %v1340_v48  ;;  %v758_v39 = vor.u32 %v756_v45, %v755_v14  ;;  %v759_v30 = vrot.slane %v755_v14, 4  ;;  %v763_v19 = vrot.slane %v761_v51, 7  ;;  %7139 = vmatprep.subr.bf16.mxu0 %v7601_v50 }
  0xc4   : > { %v750_v59 = vsel %vm7909_vm9, %v742_v36, %v749_v15  ;;  %v956_v58 = vsel %vm7901_vm8, %v751_v62, %v955_v38  ;;  %v3754_v44 = vrot.slane %v7675_v31, 5  ;;  %v6294_v13 = vrot.slane %v3662_v41, 9 }
  0xc5   : > { %6874 = vmatmul.mubr.bf16.gmra.mrb[20].mxu1 %v6116_v9  ;;  %954 = vst [vmem:[#allocation2 + $0x94] sm:$0xf] %v750_v59  ;;  %957 = vst [vmem:[#allocation2 + $0x98] sm:$0x1] %v956_v58  ;;  %v766_v56 = vor.u32 %v764_v61, %v763_v19  ;;  %v768_v18 = vrot.slane %v763_v19, 4  ;;  %v959_v43 = vsel %vm7916_vm10, %v758_v39, %v958_v6  ;;  %v3758_v2 = vrot.slane %v8180_v33, 5 }
  0xc6   : > { %960 = vst [vmem:[#allocation2 + $0x9c] sm:$0xf] %v959_v43  ;;  %v3755_v57 = vsel %vm8221_vm13, %v3753_v52, %v3754_v44  ;;  %v3761_v20 = vrot.slane %v8182_v34, 5  ;;  %v6573_v53 = vunpack.c.l.bf16 %v6615_v10  ;;  %v6574_v21 = vunpack.c.h.bf16 %v6615_v10  ;;  %7140 = vmatpush3.bf16.msra.mxu0 %v7601_v50 }
  0xc7   : > { %v8422_v42 = vld [vmem:[#allocation2 + $0x90] sm:$0xf]  ;;  %v767_v28 = vsel %vm7909_vm9, %v759_v30, %v766_v56  ;;  %v963_v33 = vsel %vm7901_vm8, %v768_v18, %v962_v7  ;;  %v6325_v24 = vcombine.low %v3752_v49, %v3755_v57  ;;  %v3759_v36 = vsel %vm8221_vm13, %v6294_v13, %v3758_v2  ;;  %7173 = vmatprep.subr.bf16.mxu0 %v8407_v29 }
  0xc8   : > { %v1342_v34 = vshrl.u32 %v8422_v42, 16  ;;  %v1345_v22 = vshll.u32 %v8422_v42, 16  ;;  %961 = vst [vmem:[#allocation2 + $0xa0] sm:$0xf] %v767_v28  ;;  %964 = vst [vmem:[#allocation2 + $0xa4] sm:$0x1] %v963_v33  ;;  %v404_v63 = vmul.f32 %v8436_v37, %v6573_v53  ;;  %v405_v23 = vmul.f32 %v8436_v37, %v6574_v21 }
  0xc9   : > { %v3760_v26 = vrot.slane %v3758_v2, 4  ;;  %7101 = vmatprep.mubr.bf16.mxu0 %v6325_v24  ;;  %v6577_v38 = vunpack.c.l.bf16 %v6616_v17  ;;  %v6578_v27 = vunpack.c.h.bf16 %v6616_v17  ;;  %v6295_v12 = vrot.slane %v8416_v47, 9  ;;  %v3665_v47 = vld [vmem:[#allocation2 + $0x6c] sm:$0xe] }
  0xca   : > { %v1344_v45 = vrot.slane %v1342_v34, 4  ;;  %v1347_v41 = vrot.slane %v1345_v22, 5  ;;  %v443_v46 = vadd.f32 %v8446_v55, %v404_v63  ;;  %v444_v6 = vadd.f32 %v8446_v55, %v405_v23  ;;  %v965_v22 = vld [vmem:[#allocation2 + $0xa8] sm:$0xf] }
  0xcb   : > { %v3762_v50 = vsel %vm8221_vm13, %v3760_v26, %v3761_v20  ;;  %v406_v49 = vmul.f32 %v8436_v37, %v6577_v38  ;;  %v407_v14 = vmul.f32 %v8436_v37, %v6578_v27  ;;  %v3765_v4 = vrot.slane %v8212_v3, 5 }
  0xcc   : > { %v6326_v40 = vcombine.low %v3759_v36, %v3762_v50  ;;  %v8452_v51 = vld [vmem:[#allocation2 + $0x94] sm:$0xf]  ;;  %v1046_v61 = vld [vmem:[#allocation2 + $0x98] sm:$0x1]  ;;  %v1348_v52 = vor.u32 %v1347_v41, %v1344_v45  ;;  %v6513_v10 = vpack.c.bf16 %v443_v46, %v443_v46  ;;  %v3768_v48 = vrot.slane %v8231_v11, 5 }
  0xcd   : > { %v1351_v15 = vshll.u32 %v8452_v51, 16  ;;  %v1355_v62 = vshrl.u32 %v8452_v51, 16  ;;  %v1361_v9 = vshll.u32 %v1046_v61, 16  ;;  %v8458_v39 = vld [vmem:[#allocation2 + $0x9c] sm:$0xf]  ;;  %v6514_v30 = vpack.c.bf16 %v444_v6, %v444_v6 }
  0xce   : > { %7102 = vmatmul.mubr.bf16.gmra.mrb[8].mxu0 %v6326_v40  ;;  %v1349_v19 = vrot.slane %v1348_v52, 4  ;;  %v1366_v59 = vshrl.u32 %v8458_v39, 16  ;;  %v1369_v58 = vshll.u32 %v8458_v39, 16  ;;  %v770_v7 = vshrl.u32 %v6513_v10, 16  ;;  %v3664_v52 = vld [vmem:[#allocation2 + $0x60] sm:$0xe] }
  0xcf   : > { %v1353_v31 = vrot.slane %v1351_v15, 5  ;;  %v1357_v44 = vrot.slane %v1355_v62, 4  ;;  %v1363_v3 = vrot.slane %v1361_v9, 5  ;;  %v8462_v13 = vld [vmem:[#allocation2 + $0xa0] sm:$0xf]  ;;  %v773_v56 = vshll.u32 %v6513_v10, 16 }
  0xd0   : > { %v1047_v18 = vld [vmem:[#allocation2 + $0xa4] sm:$0x1]  ;;  %v1368_v43 = vrot.slane %v1366_v59, 4  ;;  %v1371_v2 = vrot.slane %v1369_v58, 5  ;;  %v1375_v57 = vshll.u32 %v8462_v13, 16  ;;  %v1379_v20 = vshrl.u32 %v8462_v13, 16 }
  0xd1   : > { %v1354_v53 = vsel %vm7871_vm2, %v1349_v19, %v1353_v31  ;;  %v1358_v21 = vor.u32 %v1357_v44, %v1353_v31  ;;  %v1385_v17 = vshll.u32 %v1047_v18, 16  ;;  %v772_v28 = vrot.slane %v770_v7, 7  ;;  %v969_v19 = vld [vmem:[#allocation2 + $0xb0] sm:$0x1] }
  0xd2   : > { %v1372_v33 = vor.u32 %v1371_v2, %v1368_v43  ;;  %v1377_v24 = vrot.slane %v1375_v57, 5  ;;  %v1381_v36 = vrot.slane %v1379_v20, 4  ;;  %v778_v34 = vshrl.u32 %v6514_v30, 16 }
  0xd3   : > { %v1359_v26 = vrot.slane %v1358_v21, 4  ;;  %v1387_v63 = vrot.slane %v1385_v17, 5  ;;  %v775_v23 = vor.u32 %v773_v56, %v772_v28  ;;  %v776_v38 = vrot.slane %v772_v28, 4 }
  0xd4   : > { %v1373_v27 = vrot.slane %v1372_v33, 4  ;;  %v1382_v45 = vor.u32 %v1381_v36, %v1377_v24  ;;  %v780_v41 = vrot.slane %v778_v34, 7  ;;  %v781_v50 = vshll.u32 %v6514_v30, 16  ;;  %v972_v33 = vld [vmem:[#allocation2 + $0xb4] sm:$0xf] }
  0xd5   : > { %v1364_v46 = vsel %vm7871_vm2, %v1359_v26, %v1363_v3  ;;  %v966_v40 = vsel %vm7916_vm10, %v775_v23, %v965_v22  ;;  %v445_v6 = vadd.f32 %v8446_v55, %v406_v49  ;;  %v446_v61 = vadd.f32 %v8446_v55, %v407_v14 }
  0xd6   : > { %v6117_v10 = vcombine.low %v1354_v53, %v1364_v46  ;;  %v1378_v15 = vsel %vm7871_vm2, %v1373_v27, %v1377_v24  ;;  %v1383_v62 = vrot.slane %v1382_v45, 4  ;;  %v783_v9 = vor.u32 %v781_v50, %v780_v41  ;;  %967 = vst [vmem:[#allocation2 + $0xa8] sm:$0xf] %v966_v40  ;;  %v976_v24 = vld [vmem:[#allocation2 + $0xbc] sm:$0x1] }
  0xd7   : > { %v785_v30 = vrot.slane %v780_v41, 4  ;;  %v6515_v59 = vpack.c.bf16 %v445_v6, %v445_v6  ;;  %v6516_v58 = vpack.c.bf16 %v446_v61, %v446_v61  ;;  %v3766_v7 = vsel %vm8221_vm13, %v6295_v12, %v3765_v4  ;;  %v2929_v27 = vld [vmem:[#allocation2 + $0x74] sm:$0x1] }
  0xd8   : > { %6877 = vmatprep.mubr.bf16.mxu1 %v6117_v10  ;;  %v1388_v49 = vsel %vm7871_vm2, %v1383_v62, %v1387_v63  ;;  %v784_v14 = vsel %vm7909_vm9, %v776_v38, %v783_v9  ;;  %v3767_v31 = vrot.slane %v3765_v4, 4  ;;  %v6296_v44 = vrot.slane %v3664_v52, 9  ;;  %v2928_v4 = vld [vmem:[#allocation2 + $0x70] sm:$0xf] }
  0xd9   : > { %v6118_v3 = vcombine.low %v1378_v15, %v1388_v49  ;;  %968 = vst [vmem:[#allocation2 + $0xac] sm:$0xf] %v784_v14  ;;  %v970_v56 = vsel %vm7901_vm8, %v785_v30, %v969_v19  ;;  %v787_v18 = vshrl.u32 %v6515_v59, 16  ;;  %v790_v43 = vshll.u32 %v6515_v59, 16 }
  0xda   : > { %971 = vst [vmem:[#allocation2 + $0xb0] sm:$0x1] %v970_v56  ;;  %v795_v2 = vshrl.u32 %v6516_v58, 16  ;;  %v798_v12 = vshll.u32 %v6516_v58, 16  ;;  %v3769_v57 = vsel %vm8221_vm13, %v3767_v31, %v3768_v48  ;;  %v3772_v20 = vrot.slane %v8262_v16, 5 }
  0xdb   : > { %6878 = vmatmul.mubr.bf16.gmra.mrb[24].mxu1 %v6118_v3  ;;  %v789_v53 = vrot.slane %v787_v18, 7  ;;  %v6327_v21 = vcombine.low %v3766_v7, %v3769_v57  ;;  %v3775_v17 = vrot.slane %v8250_v54, 5  ;;  %v6297_v48 = vrot.slane %v3665_v47, 9  ;;  %v3666_v7 = vld [vmem:[#allocation2 + $0x78] sm:$0xe] }
  0xdc   : > { %v797_v28 = vrot.slane %v795_v2, 7  ;;  %v3773_v36 = vsel %vm8221_vm13, %v6296_v44, %v3772_v20  ;;  %v3774_v34 = vrot.slane %v3772_v20, 4  ;;  %v3779_v16 = vrot.slane %v2928_v4, 5  ;;  %v8514_v44 = vld [vmem:[#allocation2 + $0x7c] sm:$0xf] }
  0xdd   : > { %v8494_v22 = vld [vmem:[#allocation2 + $0xa8] sm:$0xf]  ;;  %v792_v11 = vor.u32 %v790_v43, %v789_v53  ;;  %v793_v26 = vrot.slane %v789_v53, 4  ;;  %7105 = vmatprep.mubr.bf16.mxu0 %v6327_v21  ;;  %v3782_v30 = vrot.slane %v2929_v27, 5  ;;  %v8516_v18 = vld [vmem:[#allocation2 + $0x80] sm:$0x1] }
  0xde   : > { %v1390_v63 = vshrl.u32 %v8494_v22, 16  ;;  %v1393_v23 = vshll.u32 %v8494_v22, 16  ;;  %v800_v38 = vor.u32 %v798_v12, %v797_v28  ;;  %v802_v54 = vrot.slane %v797_v28, 4  ;;  %v3667_v43 = vld [vmem:[#allocation2 + $0x84] sm:$0xe] }
  0xdf   : > { %v973_v45 = vsel %vm7916_vm10, %v792_v11, %v972_v33  ;;  %v3776_v41 = vsel %vm8221_vm13, %v3774_v34, %v3775_v17  ;;  %v3780_v50 = vsel %vm8221_vm13, %v6297_v48, %v3779_v16  ;;  %v3781_v46 = vrot.slane %v3779_v16, 4  ;;  %v2934_v17 = vld [vmem:[#allocation2 + $0x88] sm:$0xf]  ;;  %v2935_v28 = vld [vmem:[#allocation2 + $0x8c] sm:$0x1] }
  0xe0   : > { %v8504_v40 = vld [vmem:[#allocation2 + $0xac] sm:$0xf]  ;;  %v1392_v6 = vrot.slane %v1390_v63, 4  ;;  %v1395_v61 = vrot.slane %v1393_v23, 5  ;;  %v801_v52 = vsel %vm7909_vm9, %v793_v26, %v800_v38  ;;  %974 = vst [vmem:[#allocation2 + $0xb4] sm:$0xf] %v973_v45  ;;  %v977_v10 = vsel %vm7901_vm8, %v802_v54, %v976_v24 }
  0xe1   : > { %v1048_v15 = vld [vmem:[#allocation2 + $0xb0] sm:$0x1]  ;;  %v1399_v62 = vshll.u32 %v8504_v40, 16  ;;  %v1403_v9 = vshrl.u32 %v8504_v40, 16  ;;  %975 = vst [vmem:[#allocation2 + $0xb8] sm:$0xf] %v801_v52  ;;  %v6328_v19 = vcombine.low %v3773_v36, %v3776_v41  ;;  %v3783_v31 = vsel %vm8221_vm13, %v3781_v46, %v3782_v30 }
  0xe2   : > { %978 = vst [vmem:[#allocation2 + $0xbc] sm:$0x1] %v977_v10  ;;  %v1396_v59 = vor.u32 %v1395_v61, %v1392_v6  ;;  %v1409_v58 = vshll.u32 %v1048_v15, 16  ;;  %v6329_v56 = vcombine.low %v3780_v50, %v3783_v31  ;;  %v6298_v57 = vrot.slane %v3666_v7, 9  ;;  %v3668_v23 = vld [vmem:[#allocation2 + $0x90] sm:$0xe] }
  0xe3   : > { %v1401_v49 = vrot.slane %v1399_v62, 5  ;;  %v1405_v14 = vrot.slane %v1403_v9, 4  ;;  %7106 = vmatmul.mubr.bf16.gmra.mrb[12].mxu0 %v6328_v19  ;;  %v3786_v53 = vrot.slane %v8514_v44, 5  ;;  %v3789_v21 = vrot.slane %v8516_v18, 5  ;;  %v2937_v41 = vld [vmem:[#allocation2 + $0x94] sm:$0xf] }
  0xe4   : > { %v1397_v3 = vrot.slane %v1396_v59, 4  ;;  %v1411_v2 = vrot.slane %v1409_v58, 5  ;;  %7109 = vmatprep.mubr.bf16.mxu0 %v6329_v56  ;;  %v6299_v33 = vrot.slane %v3667_v43, 9  ;;  %v2938_v50 = vld [vmem:[#allocation2 + $0x98] sm:$0x1]  ;;  %v3793_v15 = vrot.slane %v2934_v17, 5 }
  0xe5   : > { %v1406_v47 = vor.u32 %v1405_v14, %v1401_v49  ;;  %v3787_v45 = vsel %vm8221_vm13, %v6298_v57, %v3786_v53  ;;  %v3788_v52 = vrot.slane %v3786_v53, 4  ;;  %v3796_v62 = vrot.slane %v2935_v28, 5  ;;  %v2940_v7 = vld [vmem:[#allocation2 + $0xa0] sm:$0xf]  ;;  %v2941_v43 = vld [vmem:[#allocation2 + $0xa4] sm:$0x1] }
  0xe6   : > { %v1402_v12 = vsel %vm7871_vm2, %v1397_v3, %v1401_v49  ;;  %v6300_v9 = vrot.slane %v3668_v23, 9  ;;  %v3800_v59 = vrot.slane %v2937_v41, 5  ;;  %v3803_v58 = vrot.slane %v2938_v50, 5  ;;  %v3669_v49 = vld [vmem:[#allocation2 + $0x9c] sm:$0xe] }
  0xe7   : > { %v1407_v20 = vrot.slane %v1406_v47, 4  ;;  %v8520_v4 = vld [vmem:[#allocation2 + $0xb4] sm:$0xf]  ;;  %v3790_v30 = vsel %vm8221_vm13, %v3788_v52, %v3789_v21  ;;  %v3794_v3 = vsel %vm8221_vm13, %v6299_v33, %v3793_v15  ;;  %v3795_v56 = vrot.slane %v3793_v15, 4 }
  0xe8   : > { %v8524_v24 = vld [vmem:[#allocation2 + $0xb8] sm:$0xf]  ;;  %v1414_v34 = vshrl.u32 %v8520_v4, 16  ;;  %v1417_v11 = vshll.u32 %v8520_v4, 16  ;;  %v6330_v31 = vcombine.low %v3787_v45, %v3790_v30  ;;  %v3802_v53 = vrot.slane %v3800_v59, 4 }
  0xe9   : > { %v8526_v36 = vld [vmem:[#allocation2 + $0xbc] sm:$0x1]  ;;  %v1412_v26 = vsel %vm7871_vm2, %v1407_v20, %v1411_v2  ;;  %v1423_v48 = vshll.u32 %v8524_v24, 16  ;;  %v1427_v16 = vshrl.u32 %v8524_v24, 16  ;;  %v7678_v2 = vld [vmem:[#allocation2] sm:$0xf]  ;;  %v3801_v20 = vsel %vm8221_vm13, %v6300_v9, %v3800_v59 }
  0xea   : > { %v1433_v63 = vshll.u32 %v8526_v36, 16  ;;  %v6119_v38 = vcombine.low %v1402_v12, %v1412_v26  ;;  %v1416_v54 = vrot.slane %v1414_v34, 4  ;;  %v1419_v27 = vrot.slane %v1417_v11, 5  ;;  %v8541_v12 = vld [vmem:[#allocation2 + $0x4] sm:$0xf] }
  0xeb   : > { %v1425_v46 = vrot.slane %v1423_v48, 5  ;;  %v1429_v6 = vrot.slane %v1427_v16, 4  ;;  %v6129_v57 = vcombine.low %v7678_v2, %v8541_v12  ;;  %7110 = vmatmul.mubr.bf16.gmra.mrb[16].mxu0 %v6330_v31  ;;  %v3797_v17 = vsel %vm8221_vm13, %v3795_v56, %v3796_v62  ;;  %v2943_v34 = vld [vmem:[#allocation2 + $0xac] sm:$0xf]  ;;  %v2946_v23 = vld [vmem:[#allocation2 + $0xb8] sm:$0xf] }
  0xec   : > { %v1435_v61 = vrot.slane %v1433_v63, 5  ;;  %6881 = vmatprep.mubr.bf16.mxu1 %v6119_v38  ;;  %v1420_v10 = vor.u32 %v1419_v27, %v1416_v54  ;;  %v6301_v28 = vrot.slane %v3669_v49, 9  ;;  %v3807_v33 = vrot.slane %v2940_v7, 5  ;;  %v3670_v63 = vld [vmem:[#allocation2 + $0xa8] sm:$0xe] }
  0xed   : > { %v1430_v19 = vor.u32 %v1429_v6, %v1425_v46  ;;  %v6331_v26 = vcombine.low %v3794_v3, %v3797_v17  ;;  %v3804_v48 = vsel %vm8221_vm13, %v3802_v53, %v3803_v58  ;;  %v3810_v16 = vrot.slane %v2941_v43, 5  ;;  %v2944_v45 = vld [vmem:[#allocation2 + $0xb0] sm:$0x1]  ;;  %v3671_v41 = vld [vmem:[#allocation2 + $0xb4] sm:$0xe]  ;;  %v6617_v6 = vld [vmem:[%s7845_s26 + $0x78] sm:$0xff]  }
  0xee   : > { %v1421_v14 = vrot.slane %v1420_v10, 4  ;;  %v3808_v54 = vsel %vm8221_vm13, %v6301_v28, %v3807_v33  ;;  %v3809_v27 = vrot.slane %v3807_v33, 4  ;;  %v3814_v50 = vrot.slane %v2943_v34, 5  ;;  %v8559_v31 = vld [vmem:[#allocation2 + $0x10] sm:$0xf] }
  0xef   : > { %v1431_v47 = vrot.slane %v1430_v19, 4  ;;  %7113 = vmatprep.mubr.bf16.mxu0 %v6331_v26  ;;  %v6302_v10 = vrot.slane %v3670_v63, 9  ;;  %v3821_v15 = vrot.slane %v2946_v23, 5  ;;  %v3817_v19 = vrot.slane %v2944_v45, 5  ;;  %v8564_v2 = vld [vmem:[#allocation2 + $0x1c] sm:$0xf] }
  0xf0   : > { %v1426_v21 = vsel %vm7871_vm2, %v1421_v14, %v1425_v46  ;;  %v2947_v46 = vld [vmem:[#allocation2 + $0xbc] sm:$0x1]  ;;  %v3811_v52 = vsel %vm8221_vm13, %v3809_v27, %v3810_v16  ;;  %v3816_v9 = vrot.slane %v3814_v50, 4  ;;  %v6303_v30 = vrot.slane %v3671_v41, 9  ;;  %v7680_v14 = vld [vmem:[#allocation2 + $0xc] sm:$0xf] }
  0xf1   : > { %v1436_v11 = vsel %vm7871_vm2, %v1431_v47, %v1435_v61  ;;  %v6332_v61 = vcombine.low %v3801_v20, %v3804_v48  ;;  %v6333_v62 = vcombine.low %v3808_v54, %v3811_v52  ;;  %v3823_v59 = vrot.slane %v3821_v15, 4  ;;  %v7682_v47 = vld [vmem:[#allocation2 + $0x18] sm:$0xf]  ;;  %v7684_v48 = vld [vmem:[%s9680_s1 + $0x80] sm:$0xff]   ;;  %v7596_v16 = vld [vmem:[%s9680_s1 + $0x90] sm:$0xff]  }
  0xf2   : > { %v6120_v38 = vcombine.low %v1426_v21, %v1436_v11  ;;  %v3824_v58 = vrot.slane %v2947_v46, 5  ;;  %v6581_v7 = vunpack.c.l.bf16 %v6617_v6  ;;  %v6582_v49 = vunpack.c.h.bf16 %v6617_v6  ;;  %v7592_v21 = vld [vmem:[%s9680_s1 + $0x88] sm:$0xff]   ;;  %v7685_v27 = vld [vmem:[#allocation2 + $0x24] sm:$0xf]  ;;  %v7687_v6 = vld [vmem:[#allocation2 + $0x30] sm:$0xf] }
  0xf3   : > { %v6130_v3 = vcombine.low %v7680_v14, %v8559_v31  ;;  %7114 = vmatmul.mubr.bf16.gmra.mrb[20].mxu0 %v6332_v61  ;;  %v3815_v20 = vsel %vm8221_vm13, %v6302_v10, %v3814_v50  ;;  %v3818_v53 = vsel %vm8221_vm13, %v3816_v9, %v3817_v19  ;;  %v3822_v17 = vsel %vm8221_vm13, %v6303_v30, %v3821_v15  ;;  %v8586_v45 = vld [vmem:[#allocation2 + $0x28] sm:$0xf]  ;;  %v8589_v61 = vld [vmem:[#allocation2 + $0x34] sm:$0xf]  ;;  %v979_v10 = vld [vmem:[#allocation2 + $0xc0] sm:$0xf] }
  0xf4   : > { %6882 = vmatmul.mubr.bf16.gmra.mrb[28].mxu1 %v6120_v38  ;;  %v408_v56 = vmul.f32 %v8436_v37, %v6581_v7  ;;  %v409_v43 = vmul.f32 %v8436_v37, %v6582_v49  ;;  %7117 = vmatprep.mubr.bf16.mxu0 %v6333_v62  ;;  %v3825_v37 = vsel %vm8221_vm13, %v3823_v59, %v3824_v58  ;;  %v983_v15 = vld [vmem:[#allocation2 + $0xc8] sm:$0x1]  ;;  %v7600_v62 = vld [vmem:[%s9680_s1 + $0x98] sm:$0xff]   ;;  %v7604_v14 = vld [vmem:[%s9680_s1 + $0xa0] sm:$0xff]  }
  0xf5   : > { %6901 = vmatprep.mubr.bf16.mxu1 %v6129_v57  ;;  %v6131_v57 = vcombine.low %v7682_v47, %v8564_v2  ;;  %v6334_v34 = vcombine.low %v3815_v20, %v3818_v53  ;;  %v6335_v63 = vcombine.low %v3822_v17, %v3825_v37  ;;  %v6132_v41 = vcombine.low %v7685_v27, %v8586_v45  ;;  %v7610_v47 = vld [vmem:[%s9680_s1 + $0xa8] sm:$0xff]   ;;  %v7605_v27 = vld [vmem:[#allocation2 + $0x18] sm:$0xff]  }
  0xf6   : > { %v447_v28 = vadd.f32 %v8446_v55, %v408_v56  ;;  %v448_v33 = vadd.f32 %v8446_v55, %v409_v43  ;;  %v6133_v52 = vcombine.low %v7687_v6, %v8589_v61  ;;  %v8604_v56 = vld [vmem:[#allocation2 + $0x40] sm:$0xf]  ;;  %v8607_v43 = vld [vmem:[#allocation2 + $0x4c] sm:$0xf]  ;;  %v2092_v6 = vrot.slane %v8559_v31, 5 }
  0xf7   : > { %v6135_v60 = vcombine.low %v7691_v5, %v8607_v43  ;;  %v2035_v5 = vld [vmem:[#allocation2 + $0x24] sm:$0xe] }
  0xf8   : > { %v6517_v11 = vpack.c.bf16 %v447_v28, %v447_v28  ;;  %v6518_v26 = vpack.c.bf16 %v448_v33, %v448_v33  ;;  %v7616_v28 = vld [vmem:[%s9680_s1 + $0xb0] sm:$0xff]  }
  0xfa   : > { %v804_v23 = vshrl.u32 %v6517_v11, 16  ;;  %v807_v38 = vshll.u32 %v6517_v11, 16  ;;  %v812_v54 = vshrl.u32 %v6518_v26, 16  ;;  %v815_v55 = vshll.u32 %v6518_v26, 16 }
  0xfb   : > { %7118 = vmatmul.mubr.bf16.gmra.mrb[24].mxu0 %v6334_v34  ;;  %v3177_v11 = vshll.u32 %v8514_v44, 16  ;;  %v3181_v26 = vshrl.u32 %v8514_v44, 16  ;;  %v2032_v44 = vld [vmem:[#allocation2] sm:$0xe] }
  0xfc   : > { %6902 = vmatmul.mubr.bf16.vlgmr.msra.gmra.mrb[0].mxu1 %v6130_v3  ;;  %v806_v50 = vrot.slane %v804_v23, 7  ;;  %v814_v46 = vrot.slane %v812_v54, 7  ;;  %7121 = vmatprep.mubr.bf16.mxu0 %v6335_v63  ;;  %v7689_v3 = vld [vmem:[#allocation2 + $0x3c] sm:$0xf]  ;;  %v8625_v54 = vld [vmem:[#allocation2 + $0x64] sm:$0xf] }
  0xfd   : > { %6934 = vmatpush3.bf16.msra.mxu1 %v7684_v48  ;;  %6905 = vmatprep.mubr.bf16.mxu1 %v6131_v57  ;;  %v6134_v0 = vcombine.low %v7689_v3, %v8604_v56  ;;  %v7693_v48 = vld [vmem:[#allocation2 + $0x54] sm:$0xf]  ;;  %v6153_v31 = vrot.slane %v2032_v44, 9  ;;  %v7699_v3 = vld [vmem:[#allocation2 + $0x20] sm:$0x1]  ;;  %v6142_v44 = vcombine.low %v8458_v39, %v8462_v13 }
  0xfe   : > { %6935 = vmatprep.subr.bf16.mxu1 %v7592_v21  ;;  %v809_v9 = vor.u32 %v807_v38, %v806_v50  ;;  %v810_v19 = vrot.slane %v806_v50, 4  ;;  %v817_v30 = vor.u32 %v815_v55, %v814_v46  ;;  %v819_v59 = vrot.slane %v814_v46, 4  ;;  %v7695_v38 = vld [vmem:[#allocation2 + $0x60] sm:$0xf]  ;;  %v2033_v46 = vld [vmem:[#allocation2 + $0xc] sm:$0xe] }
  0xff   : > { %v6137_v55 = vcombine.low %v7695_v38, %v8625_v54 }
 0x100   : > { %v818_v58 = vsel %vm7909_vm9, %v810_v19, %v817_v30  ;;  %v980_v7 = vsel %vm7916_vm10, %v809_v9, %v979_v10  ;;  %v984_v49 = vsel %vm7901_vm8, %v819_v59, %v983_v15  ;;  %v7622_v10 = vld [vmem:[%s9680_s1 + $0xb8] sm:$0xff]   ;;  %v8634_v19 = vrot.slane %v3177_v11, 5  ;;  %v7611_v11 = vld [vmem:[#allocation2 + $0x30] sm:$0xff]  }
 0x101   : > { %6936 = vmatpush3.bf16.msra.mxu1 %v7592_v21  ;;  %981 = vst [vmem:[#allocation2 + $0xc0] sm:$0xf] %v980_v7  ;;  %982 = vst [vmem:[#allocation2 + $0xc4] sm:$0xf] %v818_v58  ;;  %v2034_v15 = vld [vmem:[#allocation2 + $0x18] sm:$0xe] }
 0x102   : > { %6937 = vmatprep.subr.bf16.mxu1 %v7596_v16  ;;  %985 = vst [vmem:[#allocation2 + $0xc8] sm:$0x1] %v984_v49  ;;  %9711 = vst [vmem:[#allocation4_spill] sm:$0xff] %v8634_v19  ;;  %v8636_v30 = vrot.slane %v3181_v26, 4  ;;  %v2094_v7 = vrot.slane %v2092_v6, 4  ;;  %v6155_v49 = vrot.slane %v2034_v15, 9  ;;  %v6143_v15 = vcombine.low %v8494_v22, %v8504_v40 }
 0x104   : > { %6906 = vmatmul.mubr.bf16.gmra.mrb[4].mxu1 %v6132_v41  ;;  %v2085_v41 = vrot.slane %v8541_v12, 5  ;;  %9712 = vst [vmem:[#allocation5_spill] sm:$0xff] %v8636_v30  ;;  %v7698_v12 = vld [vmem:[#allocation2 + $0x14] sm:$0x1] }
 0x105   : > { %6909 = vmatprep.mubr.bf16.mxu1 %v6133_v52  ;;  %6938 = vmatpush3.bf16.msra.mxu1 %v7596_v16  ;;  %v8620_v16 = vld [vmem:[#allocation2 + $0x58] sm:$0xf]  ;;  %v2099_v52 = vrot.slane %v8564_v2, 5  ;;  %v2095_v59 = vrot.slane %v7698_v12, 5  ;;  %v6154_v2 = vrot.slane %v2033_v46, 9 }
 0x106   : > { %6939 = vmatprep.subr.bf16.mxu1 %v7600_v62  ;;  %v6136_v63 = vcombine.low %v7693_v48, %v8620_v16  ;;  %v2087_v58 = vrot.slane %v2085_v41, 4  ;;  %v8655_v26 = vsel %vm8221_vm13, %v6153_v31, %v2085_v41  ;;  %v2037_v41 = vld [vmem:[#allocation2 + $0x3c] sm:$0xe] }
 0x107   : > { %v8663_v48 = vsel %vm8221_vm13, %v6154_v2, %v2092_v6  ;;  %v8674_v38 = vsel %vm8221_vm13, %v6155_v49, %v2099_v52  ;;  %v7703_v6 = vld [vmem:[#allocation2 + $0x2c] sm:$0x1]  ;;  %v4542_v2 = vld [vmem:[#allocation2 + $0x18] sm:$0xf] }
 0x108   : > { %v2949_v57 = vld [vmem:[#allocation2 + $0xc4] sm:$0xf]  ;;  %v3672_v53 = vld [vmem:[#allocation2 + $0xc0] sm:$0xe] }
 0x109   : > { %6940 = vmatpush3.bf16.msra.mxu1 %v7600_v62  ;;  %v2950_v20 = vld [vmem:[#allocation2 + $0xc8] sm:$0x1]  ;;  %v6304_v21 = vrot.slane %v3672_v53, 9  ;;  %v3828_v17 = vrot.slane %v2949_v57, 5  ;;  %v8642_v57 = vld [vmem:[%s9680_s1 + $0xc0] sm:$0xff]  }
 0x10a   : > { %6941 = vmatprep.subr.bf16.mxu1 %v7604_v14  ;;  %v3831_v37 = vrot.slane %v2950_v20, 5  ;;  %v7697_v62 = vld [vmem:[#allocation2 + $0x8] sm:$0x1]  ;;  %v2106_v20 = vrot.slane %v8586_v45, 5  ;;  %v4545_v53 = vld [vmem:[#allocation2 + $0x24] sm:$0xf] }
 0x10b   : > { %v3829_v33 = vsel %vm8221_vm13, %v6304_v21, %v3828_v17  ;;  %v3830_v34 = vrot.slane %v3828_v17, 4  ;;  %v2088_v9 = vrot.slane %v7697_v62, 5  ;;  %v7700_v21 = vld [vmem:[#allocation2 + $0x6c] sm:$0xf]  ;;  %v8647_v17 = vld [vmem:[#allocation2 + $0x70] sm:$0xf] }
 0x10c   : > { %6910 = vmatmul.mubr.bf16.gmra.mrb[8].mxu1 %v6134_v0  ;;  %v2102_v0 = vrot.slane %v7699_v3, 5  ;;  %v2108_v46 = vrot.slane %v2106_v20, 4  ;;  %v4544_v62 = vld [vmem:[#allocation2 + $0x20] sm:$0x1] }
 0x10d   : > { %6913 = vmatprep.mubr.bf16.mxu1 %v6135_v60  ;;  %6942 = vmatpush3.bf16.msra.mxu1 %v7604_v14  ;;  %v3832_v23 = vsel %vm8221_vm13, %v3830_v34, %v3831_v37  ;;  %v2101_v14 = vrot.slane %v2099_v52, 4  ;;  %v3187_v60 = vshll.u32 %v8516_v18, 16  ;;  %v6138_v37 = vcombine.low %v7700_v21, %v8647_v17  ;;  %v2036_v34 = vld [vmem:[#allocation2 + $0x30] sm:$0xe] }
 0x10e   : > { %6943 = vmatprep.subr.bf16.mxu1 %v7610_v47  ;;  %v6336_v50 = vcombine.low %v3829_v33, %v3832_v23  ;;  %v6140_v33 = vcombine.low %v8372_v25, %v8374_v1  ;;  %v8659_v45 = vsel %vm8221_vm13, %v2087_v58, %v2088_v9  ;;  %v8670_v23 = vsel %vm8221_vm13, %v2094_v7, %v2095_v59  ;;  %v2038_v9 = vld [vmem:[#allocation2 + $0x48] sm:$0xe]  ;;  %v4543_v7 = vld [vmem:[#allocation2 + $0x1c] sm:$0xf]  ;;  %v7708_v25 = vld [vmem:[#allocation2 + $0x68] sm:$0x1] }
 0x10f   : > { %v8686_v52 = vrot.slane %v3187_v60, 5  ;;  %v6157_v58 = vrot.slane %v2036_v34, 9  ;;  %v7613_v60 = vld [vmem:[#allocation2 + $0x3c] sm:$0xff]   ;;  %v4591_v34 = vshrl.u32 %v4542_v2, 16  ;;  %v2144_v1 = vrot.slane %v7708_v25, 5 }
 0x110   : > { %7122 = vmatmul.mubr.bf16.gmra.mrb[28].mxu0 %v6336_v50  ;;  %v6141_v50 = vcombine.low %v8422_v42, %v8452_v51  ;;  %v7628_v42 = vld [vmem:[%s9680_s1 + $0x1e0] sm:$0xff]  }
 0x111   : > { %6944 = vmatpush3.bf16.msra.mxu1 %v7610_v47  ;;  %7141 = vmatprep.mubr.bf16.mxu0 %v7605_v27  ;;  %v7607_v47 = vld [vmem:[#allocation2 + $0x24] sm:$0xff]   ;;  %v2113_v27 = vrot.slane %v8589_v61, 5  ;;  %9713 = vst [vmem:[#allocation6_spill] sm:$0xff] %v8686_v52  ;;  %v6144_v61 = vcombine.low %v8520_v4, %v8524_v24  ;;  %v8866_v52 = vld [vmem:[#allocation2 + $0x58] sm:$0xf] }
 0x112   : > { %6945 = vmatprep.subr.bf16.mxu1 %v7616_v28  ;;  %9719 = vst [vmem:[#allocation11_spill] sm:$0xff] %v8866_v52 }
 0x113   : > { %v2115_v49 = vrot.slane %v2113_v27, 4 }
 0x114   : > { %6914 = vmatmul.mubr.bf16.gmra.mrb[12].mxu1 %v6136_v63  ;;  %v6156_v63 = vrot.slane %v2035_v5, 9  ;;  %v2120_v5 = vrot.slane %v8604_v56, 5  ;;  %v8714_v56 = vsel %vm8221_vm13, %v6157_v58, %v2113_v27  ;;  %v7624_v27 = vld [vmem:[%s9680_s1 + $0x1d8] sm:$0xff]   ;;  %v4546_v58 = vld [vmem:[#allocation2 + $0x28] sm:$0xf] }
 0x115   : > { %6917 = vmatprep.mubr.bf16.mxu1 %v6137_v55  ;;  %6946 = vmatpush3.bf16.msra.mxu1 %v7616_v28  ;;  %v7702_v28 = vld [vmem:[#allocation2 + $0x78] sm:$0xf]  ;;  %v8678_v55 = vsel %vm8221_vm13, %v2101_v14, %v2102_v0  ;;  %v6158_v0 = vrot.slane %v2037_v41, 9  ;;  %v7617_v41 = vld [vmem:[#allocation2 + $0x48] sm:$0xff]  }
 0x116   : > { %6947 = vmatprep.subr.bf16.mxu1 %v7622_v10  ;;  %v6139_v18 = vcombine.low %v7702_v28, %v8357_v32  ;;  %v7612_v32 = vld [vmem:[%s9680_s1 + $0x1c8] sm:$0xff]   ;;  %v8701_v31 = vsel %vm8221_vm13, %v6156_v63, %v2106_v20  ;;  %v7704_v14 = vld [vmem:[#allocation2 + $0x38] sm:$0x1]  ;;  %v7705_v20 = vld [vmem:[#allocation2 + $0x44] sm:$0x1]  ;;  %v2127_v28 = vrot.slane %v8607_v43, 5 }
 0x117   : > { %v2116_v3 = vrot.slane %v7704_v14, 5  ;;  %v2123_v21 = vrot.slane %v7705_v20, 5  ;;  %v4600_v63 = vshll.u32 %v4543_v7, 16  ;;  %v7706_v14 = vld [vmem:[#allocation2 + $0x50] sm:$0x1] }
 0x118   : > { %7142 = vmatmul.mubr.bf16.vlgmr.msra.gmra.mrb[0].mxu0 %v7607_v47  ;;  %v2040_v20 = vld [vmem:[#allocation2 + $0x60] sm:$0xe] }
 0x119   : > { %6948 = vmatpush3.bf16.msra.mxu1 %v7622_v10  ;;  %v2109_v10 = vrot.slane %v7703_v6, 5  ;;  %7174 = vmatpush3.bf16.msra.mxu0 %v8407_v29  ;;  %v7618_v29 = vld [vmem:[%s9680_s1 + $0x1d0] sm:$0xff]   ;;  %v4604_v6 = vshrl.u32 %v4543_v7, 16  ;;  %v8720_v43 = vsel %vm8221_vm13, %v2115_v49, %v2116_v3  ;;  %v4618_v49 = vshll.u32 %v4545_v53, 16 }
 0x11a   : > { %6981 = vmatprep.subr.bf16.mxu1 %v8642_v57  ;;  %7145 = vmatprep.mubr.bf16.mxu0 %v7611_v11  ;;  %v4594_v11 = vshll.u32 %v4542_v2, 16  ;;  %v8724_v2 = vsel %vm8221_vm13, %v6158_v0, %v2120_v5  ;;  %v4593_v3 = vrot.slane %v4591_v34, 4  ;;  %v6161_v12 = vrot.slane %v2040_v20, 9 }
 0x11b   : > { %7175 = vmatprep.subr.bf16.mxu0 %v7612_v32  ;;  %v8709_v47 = vsel %vm8221_vm13, %v2108_v46, %v2109_v10  ;;  %v2130_v46 = vrot.slane %v7706_v14, 5  ;;  %v2134_v10 = vrot.slane %v8620_v16, 5  ;;  %v4615_v14 = vshrl.u32 %v4545_v53, 16 }
 0x11c   : > { %6918 = vmatmul.mubr.bf16.gmra.mrb[16].mxu1 %v6138_v37  ;;  %v6159_v37 = vrot.slane %v2038_v9, 9  ;;  %v2141_v9 = vrot.slane %v8625_v54, 5  ;;  %v2129_v54 = vrot.slane %v2127_v28, 4  ;;  %v4596_v0 = vrot.slane %v4594_v11, 5 }
 0x11d   : > { %6921 = vmatprep.mubr.bf16.mxu1 %v6139_v18  ;;  %v2039_v18 = vld [vmem:[#allocation2 + $0x54] sm:$0xe]  ;;  %7176 = vmatpush3.bf16.msra.mxu0 %v7612_v32  ;;  %v2122_v32 = vrot.slane %v2120_v5, 4  ;;  %v8736_v5 = vrot.slane %v4600_v63, 5  ;;  %v4624_v34 = vshll.u32 %v4546_v58, 16  ;;  %v4628_v11 = vshrl.u32 %v4546_v58, 16 }
 0x11e   : > { %7177 = vmatprep.subr.bf16.mxu0 %v7618_v29  ;;  %v6160_v7 = vrot.slane %v2039_v18, 9  ;;  %v8731_v16 = vsel %vm8221_vm13, %v6159_v37, %v2127_v28  ;;  %v4606_v18 = vrot.slane %v4604_v6, 4  ;;  %v2136_v37 = vrot.slane %v2134_v10, 4  ;;  %v7707_v28 = vld [vmem:[#allocation2 + $0x5c] sm:$0x1]  ;;  %v7619_v6 = vld [vmem:[#allocation2 + $0x54] sm:$0xff]  }
 0x11f   : > { %v2137_v59 = vrot.slane %v7707_v28, 5  ;;  %v2143_v53 = vrot.slane %v2141_v9, 4  ;;  %v8747_v51 = vsel %vm8221_vm13, %v2122_v32, %v2123_v21  ;;  %v4620_v63 = vrot.slane %v4618_v49, 5  ;;  %v7623_v28 = vld [vmem:[#allocation2 + $0x60] sm:$0xff]   ;;  %v4547_v49 = vld [vmem:[#allocation2 + $0x2c] sm:$0x1] }
 0x120   : > { %7146 = vmatmul.mubr.bf16.gmra.mrb[4].mxu0 %v7613_v60  ;;  %v2148_v60 = vrot.slane %v8647_v17, 5  ;;  %v8755_v17 = vsel %vm8221_vm13, %v2129_v54, %v2130_v46  ;;  %v4607_v20 = vor.u32 %v4606_v18, %v8736_v5  ;;  %v4610_v58 = vshll.u32 %v4544_v62, 16  ;;  %v7710_v18 = vld [vmem:[#allocation2 + $0x7c] sm:$0xf] }
 0x121   : > { %7149 = vmatprep.mubr.bf16.mxu0 %v7617_v41  ;;  %7178 = vmatpush3.bf16.msra.mxu0 %v7618_v29  ;;  %v4617_v29 = vrot.slane %v4615_v14, 4  ;;  %v4597_v41 = vor.u32 %v4596_v0, %v4593_v3  ;;  %v8760_v21 = vsel %vm8221_vm13, %v2136_v37, %v2137_v59  ;;  %v8768_v46 = vsel %vm8221_vm13, %v2143_v53, %v2144_v1  ;;  %v2042_v0 = vld [vmem:[#allocation2 + $0x78] sm:$0xe]  ;;  %v4553_v59 = vld [vmem:[#allocation2 + $0x44] sm:$0x1] }
 0x122   : > { %7179 = vmatprep.subr.bf16.mxu0 %v7624_v27  ;;  %v2150_v54 = vrot.slane %v2148_v60, 4  ;;  %v8770_v62 = vrot.slane %v4624_v34, 5  ;;  %v4630_v3 = vrot.slane %v4628_v11, 4  ;;  %v2155_v37 = vrot.slane %v7710_v18, 5  ;;  %v7625_v18 = vld [vmem:[#allocation2 + $0x6c] sm:$0xff]  }
 0x123   : > { %v4598_v25 = vrot.slane %v4597_v41, 4  ;;  %v4608_v1 = vrot.slane %v4607_v20, 4  ;;  %v4634_v13 = vshll.u32 %v4547_v49, 16  ;;  %v7711_v20 = vld [vmem:[#allocation2 + $0x80] sm:$0x1]  ;;  %v9717_v34 = vcombine.low %v8655_v26, %v8659_v45  ;;  %v7631_v45 = vld [vmem:[#allocation2 + $0x90] sm:$0xff]  }
 0x124   : > { %6922 = vmatmul.mubr.bf16.gmra.mrb[20].mxu1 %v6140_v33  ;;  %v2041_v33 = vld [vmem:[#allocation2 + $0x6c] sm:$0xe]  ;;  %v4551_v11 = vld [vmem:[#allocation2 + $0x3c] sm:$0xf]  ;;  %v8850_v26 = vld [vmem:[%s9680_s1 + $0x200] sm:$0xff]  }
 0x125   : > { %6925 = vmatprep.mubr.bf16.mxu1 %v6141_v50  ;;  %v8751_v50 = vsel %vm8221_vm13, %v6160_v7, %v2134_v10  ;;  %v8764_v10 = vsel %vm8221_vm13, %v6161_v12, %v2141_v9  ;;  %v6162_v32 = vrot.slane %v2041_v33, 9  ;;  %v7709_v7 = vld [vmem:[#allocation2 + $0x74] sm:$0x1]  ;;  %7180 = vmatpush3.bf16.msra.mxu0 %v7624_v27  ;;  %v7632_v12 = vld [vmem:[%s9680_s1 + $0x1e8] sm:$0xff]   ;;  %v4621_v27 = vor.u32 %v4620_v63, %v4617_v29 }
 0x126   : > { %v2151_v14 = vrot.slane %v7709_v7, 5  ;;  %7181 = vmatprep.subr.bf16.mxu0 %v7628_v42  ;;  %v4612_v33 = vrot.slane %v4610_v58, 5  ;;  %v7636_v29 = vld [vmem:[%s9680_s1 + $0x1f0] sm:$0xff]   ;;  %v6163_v63 = vrot.slane %v2042_v0, 9  ;;  %v2158_v58 = vrot.slane %v7711_v20, 5  ;;  %9718 = vst [vmem:[#allocation10_spill] sm:$0xff] %v8850_v26 }
 0x127   : > { %v8798_v22 = vsel %vm8221_vm13, %v6162_v32, %v2148_v60  ;;  %v8805_v41 = vrot.slane %v4621_v27, 4  ;;  %v7712_v7 = vld [vmem:[#allocation2 + $0x88] sm:$0xf]  ;;  %v4603_v60 = vsel %vm7871_vm2, %v4598_v25, %v8736_v5  ;;  %v8814_v0 = vrot.slane %v4634_v13, 5  ;;  %v7640_v13 = vld [vmem:[%s9680_s1 + $0x1f8] sm:$0xff]  }
 0x128   : > { %7150 = vmatmul.mubr.bf16.gmra.mrb[8].mxu0 %v7619_v6  ;;  %v8802_v40 = vsel %vm8221_vm13, %v2150_v54, %v2151_v14  ;;  %v4549_v6 = vld [vmem:[#allocation2 + $0x34] sm:$0xf]  ;;  %v2162_v49 = vrot.slane %v7712_v7, 5  ;;  %v4613_v32 = vsel %vm7871_vm2, %v4608_v1, %v4612_v33  ;;  %v8820_v5 = vsel %vm8221_vm13, %v6163_v63, %v2155_v37  ;;  %v7713_v1 = vld [vmem:[#allocation2 + $0x8c] sm:$0x1] }
 0x129   : > { %7153 = vmatprep.mubr.bf16.mxu0 %v7623_v28  ;;  %7182 = vmatpush3.bf16.msra.mxu0 %v7628_v42  ;;  %v2157_v42 = vrot.slane %v2155_v37, 4  ;;  %v2043_v28 = vld [vmem:[#allocation2 + $0x84] sm:$0xe]  ;;  %v4648_v20 = vshll.u32 %v4549_v6, 16  ;;  %v4652_v39 = vshrl.u32 %v4549_v6, 16  ;;  %9714 = vst [vmem:[#allocation7_spill] sm:$0xff] %v8820_v5  ;;  %v8825_v27 = vcombine.low %v4603_v60, %v4613_v32 }
 0x12a   : > { %7183 = vmatprep.subr.bf16.mxu0 %v7632_v12  ;;  %v6164_v25 = vrot.slane %v2043_v28, 9  ;;  %v2165_v33 = vrot.slane %v7713_v1, 5  ;;  %v4554_v63 = vld [vmem:[#allocation2 + $0x48] sm:$0xf]  ;;  %v8835_v6 = vld [vmem:[#allocation2 + $0x4c] sm:$0xf] }
 0x12b   : > { %v8833_v37 = vsel %vm8221_vm13, %v2157_v42, %v2158_v58  ;;  %9716 = vst [vmem:[#allocation9_spill] sm:$0xff] %v8835_v6  ;;  %v4663_v32 = vshrl.u32 %v4551_v11, 16  ;;  %v4666_v1 = vshll.u32 %v4551_v11, 16  ;;  %v4550_v42 = vld [vmem:[#allocation2 + $0x38] sm:$0x1]  ;;  %v8843_v58 = vrot.slane %v4648_v20, 5 }
 0x12c   : > { %6926 = vmatmul.mubr.bf16.gmra.mrb[24].mxu1 %v6142_v44  ;;  %v4548_v44 = vld [vmem:[#allocation2 + $0x30] sm:$0xf]  ;;  %9715 = vst [vmem:[#allocation8_spill] sm:$0xff] %v8833_v37  ;;  %v4654_v53 = vrot.slane %v4652_v39, 4  ;;  %v4687_v4 = vshrl.u32 %v4554_v63, 16  ;;  %v8860_v11 = vsel %vm8221_vm13, %v6164_v25, %v2162_v49  ;;  %v4658_v20 = vshll.u32 %v4550_v42, 16 }
 0x12d   : > { %6929 = vmatprep.mubr.bf16.mxu1 %v6143_v15  ;;  %v4631_v15 = vor.u32 %v4630_v3, %v8770_v62  ;;  %v4639_v14 = vshrl.u32 %v4548_v44, 16  ;;  %v4642_v54 = vshll.u32 %v4548_v44, 16  ;;  %v7627_v3 = vld [vmem:[#allocation2 + $0x78] sm:$0xff]   ;;  %7184 = vmatpush3.bf16.msra.mxu0 %v7632_v12  ;;  %v4552_v44 = vld [vmem:[#allocation2 + $0x40] sm:$0xf]  ;;  %v4720_v37 = vshll.u32 %v8866_v52, 16 }
 0x12e   : > { %7185 = vmatprep.subr.bf16.mxu0 %v7636_v29  ;;  %v4672_v12 = vshll.u32 %v4552_v44, 16  ;;  %v4676_v9 = vshrl.u32 %v4552_v44, 16  ;;  %v4665_v44 = vrot.slane %v4663_v32, 4  ;;  %v4689_v19 = vrot.slane %v4687_v4, 4  ;;  %v7714_v4 = vld [vmem:[#allocation2 + $0x94] sm:$0xf] }
 0x12f   : > { %v8816_v7 = vrot.slane %v4631_v15, 4  ;;  %v2164_v15 = vrot.slane %v2162_v49, 4  ;;  %v4641_v28 = vrot.slane %v4639_v14, 4  ;;  %v4644_v60 = vrot.slane %v4642_v54, 5  ;;  %v7629_v54 = vld [vmem:[#allocation2 + $0x84] sm:$0xff]  }
 0x130   : > { %7154 = vmatmul.mubr.bf16.gmra.mrb[12].mxu0 %v7625_v18  ;;  %v4696_v18 = vshll.u32 %v8835_v6, 16  ;;  %v4700_v14 = vshrl.u32 %v8835_v6, 16  ;;  %v4655_v49 = vor.u32 %v4654_v53, %v8843_v58  ;;  %v8872_v25 = vrot.slane %v4672_v12, 5 }
 0x131   : > { %7157 = vmatprep.mubr.bf16.mxu0 %v7627_v3  ;;  %7186 = vmatpush3.bf16.msra.mxu0 %v7636_v29  ;;  %v8864_v39 = vsel %vm8221_vm13, %v2164_v15, %v2165_v33  ;;  %v4557_v29 = vld [vmem:[#allocation2 + $0x54] sm:$0xf]  ;;  %v4645_v3 = vor.u32 %v4644_v60, %v4641_v28  ;;  %v4678_v6 = vrot.slane %v4676_v9, 4  ;;  %v4682_v33 = vshll.u32 %v4553_v59, 16  ;;  %v2044_v15 = vld [vmem:[#allocation2 + $0x90] sm:$0xe] }
 0x132   : > { %7187 = vmatprep.subr.bf16.mxu0 %v7640_v13  ;;  %v8874_v60 = vrot.slane %v4696_v18, 5  ;;  %v4702_v32 = vrot.slane %v4700_v14, 4  ;;  %v4711_v42 = vshrl.u32 %v4557_v29, 16  ;;  %v4714_v30 = vshll.u32 %v4557_v29, 16 }
 0x133   : > { %v4724_v53 = vshrl.u32 %v8866_v52, 16  ;;  %v9721_v59 = vcombine.low %v8663_v48, %v8670_v23  ;;  %v8884_v9 = vrot.slane %v4645_v3, 4  ;;  %v9722_v18 = vcombine.low %v8674_v38, %v8678_v55  ;;  %v7715_v23 = vld [vmem:[#allocation2 + $0xa0] sm:$0xf]  ;;  %v7634_v3 = vld [vmem:[%s9680_s1 + $0xd0] sm:$0xff]  }
 0x134   : > { %6930 = vmatmul.mubr.bf16.gmra.mrb[28].mxu1 %v6144_v61  ;;  %v4690_v61 = vshll.u32 %v4554_v63, 16  ;;  %v4668_v63 = vrot.slane %v4666_v1, 5  ;;  %v8877_v1 = vld [vmem:[#allocation2 + $0x50] sm:$0x1]  ;;  %v8892_v14 = vrot.slane %v4655_v49, 4  ;;  %v4679_v29 = vor.u32 %v4678_v6, %v8872_v25 }
 0x135   : > { %6949 = vmatprep.mubr.bf16.mxu1 %v9717_v34  ;;  %v7630_v34 = vld [vmem:[%s9680_s1 + $0xc8] sm:$0xff]   ;;  %7188 = vmatpush3.bf16.msra.mxu0 %v7640_v13  ;;  %9720 = vst [vmem:[#allocation12_spill] sm:$0xff] %v8877_v1  ;;  %v8886_v13 = vrot.slane %v4658_v20, 5  ;;  %v6165_v48 = vrot.slane %v2044_v15, 9  ;;  %v8898_v20 = vrot.slane %v4682_v33, 5  ;;  %v4703_v38 = vor.u32 %v4702_v32, %v8874_v60 }
 0x136   : > { %v4692_v28 = vrot.slane %v4690_v61, 5  ;;  %7221 = vmatprep.subr.bf16.mxu0 %v8850_v26  ;;  %v4669_v12 = vor.u32 %v4668_v63, %v4665_v44  ;;  %v2169_v61 = vrot.slane %v7714_v4, 5  ;;  %v4706_v55 = vshll.u32 %v8877_v1, 16  ;;  %v8902_v63 = vld [vmem:[#allocation2 + $0x5c] sm:$0x1]  ;;  %v7635_v32 = vld [vmem:[#allocation2 + $0xa8] sm:$0xff]  }
 0x137   : > { %v4713_v6 = vrot.slane %v4711_v42, 4  ;;  %v4716_v49 = vrot.slane %v4714_v30, 5  ;;  %v8904_v15 = vrot.slane %v4720_v37, 5  ;;  %v4651_v33 = vsel %vm7871_vm2, %v8884_v9, %v8843_v58  ;;  %v7717_v42 = vld [vmem:[#allocation2 + $0xa4] sm:$0x1] }
 0x138   : > { %7158 = vmatmul.mubr.bf16.gmra.mrb[16].mxu0 %v7629_v54  ;;  %v2176_v54 = vrot.slane %v7715_v23, 5  ;;  %v4693_v44 = vor.u32 %v4692_v28, %v4689_v19  ;;  %v4670_v4 = vrot.slane %v4669_v12, 4  ;;  %v7716_v19 = vld [vmem:[#allocation2 + $0x98] sm:$0x1]  ;;  %v4680_v23 = vrot.slane %v4679_v29, 4 }
 0x139   : > { %7161 = vmatprep.mubr.bf16.mxu0 %v7631_v45  ;;  %v7633_v45 = vld [vmem:[#allocation2 + $0x9c] sm:$0xff]   ;;  %v2172_v28 = vrot.slane %v7716_v19, 5  ;;  %v2179_v30 = vrot.slane %v7717_v42, 5  ;;  %v8912_v37 = vsel %vm8221_vm13, %v6165_v48, %v2169_v61  ;;  %v4708_v5 = vrot.slane %v4706_v55, 5  ;;  %v2046_v9 = vld [vmem:[#allocation2 + $0xa8] sm:$0xe] }
 0x13a   : > { %v2178_v1 = vrot.slane %v2176_v54, 4  ;;  %v4730_v58 = vshll.u32 %v8902_v63, 16  ;;  %v4704_v12 = vrot.slane %v4703_v38, 4  ;;  %v4717_v29 = vor.u32 %v4716_v49, %v4713_v6  ;;  %v7718_v19 = vld [vmem:[#allocation2 + $0xac] sm:$0xf] }
 0x13b   : > { %v2183_v42 = vrot.slane %v7718_v19, 5  ;;  %v2047_v26 = vld [vmem:[#allocation2 + $0xb4] sm:$0xe]  ;;  %v4661_v48 = vsel %vm7871_vm2, %v8892_v14, %v8886_v13  ;;  %v2190_v55 = vrot.slane %v8524_v24, 5  ;;  %v6167_v14 = vrot.slane %v2046_v9, 9 }
 0x13c   : > { %6950 = vmatmul.mubr.bf16.vlgmr.msra.gmra.mrb[0].mxu1 %v9721_v59  ;;  %v4726_v59 = vrot.slane %v4724_v53, 4  ;;  %v4694_v53 = vrot.slane %v4693_v44, 4  ;;  %v4675_v44 = vsel %vm7871_vm2, %v4670_v4, %v8872_v25  ;;  %v8946_v25 = vsel %vm8221_vm13, %v2178_v1, %v2179_v30  ;;  %v4560_v6 = vld [vmem:[#allocation2 + $0x60] sm:$0xf]  ;;  %v8997_v9 = vld [vmem:[#allocation2 + $0x70] sm:$0xf] }
 0x13d   : > { %6982 = vmatpush3.bf16.msra.mxu1 %v8642_v57  ;;  %6953 = vmatprep.mubr.bf16.mxu1 %v9722_v18  ;;  %v2045_v57 = vld [vmem:[#allocation2 + $0x9c] sm:$0xe]  ;;  %v2171_v18 = vrot.slane %v2169_v61, 4  ;;  %v9723_v61 = vcombine.low %v8701_v31, %v8709_v47  ;;  %v9724_v31 = vcombine.low %v8714_v56, %v8720_v43  ;;  %v4685_v47 = vsel %vm7871_vm2, %v4680_v23, %v8898_v20  ;;  %v7719_v43 = vld [vmem:[#allocation2 + $0xb0] sm:$0x1] }
 0x13e   : > { %6983 = vmatprep.subr.bf16.mxu1 %v7630_v34  ;;  %v6166_v52 = vrot.slane %v2045_v57, 9  ;;  %v4727_v57 = vor.u32 %v4726_v59, %v8904_v15  ;;  %9725 = vst [vmem:[#allocation13_spill] sm:$0xff] %v8946_v25  ;;  %v4699_v24 = vsel %vm7871_vm2, %v4694_v53, %v8874_v60  ;;  %v8951_v56 = vrot.slane %v4730_v58, 5  ;;  %v4563_v58 = vld [vmem:[#allocation2 + $0x6c] sm:$0xf]  ;;  %9728 = vst [vmem:[#allocation14_spill] sm:$0xff] %v8997_v9 }
 0x13f   : > { %v8931_v38 = vsel %vm8221_vm13, %v2171_v18, %v2172_v28  ;;  %v2186_v49 = vrot.slane %v7719_v43, 5  ;;  %v6168_v20 = vrot.slane %v2047_v26, 9  ;;  %v4709_v1 = vsel %vm7871_vm2, %v4704_v12, %v4708_v5  ;;  %v4566_v12 = vld [vmem:[#allocation2 + $0x78] sm:$0xf] }
 0x140   : > { %7162 = vmatmul.mubr.bf16.gmra.mrb[20].mxu0 %v7633_v45  ;;  %v8942_v13 = vsel %vm8221_vm13, %v6166_v52, %v2176_v54  ;;  %v7642_v52 = vld [vmem:[%s9680_s1 + $0xe0] sm:$0xff]   ;;  %v8958_v54 = vrot.slane %v4717_v29, 4  ;;  %v2185_v59 = vrot.slane %v2183_v42, 4  ;;  %v7637_v45 = vld [vmem:[#allocation2 + $0xb4] sm:$0xff]   ;;  %v9726_v60 = vsel %vm7871_vm2, %v8816_v7, %v8814_v0 }
 0x141   : > { %6984 = vmatpush3.bf16.msra.mxu1 %v7630_v34  ;;  %v7638_v34 = vld [vmem:[%s9680_s1 + $0xd8] sm:$0xff]   ;;  %7165 = vmatprep.mubr.bf16.mxu0 %v7635_v32  ;;  %v9727_v26 = vsel %vm7871_vm2, %v8805_v41, %v8770_v62  ;;  %v2192_v18 = vrot.slane %v2190_v55, 4  ;;  %v2193_v5 = vrot.slane %v8526_v36, 5  ;;  %v4735_v28 = vshrl.u32 %v4560_v6, 16  ;;  %v7639_v32 = vld [vmem:[#allocation2 + $0xc0] sm:$0xff]  }
 0x142   : > { %6985 = vmatprep.subr.bf16.mxu1 %v7634_v3  ;;  %v8972_v4 = vcombine.low %v9727_v26, %v9726_v60  ;;  %v8977_v30 = vcombine.low %v4651_v33, %v4661_v48  ;;  %v8979_v53 = vcombine.low %v4675_v44, %v4685_v47  ;;  %v8983_v7 = vld [vmem:[#allocation2 + $0x64] sm:$0xf]  ;;  %v8987_v41 = vcombine.low %v4699_v24, %v4709_v1  ;;  %v9027_v24 = vld [vmem:[#allocation2 + $0x88] sm:$0xf]  ;;  %v7641_v26 = vld [vmem:[#allocation2 + $0xcc] sm:$0xff]  }
 0x143   : > { %v8991_v36 = vsel %vm8221_vm13, %v6167_v14, %v2183_v42  ;;  %v8995_v33 = vsel %vm8221_vm13, %v6168_v20, %v2190_v55  ;;  %v9012_v19 = vsel %vm8221_vm13, %v2185_v59, %v2186_v49  ;;  %v4738_v42 = vshll.u32 %v4560_v6, 16  ;;  %v4569_v48 = vld [vmem:[#allocation2 + $0x84] sm:$0xf]  ;;  %9731 = vst [vmem:[#allocation16_spill] sm:$0xff] %v9027_v24 }
 0x144   : > { %6954 = vmatmul.mubr.bf16.gmra.mrb[4].mxu1 %v9723_v61  ;;  %v9014_v61 = vld [vmem:[#allocation2 + $0x7c] sm:$0xf]  ;;  %v9730_v44 = vcombine.low %v8724_v2, %v8747_v51  ;;  %v9021_v55 = vsel %vm8221_vm13, %v2192_v18, %v2193_v5  ;;  %v4744_v47 = vshll.u32 %v8983_v7, 16  ;;  %v4748_v14 = vshrl.u32 %v8983_v7, 16  ;;  %v9032_v2 = vld [vmem:[#allocation2 + $0x68] sm:$0x1] }
 0x145   : > { %6957 = vmatprep.mubr.bf16.mxu1 %v9724_v31  ;;  %6986 = vmatpush3.bf16.msra.mxu1 %v7634_v3  ;;  %v8960_v3 = vrot.slane %v4727_v57, 4  ;;  %9729 = vst [vmem:[#allocation15_spill] sm:$0xff] %v9014_v61  ;;  %v9023_v31 = vrot.slane %v4735_v28, 4  ;;  %v9732_v6 = vcombine.low %v8731_v16, %v8755_v17  ;;  %v4759_v51 = vshrl.u32 %v4563_v58, 16  ;;  %v7646_v16 = vld [vmem:[%s9680_s1 + $0xf0] sm:$0xff]  }
 0x146   : > { %6987 = vmatprep.subr.bf16.mxu1 %v7638_v34  ;;  %v4762_v43 = vshll.u32 %v4563_v58, 16  ;;  %v4768_v49 = vshll.u32 %v8997_v9, 16  ;;  %v4772_v20 = vshrl.u32 %v8997_v9, 16  ;;  %v4783_v1 = vshrl.u32 %v4566_v12, 16 }
 0x147   : > { %v4786_v59 = vshll.u32 %v4566_v12, 16  ;;  %v4796_v60 = vshrl.u32 %v9014_v61, 16  ;;  %v4740_v17 = vrot.slane %v4738_v42, 5  ;;  %v4807_v18 = vshrl.u32 %v4569_v48, 16 }
 0x148   : > { %7166 = vmatmul.mubr.bf16.gmra.mrb[24].mxu0 %v7637_v45  ;;  %v4792_v45 = vshll.u32 %v9014_v61, 16  ;;  %v4810_v5 = vshll.u32 %v4569_v48, 16  ;;  %v4816_v28 = vshll.u32 %v9027_v24, 16  ;;  %v4754_v58 = vshll.u32 %v9032_v2, 16  ;;  %v9051_v48 = vld [vmem:[#allocation2 + $0x94] sm:$0xf] }
 0x149   : > { %6988 = vmatpush3.bf16.msra.mxu1 %v7638_v34  ;;  %v7644_v34 = vld [vmem:[%s9680_s1 + $0xe8] sm:$0xff]   ;;  %7169 = vmatprep.mubr.bf16.mxu0 %v7639_v32  ;;  %v9042_v32 = vrot.slane %v4744_v47, 5  ;;  %v4820_v12 = vshrl.u32 %v9027_v24, 16  ;;  %v4761_v62 = vrot.slane %v4759_v51, 4  ;;  %v4764_v0 = vrot.slane %v4762_v43, 5  ;;  %9733 = vst [vmem:[#allocation17_spill] sm:$0xff] %v9051_v48 }
 0x14a   : > { %6989 = vmatprep.subr.bf16.mxu1 %v7642_v52  ;;  %v9049_v23 = vrot.slane %v4768_v49, 5  ;;  %v4774_v42 = vrot.slane %v4772_v20, 4  ;;  %v9053_v47 = vld [vmem:[#allocation2 + $0x74] sm:$0x1]  ;;  %v4788_v29 = vrot.slane %v4786_v59, 5  ;;  %v9055_v57 = vrot.slane %v4792_v45, 5 }
 0x14b   : > { %v4798_v24 = vrot.slane %v4796_v60, 4  ;;  %v9057_v61 = vld [vmem:[#allocation2 + $0x80] sm:$0x1]  ;;  %v4809_v9 = vrot.slane %v4807_v18, 4  ;;  %v4812_v25 = vrot.slane %v4810_v5, 5  ;;  %v9059_v51 = vrot.slane %v4816_v28, 5 }
 0x14c   : > { %6958 = vmatmul.mubr.bf16.gmra.mrb[8].mxu1 %v9730_v44  ;;  %v4572_v44 = vld [vmem:[#allocation2 + $0x90] sm:$0xf]  ;;  %v9734_v49 = vcombine.low %v8751_v50, %v8760_v21  ;;  %v4822_v20 = vrot.slane %v4820_v12, 4  ;;  %v4840_v59 = vshll.u32 %v9051_v48, 16  ;;  %v4844_v45 = vshrl.u32 %v9051_v48, 16 }
 0x14d   : > { %6961 = vmatprep.mubr.bf16.mxu1 %v9732_v6  ;;  %6990 = vmatpush3.bf16.msra.mxu1 %v7642_v52  ;;  %v4750_v52 = vrot.slane %v4748_v14, 4  ;;  %v7648_v6 = vld [vmem:[%s9680_s1 + $0xf8] sm:$0xff]   ;;  %v4785_v14 = vrot.slane %v4783_v1, 4  ;;  %v4831_v43 = vshrl.u32 %v4572_v44, 16  ;;  %v4834_v1 = vshll.u32 %v4572_v44, 16 }
 0x14e   : > { %6991 = vmatprep.subr.bf16.mxu1 %v7644_v34  ;;  %v9735_v60 = vcombine.low %v8764_v10, %v8768_v46  ;;  %v4741_v18 = vor.u32 %v4740_v17, %v9023_v31  ;;  %v9074_v21 = vrot.slane %v4754_v58, 5  ;;  %v4765_v5 = vor.u32 %v4764_v0, %v4761_v62  ;;  %v7645_v17 = vld [vmem:[%s9680_s1 + $0x208] sm:$0xff]   ;;  %v9089_v48 = vld [vmem:[#allocation2 + $0xa0] sm:$0xf] }
 0x14f   : > { %v4751_v50 = vor.u32 %v4750_v52, %v9042_v32  ;;  %v4775_v28 = vor.u32 %v4774_v42, %v9049_v23  ;;  %v4789_v12 = vor.u32 %v4788_v29, %v4785_v14  ;;  %v4802_v44 = vshll.u32 %v9057_v61, 16  ;;  %v9087_v42 = vld [vmem:[#allocation2 + $0x98] sm:$0x1] }
 0x150   : > { %7170 = vmatmul.mubr.bf16.gmra.mrb[28].mxu0 %v7641_v26  ;;  %v4778_v26 = vshll.u32 %v9053_v47, 16  ;;  %v4799_v10 = vor.u32 %v4798_v24, %v9055_v57  ;;  %v4813_v46 = vor.u32 %v4812_v25, %v4809_v9  ;;  %v4833_v31 = vrot.slane %v4831_v43, 4 }
 0x151   : > { %6992 = vmatpush3.bf16.msra.mxu1 %v7644_v34  ;;  %v9064_v34 = vld [vmem:[#allocation2 + $0x8c] sm:$0x1]  ;;  %7189 = vmatprep.mubr.bf16.mxu0 %v8825_v27  ;;  %v4836_v0 = vrot.slane %v4834_v1, 5  ;;  %v9085_v62 = vrot.slane %v4840_v59, 5  ;;  %v4846_v29 = vrot.slane %v4844_v45, 4  ;;  %v4742_v52 = vrot.slane %v4741_v18, 4 }
 0x152   : > { %6993 = vmatprep.subr.bf16.mxu1 %v7646_v16  ;;  %v4826_v27 = vshll.u32 %v9064_v34, 16  ;;  %v4780_v58 = vrot.slane %v4778_v26, 5  ;;  %v4752_v25 = vrot.slane %v4751_v50, 4  ;;  %v4766_v9 = vrot.slane %v4765_v5, 4 }
 0x153   : > { %v4776_v43 = vrot.slane %v4775_v28, 4  ;;  %v4790_v1 = vrot.slane %v4789_v12, 4  ;;  %v4800_v59 = vrot.slane %v4799_v10, 4  ;;  %v4814_v45 = vrot.slane %v4813_v46, 4  ;;  %v9107_v10 = vld [vmem:[#allocation2 + $0xa4] sm:$0x1] }
 0x154   : > { %6962 = vmatmul.mubr.bf16.gmra.mrb[12].mxu1 %v9734_v49  ;;  %v4575_v49 = vld [vmem:[#allocation2 + $0x9c] sm:$0xf]  ;;  %v4828_v18 = vrot.slane %v4826_v27, 5  ;;  %v9737_v50 = vcombine.low %v8798_v22, %v8802_v40  ;;  %v4837_v26 = vor.u32 %v4836_v0, %v4833_v31  ;;  %v4847_v5 = vor.u32 %v4846_v29, %v9085_v62  ;;  %v7647_v29 = vld [vmem:[%s9680_s1 + $0x210] sm:$0xff]  }
 0x155   : > { %6965 = vmatprep.mubr.bf16.mxu1 %v9735_v60  ;;  %6994 = vmatpush3.bf16.msra.mxu1 %v7646_v16  ;;  %v4823_v16 = vor.u32 %v4822_v20, %v9059_v51  ;;  %v4855_v14 = vshrl.u32 %v4575_v49, 16  ;;  %v4858_v24 = vshll.u32 %v4575_v49, 16  ;;  %v4804_v60 = vrot.slane %v4802_v44, 5  ;;  %v9094_v20 = vld [vmem:[%s9680_s1 + $0x100] sm:$0xff]   ;;  %v9738_v44 = vld [vmem:[#allocation10_spill] sm:$0xff]  ;;  %v9739_v49 = vld [vmem:[#allocation7_spill] sm:$0xff] }
 0x156   : > { %6995 = vmatprep.subr.bf16.mxu1 %v7648_v6  ;;  %9736 = vst [vmem:[#allocation18_spill] sm:$0xff] %v9094_v20  ;;  %v4850_v28 = vshll.u32 %v9087_v42, 16  ;;  %v4864_v22 = vshll.u32 %v9089_v48, 16  ;;  %v4868_v40 = vshrl.u32 %v9089_v48, 16  ;;  %v9743_v31 = vld [vmem:[#allocation4_spill] sm:$0xff] }
 0x157   : > { %v4857_v46 = vrot.slane %v4855_v14, 4  ;;  %v4860_v27 = vrot.slane %v4858_v24, 5  ;;  %v4747_v14 = vsel %vm7871_vm2, %v4742_v52, %v9042_v32  ;;  %v4757_v24 = vsel %vm7871_vm2, %v4752_v25, %v9074_v21  ;;  %v4578_v52 = vld [vmem:[#allocation2 + $0xa8] sm:$0xf] }
 0x158   : > { %7190 = vmatmul.mubr.bf16.vlgmr.msra.gmra.mrb[0].mxu0 %v8972_v4  ;;  %v9742_v4 = vld [vmem:[#allocation5_spill] sm:$0xff]  ;;  %v4819_v32 = vsel %vm7871_vm2, %v4814_v45, %v9059_v51  ;;  %v4838_v21 = vrot.slane %v4837_v26, 4  ;;  %v4848_v25 = vrot.slane %v4847_v5, 4  ;;  %v9745_v51 = vsel %vm7871_vm2, %v8960_v3, %v8951_v56  ;;  %v9160_v45 = vld [vmem:[#allocation2 + $0xac] sm:$0xf]  ;;  %v7649_v56 = vld [vmem:[%s9680_s1 + $0x218] sm:$0xff]  }
 0x159   : > { %6996 = vmatpush3.bf16.msra.mxu1 %v7648_v6  ;;  %v4824_v6 = vrot.slane %v4823_v16, 4  ;;  %7222 = vmatpush3.bf16.msra.mxu0 %v9738_v44  ;;  %v9744_v16 = vor.u32 %v9742_v4, %v9743_v31  ;;  %v4805_v44 = vsel %vm7871_vm2, %v4800_v59, %v4804_v60  ;;  %v9746_v60 = vsel %vm7871_vm2, %v8958_v54, %v8904_v15  ;;  %v5300_v54 = vld [vmem:[#allocation2 + $0x48] sm:$0xe] }
 0x15a   : > { %7269 = vmatprep.subr.bf16.mxu1 %v9094_v20  ;;  %v9740_v20 = vld [vmem:[#allocation8_spill] sm:$0xff]  ;;  %7193 = vmatprep.mubr.bf16.mxu0 %v8977_v30  ;;  %v4781_v30 = vsel %vm7871_vm2, %v4776_v43, %v4780_v58  ;;  %v9142_v43 = vrot.slane %v4864_v22, 5  ;;  %v6200_v59 = vcombine.low %v8995_v33, %v9021_v55  ;;  %v4882_v15 = vshll.u32 %v4578_v52, 16  ;;  %v9182_v22 = vld [vmem:[#allocation2 + $0xb0] sm:$0x1] }
 0x15b   : > { %v9741_v12 = vcombine.low %v9739_v49, %v9740_v20  ;;  %v9114_v0 = vrot.slane %v9744_v16, 4  ;;  %7223 = vmatprep.subr.bf16.mxu0 %v7645_v17  ;;  %v4771_v20 = vsel %vm7871_vm2, %v4766_v9, %v9049_v23  ;;  %v4852_v49 = vrot.slane %v4850_v28, 5 }
 0x15c   : > { %6966 = vmatmul.mubr.bf16.gmra.mrb[16].mxu1 %v9737_v50  ;;  %v4795_v50 = vsel %vm7871_vm2, %v4790_v1, %v9055_v57  ;;  %v4874_v23 = vshll.u32 %v9107_v10, 16  ;;  %v4829_v58 = vsel %vm7871_vm2, %v4824_v6, %v4828_v18  ;;  %v4861_v9 = vor.u32 %v4860_v27, %v4857_v46 }
 0x15d   : > { %6969 = vmatprep.mubr.bf16.mxu1 %v9741_v12  ;;  %7224 = vmatpush3.bf16.msra.mxu0 %v7645_v17  ;;  %v9144_v57 = vrot.slane %v4868_v40, 4  ;;  %v6406_v17 = vcombine.low %v9746_v60, %v9745_v51  ;;  %v6199_v1 = vcombine.low %v8991_v36, %v9012_v19  ;;  %v4879_v18 = vshrl.u32 %v4578_v52, 16  ;;  %v5301_v40 = vld [vmem:[#allocation2 + $0x54] sm:$0xe] }
 0x15e   : > { %7225 = vmatprep.subr.bf16.mxu0 %v7647_v29  ;;  %v6407_v6 = vcombine.low %v4747_v14, %v4757_v24  ;;  %v9165_v3 = vcombine.low %v4771_v20, %v4781_v30  ;;  %v9167_v26 = vcombine.low %v4795_v50, %v4805_v44  ;;  %v9747_v5 = vcombine.low %v8860_v11, %v8864_v39  ;;  %v9749_v24 = vld [vmem:[#allocation9_spill] sm:$0xff]  ;;  %v9750_v30 = vld [vmem:[#allocation12_spill] sm:$0xff] }
 0x15f   : > { %v9173_v28 = vcombine.low %v4819_v32, %v4829_v58  ;;  %v4843_v12 = vsel %vm7871_vm2, %v4838_v21, %v9085_v62  ;;  %v4853_v46 = vsel %vm7871_vm2, %v4848_v25, %v4852_v49  ;;  %v9180_v27 = vrot.slane %v4874_v23, 5  ;;  %v9751_v25 = vld [vmem:[#allocation11_spill] sm:$0xff]  ;;  %v5303_v58 = vld [vmem:[#allocation2 + $0x6c] sm:$0xe] }
 0x160   : > { %7194 = vmatmul.mubr.bf16.gmra.mrb[4].mxu0 %v8979_v53  ;;  %v9748_v11 = vcombine.low %v8912_v37, %v8931_v38  ;;  %v9188_v39 = vrot.slane %v4861_v9, 4  ;;  %v4871_v53 = vor.u32 %v9144_v57, %v9142_v43  ;;  %v4888_v62 = vshll.u32 %v9160_v45, 16  ;;  %v5302_v38 = vld [vmem:[#allocation2 + $0x60] sm:$0xe] }
 0x161   : > { %7197 = vmatprep.mubr.bf16.mxu0 %v8987_v41  ;;  %v4892_v4 = vshrl.u32 %v9160_v45, 16  ;;  %7226 = vmatpush3.bf16.msra.mxu0 %v7647_v29  ;;  %v9194_v16 = vrot.slane %v4879_v18, 4  ;;  %v6429_v14 = vrot.slane %v5300_v54, 9  ;;  %v5390_v20 = vrot.slane %v9749_v24, 5  ;;  %v7652_v41 = vld [vmem:[%s9680_s1 + $0x220] sm:$0xff]   ;;  %v9754_v24 = vld [vmem:[#allocation14_spill] sm:$0xff] }
 0x162   : > { %v5393_v37 = vrot.slane %v9750_v30, 5  ;;  %7227 = vmatprep.subr.bf16.mxu0 %v7649_v56  ;;  %v9201_v50 = vcombine.low %v4843_v12, %v4853_v46  ;;  %v4884_v44 = vrot.slane %v4882_v15, 5  ;;  %v4898_v32 = vshll.u32 %v9182_v22, 16  ;;  %v9214_v15 = vld [vmem:[#allocation2 + $0xb4] sm:$0xf] }
 0x163   : > { %v6430_v52 = vrot.slane %v5301_v40, 9  ;;  %v9206_v29 = vsel %vm8221_vm13, %v6429_v14, %v5390_v20  ;;  %v5392_v21 = vrot.slane %v5390_v20, 4  ;;  %v5397_v49 = vrot.slane %v9751_v25, 5  ;;  %v9752_v40 = vld [vmem:[#allocation13_spill] sm:$0xff] }
 0x164   : > { %6970 = vmatmul.mubr.bf16.gmra.mrb[20].mxu1 %v9747_v5  ;;  %v5400_v23 = vrot.slane %v8902_v63, 5  ;;  %v9210_v9 = vrot.slane %v4888_v62, 5  ;;  %v6431_v57 = vrot.slane %v5302_v38, 9  ;;  %v5404_v51 = vrot.slane %v8983_v7, 5  ;;  %v7655_v7 = vld [vmem:[%s9680_s1 + $0x228] sm:$0xff]  }
 0x165   : > { %6973 = vmatprep.mubr.bf16.mxu1 %v9748_v11  ;;  %v5407_v60 = vrot.slane %v9032_v2, 5  ;;  %7228 = vmatpush3.bf16.msra.mxu0 %v7649_v56  ;;  %v4894_v18 = vrot.slane %v4892_v4, 4  ;;  %v9218_v54 = vsel %vm8221_vm13, %v5392_v21, %v5393_v37  ;;  %v9222_v5 = vsel %vm8221_vm13, %v6430_v52, %v5397_v49  ;;  %v9240_v4 = vld [vmem:[#allocation2 + $0xb8] sm:$0xf]  ;;  %v4584_v25 = vld [vmem:[#allocation2 + $0xc0] sm:$0xf] }
 0x166   : > { %v5399_v63 = vrot.slane %v5397_v49, 4  ;;  %7229 = vmatprep.subr.bf16.mxu0 %v7652_v41  ;;  %v6461_v2 = vcombine.low %v9206_v29, %v9218_v54  ;;  %v9231_v56 = vsel %vm8221_vm13, %v6431_v57, %v5404_v51  ;;  %v5406_v12 = vrot.slane %v5404_v51, 4  ;;  %v2930_v52 = vld [vmem:[#allocation2 + $0x78] sm:$0xf]  ;;  %v9755_v57 = vld [vmem:[#allocation6_spill] sm:$0xff] }
 0x167   : > { %v6432_v46 = vrot.slane %v5303_v58, 9  ;;  %v9753_v11 = vcombine.low %v8942_v13, %v9752_v40  ;;  %v4867_v62 = vsel %vm7871_vm2, %v9188_v39, %v9142_v43  ;;  %v5411_v20 = vrot.slane %v9754_v24, 5  ;;  %v5305_v51 = vld [vmem:[#allocation2 + $0x84] sm:$0xe] }
 0x168   : > { %7198 = vmatmul.mubr.bf16.gmra.mrb[8].mxu0 %v6406_v17  ;;  %v9244_v14 = vsel %vm8221_vm13, %v5399_v63, %v5400_v23  ;;  %v5414_v30 = vrot.slane %v9053_v47, 5  ;;  %v4885_v13 = vor.u32 %v4884_v44, %v9194_v16  ;;  %v4903_v17 = vshrl.u32 %v9214_v15, 16  ;;  %v7658_v16 = vld [vmem:[%s9680_s1 + $0x230] sm:$0xff]   ;;  %v5304_v44 = vld [vmem:[#allocation2 + $0x78] sm:$0xe] }
 0x169   : > { %7201 = vmatprep.mubr.bf16.mxu0 %v6407_v6  ;;  %v6462_v37 = vcombine.low %v9222_v5, %v9244_v14  ;;  %v9257_v38 = vsel %vm8221_vm13, %v5406_v12, %v5407_v60  ;;  %7230 = vmatpush3.bf16.msra.mxu0 %v7652_v41  ;;  %v9259_v21 = vrot.slane %v4871_v53, 4  ;;  %v9265_v19 = vsel %vm8221_vm13, %v6432_v46, %v5411_v20  ;;  %v7650_v60 = vld [vmem:[#allocation2 + $0xc] sm:$0xff]   ;;  %v9290_v46 = vld [vmem:[#allocation2 + $0xc4] sm:$0xf] }
 0x16a   : > { %v6463_v36 = vcombine.low %v9231_v56, %v9257_v38  ;;  %v5413_v47 = vrot.slane %v5411_v20, 4  ;;  %7231 = vmatprep.subr.bf16.mxu0 %v7655_v7  ;;  %v9268_v6 = vrot.slane %v4898_v32, 5  ;;  %v4906_v53 = vshll.u32 %v9214_v15, 16  ;;  %v9756_v20 = vld [vmem:[#allocation15_spill] sm:$0xff] }
 0x16b   : > { %v4912_v41 = vshll.u32 %v9240_v4, 16  ;;  %v3168_v23 = vshrl.u32 %v2930_v52, 16  ;;  %v3171_v58 = vshll.u32 %v2930_v52, 16  ;;  %v3190_v32 = vsel %vm7871_vm2, %v9114_v0, %v9755_v57  ;;  %v9307_v57 = vld [vmem:[#allocation2 + $0xbc] sm:$0x1] }
 0x16c   : > { %6974 = vmatmul.mubr.bf16.gmra.mrb[24].mxu1 %v9753_v11  ;;  %v9277_v49 = vsel %vm8221_vm13, %v5413_v47, %v5414_v30  ;;  %v9285_v15 = vrot.slane %v4903_v17, 4  ;;  %v4916_v63 = vshrl.u32 %v9240_v4, 16  ;;  %v6433_v24 = vrot.slane %v5304_v44, 9 }
 0x16d   : > { %6977 = vmatprep.mubr.bf16.mxu1 %v6199_v1  ;;  %v4895_v1 = vor.u32 %v4894_v18, %v9210_v9  ;;  %v9283_v18 = vrot.slane %v4885_v13, 4  ;;  %v6464_v12 = vcombine.low %v9265_v19, %v9277_v49  ;;  %7232 = vmatpush3.bf16.msra.mxu0 %v7655_v7  ;;  %v3170_v40 = vrot.slane %v3168_v23, 4  ;;  %v7661_v13 = vld [vmem:[%s9680_s1 + $0x238] sm:$0xff]  }
 0x16e   : > { %v3173_v11 = vrot.slane %v3171_v58, 5  ;;  %v5418_v30 = vrot.slane %v9756_v20, 5  ;;  %7233 = vmatprep.subr.bf16.mxu0 %v7658_v16  ;;  %v4927_v52 = vshrl.u32 %v4584_v25, 16  ;;  %v5421_v17 = vrot.slane %v9057_v61, 5  ;;  %v9757_v23 = vld [vmem:[#allocation16_spill] sm:$0xff] }
 0x16f   : > { %v4896_v0 = vrot.slane %v4895_v1, 4  ;;  %v6434_v47 = vrot.slane %v5305_v51, 9  ;;  %v5425_v58 = vrot.slane %v9757_v23, 5  ;;  %v4930_v61 = vshll.u32 %v4584_v25, 16 }
 0x170   : > { %7202 = vmatmul.mubr.bf16.gmra.mrb[12].mxu0 %v9165_v3  ;;  %v3174_v7 = vor.u32 %v3173_v11, %v3170_v40  ;;  %v9303_v44 = vsel %vm8221_vm13, %v6433_v24, %v5418_v30  ;;  %v5420_v1 = vrot.slane %v5418_v30, 4  ;;  %v4936_v51 = vshll.u32 %v9290_v46, 16  ;;  %v4587_v30 = vld [vmem:[#allocation2 + $0xcc] sm:$0xf] }
 0x171   : > { %7205 = vmatprep.mubr.bf16.mxu0 %v9167_v26  ;;  %v4940_v33 = vshrl.u32 %v9290_v46, 16  ;;  %v5428_v55 = vrot.slane %v9064_v34, 5  ;;  %7234 = vmatpush3.bf16.msra.mxu0 %v7658_v16  ;;  %v5427_v26 = vrot.slane %v5425_v58, 4  ;;  %v4908_v40 = vrot.slane %v4906_v53, 5  ;;  %v7651_v34 = vld [vmem:[#allocation2 + $0x18] sm:$0xff]  }
 0x172   : > { %v9314_v3 = vsel %vm8221_vm13, %v5420_v1, %v5421_v17  ;;  %v9320_v11 = vrot.slane %v4912_v41, 5  ;;  %v4918_v25 = vrot.slane %v4916_v63, 4  ;;  %7235 = vmatprep.subr.bf16.mxu0 %v7661_v13  ;;  %v4877_v16 = vsel %vm7871_vm2, %v9259_v21, %v9180_v27  ;;  %v7653_v63 = vld [vmem:[#allocation2 + $0x24] sm:$0xff]  }
 0x173   : > { %v6465_v24 = vcombine.low %v9303_v44, %v9314_v3  ;;  %v4922_v20 = vshll.u32 %v9307_v57, 16  ;;  %v9334_v41 = vsel %vm8221_vm13, %v5427_v26, %v5428_v55  ;;  %v4929_v17 = vrot.slane %v4927_v52, 4  ;;  %v5307_v26 = vld [vmem:[#allocation2 + $0x9c] sm:$0xe] }
 0x174   : > { %6978 = vmatmul.mubr.bf16.gmra.mrb[28].mxu1 %v6200_v59  ;;  %v3175_v59 = vrot.slane %v3174_v7, 4  ;;  %v4891_v27 = vsel %vm7871_vm2, %v9283_v18, %v9210_v9  ;;  %v9347_v21 = vrot.slane %v4936_v51, 5  ;;  %v4942_v23 = vrot.slane %v4940_v33, 4 }
 0x175   : > { %6997 = vmatprep.mubr.bf16.mxu1 %v7650_v60  ;;  %v9318_v60 = vsel %vm8221_vm13, %v6434_v47, %v5425_v58  ;;  %v4932_v47 = vrot.slane %v4930_v61, 5  ;;  %v9349_v58 = vld [vmem:[#allocation2 + $0xd0] sm:$0xf]  ;;  %7236 = vmatpush3.bf16.msra.mxu0 %v7661_v13  ;;  %v4919_v52 = vor.u32 %v4918_v25, %v9320_v11  ;;  %v9353_v61 = vld [vmem:[#allocation2 + $0xc8] sm:$0x1]  ;;  %v4951_v55 = vshrl.u32 %v4587_v30, 16 }
 0x176   : > { %v3180_v53 = vsel %vm7871_vm2, %v3175_v59, %v9743_v31  ;;  %v6466_v1 = vcombine.low %v9318_v60, %v9334_v41  ;;  %v4901_v31 = vsel %vm7871_vm2, %v4896_v0, %v9268_v6  ;;  %v5306_v59 = vld [vmem:[#allocation2 + $0x90] sm:$0xe]  ;;  %v6412_v9 = vcombine.low %v4867_v62, %v4877_v16  ;;  %v9758_v0 = vld [vmem:[#allocation18_spill] sm:$0xff] }
 0x177   : > { %v9336_v7 = vcombine.low %v3180_v53, %v3190_v32  ;;  %v4909_v32 = vor.u32 %v4908_v40, %v9285_v15  ;;  %v9361_v6 = vrot.slane %v4922_v20, 5  ;;  %v4954_v18 = vshll.u32 %v4587_v30, 16  ;;  %v9759_v40 = vld [vmem:[#allocation17_spill] sm:$0xff]  ;;  %v7654_v53 = vld [vmem:[#allocation2 + $0x30] sm:$0xff]  }
 0x178   : > { %7206 = vmatmul.mubr.bf16.gmra.mrb[16].mxu0 %v9173_v28  ;;  %v6413_v15 = vcombine.low %v4891_v27, %v4901_v31  ;;  %v4933_v13 = vor.u32 %v4932_v47, %v4929_v17  ;;  %v4960_v51 = vshll.u32 %v9349_v58, 16  ;;  %v4964_v33 = vshrl.u32 %v9349_v58, 16  ;;  %v7721_v28 = vld [vmem:[%s9680_s1 + $0x108] sm:$0xff]   ;;  %v9378_v31 = vld [vmem:[#allocation2 + $0xd4] sm:$0x1] }
 0x179   : > { %7209 = vmatprep.mubr.bf16.mxu0 %v9201_v50  ;;  %v4943_v43 = vor.u32 %v4942_v23, %v9347_v21  ;;  %v4946_v39 = vshll.u32 %v9353_v61, 16  ;;  %v6435_v62 = vrot.slane %v5306_v59, 9  ;;  %v5432_v25 = vrot.slane %v9759_v40, 5  ;;  %v7723_v40 = vld [vmem:[#allocation2 + $0x1c] sm:$0xf] }
 0x17a   : > { %v4920_v16 = vrot.slane %v4919_v52, 4  ;;  %v4953_v20 = vrot.slane %v4951_v55, 4  ;;  %v5435_v30 = vrot.slane %v9087_v42, 5  ;;  %v4956_v17 = vrot.slane %v4954_v18, 5  ;;  %v7722_v42 = vld [vmem:[%s9680_s1 + $0x110] sm:$0xff]  }
 0x17b   : > { %v9376_v47 = vsel %vm8221_vm13, %v6435_v62, %v5432_v25  ;;  %v5434_v50 = vrot.slane %v5432_v25, 4  ;;  %v6436_v27 = vrot.slane %v5307_v26, 9  ;;  %v9380_v23 = vrot.slane %v4960_v51, 5 }
 0x17c   : > { %6998 = vmatmul.mubr.bf16.vlgmr.msra.gmra.mrb[0].mxu1 %v7651_v34  ;;  %v4910_v34 = vrot.slane %v4909_v32, 4  ;;  %v4966_v59 = vrot.slane %v4964_v33, 4  ;;  %v5439_v32 = vrot.slane %v9089_v48, 5  ;;  %v5442_v52 = vrot.slane %v9107_v10, 5 }
 0x17d   : > { %7277 = vmatpush3.bf16.msra.mxu1 %v9758_v0  ;;  %7001 = vmatprep.mubr.bf16.mxu1 %v7653_v63  ;;  %v7656_v63 = vld [vmem:[#allocation2 + $0x3c] sm:$0xff]   ;;  %v4934_v55 = vrot.slane %v4933_v13, 4  ;;  %v4944_v18 = vrot.slane %v4943_v43, 4  ;;  %v4948_v0 = vrot.slane %v4946_v39, 5  ;;  %v9389_v26 = vsel %vm8221_vm13, %v5434_v50, %v5435_v30 }
 0x17e   : > { %7270 = vmatprep.subr.bf16.mxu1 %v7721_v28  ;;  %v6467_v51 = vcombine.low %v9376_v47, %v9389_v26  ;;  %v9395_v48 = vsel %vm8221_vm13, %v6436_v27, %v5439_v32  ;;  %v5441_v10 = vrot.slane %v5439_v32, 4  ;;  %v4915_v13 = vsel %vm7871_vm2, %v4910_v34, %v9320_v11  ;;  %v7724_v34 = vld [vmem:[%s9680_s1 + $0x118] sm:$0xff]   ;;  %v5309_v32 = vld [vmem:[#allocation2 + $0xb4] sm:$0xe] }
 0x17f   : > { %v4957_v33 = vor.u32 %v4956_v17, %v4953_v20  ;;  %v4925_v43 = vsel %vm7871_vm2, %v4920_v16, %v9361_v6  ;;  %v4967_v39 = vor.u32 %v4966_v59, %v9380_v23  ;;  %v4939_v11 = vsel %vm7871_vm2, %v4934_v55, %v9347_v21  ;;  %v5308_v6 = vld [vmem:[#allocation2 + $0xa8] sm:$0xe]  ;;  %v5296_v16 = vld [vmem:[#allocation2 + $0x18] sm:$0xe]  ;;  %v7725_v55 = vld [vmem:[#allocation2 + $0x20] sm:$0x1] }
 0x180   : > { %7210 = vmatmul.mubr.bf16.gmra.mrb[20].mxu0 %v6412_v9  ;;  %v9407_v62 = vsel %vm8221_vm13, %v5441_v10, %v5442_v52  ;;  %v4949_v9 = vsel %vm7871_vm2, %v4944_v18, %v4948_v0  ;;  %v7657_v20 = vld [vmem:[#allocation2 + $0x48] sm:$0xff]   ;;  %v6414_v30 = vcombine.low %v4915_v13, %v4925_v43  ;;  %v7659_v21 = vld [vmem:[#allocation2 + $0x54] sm:$0xff]   ;;  %v6437_v27 = vrot.slane %v5308_v6, 9  ;;  %v7726_v0 = vld [vmem:[%s9680_s1 + $0x120] sm:$0xff]  }
 0x181   : > { %7278 = vmatpush3.bf16.msra.mxu1 %v7721_v28  ;;  %v4970_v28 = vshll.u32 %v9378_v31, 16  ;;  %7213 = vmatprep.mubr.bf16.mxu0 %v6413_v15  ;;  %v5362_v15 = vrot.slane %v7723_v40, 5  ;;  %v6468_v25 = vcombine.low %v9395_v48, %v9407_v62  ;;  %v6415_v17 = vcombine.low %v4939_v11, %v4949_v9  ;;  %v5297_v9 = vld [vmem:[#allocation2 + $0x24] sm:$0xe] }
 0x182   : > { %7271 = vmatprep.subr.bf16.mxu1 %v7722_v42  ;;  %v4968_v50 = vrot.slane %v4967_v39, 4  ;;  %v5446_v59 = vrot.slane %v9160_v45, 5  ;;  %v6425_v52 = vrot.slane %v5296_v16, 9  ;;  %v5365_v18 = vrot.slane %v7725_v55, 5  ;;  %v7728_v16 = vld [vmem:[#allocation2 + $0x34] sm:$0xf] }
 0x183   : > { %v6438_v39 = vrot.slane %v5309_v32, 9  ;;  %v5456_v6 = vrot.slane %v9307_v57, 5  ;;  %v7730_v32 = vld [vmem:[#allocation2 + $0x2c] sm:$0x1]  ;;  %v5310_v55 = vld [vmem:[#allocation2 + $0xc0] sm:$0xe] }
 0x184   : > { %7002 = vmatmul.mubr.bf16.gmra.mrb[4].mxu1 %v7654_v53  ;;  %v4958_v53 = vrot.slane %v4957_v33, 4  ;;  %v9425_v10 = vsel %vm8221_vm13, %v6437_v27, %v5446_v59  ;;  %v5448_v13 = vrot.slane %v5446_v59, 4  ;;  %v5449_v33 = vrot.slane %v9182_v22, 5 }
 0x185   : > { %7005 = vmatprep.mubr.bf16.mxu1 %v7656_v63  ;;  %7279 = vmatpush3.bf16.msra.mxu1 %v7722_v42  ;;  %v4972_v63 = vrot.slane %v4970_v28, 5  ;;  %v5364_v42 = vrot.slane %v5362_v15, 4  ;;  %v7727_v28 = vld [vmem:[#allocation2 + $0x28] sm:$0xf]  ;;  %v5453_v22 = vrot.slane %v9240_v4, 5 }
 0x186   : > { %7272 = vmatprep.subr.bf16.mxu1 %v7724_v34  ;;  %v4963_v45 = vsel %vm7871_vm2, %v4958_v53, %v9380_v23  ;;  %v5369_v43 = vrot.slane %v7727_v28, 5  ;;  %v9435_v40 = vsel %vm8221_vm13, %v5448_v13, %v5449_v33  ;;  %v5363_v23 = vsel %vm8221_vm13, %v6425_v52, %v5362_v15  ;;  %v7729_v53 = vld [vmem:[%s9680_s1 + $0x128] sm:$0xff]   ;;  %v5298_v4 = vld [vmem:[#allocation2 + $0x30] sm:$0xe]  ;;  %v7731_v13 = vld [vmem:[#allocation2 + $0x38] sm:$0x1] }
 0x187   : > { %v4973_v11 = vsel %vm7871_vm2, %v4968_v50, %v4972_v63  ;;  %v9450_v57 = vsel %vm8221_vm13, %v6438_v39, %v5453_v22  ;;  %v5455_v15 = vrot.slane %v5453_v22, 4  ;;  %v7660_v63 = vld [vmem:[#allocation2 + $0x60] sm:$0xff]   ;;  %v7662_v50 = vld [vmem:[#allocation2 + $0x6c] sm:$0xff]   ;;  %v5372_v52 = vrot.slane %v7730_v32, 5  ;;  %v5299_v39 = vld [vmem:[#allocation2 + $0x3c] sm:$0xe] }
 0x188   : > { %7214 = vmatmul.mubr.bf16.gmra.mrb[24].mxu0 %v6414_v30  ;;  %v6469_v30 = vcombine.low %v9425_v10, %v9435_v40  ;;  %v5371_v59 = vrot.slane %v5369_v43, 4  ;;  %v5379_v33 = vrot.slane %v7731_v13, 5  ;;  %v5470_v13 = vrot.slane %v9378_v31, 5 }
 0x189   : > { %7280 = vmatpush3.bf16.msra.mxu1 %v7724_v34  ;;  %7217 = vmatprep.mubr.bf16.mxu0 %v6415_v17  ;;  %v5366_v34 = vsel %vm8221_vm13, %v5364_v42, %v5365_v18  ;;  %v6426_v17 = vrot.slane %v5297_v9, 9  ;;  %v9454_v42 = vsel %vm8221_vm13, %v5455_v15, %v5456_v6  ;;  %v6427_v18 = vrot.slane %v5298_v4, 9  ;;  %v5311_v9 = vld [vmem:[#allocation2 + $0xcc] sm:$0xe] }
 0x18a   : > { %7273 = vmatprep.subr.bf16.mxu1 %v7726_v0  ;;  %v6457_v27 = vcombine.low %v5363_v23, %v5366_v34  ;;  %v6470_v28 = vcombine.low %v9450_v57, %v9454_v42  ;;  %v5373_v6 = vsel %vm8221_vm13, %v5371_v59, %v5372_v52  ;;  %v7733_v23 = vld [vmem:[#allocation2 + $0x40] sm:$0xf]  ;;  %v5460_v4 = vrot.slane %v9290_v46, 5  ;;  %v7735_v59 = vld [vmem:[#allocation2 + $0x44] sm:$0x1] }
 0x18b   : > { %v5370_v22 = vsel %vm8221_vm13, %v6426_v17, %v5369_v43  ;;  %v5383_v34 = vrot.slane %v7733_v23, 5  ;;  %v6428_v15 = vrot.slane %v5299_v39, 9  ;;  %v2927_v43 = vld [vmem:[#allocation2 + $0x6c] sm:$0xf]  ;;  %v6440_v17 = vrot.slane %v5311_v9, 9  ;;  %v7664_v46 = vld [vmem:[#allocation2 + $0x84] sm:$0xff]  }
 0x18c   : > { %7006 = vmatmul.mubr.bf16.gmra.mrb[8].mxu1 %v7657_v20  ;;  %v5376_v20 = vrot.slane %v7728_v16, 5  ;;  %v5462_v52 = vrot.slane %v5460_v4, 4 }
 0x18d   : > { %7009 = vmatprep.mubr.bf16.mxu1 %v7659_v21  ;;  %7281 = vmatpush3.bf16.msra.mxu1 %v7726_v0  ;;  %v6416_v21 = vcombine.low %v4963_v45, %v4973_v11  ;;  %v7732_v45 = vld [vmem:[%s9680_s1 + $0x130] sm:$0xff]   ;;  %v6439_v11 = vrot.slane %v5310_v55, 9  ;;  %v5384_v31 = vsel %vm8221_vm13, %v6428_v15, %v5383_v34 }
 0x18e   : > { %7274 = vmatprep.subr.bf16.mxu1 %v7729_v53  ;;  %v5378_v0 = vrot.slane %v5376_v20, 4  ;;  %v5377_v16 = vsel %vm8221_vm13, %v6427_v18, %v5376_v20  ;;  %v5386_v20 = vrot.slane %v7735_v59, 5  ;;  %v5385_v18 = vrot.slane %v5383_v34, 4  ;;  %v2933_v59 = vld [vmem:[#allocation2 + $0x84] sm:$0xf] }
 0x18f   : > { %v9476_v32 = vsel %vm8221_vm13, %v6439_v11, %v5460_v4  ;;  %v7737_v15 = vld [vmem:[#allocation2 + $0x74] sm:$0x1]  ;;  %v3192_v8 = vshrl.u32 %v2933_v59, 16 }
 0x190   : > { %7218 = vmatmul.mubr.bf16.gmra.mrb[28].mxu0 %v6416_v21  ;;  %v5463_v21 = vrot.slane %v9353_v61, 5  ;;  %v3147_v61 = vshll.u32 %v2927_v43, 16  ;;  %v5387_v23 = vsel %vm8221_vm13, %v5385_v18, %v5386_v20  ;;  %v3195_v20 = vshll.u32 %v2933_v59, 16 }
 0x191   : > { %7282 = vmatpush3.bf16.msra.mxu1 %v7729_v53  ;;  %7237 = vmatprep.mubr.bf16.mxu0 %v6457_v27  ;;  %v5380_v53 = vsel %vm8221_vm13, %v5378_v0, %v5379_v33  ;;  %v6458_v27 = vcombine.low %v5370_v22, %v5373_v6  ;;  %v5467_v0 = vrot.slane %v9349_v58, 5  ;;  %v3144_v33 = vshrl.u32 %v2927_v43, 16 }
 0x192   : > { %7275 = vmatprep.subr.bf16.mxu1 %v7732_v45  ;;  %v6459_v55 = vcombine.low %v5377_v16, %v5380_v53  ;;  %v9482_v9 = vsel %vm8221_vm13, %v5462_v52, %v5463_v21  ;;  %v3149_v4 = vrot.slane %v3147_v61, 5 }
 0x193   : > { %v6471_v11 = vcombine.low %v9476_v32, %v9482_v9  ;;  %v9488_v6 = vsel %vm8221_vm13, %v6440_v17, %v5467_v0  ;;  %v5469_v58 = vrot.slane %v5467_v0, 4  ;;  %v3146_v53 = vrot.slane %v3144_v33, 4  ;;  %v7665_v17 = vld [vmem:[#allocation2 + $0x90] sm:$0xff]  }
 0x194   : > { %7010 = vmatmul.mubr.bf16.gmra.mrb[12].mxu1 %v7660_v63  ;;  %v7734_v63 = vld [vmem:[%s9680_s1 + $0x138] sm:$0xff]   ;;  %v2936_v33 = vld [vmem:[#allocation2 + $0x90] sm:$0xf] }
 0x195   : > { %7013 = vmatprep.mubr.bf16.mxu1 %v7662_v50  ;;  %7283 = vmatpush3.bf16.msra.mxu1 %v7732_v45  ;;  %v7663_v50 = vld [vmem:[#allocation2 + $0x78] sm:$0xff]   ;;  %v7736_v45 = vld [vmem:[#allocation2 + $0x70] sm:$0xf]  ;;  %v9496_v16 = vsel %vm8221_vm13, %v5469_v58, %v5470_v13  ;;  %v3150_v52 = vor.u32 %v3149_v4, %v3146_v53  ;;  %v3194_v58 = vrot.slane %v3192_v8, 4  ;;  %v3216_v4 = vshrl.u32 %v2936_v33, 16 }
 0x196   : > { %7276 = vmatprep.subr.bf16.mxu1 %v7734_v63  ;;  %v3153_v39 = vshll.u32 %v7736_v45, 16  ;;  %v3157_v22 = vshrl.u32 %v7736_v45, 16 }
 0x197   : > { %v3151_v13 = vrot.slane %v3150_v52, 4 }
 0x198   : > { %7238 = vmatmul.mubr.bf16.vlgmr.msra.gmra.mrb[0].mxu0 %v6458_v27  ;;  %v3155_v43 = vrot.slane %v3153_v39, 5  ;;  %v3159_v21 = vrot.slane %v3157_v22, 4  ;;  %v7666_v27 = vld [vmem:[#allocation2 + $0x9c] sm:$0xff]   ;;  %v7667_v39 = vld [vmem:[#allocation2 + $0xa8] sm:$0xff]   ;;  %v7668_v22 = vld [vmem:[#allocation2 + $0xb4] sm:$0xff]  }
 0x199   : > { %7284 = vmatpush3.bf16.msra.mxu1 %v7734_v63  ;;  %7241 = vmatprep.mubr.bf16.mxu0 %v6459_v55  ;;  %v6472_v63 = vcombine.low %v9488_v6, %v9496_v16  ;;  %v7738_v55 = vld [vmem:[#allocation2 + $0x88] sm:$0xf] }
 0x19a   : > { %v3160_v34 = vor.u32 %v3159_v21, %v3155_v43  ;;  %v3201_v18 = vshll.u32 %v7738_v55, 16  ;;  %v3205_v0 = vshrl.u32 %v7738_v55, 16  ;;  %v3219_v21 = vshll.u32 %v2936_v33, 16 }
 0x19b   : > { %v3156_v29 = vsel %vm7871_vm2, %v3151_v13, %v3155_v43  ;;  %v7669_v13 = vld [vmem:[#allocation2 + $0xc0] sm:$0xff]  }
 0x19c   : > { %7014 = vmatmul.mubr.bf16.gmra.mrb[16].mxu1 %v7663_v50  ;;  %v6460_v50 = vcombine.low %v5384_v31, %v5387_v23  ;;  %v3161_v61 = vrot.slane %v3160_v34, 4  ;;  %v3197_v31 = vrot.slane %v3195_v20, 5  ;;  %v9503_v23 = vrot.slane %v3201_v18, 5 }
 0x19d   : > { %7017 = vmatprep.mubr.bf16.mxu1 %v7664_v46  ;;  %v3163_v46 = vshll.u32 %v7737_v15, 16  ;;  %v3207_v53 = vrot.slane %v3205_v0, 4  ;;  %v3218_v18 = vrot.slane %v3216_v4, 4  ;;  %v3221_v0 = vrot.slane %v3219_v21, 5 }
 0x19e   : > { %v3198_v43 = vor.u32 %v3197_v31, %v3194_v58 }
 0x19f   : > { %v3165_v45 = vrot.slane %v3163_v46, 5  ;;  %v7741_v46 = vld [vmem:[#allocation2 + $0xa0] sm:$0xf]  ;;  %v3208_v55 = vor.u32 %v3207_v53, %v9503_v23  ;;  %v3222_v38 = vor.u32 %v3221_v0, %v3218_v18  ;;  %v7743_v53 = vld [vmem:[#allocation2 + $0xa4] sm:$0x1] }
 0x1a0   : > { %7242 = vmatmul.mubr.bf16.gmra.mrb[4].mxu0 %v6460_v50  ;;  %v3249_v8 = vshll.u32 %v7741_v46, 16  ;;  %v3253_v20 = vshrl.u32 %v7741_v46, 16  ;;  %v3259_v4 = vshll.u32 %v7743_v53, 16  ;;  %v7746_v53 = vld [vmem:[#allocation2 + $0xb0] sm:$0x1] }
 0x1a1   : > { %7245 = vmatprep.mubr.bf16.mxu0 %v6461_v2  ;;  %v3166_v54 = vsel %vm7871_vm2, %v3161_v61, %v3165_v45  ;;  %v7739_v2 = vld [vmem:[#allocation2 + $0x8c] sm:$0x1]  ;;  %v3209_v56 = vrot.slane %v3208_v55, 4  ;;  %v3223_v19 = vrot.slane %v3222_v38, 4 }
 0x1a2   : > { %v3211_v50 = vshll.u32 %v7739_v2, 16  ;;  %v6273_v33 = vcombine.low %v3156_v29, %v3166_v54  ;;  %v3199_v2 = vrot.slane %v3198_v43, 4  ;;  %v2945_v54 = vld [vmem:[#allocation2 + $0xb4] sm:$0xf]  ;;  %v3261_v0 = vrot.slane %v3259_v4, 5 }
 0x1a4   : > { %7018 = vmatmul.mubr.bf16.gmra.mrb[20].mxu1 %v7665_v17  ;;  %v2939_v17 = vld [vmem:[#allocation2 + $0x9c] sm:$0xf]  ;;  %v3213_v61 = vrot.slane %v3211_v50, 5 }
 0x1a5   : > { %7021 = vmatprep.mubr.bf16.mxu1 %v7666_v27  ;;  %v7740_v27 = vld [vmem:[#allocation2 + $0x94] sm:$0xf]  ;;  %v3240_v34 = vshrl.u32 %v2939_v17, 16  ;;  %v3243_v15 = vshll.u32 %v2939_v17, 16  ;;  %v2942_v17 = vld [vmem:[#allocation2 + $0xa8] sm:$0xf] }
 0x1a6   : > { %v3225_v59 = vshll.u32 %v7740_v27, 16  ;;  %v3229_v52 = vshrl.u32 %v7740_v27, 16  ;;  %v3264_v21 = vshrl.u32 %v2942_v17, 16  ;;  %v3267_v29 = vshll.u32 %v2942_v17, 16  ;;  %v2948_v17 = vld [vmem:[#allocation2 + $0xc0] sm:$0xf] }
 0x1a7   : > { %v3245_v45 = vrot.slane %v3243_v15, 5  ;;  %v3204_v15 = vsel %vm7871_vm2, %v3199_v2, %v9503_v23  ;;  %v3214_v46 = vsel %vm7871_vm2, %v3209_v56, %v3213_v61  ;;  %v3315_v4 = vshll.u32 %v2948_v17, 16 }
 0x1a8   : > { %7246 = vmatmul.mubr.bf16.gmra.mrb[8].mxu0 %v6462_v37  ;;  %v9516_v5 = vrot.slane %v3225_v59, 5  ;;  %v3231_v14 = vrot.slane %v3229_v52, 4  ;;  %v3242_v37 = vrot.slane %v3240_v34, 4  ;;  %v7744_v59 = vld [vmem:[#allocation2 + $0xac] sm:$0xf] }
 0x1a9   : > { %7249 = vmatprep.mubr.bf16.mxu0 %v6463_v36  ;;  %v7742_v36 = vld [vmem:[#allocation2 + $0x98] sm:$0x1]  ;;  %v3273_v52 = vshll.u32 %v7744_v59, 16  ;;  %v3277_v34 = vshrl.u32 %v7744_v59, 16 }
 0x1aa   : > { %v3235_v58 = vshll.u32 %v7742_v36, 16  ;;  %v3232_v31 = vor.u32 %v3231_v14, %v9516_v5  ;;  %v3246_v50 = vor.u32 %v3245_v45, %v3242_v37  ;;  %v6275_v37 = vcombine.low %v3204_v15, %v3214_v46 }
 0x1ab   : > { %v3279_v14 = vrot.slane %v3277_v34, 4  ;;  %v3228_v2 = vsel %vm7871_vm2, %v3223_v19, %v9516_v5  ;;  %v3283_v5 = vshll.u32 %v7746_v53, 16  ;;  %v3317_v46 = vrot.slane %v3315_v4, 5 }
 0x1ac   : > { %7022 = vmatmul.mubr.bf16.gmra.mrb[24].mxu1 %v7667_v39  ;;  %v9518_v39 = vrot.slane %v3249_v8, 5  ;;  %v3237_v49 = vrot.slane %v3235_v58, 5  ;;  %v3291_v8 = vshll.u32 %v2945_v54, 16  ;;  %v3233_v18 = vrot.slane %v3232_v31, 4 }
 0x1ad   : > { %7025 = vmatprep.mubr.bf16.mxu1 %v7668_v22  ;;  %v3255_v22 = vrot.slane %v3253_v20, 4  ;;  %v7745_v20 = vld [vmem:[#allocation2 + $0xb8] sm:$0xf]  ;;  %v3247_v44 = vrot.slane %v3246_v50, 4  ;;  %v3285_v34 = vrot.slane %v3283_v5, 5 }
 0x1ae   : > { %v3297_v43 = vshll.u32 %v7745_v20, 16  ;;  %v3301_v55 = vshrl.u32 %v7745_v20, 16  ;;  %v3293_v45 = vrot.slane %v3291_v8, 5  ;;  %v3238_v56 = vsel %vm7871_vm2, %v3233_v18, %v3237_v49 }
 0x1af   : > { %v3256_v27 = vor.u32 %v3255_v22, %v9518_v39  ;;  %v3252_v36 = vsel %vm7871_vm2, %v3247_v44, %v9518_v39  ;;  %v6276_v50 = vcombine.low %v3228_v2, %v3238_v56  ;;  %v9595_v56 = vld [vmem:[%s9684_s5] ss:$0 sm:$0xff] }
 0x1b0   : > { %7250 = vmatmul.mubr.bf16.gmra.mrb[12].mxu0 %v6464_v12  ;;  %v3288_v12 = vshrl.u32 %v2945_v54, 16  ;;  %v3299_v22 = vrot.slane %v3297_v43, 5  ;;  %v3303_v61 = vrot.slane %v3301_v55, 4  ;;  %v7748_v54 = vld [vmem:[#allocation2 + $0xbc] sm:$0x1] }
 0x1b1   : > { %7253 = vmatprep.mubr.bf16.mxu0 %v6465_v24  ;;  %v3257_v3 = vrot.slane %v3256_v27, 4  ;;  %v3275_v24 = vrot.slane %v3273_v52, 5  ;;  %v3307_v39 = vshll.u32 %v7748_v54, 16  ;;  %v7749_v55 = vld [vmem:[#allocation2 + $0xc8] sm:$0x1] }
 0x1b2   : > { %v3290_v23 = vrot.slane %v3288_v12, 4  ;;  %v3331_v18 = vshll.u32 %v7749_v55, 16 }
 0x1b3   : > { %v3262_v58 = vsel %vm7871_vm2, %v3257_v3, %v3261_v0  ;;  %v3280_v31 = vor.u32 %v3279_v14, %v3275_v24 }
 0x1b4   : > { %7026 = vmatmul.mubr.bf16.gmra.mrb[28].mxu1 %v7669_v13  ;;  %v3266_v13 = vrot.slane %v3264_v21, 4  ;;  %v7747_v21 = vld [vmem:[#allocation2 + $0xc4] sm:$0xf]  ;;  %v6277_v27 = vcombine.low %v3252_v36, %v3262_v58  ;;  %v3333_v44 = vrot.slane %v3331_v18, 5 }
 0x1b5   : > { %7061 = vmatprep.mubr.bf16.mxu1 %v6273_v33  ;;  %v3269_v33 = vrot.slane %v3267_v29, 5  ;;  %v3321_v60 = vshll.u32 %v7747_v21, 16  ;;  %v3325_v41 = vshrl.u32 %v7747_v21, 16  ;;  %v3304_v29 = vor.u32 %v3303_v61, %v3299_v22 }
 0x1b6   : > { %v3281_v52 = vrot.slane %v3280_v31, 4 }
 0x1b7   : > { %v3270_v38 = vor.u32 %v3269_v33, %v3266_v13  ;;  %v3323_v19 = vrot.slane %v3321_v60, 5  ;;  %v3327_v49 = vrot.slane %v3325_v41, 4  ;;  %v3305_v26 = vrot.slane %v3304_v29, 4 }
 0x1b8   : > { %7254 = vmatmul.mubr.bf16.gmra.mrb[16].mxu0 %v6466_v1  ;;  %v3294_v1 = vor.u32 %v3293_v45, %v3290_v23  ;;  %v3286_v8 = vsel %vm7871_vm2, %v3281_v52, %v3285_v34 }
 0x1b9   : > { %7257 = vmatprep.mubr.bf16.mxu0 %v6467_v51  ;;  %v3271_v59 = vrot.slane %v3270_v38, 4  ;;  %v3309_v51 = vrot.slane %v3307_v39, 5  ;;  %v3328_v43 = vor.u32 %v3327_v49, %v3323_v19 }
 0x1ba   : > { %v3295_v47 = vrot.slane %v3294_v1, 4 }
 0x1bb   : > { %v3276_v12 = vsel %vm7871_vm2, %v3271_v59, %v3275_v24  ;;  %v3310_v48 = vsel %vm7871_vm2, %v3305_v26, %v3309_v51  ;;  %v3329_v33 = vrot.slane %v3328_v43, 4 }
 0x1bc   : > { %7062 = vmatmul.mubr.bf16.vlgmr.msra.gmra.mrb[16].mxu1 %v9336_v7  ;;  %v3312_v7 = vshrl.u32 %v2948_v17, 16  ;;  %v3300_v0 = vsel %vm7871_vm2, %v3295_v47, %v3299_v22  ;;  %v6278_v62 = vcombine.low %v3276_v12, %v3286_v8 }
 0x1bd   : > { %7065 = vmatprep.mubr.bf16.mxu1 %v6275_v37  ;;  %v3334_v40 = vsel %vm7871_vm2, %v3329_v33, %v3333_v44 }
 0x1be   : > { %v3314_v15 = vrot.slane %v3312_v7, 4 }
 0x1c0   : > { %7258 = vmatmul.mubr.bf16.gmra.mrb[20].mxu0 %v6468_v25  ;;  %v3318_v20 = vor.u32 %v3317_v46, %v3314_v15  ;;  %v6279_v25 = vcombine.low %v3300_v0, %v3310_v48 }
 0x1c1   : > { %7261 = vmatprep.mubr.bf16.mxu0 %v6469_v30 }
 0x1c2   : > { %v3319_v13 = vrot.slane %v3318_v20, 4 }
 0x1c4   : > { %7066 = vmatmul.mubr.bf16.gmra.mrb[20].mxu1 %v6276_v50  ;;  %v3324_v10 = vsel %vm7871_vm2, %v3319_v13, %v3323_v19 }
 0x1c5   : > { %7069 = vmatprep.mubr.bf16.mxu1 %v6277_v27  ;;  %v6280_v30 = vcombine.low %v3324_v10, %v3334_v40 }
 0x1c8   : > { %7262 = vmatmul.mubr.bf16.gmra.mrb[24].mxu0 %v6470_v28 }
 0x1c9   : > { %7265 = vmatprep.mubr.bf16.mxu0 %v6471_v11 }
 0x1cc   : > { %7070 = vmatmul.mubr.bf16.gmra.mrb[24].mxu1 %v6278_v62 }
 0x1cd   : > { %7073 = vmatprep.mubr.bf16.mxu1 %v6279_v25 }
 0x1d0   : > { %7266 = vmatmul.mubr.bf16.gmra.mrb[28].mxu0 %v6472_v63  ;;  %v9590_v63 = vld [vmem:[%s9683_s4] ss:$0 sm:$0xff] }
 0x1d4   : > { %7074 = vmatmul.mubr.bf16.gmra.mrb[28].mxu1 %v6280_v30 }
 0x24f   : > { %v6999_v3 = vpop.f32.mrb[0].mxu1 }
 0x250   : > { %v2744_v57 = vpop.f32.mrb[1].mxu1 }
 0x251   : > { %v7000_v42 = vpop.f32.mrb[2].mxu1 }
 0x252   : > { %v2747_v28 = vpop.f32.mrb[3].mxu1 }
 0x257   : > { %v7003_v24 = vpop.f32.mrb[4].mxu1 }
 0x258   : > { %v2760_v14 = vpop.f32.mrb[5].mxu1 }
 0x259   : > { %v7004_v37 = vpop.f32.mrb[6].mxu1 }
 0x25a   : > { %v2763_v23 = vpop.f32.mrb[7].mxu1 }
 0x25f   : > { %v7007_v35 = vpop.f32.mrb[8].mxu1 }
 0x260   : > { %v2776_v45 = vpop.f32.mrb[9].mxu1 }
 0x261   : > { %v7008_v22 = vpop.f32.mrb[10].mxu1 }
 0x262   : > { %v9577_v61 = vpop.f32.mrb[11].mxu1 }
 0x267   : > { %v9579_v32 = vpop.f32.mrb[12].mxu1 }
 0x268   : > { %v9581_v9 = vpop.f32.mrb[13].mxu1 }
 0x269   : > { %v9583_v11 = vpop.f32.mrb[14].mxu1 }
 0x26a   : > { %v9585_v6 = vpop.f32.mrb[15].mxu1 }
 0x26b   : > { %v7239_v16 = vpop.f32.mrb[0].mxu0 }
 0x26c   : > { %v7285_v17 = vadd.f32 %v7239_v16, %v6999_v3  ;;  %v5635_v2 = vpop.f32.mrb[1].mxu0 }
 0x26d   : > { %v7286_v38 = vadd.f32 %v5635_v2, %v2744_v57  ;;  %v7240_v36 = vpop.f32.mrb[2].mxu0 }
 0x26e   : > { %v5803_v58 = vmul.f32 %v7285_v17, %v9590_v63  ;;  %v7287_v31 = vadd.f32 %v7240_v36, %v7000_v42  ;;  %v5638_v53 = vpop.f32.mrb[3].mxu0 }
 0x26f   : > { %v5801_v5 = vmul.f32 %v7286_v38, %v9590_v63  ;;  %v7288_v7 = vadd.f32 %v5638_v53, %v2747_v28 }
 0x270   : > { %v5842_v4 = vadd.f32 %v9595_v56, %v5803_v58  ;;  %v5804_v21 = vmul.f32 %v7287_v31, %v9590_v63 }
 0x271   : > { %v5840_v60 = vadd.f32 %v9595_v56, %v5801_v5  ;;  %v5802_v41 = vmul.f32 %v7288_v7, %v9590_v63 }
 0x272   : > { %v5874_v1 = vmax.f32 %v5842_v4, 0.0  ;;  %v5843_v29 = vadd.f32 %v9595_v56, %v5804_v21 }
 0x273   : > { %v5872_v54 = vmax.f32 %v5840_v60, 0.0  ;;  %v5841_v39 = vadd.f32 %v9595_v56, %v5802_v41  ;;  %v7243_v50 = vpop.f32.mrb[4].mxu0 }
 0x274   : > { %v5875_v27 = vmax.f32 %v5843_v29, 0.0  ;;  %v7289_v59 = vadd.f32 %v7243_v50, %v7003_v24  ;;  %v5651_v52 = vpop.f32.mrb[5].mxu0 }
 0x275   : > { %v5904_v34 = vmax.f32 %v5872_v54, %v5874_v1  ;;  %v5873_v15 = vmax.f32 %v5841_v39, 0.0  ;;  %v7290_v46 = vadd.f32 %v5651_v52, %v2760_v14  ;;  %v7244_v19 = vpop.f32.mrb[6].mxu0 }
 0x276   : > { %v5807_v49 = vmul.f32 %v7289_v59, %v9590_v63  ;;  %v7291_v47 = vadd.f32 %v7244_v19, %v7004_v37  ;;  %v5654_v26 = vpop.f32.mrb[7].mxu0 }
 0x277   : > { %5920 = vst [vmem:[#allocation3] sm:$0xff] %v5904_v34  ;;  %v5905_v51 = vmax.f32 %v5873_v15, %v5875_v27  ;;  %v5805_v12 = vmul.f32 %v7290_v46, %v9590_v63  ;;  %v7292_v8 = vadd.f32 %v5654_v26, %v2763_v23 }
 0x278   : > { %v5846_v20 = vadd.f32 %v9595_v56, %v5807_v49  ;;  %v5808_v43 = vmul.f32 %v7291_v47, %v9590_v63 }
 0x279   : > { %5921 = vst [vmem:[#allocation3 + $0x8] sm:$0xff] %v5905_v51  ;;  %v5844_v55 = vadd.f32 %v9595_v56, %v5805_v12  ;;  %v5806_v18 = vmul.f32 %v7292_v8, %v9590_v63 }
 0x27a   : > { %v5878_v0 = vmax.f32 %v5846_v20, 0.0  ;;  %v5847_v48 = vadd.f32 %v9595_v56, %v5808_v43 }
 0x27b   : > { %v5876_v62 = vmax.f32 %v5844_v55, 0.0  ;;  %v5845_v25 = vadd.f32 %v9595_v56, %v5806_v18  ;;  %v7247_v13 = vpop.f32.mrb[8].mxu0 }
 0x27c   : > { %v5879_v33 = vmax.f32 %v5847_v48, 0.0  ;;  %v7293_v44 = vadd.f32 %v7247_v13, %v7007_v35  ;;  %v5667_v10 = vpop.f32.mrb[9].mxu0 }
 0x27d   : > { %v5906_v40 = vmax.f32 %v5876_v62, %v5878_v0  ;;  %v5877_v30 = vmax.f32 %v5845_v25, 0.0  ;;  %v7294_v3 = vadd.f32 %v5667_v10, %v2776_v45  ;;  %v7248_v57 = vpop.f32.mrb[10].mxu0 }
 0x27e   : > { %v5811_v42 = vmul.f32 %v7293_v44, %v9590_v63  ;;  %v7295_v28 = vadd.f32 %v7248_v57, %v7008_v22  ;;  %v5670_v24 = vpop.f32.mrb[11].mxu0 }
 0x27f   : > { %5922 = vst [vmem:[#allocation3 + $0x10] sm:$0xff] %v5906_v40  ;;  %v5907_v14 = vmax.f32 %v5877_v30, %v5879_v33  ;;  %v5809_v37 = vmul.f32 %v7294_v3, %v9590_v63  ;;  %v7296_v23 = vadd.f32 %v5670_v24, %v9577_v61 }
 0x280   : > { %v5850_v16 = vadd.f32 %v9595_v56, %v5811_v42  ;;  %v5812_v17 = vmul.f32 %v7295_v28, %v9590_v63  ;;  %v5936_v60 = vld [vmem:[#allocation3] ss:$2 sm:$0xff]  ;;  %v5952_v41 = vld [vmem:[#allocation3 + $0x1] ss:$2 sm:$0xff] }
 0x281   : > { %5923 = vst [vmem:[#allocation3 + $0x18] sm:$0xff] %v5907_v14  ;;  %v5848_v35 = vadd.f32 %v9595_v56, %v5809_v37  ;;  %v5810_v45 = vmul.f32 %v7296_v23, %v9590_v63  ;;  %v5967_v34 = vmax.f32 %v5936_v60, %v5952_v41 }
 0x282   : > { %v5882_v2 = vmax.f32 %v5850_v16, 0.0  ;;  %v5851_v38 = vadd.f32 %v9595_v56, %v5812_v17 }
 0x283   : > { %v5880_v22 = vmax.f32 %v5848_v35, 0.0  ;;  %v5849_v36 = vadd.f32 %v9595_v56, %v5810_v45  ;;  %v7251_v58 = vpop.f32.mrb[12].mxu0 }
 0x284   : > { %v5883_v31 = vmax.f32 %v5851_v38, 0.0  ;;  %v7297_v61 = vadd.f32 %v7251_v58, %v9579_v32  ;;  %v5683_v53 = vpop.f32.mrb[13].mxu0 }
 0x285   : > { %v5908_v5 = vmax.f32 %v5880_v22, %v5882_v2  ;;  %v5881_v7 = vmax.f32 %v5849_v36, 0.0  ;;  %v7298_v4 = vadd.f32 %v5683_v53, %v9581_v9  ;;  %v7252_v21 = vpop.f32.mrb[14].mxu0 }
 0x286   : > { %v5815_v1 = vmul.f32 %v7297_v61, %v9590_v63  ;;  %v7299_v29 = vadd.f32 %v7252_v21, %v9583_v11  ;;  %v5686_v54 = vpop.f32.mrb[15].mxu0 }
 0x287   : > { %5924 = vst [vmem:[#allocation3 + $0x20] sm:$0xff] %v5908_v5  ;;  %v5909_v39 = vmax.f32 %v5881_v7, %v5883_v31  ;;  %v5813_v50 = vmul.f32 %v7298_v4, %v9590_v63  ;;  %v7300_v32 = vadd.f32 %v5686_v54, %v9585_v6 }
 0x288   : > { %v5938_v27 = vld [vmem:[#allocation3 + $0x10] ss:$2 sm:$0xff]  ;;  %v5954_v59 = vld [vmem:[#allocation3 + $0x11] ss:$2 sm:$0xff]  ;;  %v5854_v52 = vadd.f32 %v9595_v56, %v5815_v1  ;;  %v5816_v9 = vmul.f32 %v7299_v29, %v9590_v63 }
 0x289   : > { %v5968_v15 = vmax.f32 %v5938_v27, %v5954_v59  ;;  %5925 = vst [vmem:[#allocation3 + $0x28] sm:$0xff] %v5909_v39  ;;  %v5852_v46 = vadd.f32 %v9595_v56, %v5813_v50  ;;  %v5814_v11 = vmul.f32 %v7300_v32, %v9590_v63 }
 0x28a   : > { %v5886_v6 = vmax.f32 %v5854_v52, 0.0  ;;  %v5855_v19 = vadd.f32 %v9595_v56, %v5816_v9 }
 0x28b   : > { %v6586_v49 = vpack.c.bf16 %v5968_v15, %v5967_v34  ;;  %v5884_v47 = vmax.f32 %v5852_v46, 0.0  ;;  %v5853_v26 = vadd.f32 %v9595_v56, %v5814_v11  ;;  %v7255_v12 = vpop.f32.mrb[16].mxu0 }
 0x28c   : > { %v5887_v8 = vmax.f32 %v5855_v19, 0.0  ;;  %v5699_v55 = vpop.f32.mrb[17].mxu0 }
 0x28d   : > { %6587 = vst [vmem:[%s9636_s10] sm:$0xff] %v6586_v49   ;;  %v5910_v18 = vmax.f32 %v5884_v47, %v5886_v6  ;;  %v5885_v0 = vmax.f32 %v5853_v26, 0.0  ;;  %v7256_v25 = vpop.f32.mrb[18].mxu0 }
 0x28e   : > { %v5702_v10 = vpop.f32.mrb[19].mxu0 }
 0x28f   : > { %v7063_v51 = vpop.f32.mrb[16].mxu1  ;;  %5926 = vst [vmem:[#allocation3 + $0x30] sm:$0xff] %v5910_v18  ;;  %v5911_v40 = vmax.f32 %v5885_v0, %v5887_v8 }
 0x290   : > { %v3562_v20 = vpop.f32.mrb[17].mxu1  ;;  %v7301_v43 = vadd.f32 %v7255_v12, %v7063_v51  ;;  %v5940_v5 = vld [vmem:[#allocation3 + $0x20] ss:$2 sm:$0xff]  ;;  %v5956_v7 = vld [vmem:[#allocation3 + $0x21] ss:$2 sm:$0xff] }
 0x291   : > { %v7064_v48 = vpop.f32.mrb[18].mxu1  ;;  %v7302_v62 = vadd.f32 %v5699_v55, %v3562_v20  ;;  %5927 = vst [vmem:[#allocation3 + $0x38] sm:$0xff] %v5911_v40  ;;  %v5969_v59 = vmax.f32 %v5940_v5, %v5956_v7 }
 0x292   : > { %v5819_v13 = vmul.f32 %v7301_v43, %v9590_v63  ;;  %v3565_v33 = vpop.f32.mrb[19].mxu1  ;;  %v7303_v44 = vadd.f32 %v7256_v25, %v7064_v48 }
 0x293   : > { %v5817_v30 = vmul.f32 %v7302_v62, %v9590_v63  ;;  %v7304_v3 = vadd.f32 %v5702_v10, %v3565_v33  ;;  %v7259_v35 = vpop.f32.mrb[20].mxu0 }
 0x294   : > { %v5858_v57 = vadd.f32 %v9595_v56, %v5819_v13  ;;  %v5820_v42 = vmul.f32 %v7303_v44, %v9590_v63  ;;  %v5715_v22 = vpop.f32.mrb[21].mxu0 }
 0x295   : > { %v5856_v28 = vadd.f32 %v9595_v56, %v5817_v30  ;;  %v5818_v24 = vmul.f32 %v7304_v3, %v9590_v63  ;;  %v7260_v53 = vpop.f32.mrb[22].mxu0 }
 0x296   : > { %v5890_v14 = vmax.f32 %v5858_v57, 0.0  ;;  %v5859_v37 = vadd.f32 %v9595_v56, %v5820_v42  ;;  %v5718_v41 = vpop.f32.mrb[23].mxu0 }
 0x297   : > { %v5888_v23 = vmax.f32 %v5856_v28, 0.0  ;;  %v5857_v16 = vadd.f32 %v9595_v56, %v5818_v24  ;;  %v7067_v17 = vpop.f32.mrb[20].mxu1 }
 0x298   : > { %v5891_v45 = vmax.f32 %v5859_v37, 0.0  ;;  %v3578_v2 = vpop.f32.mrb[21].mxu1  ;;  %v7305_v38 = vadd.f32 %v7259_v35, %v7067_v17  ;;  %v5942_v39 = vld [vmem:[#allocation3 + $0x30] ss:$2 sm:$0xff]  ;;  %v5958_v50 = vld [vmem:[#allocation3 + $0x31] ss:$2 sm:$0xff] }
 0x299   : > { %v5912_v36 = vmax.f32 %v5888_v23, %v5890_v14  ;;  %v5889_v58 = vmax.f32 %v5857_v16, 0.0  ;;  %v7068_v31 = vpop.f32.mrb[22].mxu1  ;;  %v7306_v61 = vadd.f32 %v5715_v22, %v3578_v2  ;;  %v5970_v52 = vmax.f32 %v5942_v39, %v5958_v50 }
 0x29a   : > { %v5823_v4 = vmul.f32 %v7305_v38, %v9590_v63  ;;  %v3581_v21 = vpop.f32.mrb[23].mxu1  ;;  %v7307_v60 = vadd.f32 %v7260_v53, %v7068_v31 }
 0x29b   : > { %5928 = vst [vmem:[#allocation3 + $0x40] sm:$0xff] %v5912_v36  ;;  %v5913_v1 = vmax.f32 %v5889_v58, %v5891_v45  ;;  %v5821_v29 = vmul.f32 %v7306_v61, %v9590_v63  ;;  %v7308_v54 = vadd.f32 %v5718_v41, %v3581_v21  ;;  %v6591_v11 = vpack.c.bf16 %v5970_v52, %v5969_v59  ;;  %v7263_v47 = vpop.f32.mrb[24].mxu0 }
 0x29c   : > { %v5862_v32 = vadd.f32 %v9595_v56, %v5823_v4  ;;  %v5824_v27 = vmul.f32 %v7307_v60, %v9590_v63  ;;  %v5731_v8 = vpop.f32.mrb[25].mxu0 }
 0x29d   : > { %5929 = vst [vmem:[#allocation3 + $0x48] sm:$0xff] %v5913_v1  ;;  %v5860_v9 = vadd.f32 %v9595_v56, %v5821_v29  ;;  %v5822_v34 = vmul.f32 %v7308_v54, %v9590_v63  ;;  %6618 = vst [vmem:[%s9636_s10 + $0x8] sm:$0xff] %v6591_v11   ;;  %v7264_v0 = vpop.f32.mrb[26].mxu0 }
 0x29e   : > { %v5894_v15 = vmax.f32 %v5862_v32, 0.0  ;;  %v5863_v46 = vadd.f32 %v9595_v56, %v5824_v27  ;;  %v5734_v13 = vpop.f32.mrb[27].mxu0 }
 0x29f   : > { %v5892_v6 = vmax.f32 %v5860_v9, 0.0  ;;  %v5861_v19 = vadd.f32 %v9595_v56, %v5822_v34  ;;  %v7071_v49 = vpop.f32.mrb[24].mxu1 }
 0x2a0   : > { %v5895_v26 = vmax.f32 %v5863_v46, 0.0  ;;  %v3594_v51 = vpop.f32.mrb[25].mxu1  ;;  %v7309_v12 = vadd.f32 %v7263_v47, %v7071_v49 }
 0x2a1   : > { %v5914_v20 = vmax.f32 %v5892_v6, %v5894_v15  ;;  %v5893_v43 = vmax.f32 %v5861_v19, 0.0  ;;  %v7072_v55 = vpop.f32.mrb[26].mxu1  ;;  %v7310_v18 = vadd.f32 %v5731_v8, %v3594_v51 }
 0x2a2   : > { %v5827_v48 = vmul.f32 %v7309_v12, %v9590_v63  ;;  %v3597_v62 = vpop.f32.mrb[27].mxu1  ;;  %v7311_v25 = vadd.f32 %v7264_v0, %v7072_v55 }
 0x2a3   : > { %5930 = vst [vmem:[#allocation3 + $0x50] sm:$0xff] %v5914_v20  ;;  %v5915_v33 = vmax.f32 %v5893_v43, %v5895_v26  ;;  %v5825_v44 = vmul.f32 %v7310_v18, %v9590_v63  ;;  %v7312_v10 = vadd.f32 %v5734_v13, %v3597_v62  ;;  %v7267_v23 = vpop.f32.mrb[28].mxu0 }
 0x2a4   : > { %v5866_v40 = vadd.f32 %v9595_v56, %v5827_v48  ;;  %v5828_v30 = vmul.f32 %v7311_v25, %v9590_v63  ;;  %v5747_v45 = vpop.f32.mrb[29].mxu0  ;;  %v5944_v31 = vld [vmem:[#allocation3 + $0x40] ss:$2 sm:$0xff]  ;;  %v5960_v61 = vld [vmem:[#allocation3 + $0x41] ss:$2 sm:$0xff] }
 0x2a5   : > { %5931 = vst [vmem:[#allocation3 + $0x58] sm:$0xff] %v5915_v33  ;;  %v5864_v3 = vadd.f32 %v9595_v56, %v5825_v44  ;;  %v5826_v57 = vmul.f32 %v7312_v10, %v9590_v63  ;;  %v7268_v58 = vpop.f32.mrb[30].mxu0  ;;  %v5971_v50 = vmax.f32 %v5944_v31, %v5960_v61 }
 0x2a6   : > { %v5898_v42 = vmax.f32 %v5866_v40, 0.0  ;;  %v5867_v28 = vadd.f32 %v9595_v56, %v5828_v30  ;;  %v5750_v4 = vpop.f32.mrb[31].mxu0 }
 0x2a7   : > { %v5896_v24 = vmax.f32 %v5864_v3, 0.0  ;;  %v5865_v14 = vadd.f32 %v9595_v56, %v5826_v57  ;;  %v7075_v37 = vpop.f32.mrb[28].mxu1 }
 0x2a8   : > { %v5899_v16 = vmax.f32 %v5867_v28, 0.0  ;;  %v3610_v17 = vpop.f32.mrb[29].mxu1  ;;  %v7313_v35 = vadd.f32 %v7267_v23, %v7075_v37 }
 0x2a9   : > { %v5916_v2 = vmax.f32 %v5896_v24, %v5898_v42  ;;  %v5897_v38 = vmax.f32 %v5865_v14, 0.0  ;;  %v7076_v22 = vpop.f32.mrb[30].mxu1  ;;  %v7314_v36 = vadd.f32 %v5747_v45, %v3610_v17 }
 0x2aa   : > { %v5831_v53 = vmul.f32 %v7313_v35, %v9590_v63  ;;  %v3613_v5 = vpop.f32.mrb[31].mxu1  ;;  %v7315_v7 = vadd.f32 %v7268_v58, %v7076_v22 }
 0x2ab   : > { %5932 = vst [vmem:[#allocation3 + $0x60] sm:$0xff] %v5916_v2  ;;  %v5917_v21 = vmax.f32 %v5897_v38, %v5899_v16  ;;  %v5829_v60 = vmul.f32 %v7314_v36, %v9590_v63  ;;  %v7316_v41 = vadd.f32 %v5750_v4, %v3613_v5 }
 0x2ac   : > { %v5946_v1 = vld [vmem:[#allocation3 + $0x50] ss:$2 sm:$0xff]  ;;  %v5962_v29 = vld [vmem:[#allocation3 + $0x51] ss:$2 sm:$0xff]  ;;  %v5870_v54 = vadd.f32 %v9595_v56, %v5831_v53  ;;  %v5832_v39 = vmul.f32 %v7315_v7, %v9590_v63 }
 0x2ad   : > { %v5972_v32 = vmax.f32 %v5946_v1, %v5962_v29  ;;  %5933 = vst [vmem:[#allocation3 + $0x68] sm:$0xff] %v5917_v21  ;;  %v5868_v27 = vadd.f32 %v9595_v56, %v5829_v60  ;;  %v5830_v59 = vmul.f32 %v7316_v41, %v9590_v63 }
 0x2ae   : > { %v5902_v52 = vmax.f32 %v5870_v54, 0.0  ;;  %v5871_v9 = vadd.f32 %v9595_v56, %v5832_v39 }
 0x2af   : > { %v6596_v34 = vpack.c.bf16 %v5972_v32, %v5971_v50  ;;  %v5900_v15 = vmax.f32 %v5868_v27, 0.0  ;;  %v5869_v46 = vadd.f32 %v9595_v56, %v5830_v59 }
 0x2b0   : > { %v5903_v11 = vmax.f32 %v5871_v9, 0.0 }
 0x2b1   : > { %6619 = vst [vmem:[%s9636_s10 + $0x10] sm:$0xff] %v6596_v34   ;;  %v5918_v6 = vmax.f32 %v5900_v15, %v5902_v52  ;;  %v5901_v19 = vmax.f32 %v5869_v46, 0.0 }
 0x2b3   : > { %5934 = vst [vmem:[#allocation3 + $0x70] sm:$0xff] %v5918_v6  ;;  %v5919_v49 = vmax.f32 %v5901_v19, %v5903_v11 }
 0x2b4   : > { %v5948_v47 = vld [vmem:[#allocation3 + $0x60] ss:$2 sm:$0xff]  ;;  %v5964_v26 = vld [vmem:[#allocation3 + $0x61] ss:$2 sm:$0xff] }
 0x2b5   : > { %5935 = vst [vmem:[#allocation3 + $0x78] sm:$0xff] %v5919_v49  ;;  %v5973_v63 = vmax.f32 %v5948_v47, %v5964_v26 }
 0x2bc   : > { %v5950_v51 = vld [vmem:[#allocation3 + $0x70] ss:$2 sm:$0xff]  ;;  %v5966_v12 = vld [vmem:[#allocation3 + $0x71] ss:$2 sm:$0xff] }
 0x2bd   : > { %v5974_v8 = vmax.f32 %v5950_v51, %v5966_v12 }
 0x2bf   : > { %v6601_v20 = vpack.c.bf16 %v5974_v8, %v5973_v63 }
 0x2c1   : > { %6620 = vst [vmem:[%s9636_s10 + $0x18] sm:$0xff] %v6601_v20  }
 0x2c2 PF: > { %s16_s21 = sadd.s32 1, %s7756_s21  }
 0x2c3   : > { %p13_p4 = scmp.ge.s32.totalorder %s16_s21, 4  }
 0x2c5   :  { %15 = sbr.rel (!%p13_p4) target bundleno = 1 (0x1), region = 99 }

</bundles_post_ra>
